<compile_context>
chip_gen: v7x
topology: tpu7x:2x2x1
jax: 0.10.0
libtpu: 0.0.40
codegen_flags: <defaults>
</compile_context>

<pallas_src>
import functools

import jax
import jax.numpy as jnp
from jax.experimental import pallas as pl
from jax.experimental.pallas import tpu as pltpu

_EPS = 1e-5  # BatchNorm2d default eps

_VMEM = functools.partial(pl.BlockSpec, memory_space=pltpu.MemorySpace.VMEM)
_SMEM = functools.partial(pl.BlockSpec, memory_space=pltpu.MemorySpace.SMEM)


# ---------------------------------------------------------------------------
# In-kernel helpers (traced into the kernel bodies)
# ---------------------------------------------------------------------------
def _bn_scale_shift(y, g, bt):
    # Training-mode BatchNorm2d: per-channel batch stats over the lane axis
    # (M = N*H*W), biased variance, folded into one scale/shift per channel.
    mean = jnp.mean(y, axis=-1, keepdims=True)
    var = jnp.mean(jnp.square(y - mean), axis=-1, keepdims=True)
    scale = g * jax.lax.rsqrt(var + _EPS)
    return y * scale + (bt - mean * scale)


def _conv_bn_prelu(x_bf16, w_bf16, b, g, bt, a):
    # x: (K, M) bf16 patches, w: (Cout, K) bf16  ->  (Cout, M) f32, lane-dense.
    y = jnp.dot(w_bf16, x_bf16, preferred_element_type=jnp.float32) + b
    yn = _bn_scale_shift(y, g, bt)
    return jnp.where(yn > 0, yn, a * yn)   # PReLU, single shared slope


# ---------------------------------------------------------------------------
# Pallas kernels
# ---------------------------------------------------------------------------
def _conv_bn_prelu_kernel(x_ref, w_ref, b_ref, g_ref, bt_ref, a_ref, o_ref):
    o_ref[...] = _conv_bn_prelu(x_ref[...], w_ref[...], b_ref[...],
                                g_ref[...], bt_ref[...], a_ref[0])


def _dual_conv_bn_prelu_kernel(x1_ref, w1_ref, b1_ref, g1_ref, bt1_ref, a1_ref,
                               x2_ref, w2_ref, b2_ref, g2_ref, bt2_ref, a2_ref,
                               o1_ref, o2_ref):
    # Two independent unetConv2 blocks (conv_p_e and down_r) that consume the
    # same source activation — launched as one kernel to cut launch overhead.
    o1_ref[...] = _conv_bn_prelu(x1_ref[...], w1_ref[...], b1_ref[...],
                                 g1_ref[...], bt1_ref[...], a1_ref[0])
    o2_ref[...] = _conv_bn_prelu(x2_ref[...], w2_ref[...], b2_ref[...],
                                 g2_ref[...], bt2_ref[...], a2_ref[0])


def _up_double_conv_kernel(x_ref, w1_ref, b1_ref, g1_ref, bt1_ref, a1_ref,
                           w2_ref, b2_ref, g2_ref, bt2_ref, a2_ref, o_ref):
    # conv_b_d (3x3) + BN + PReLU, then conv_p_d (1x1) + BN + PReLU, fused.
    h = _conv_bn_prelu(x_ref[...], w1_ref[...], b1_ref[...],
                       g1_ref[...], bt1_ref[...], a1_ref[0])
    o_ref[...] = _conv_bn_prelu(h.astype(jnp.bfloat16), w2_ref[...], b2_ref[...],
                                g2_ref[...], bt2_ref[...], a2_ref[0])


def _up_double_conv_final_kernel(x_ref, w1_ref, b1_ref, g1_ref, bt1_ref, a1_ref,
                                 w2_ref, b2_ref, g2_ref, bt2_ref, a2_ref,
                                 wf_ref, bf_ref, o_ref):
    # Same as above, plus the final bias-only 1x1 conv chained on (last level).
    h = _conv_bn_prelu(x_ref[...], w1_ref[...], b1_ref[...],
                       g1_ref[...], bt1_ref[...], a1_ref[0])
    h2 = _conv_bn_prelu(h.astype(jnp.bfloat16), w2_ref[...], b2_ref[...],
                        g2_ref[...], bt2_ref[...], a2_ref[0])
    o_ref[...] = (jnp.dot(wf_ref[...], h2.astype(jnp.bfloat16),
                          preferred_element_type=jnp.float32) + bf_ref[...])


def _upsample_bn_kernel(x_ref, u_ref, g_ref, bt_ref, o_ref):
    # unetUp: bilinear 2x upsample (exact, expressed as a fixed interpolation
    # matrix -> one MXU matmul, lane-dense output) + BatchNorm2d (batch stats).
    y = jnp.dot(x_ref[...], u_ref[...], preferred_element_type=jnp.float32)
    o_ref[...] = _bn_scale_shift(y, g_ref[...], bt_ref[...])


# ---------------------------------------------------------------------------
# Wrapper-side layout plumbing (pure data movement, XLA glue)
# ---------------------------------------------------------------------------
def _flatten_nchw(x):
    n, c, h, w = x.shape
    return jnp.transpose(x, (1, 0, 2, 3)).reshape(c, n * h * w)


def _unflatten(y, n, h, w):
    c = y.shape[0]
    return jnp.transpose(y.reshape(c, n, h, w), (1, 0, 2, 3))


def _im2col_t(x, k, stride, pad):
    """x: (N, C, H, W) -> (k*k*C, N*Ho*Wo) patches (spatial on the lane axis)."""
    n, c, h, w = x.shape
    if pad > 0:
        x = jnp.pad(x, ((0, 0), (0, 0), (pad, pad), (pad, pad)))
    ho = (h + 2 * pad - k) // stride + 1
    wo = (w + 2 * pad - k) // stride + 1
    cols = []
    for dy in range(k):
        for dx in range(k):
            cols.append(x[:, :,
                          dy:dy + stride * (ho - 1) + 1:stride,
                          dx:dx + stride * (wo - 1) + 1:stride])
    cols = jnp.concatenate(cols, axis=1) if len(cols) > 1 else cols[0]
    cols = jnp.transpose(cols, (1, 0, 2, 3)).reshape(k * k * c, n * ho * wo)
    return cols, (n, ho, wo)


def _interp_matrix_1d(out_size, in_size):
    # nn.Upsample(scale_factor=2, mode='bilinear', align_corners=False), 1 axis.
    i = jnp.arange(out_size, dtype=jnp.float32)
    src = jnp.clip((i + 0.5) / 2.0 - 0.5, 0.0, float(in_size - 1))
    i0 = jnp.floor(src).astype(jnp.int32)
    i1 = jnp.minimum(i0 + 1, in_size - 1)
    f = src - i0.astype(jnp.float32)
    return (jax.nn.one_hot(i0, in_size, dtype=jnp.float32) * (1.0 - f)[:, None]
            + jax.nn.one_hot(i1, in_size, dtype=jnp.float32) * f[:, None])


# ---------------------------------------------------------------------------
# Op wrappers (each is exactly one pallas_call)
# ---------------------------------------------------------------------------
def unet_conv(x, p, k, stride, pad):
    """unetConv2: Conv2d + BatchNorm2d(batch stats) + PReLU, one fused kernel."""
    w, b, g, bt, a = p
    cols, (n, ho, wo) = _im2col_t(x, k, stride, pad)
    cout = w.shape[0]
    out = pl.pallas_call(
        _conv_bn_prelu_kernel,
        out_shape=jax.ShapeDtypeStruct((cout, cols.shape[1]), jnp.float32),
        in_specs=[_VMEM()] * 5 + [_SMEM()],
        out_specs=_VMEM(),
    )(cols.astype(jnp.bfloat16), w.astype(jnp.bfloat16),
      b.reshape(cout, 1), g.reshape(cout, 1), bt.reshape(cout, 1), a)
    return _unflatten(out, n, ho, wo)


def dual_conv(x, p1, k1, s1, pad1, p2, k2, s2, pad2):
    """Two unetConv2 blocks over the same input, one launch, two outputs."""
    w1, b1, g1, bt1, a1 = p1
    w2, b2, g2, bt2, a2 = p2
    cols1, (n, ho1, wo1) = _im2col_t(x, k1, s1, pad1)
    cols2, (_, ho2, wo2) = _im2col_t(x, k2, s2, pad2)
    c1, c2 = w1.shape[0], w2.shape[0]
    o1, o2 = pl.pallas_call(
        _dual_conv_bn_prelu_kernel,
        out_shape=(jax.ShapeDtypeStruct((c1, cols1.shape[1]), jnp.float32),
                   jax.ShapeDtypeStruct((c2, cols2.shape[1]), jnp.float32)),
        in_specs=[_VMEM()] * 5 + [_SMEM()] + [_VMEM()] * 5 + [_SMEM()],
        out_specs=(_VMEM(), _VMEM()),
    )(cols1.astype(jnp.bfloat16), w1.astype(jnp.bfloat16),
      b1.reshape(c1, 1), g1.reshape(c1, 1), bt1.reshape(c1, 1), a1,
      cols2.astype(jnp.bfloat16), w2.astype(jnp.bfloat16),
      b2.reshape(c2, 1), g2.reshape(c2, 1), bt2.reshape(c2, 1), a2)
    return _unflatten(o1, n, ho1, wo1), _unflatten(o2, n, ho2, wo2)


def up_double_conv(x, p1, p2, p_final=None):
    """conv_b_d (3x3,pad1) + conv_p_d (1x1), optionally + final 1x1, fused."""
    w1, b1, g1, bt1, a1 = p1
    w2, b2, g2, bt2, a2 = p2
    cols, (n, ho, wo) = _im2col_t(x, 3, 1, 1)
    c1, c2 = w1.shape[0], w2.shape[0]
    m = cols.shape[1]
    args = [cols.astype(jnp.bfloat16),
            w1.astype(jnp.bfloat16), b1.reshape(c1, 1), g1.reshape(c1, 1),
            bt1.reshape(c1, 1), a1,
            w2.astype(jnp.bfloat16), b2.reshape(c2, 1), g2.reshape(c2, 1),
            bt2.reshape(c2, 1), a2]
    in_specs = [_VMEM()] * 5 + [_SMEM()] + [_VMEM()] * 4 + [_SMEM()]
    if p_final is None:
        out = pl.pallas_call(
            _up_double_conv_kernel,
            out_shape=jax.ShapeDtypeStruct((c2, m), jnp.float32),
            in_specs=in_specs, out_specs=_VMEM(),
        )(*args)
        return _unflatten(out, n, ho, wo)
    wf, bf = p_final
    cf = wf.shape[0]
    args += [wf.astype(jnp.bfloat16), bf.reshape(cf, 1)]
    in_specs += [_VMEM(), _VMEM()]
    out = pl.pallas_call(
        _up_double_conv_final_kernel,
        out_shape=jax.ShapeDtypeStruct((cf, m), jnp.float32),
        in_specs=in_specs, out_specs=_VMEM(),
    )(*args)
    return _unflatten(out, n, ho, wo)


def upsample_bn(x, p):
    """unetUp 'up' branch: bilinear 2x upsample + BatchNorm2d, one kernel."""
    g, bt = p
    n, c, h, w = x.shape
    u = jnp.kron(_interp_matrix_1d(2 * h, h), _interp_matrix_1d(2 * w, w))
    if n > 1:
        u = jnp.kron(jnp.eye(n, dtype=jnp.float32), u)
    out = pl.pallas_call(
        _upsample_bn_kernel,
        out_shape=jax.ShapeDtypeStruct((c, n * 4 * h * w), jnp.float32),
        in_specs=[_VMEM()] * 4,
        out_specs=_VMEM(),
    )(_flatten_nchw(x), u.T, g.reshape(c, 1), bt.reshape(c, 1))
    return _unflatten(out, n, 2 * h, 2 * w)


# ---------------------------------------------------------------------------
# Parameters (deterministic, synthetic)
# ---------------------------------------------------------------------------
def _init_conv(key, cin, cout, k):
    kw, kb = jax.random.split(key)
    fan_in = cin * k * k
    bound = 1.0 / (fan_in ** 0.5)
    # weight stored as (Cout, k*k*Cin) to match the im2col K ordering
    w = jax.random.uniform(kw, (cout, k * k * cin), jnp.float32, -bound, bound)
    b = jax.random.uniform(kb, (cout,), jnp.float32, -bound, bound)
    return w, b


def _init_unetconv(key, cin, cout, k):
    w, b = _init_conv(key, cin, cout, k)
    gamma = jnp.ones((cout,), jnp.float32)      # BatchNorm2d default affine init
    beta = jnp.zeros((cout,), jnp.float32)
    a = jnp.full((1,), 0.25, jnp.float32)       # PReLU default slope
    return (w, b, gamma, beta, a)


def make_params(key, c, ncat):
    ks = jax.random.split(key, 6)
    return {
        "conv_b_e": _init_unetconv(ks[0], c, c, 3),
        "conv_b_d": _init_unetconv(ks[1], c + ncat, c, 3),
        "down_r":   _init_unetconv(ks[2], c, c, 3),
        "conv_p_e": _init_unetconv(ks[3], c, ncat, 1),
        "up_bn": (jnp.ones((c,), jnp.float32), jnp.zeros((c,), jnp.float32)),
        "conv_p_d": _init_unetconv(ks[4], c, c, 1),
        "final":    _init_conv(ks[5], c, 1, 1),
    }


# ---------------------------------------------------------------------------
# UNet2 forward (matches the PyTorch module semantics, pad='zero', bilinear up)
# ---------------------------------------------------------------------------
def unet2_forward(x, params):
    # x is NCHW, just like the PyTorch reference.
    downs = [x]
    layers_to_concat = []
    down = x
    for _ in range(5):
        cat_feat, down = dual_conv(downs[-1],
                                   params["conv_p_e"], 1, 1, 0,
                                   params["down_r"], 3, 2, 1)
        layers_to_concat.append(cat_feat)
        downs.append(unet_conv(down, params["conv_b_e"], 3, 1, 1))

    ups = [down]  # NOTE: matches the reference — the raw down_r output
    for e in range(5):
        in1 = ups[-1]
        in2 = layers_to_concat[4 - e]
        up = upsample_bn(in1, params["up_bn"])
        if in2.shape[2] != up.shape[2] or in2.shape[3] != up.shape[3]:
            d2 = in2.shape[2] - up.shape[2]
            d2 = d2 if d2 < 0 else up.shape[2]
            d3 = in2.shape[3] - up.shape[3]
            d3 = d3 if d3 < 0 else up.shape[3]
            up = up[:, :, :d2, :d3]
        cat = jnp.concatenate([up, in2], axis=1)
        out = up_double_conv(cat, params["conv_b_d"], params["conv_p_d"],
                             params["final"] if e == 4 else None)
        ups.append(out)

    final = ups[-1]                                   # (N, 1, H, W), final conv fused in
    final = final - jnp.mean(final[:, :, :30, :30])   # final -= final[:,:,:30,:30].mean()
    return final


if __name__ == "__main__":
    # Small, forward-consistent shapes: 5 stride-2 downsamplings need H=W=32.
    C, NCAT = 16, 4          # num_input_channels, num_layers_to_concat
    N, H, W = 1, 32, 32

    key = jax.random.PRNGKey(0)
    kx, kp = jax.random.split(key)
    x = jax.random.normal(kx, (N, C, H, W), jnp.float32)   # NCHW like PyTorch
    params = make_params(kp, C, NCAT)

    out = jax.jit(unet2_forward)(x, params)
    jax.block_until_ready(out)
    assert out.shape == (N, 1, H, W), out.shape
    assert jnp.isfinite(out).all()
    print("KERNEL_OK")
</pallas_src>

<mosaic_0001>
module attributes {stable_mosaic.version = 11 : i64} {
  func.func @_dual_conv_bn_prelu_kernel(%arg0: memref<16x1024xbf16, #tpu.memory_space<vmem>>, %arg1: memref<4x16xbf16, #tpu.memory_space<vmem>>, %arg2: memref<4x1xf32, #tpu.memory_space<vmem>>, %arg3: memref<4x1xf32, #tpu.memory_space<vmem>>, %arg4: memref<4x1xf32, #tpu.memory_space<vmem>>, %arg5: memref<1xf32, #tpu.memory_space<smem>>, %arg6: memref<144x256xbf16, #tpu.memory_space<vmem>>, %arg7: memref<16x144xbf16, #tpu.memory_space<vmem>>, %arg8: memref<16x1xf32, #tpu.memory_space<vmem>>, %arg9: memref<16x1xf32, #tpu.memory_space<vmem>>, %arg10: memref<16x1xf32, #tpu.memory_space<vmem>>, %arg11: memref<1xf32, #tpu.memory_space<smem>>, %arg12: memref<4x1024xf32, #tpu.memory_space<vmem>>, %arg13: memref<16x256xf32, #tpu.memory_space<vmem>>) attributes {dimension_semantics = [], scalar_prefetch = 0 : i64, scratch_operands = 0 : i64, tpu.core_type = #tpu.core_type<tc>} {
    %c0 = arith.constant 0 : index
    %c0_0 = arith.constant 0 : index
    %0 = vector.load %arg0[%c0, %c0_0] : memref<16x1024xbf16, #tpu.memory_space<vmem>>, vector<16x1024xbf16>
    %c0_1 = arith.constant 0 : index
    %c0_2 = arith.constant 0 : index
    %1 = vector.load %arg1[%c0_1, %c0_2] : memref<4x16xbf16, #tpu.memory_space<vmem>>, vector<4x16xbf16>
    %c0_3 = arith.constant 0 : index
    %c0_4 = arith.constant 0 : index
    %2 = vector.load %arg2[%c0_3, %c0_4] : memref<4x1xf32, #tpu.memory_space<vmem>>, vector<4x1xf32>
    %c0_5 = arith.constant 0 : index
    %c0_6 = arith.constant 0 : index
    %3 = vector.load %arg3[%c0_5, %c0_6] : memref<4x1xf32, #tpu.memory_space<vmem>>, vector<4x1xf32>
    %c0_7 = arith.constant 0 : index
    %c0_8 = arith.constant 0 : index
    %4 = vector.load %arg4[%c0_7, %c0_8] : memref<4x1xf32, #tpu.memory_space<vmem>>, vector<4x1xf32>
    %c0_9 = arith.constant 0 : index
    %5 = memref.load %arg5[%c0_9] : memref<1xf32, #tpu.memory_space<smem>>
    %cst = arith.constant dense<0.000000e+00> : vector<4x1024xf32>
    %6 = tpu.matmul %1, %0, %cst {dimension_numbers = #tpu.dot_dimension_numbers<[1], [0], [0], [1], [0, 0, 1, 1], [], []>} : vector<4x16xbf16>, vector<16x1024xbf16>, vector<4x1024xf32> -> vector<4x1024xf32>
    %7 = vector.broadcast %2 : vector<4x1xf32> to vector<4x1024xf32>
    %8 = arith.addf %6, %7 : vector<4x1024xf32>
    %cst_10 = arith.constant dense<0.000000e+00> : vector<4xf32>
    %9 = vector.multi_reduction <add>, %8, %cst_10 [1] : vector<4x1024xf32> to vector<4xf32>
    %10 = vector.shape_cast %9 : vector<4xf32> to vector<4x1xf32>
    %cst_11 = arith.constant 1.024000e+03 : f32
    %11 = vector.broadcast %cst_11 : f32 to vector<4x1xf32>
    %12 = arith.divf %10, %11 : vector<4x1xf32>
    %13 = vector.broadcast %12 : vector<4x1xf32> to vector<4x1024xf32>
    %14 = arith.subf %8, %13 : vector<4x1024xf32>
    %15 = arith.mulf %14, %14 : vector<4x1024xf32>
    %cst_12 = arith.constant dense<0.000000e+00> : vector<4xf32>
    %16 = vector.multi_reduction <add>, %15, %cst_12 [1] : vector<4x1024xf32> to vector<4xf32>
    %17 = vector.shape_cast %16 : vector<4xf32> to vector<4x1xf32>
    %cst_13 = arith.constant 1.024000e+03 : f32
    %18 = vector.broadcast %cst_13 : f32 to vector<4x1xf32>
    %19 = arith.divf %17, %18 : vector<4x1xf32>
    %cst_14 = arith.constant 9.99999974E-6 : f32
    %20 = vector.broadcast %cst_14 : f32 to vector<4x1xf32>
    %21 = arith.addf %19, %20 : vector<4x1xf32>
    %22 = math.rsqrt %21 : vector<4x1xf32>
    %23 = arith.mulf %3, %22 : vector<4x1xf32>
    %24 = vector.broadcast %23 : vector<4x1xf32> to vector<4x1024xf32>
    %25 = arith.mulf %8, %24 : vector<4x1024xf32>
    %26 = arith.mulf %12, %23 : vector<4x1xf32>
    %27 = arith.subf %4, %26 : vector<4x1xf32>
    %28 = vector.broadcast %27 : vector<4x1xf32> to vector<4x1024xf32>
    %29 = arith.addf %25, %28 : vector<4x1024xf32>
    %cst_15 = arith.constant 0.000000e+00 : f32
    %30 = vector.broadcast %cst_15 : f32 to vector<4x1024xf32>
    %31 = arith.cmpf ogt, %29, %30 : vector<4x1024xf32>
    %32 = vector.broadcast %5 : f32 to vector<4x1024xf32>
    %33 = arith.mulf %32, %29 : vector<4x1024xf32>
    %34 = arith.select %31, %29, %33 : vector<4x1024xi1>, vector<4x1024xf32>
    %c0_16 = arith.constant 0 : index
    %c0_17 = arith.constant 0 : index
    %35 = vector.load %arg12[%c0_16, %c0_17] : memref<4x1024xf32, #tpu.memory_space<vmem>>, vector<4x1024xf32>
    tpu.vector_store %arg12[%c0_16, %c0_17], %34 {strides = array<i32>} : memref<4x1024xf32, #tpu.memory_space<vmem>>, vector<4x1024xf32>,
    %c0_18 = arith.constant 0 : index
    %c0_19 = arith.constant 0 : index
    %36 = vector.load %arg6[%c0_18, %c0_19] : memref<144x256xbf16, #tpu.memory_space<vmem>>, vector<144x256xbf16>
    %c0_20 = arith.constant 0 : index
    %c0_21 = arith.constant 0 : index
    %37 = vector.load %arg7[%c0_20, %c0_21] : memref<16x144xbf16, #tpu.memory_space<vmem>>, vector<16x144xbf16>
    %c0_22 = arith.constant 0 : index
    %c0_23 = arith.constant 0 : index
    %38 = vector.load %arg8[%c0_22, %c0_23] : memref<16x1xf32, #tpu.memory_space<vmem>>, vector<16x1xf32>
    %c0_24 = arith.constant 0 : index
    %c0_25 = arith.constant 0 : index
    %39 = vector.load %arg9[%c0_24, %c0_25] : memref<16x1xf32, #tpu.memory_space<vmem>>, vector<16x1xf32>
    %c0_26 = arith.constant 0 : index
    %c0_27 = arith.constant 0 : index
    %40 = vector.load %arg10[%c0_26, %c0_27] : memref<16x1xf32, #tpu.memory_space<vmem>>, vector<16x1xf32>
    %c0_28 = arith.constant 0 : index
    %41 = memref.load %arg11[%c0_28] : memref<1xf32, #tpu.memory_space<smem>>
    %cst_29 = arith.constant dense<0.000000e+00> : vector<16x256xf32>
    %42 = tpu.matmul %37, %36, %cst_29 {dimension_numbers = #tpu.dot_dimension_numbers<[1], [0], [0], [1], [0, 0, 1, 1], [], []>} : vector<16x144xbf16>, vector<144x256xbf16>, vector<16x256xf32> -> vector<16x256xf32>
    %43 = vector.broadcast %38 : vector<16x1xf32> to vector<16x256xf32>
    %44 = arith.addf %42, %43 : vector<16x256xf32>
    %cst_30 = arith.constant dense<0.000000e+00> : vector<16xf32>
    %45 = vector.multi_reduction <add>, %44, %cst_30 [1] : vector<16x256xf32> to vector<16xf32>
    %46 = vector.shape_cast %45 : vector<16xf32> to vector<16x1xf32>
    %cst_31 = arith.constant 2.560000e+02 : f32
    %47 = vector.broadcast %cst_31 : f32 to vector<16x1xf32>
    %48 = arith.divf %46, %47 : vector<16x1xf32>
    %49 = vector.broadcast %48 : vector<16x1xf32> to vector<16x256xf32>
    %50 = arith.subf %44, %49 : vector<16x256xf32>
    %51 = arith.mulf %50, %50 : vector<16x256xf32>
    %cst_32 = arith.constant dense<0.000000e+00> : vector<16xf32>
    %52 = vector.multi_reduction <add>, %51, %cst_32 [1] : vector<16x256xf32> to vector<16xf32>
    %53 = vector.shape_cast %52 : vector<16xf32> to vector<16x1xf32>
    %cst_33 = arith.constant 2.560000e+02 : f32
    %54 = vector.broadcast %cst_33 : f32 to vector<16x1xf32>
    %55 = arith.divf %53, %54 : vector<16x1xf32>
    %cst_34 = arith.constant 9.99999974E-6 : f32
    %56 = vector.broadcast %cst_34 : f32 to vector<16x1xf32>
    %57 = arith.addf %55, %56 : vector<16x1xf32>
    %58 = math.rsqrt %57 : vector<16x1xf32>
    %59 = arith.mulf %39, %58 : vector<16x1xf32>
    %60 = vector.broadcast %59 : vector<16x1xf32> to vector<16x256xf32>
    %61 = arith.mulf %44, %60 : vector<16x256xf32>
    %62 = arith.mulf %48, %59 : vector<16x1xf32>
    %63 = arith.subf %40, %62 : vector<16x1xf32>
    %64 = vector.broadcast %63 : vector<16x1xf32> to vector<16x256xf32>
    %65 = arith.addf %61, %64 : vector<16x256xf32>
    %cst_35 = arith.constant 0.000000e+00 : f32
    %66 = vector.broadcast %cst_35 : f32 to vector<16x256xf32>
    %67 = arith.cmpf ogt, %65, %66 : vector<16x256xf32>
    %68 = vector.broadcast %41 : f32 to vector<16x256xf32>
    %69 = arith.mulf %68, %65 : vector<16x256xf32>
    %70 = arith.select %67, %65, %69 : vector<16x256xi1>, vector<16x256xf32>
    %c0_36 = arith.constant 0 : index
    %c0_37 = arith.constant 0 : index
    %71 = vector.load %arg13[%c0_36, %c0_37] : memref<16x256xf32, #tpu.memory_space<vmem>>, vector<16x256xf32>
    tpu.vector_store %arg13[%c0_36, %c0_37], %70 {strides = array<i32>} : memref<16x256xf32, #tpu.memory_space<vmem>>, vector<16x256xf32>,
    return
  }
}

module attributes {stable_mosaic.version = 11 : i64} {
  func.func @_conv_bn_prelu_kernel(%arg0: memref<144x256xbf16, #tpu.memory_space<vmem>>, %arg1: memref<16x144xbf16, #tpu.memory_space<vmem>>, %arg2: memref<16x1xf32, #tpu.memory_space<vmem>>, %arg3: memref<16x1xf32, #tpu.memory_space<vmem>>, %arg4: memref<16x1xf32, #tpu.memory_space<vmem>>, %arg5: memref<1xf32, #tpu.memory_space<smem>>, %arg6: memref<16x256xf32, #tpu.memory_space<vmem>>) attributes {dimension_semantics = [], scalar_prefetch = 0 : i64, scratch_operands = 0 : i64, tpu.core_type = #tpu.core_type<tc>} {
    %c0 = arith.constant 0 : index
    %c0_0 = arith.constant 0 : index
    %0 = vector.load %arg0[%c0, %c0_0] : memref<144x256xbf16, #tpu.memory_space<vmem>>, vector<144x256xbf16>
    %c0_1 = arith.constant 0 : index
    %c0_2 = arith.constant 0 : index
    %1 = vector.load %arg1[%c0_1, %c0_2] : memref<16x144xbf16, #tpu.memory_space<vmem>>, vector<16x144xbf16>
    %c0_3 = arith.constant 0 : index
    %c0_4 = arith.constant 0 : index
    %2 = vector.load %arg2[%c0_3, %c0_4] : memref<16x1xf32, #tpu.memory_space<vmem>>, vector<16x1xf32>
    %c0_5 = arith.constant 0 : index
    %c0_6 = arith.constant 0 : index
    %3 = vector.load %arg3[%c0_5, %c0_6] : memref<16x1xf32, #tpu.memory_space<vmem>>, vector<16x1xf32>
    %c0_7 = arith.constant 0 : index
    %c0_8 = arith.constant 0 : index
    %4 = vector.load %arg4[%c0_7, %c0_8] : memref<16x1xf32, #tpu.memory_space<vmem>>, vector<16x1xf32>
    %c0_9 = arith.constant 0 : index
    %5 = memref.load %arg5[%c0_9] : memref<1xf32, #tpu.memory_space<smem>>
    %cst = arith.constant dense<0.000000e+00> : vector<16x256xf32>
    %6 = tpu.matmul %1, %0, %cst {dimension_numbers = #tpu.dot_dimension_numbers<[1], [0], [0], [1], [0, 0, 1, 1], [], []>} : vector<16x144xbf16>, vector<144x256xbf16>, vector<16x256xf32> -> vector<16x256xf32>
    %7 = vector.broadcast %2 : vector<16x1xf32> to vector<16x256xf32>
    %8 = arith.addf %6, %7 : vector<16x256xf32>
    %cst_10 = arith.constant dense<0.000000e+00> : vector<16xf32>
    %9 = vector.multi_reduction <add>, %8, %cst_10 [1] : vector<16x256xf32> to vector<16xf32>
    %10 = vector.shape_cast %9 : vector<16xf32> to vector<16x1xf32>
    %cst_11 = arith.constant 2.560000e+02 : f32
    %11 = vector.broadcast %cst_11 : f32 to vector<16x1xf32>
    %12 = arith.divf %10, %11 : vector<16x1xf32>
    %13 = vector.broadcast %12 : vector<16x1xf32> to vector<16x256xf32>
    %14 = arith.subf %8, %13 : vector<16x256xf32>
    %15 = arith.mulf %14, %14 : vector<16x256xf32>
    %cst_12 = arith.constant dense<0.000000e+00> : vector<16xf32>
    %16 = vector.multi_reduction <add>, %15, %cst_12 [1] : vector<16x256xf32> to vector<16xf32>
    %17 = vector.shape_cast %16 : vector<16xf32> to vector<16x1xf32>
    %cst_13 = arith.constant 2.560000e+02 : f32
    %18 = vector.broadcast %cst_13 : f32 to vector<16x1xf32>
    %19 = arith.divf %17, %18 : vector<16x1xf32>
    %cst_14 = arith.constant 9.99999974E-6 : f32
    %20 = vector.broadcast %cst_14 : f32 to vector<16x1xf32>
    %21 = arith.addf %19, %20 : vector<16x1xf32>
    %22 = math.rsqrt %21 : vector<16x1xf32>
    %23 = arith.mulf %3, %22 : vector<16x1xf32>
    %24 = vector.broadcast %23 : vector<16x1xf32> to vector<16x256xf32>
    %25 = arith.mulf %8, %24 : vector<16x256xf32>
    %26 = arith.mulf %12, %23 : vector<16x1xf32>
    %27 = arith.subf %4, %26 : vector<16x1xf32>
    %28 = vector.broadcast %27 : vector<16x1xf32> to vector<16x256xf32>
    %29 = arith.addf %25, %28 : vector<16x256xf32>
    %cst_15 = arith.constant 0.000000e+00 : f32
    %30 = vector.broadcast %cst_15 : f32 to vector<16x256xf32>
    %31 = arith.cmpf ogt, %29, %30 : vector<16x256xf32>
    %32 = vector.broadcast %5 : f32 to vector<16x256xf32>
    %33 = arith.mulf %32, %29 : vector<16x256xf32>
    %34 = arith.select %31, %29, %33 : vector<16x256xi1>, vector<16x256xf32>
    %c0_16 = arith.constant 0 : index
    %c0_17 = arith.constant 0 : index
    %35 = vector.load %arg6[%c0_16, %c0_17] : memref<16x256xf32, #tpu.memory_space<vmem>>, vector<16x256xf32>
    tpu.vector_store %arg6[%c0_16, %c0_17], %34 {strides = array<i32>} : memref<16x256xf32, #tpu.memory_space<vmem>>, vector<16x256xf32>,
    return
  }
}

module attributes {stable_mosaic.version = 11 : i64} {
  func.func @_dual_conv_bn_prelu_kernel(%arg0: memref<16x256xbf16, #tpu.memory_space<vmem>>, %arg1: memref<4x16xbf16, #tpu.memory_space<vmem>>, %arg2: memref<4x1xf32, #tpu.memory_space<vmem>>, %arg3: memref<4x1xf32, #tpu.memory_space<vmem>>, %arg4: memref<4x1xf32, #tpu.memory_space<vmem>>, %arg5: memref<1xf32, #tpu.memory_space<smem>>, %arg6: memref<144x64xbf16, #tpu.memory_space<vmem>>, %arg7: memref<16x144xbf16, #tpu.memory_space<vmem>>, %arg8: memref<16x1xf32, #tpu.memory_space<vmem>>, %arg9: memref<16x1xf32, #tpu.memory_space<vmem>>, %arg10: memref<16x1xf32, #tpu.memory_space<vmem>>, %arg11: memref<1xf32, #tpu.memory_space<smem>>, %arg12: memref<4x256xf32, #tpu.memory_space<vmem>>, %arg13: memref<16x64xf32, #tpu.memory_space<vmem>>) attributes {dimension_semantics = [], scalar_prefetch = 0 : i64, scratch_operands = 0 : i64, tpu.core_type = #tpu.core_type<tc>} {
    %c0 = arith.constant 0 : index
    %c0_0 = arith.constant 0 : index
    %0 = vector.load %arg0[%c0, %c0_0] : memref<16x256xbf16, #tpu.memory_space<vmem>>, vector<16x256xbf16>
    %c0_1 = arith.constant 0 : index
    %c0_2 = arith.constant 0 : index
    %1 = vector.load %arg1[%c0_1, %c0_2] : memref<4x16xbf16, #tpu.memory_space<vmem>>, vector<4x16xbf16>
    %c0_3 = arith.constant 0 : index
    %c0_4 = arith.constant 0 : index
    %2 = vector.load %arg2[%c0_3, %c0_4] : memref<4x1xf32, #tpu.memory_space<vmem>>, vector<4x1xf32>
    %c0_5 = arith.constant 0 : index
    %c0_6 = arith.constant 0 : index
    %3 = vector.load %arg3[%c0_5, %c0_6] : memref<4x1xf32, #tpu.memory_space<vmem>>, vector<4x1xf32>
    %c0_7 = arith.constant 0 : index
    %c0_8 = arith.constant 0 : index
    %4 = vector.load %arg4[%c0_7, %c0_8] : memref<4x1xf32, #tpu.memory_space<vmem>>, vector<4x1xf32>
    %c0_9 = arith.constant 0 : index
    %5 = memref.load %arg5[%c0_9] : memref<1xf32, #tpu.memory_space<smem>>
    %cst = arith.constant dense<0.000000e+00> : vector<4x256xf32>
    %6 = tpu.matmul %1, %0, %cst {dimension_numbers = #tpu.dot_dimension_numbers<[1], [0], [0], [1], [0, 0, 1, 1], [], []>} : vector<4x16xbf16>, vector<16x256xbf16>, vector<4x256xf32> -> vector<4x256xf32>
    %7 = vector.broadcast %2 : vector<4x1xf32> to vector<4x256xf32>
    %8 = arith.addf %6, %7 : vector<4x256xf32>
    %cst_10 = arith.constant dense<0.000000e+00> : vector<4xf32>
    %9 = vector.multi_reduction <add>, %8, %cst_10 [1] : vector<4x256xf32> to vector<4xf32>
    %10 = vector.shape_cast %9 : vector<4xf32> to vector<4x1xf32>
    %cst_11 = arith.constant 2.560000e+02 : f32
    %11 = vector.broadcast %cst_11 : f32 to vector<4x1xf32>
    %12 = arith.divf %10, %11 : vector<4x1xf32>
    %13 = vector.broadcast %12 : vector<4x1xf32> to vector<4x256xf32>
    %14 = arith.subf %8, %13 : vector<4x256xf32>
    %15 = arith.mulf %14, %14 : vector<4x256xf32>
    %cst_12 = arith.constant dense<0.000000e+00> : vector<4xf32>
    %16 = vector.multi_reduction <add>, %15, %cst_12 [1] : vector<4x256xf32> to vector<4xf32>
    %17 = vector.shape_cast %16 : vector<4xf32> to vector<4x1xf32>
    %cst_13 = arith.constant 2.560000e+02 : f32
    %18 = vector.broadcast %cst_13 : f32 to vector<4x1xf32>
    %19 = arith.divf %17, %18 : vector<4x1xf32>
    %cst_14 = arith.constant 9.99999974E-6 : f32
    %20 = vector.broadcast %cst_14 : f32 to vector<4x1xf32>
    %21 = arith.addf %19, %20 : vector<4x1xf32>
    %22 = math.rsqrt %21 : vector<4x1xf32>
    %23 = arith.mulf %3, %22 : vector<4x1xf32>
    %24 = vector.broadcast %23 : vector<4x1xf32> to vector<4x256xf32>
    %25 = arith.mulf %8, %24 : vector<4x256xf32>
    %26 = arith.mulf %12, %23 : vector<4x1xf32>
    %27 = arith.subf %4, %26 : vector<4x1xf32>
    %28 = vector.broadcast %27 : vector<4x1xf32> to vector<4x256xf32>
    %29 = arith.addf %25, %28 : vector<4x256xf32>
    %cst_15 = arith.constant 0.000000e+00 : f32
    %30 = vector.broadcast %cst_15 : f32 to vector<4x256xf32>
    %31 = arith.cmpf ogt, %29, %30 : vector<4x256xf32>
    %32 = vector.broadcast %5 : f32 to vector<4x256xf32>
    %33 = arith.mulf %32, %29 : vector<4x256xf32>
    %34 = arith.select %31, %29, %33 : vector<4x256xi1>, vector<4x256xf32>
    %c0_16 = arith.constant 0 : index
    %c0_17 = arith.constant 0 : index
    %35 = vector.load %arg12[%c0_16, %c0_17] : memref<4x256xf32, #tpu.memory_space<vmem>>, vector<4x256xf32>
    tpu.vector_store %arg12[%c0_16, %c0_17], %34 {strides = array<i32>} : memref<4x256xf32, #tpu.memory_space<vmem>>, vector<4x256xf32>,
    %c0_18 = arith.constant 0 : index
    %c0_19 = arith.constant 0 : index
    %36 = vector.load %arg6[%c0_18, %c0_19] : memref<144x64xbf16, #tpu.memory_space<vmem>>, vector<144x64xbf16>
    %c0_20 = arith.constant 0 : index
    %c0_21 = arith.constant 0 : index
    %37 = vector.load %arg7[%c0_20, %c0_21] : memref<16x144xbf16, #tpu.memory_space<vmem>>, vector<16x144xbf16>
    %c0_22 = arith.constant 0 : index
    %c0_23 = arith.constant 0 : index
    %38 = vector.load %arg8[%c0_22, %c0_23] : memref<16x1xf32, #tpu.memory_space<vmem>>, vector<16x1xf32>
    %c0_24 = arith.constant 0 : index
    %c0_25 = arith.constant 0 : index
    %39 = vector.load %arg9[%c0_24, %c0_25] : memref<16x1xf32, #tpu.memory_space<vmem>>, vector<16x1xf32>
    %c0_26 = arith.constant 0 : index
    %c0_27 = arith.constant 0 : index
    %40 = vector.load %arg10[%c0_26, %c0_27] : memref<16x1xf32, #tpu.memory_space<vmem>>, vector<16x1xf32>
    %c0_28 = arith.constant 0 : index
    %41 = memref.load %arg11[%c0_28] : memref<1xf32, #tpu.memory_space<smem>>
    %cst_29 = arith.constant dense<0.000000e+00> : vector<16x64xf32>
    %42 = tpu.matmul %37, %36, %cst_29 {dimension_numbers = #tpu.dot_dimension_numbers<[1], [0], [0], [1], [0, 0, 1, 1], [], []>} : vector<16x144xbf16>, vector<144x64xbf16>, vector<16x64xf32> -> vector<16x64xf32>
    %43 = vector.broadcast %38 : vector<16x1xf32> to vector<16x64xf32>
    %44 = arith.addf %42, %43 : vector<16x64xf32>
    %cst_30 = arith.constant dense<0.000000e+00> : vector<16xf32>
    %45 = vector.multi_reduction <add>, %44, %cst_30 [1] : vector<16x64xf32> to vector<16xf32>
    %46 = vector.shape_cast %45 : vector<16xf32> to vector<16x1xf32>
    %cst_31 = arith.constant 6.400000e+01 : f32
    %47 = vector.broadcast %cst_31 : f32 to vector<16x1xf32>
    %48 = arith.divf %46, %47 : vector<16x1xf32>
    %49 = vector.broadcast %48 : vector<16x1xf32> to vector<16x64xf32>
    %50 = arith.subf %44, %49 : vector<16x64xf32>
    %51 = arith.mulf %50, %50 : vector<16x64xf32>
    %cst_32 = arith.constant dense<0.000000e+00> : vector<16xf32>
    %52 = vector.multi_reduction <add>, %51, %cst_32 [1] : vector<16x64xf32> to vector<16xf32>
    %53 = vector.shape_cast %52 : vector<16xf32> to vector<16x1xf32>
    %cst_33 = arith.constant 6.400000e+01 : f32
    %54 = vector.broadcast %cst_33 : f32 to vector<16x1xf32>
    %55 = arith.divf %53, %54 : vector<16x1xf32>
    %cst_34 = arith.constant 9.99999974E-6 : f32
    %56 = vector.broadcast %cst_34 : f32 to vector<16x1xf32>
    %57 = arith.addf %55, %56 : vector<16x1xf32>
    %58 = math.rsqrt %57 : vector<16x1xf32>
    %59 = arith.mulf %39, %58 : vector<16x1xf32>
    %60 = vector.broadcast %59 : vector<16x1xf32> to vector<16x64xf32>
    %61 = arith.mulf %44, %60 : vector<16x64xf32>
    %62 = arith.mulf %48, %59 : vector<16x1xf32>
    %63 = arith.subf %40, %62 : vector<16x1xf32>
    %64 = vector.broadcast %63 : vector<16x1xf32> to vector<16x64xf32>
    %65 = arith.addf %61, %64 : vector<16x64xf32>
    %cst_35 = arith.constant 0.000000e+00 : f32
    %66 = vector.broadcast %cst_35 : f32 to vector<16x64xf32>
    %67 = arith.cmpf ogt, %65, %66 : vector<16x64xf32>
    %68 = vector.broadcast %41 : f32 to vector<16x64xf32>
    %69 = arith.mulf %68, %65 : vector<16x64xf32>
    %70 = arith.select %67, %65, %69 : vector<16x64xi1>, vector<16x64xf32>
    %c0_36 = arith.constant 0 : index
    %c0_37 = arith.constant 0 : index
    %71 = vector.load %arg13[%c0_36, %c0_37] : memref<16x64xf32, #tpu.memory_space<vmem>>, vector<16x64xf32>
    tpu.vector_store %arg13[%c0_36, %c0_37], %70 {strides = array<i32>} : memref<16x64xf32, #tpu.memory_space<vmem>>, vector<16x64xf32>,
    return
  }
}

module attributes {stable_mosaic.version = 11 : i64} {
  func.func @_conv_bn_prelu_kernel(%arg0: memref<144x64xbf16, #tpu.memory_space<vmem>>, %arg1: memref<16x144xbf16, #tpu.memory_space<vmem>>, %arg2: memref<16x1xf32, #tpu.memory_space<vmem>>, %arg3: memref<16x1xf32, #tpu.memory_space<vmem>>, %arg4: memref<16x1xf32, #tpu.memory_space<vmem>>, %arg5: memref<1xf32, #tpu.memory_space<smem>>, %arg6: memref<16x64xf32, #tpu.memory_space<vmem>>) attributes {dimension_semantics = [], scalar_prefetch = 0 : i64, scratch_operands = 0 : i64, tpu.core_type = #tpu.core_type<tc>} {
    %c0 = arith.constant 0 : index
    %c0_0 = arith.constant 0 : index
    %0 = vector.load %arg0[%c0, %c0_0] : memref<144x64xbf16, #tpu.memory_space<vmem>>, vector<144x64xbf16>
    %c0_1 = arith.constant 0 : index
    %c0_2 = arith.constant 0 : index
    %1 = vector.load %arg1[%c0_1, %c0_2] : memref<16x144xbf16, #tpu.memory_space<vmem>>, vector<16x144xbf16>
    %c0_3 = arith.constant 0 : index
    %c0_4 = arith.constant 0 : index
    %2 = vector.load %arg2[%c0_3, %c0_4] : memref<16x1xf32, #tpu.memory_space<vmem>>, vector<16x1xf32>
    %c0_5 = arith.constant 0 : index
    %c0_6 = arith.constant 0 : index
    %3 = vector.load %arg3[%c0_5, %c0_6] : memref<16x1xf32, #tpu.memory_space<vmem>>, vector<16x1xf32>
    %c0_7 = arith.constant 0 : index
    %c0_8 = arith.constant 0 : index
    %4 = vector.load %arg4[%c0_7, %c0_8] : memref<16x1xf32, #tpu.memory_space<vmem>>, vector<16x1xf32>
    %c0_9 = arith.constant 0 : index
    %5 = memref.load %arg5[%c0_9] : memref<1xf32, #tpu.memory_space<smem>>
    %cst = arith.constant dense<0.000000e+00> : vector<16x64xf32>
    %6 = tpu.matmul %1, %0, %cst {dimension_numbers = #tpu.dot_dimension_numbers<[1], [0], [0], [1], [0, 0, 1, 1], [], []>} : vector<16x144xbf16>, vector<144x64xbf16>, vector<16x64xf32> -> vector<16x64xf32>
    %7 = vector.broadcast %2 : vector<16x1xf32> to vector<16x64xf32>
    %8 = arith.addf %6, %7 : vector<16x64xf32>
    %cst_10 = arith.constant dense<0.000000e+00> : vector<16xf32>
    %9 = vector.multi_reduction <add>, %8, %cst_10 [1] : vector<16x64xf32> to vector<16xf32>
    %10 = vector.shape_cast %9 : vector<16xf32> to vector<16x1xf32>
    %cst_11 = arith.constant 6.400000e+01 : f32
    %11 = vector.broadcast %cst_11 : f32 to vector<16x1xf32>
    %12 = arith.divf %10, %11 : vector<16x1xf32>
    %13 = vector.broadcast %12 : vector<16x1xf32> to vector<16x64xf32>
    %14 = arith.subf %8, %13 : vector<16x64xf32>
    %15 = arith.mulf %14, %14 : vector<16x64xf32>
    %cst_12 = arith.constant dense<0.000000e+00> : vector<16xf32>
    %16 = vector.multi_reduction <add>, %15, %cst_12 [1] : vector<16x64xf32> to vector<16xf32>
    %17 = vector.shape_cast %16 : vector<16xf32> to vector<16x1xf32>
    %cst_13 = arith.constant 6.400000e+01 : f32
    %18 = vector.broadcast %cst_13 : f32 to vector<16x1xf32>
    %19 = arith.divf %17, %18 : vector<16x1xf32>
    %cst_14 = arith.constant 9.99999974E-6 : f32
    %20 = vector.broadcast %cst_14 : f32 to vector<16x1xf32>
    %21 = arith.addf %19, %20 : vector<16x1xf32>
    %22 = math.rsqrt %21 : vector<16x1xf32>
    %23 = arith.mulf %3, %22 : vector<16x1xf32>
    %24 = vector.broadcast %23 : vector<16x1xf32> to vector<16x64xf32>
    %25 = arith.mulf %8, %24 : vector<16x64xf32>
    %26 = arith.mulf %12, %23 : vector<16x1xf32>
    %27 = arith.subf %4, %26 : vector<16x1xf32>
    %28 = vector.broadcast %27 : vector<16x1xf32> to vector<16x64xf32>
    %29 = arith.addf %25, %28 : vector<16x64xf32>
    %cst_15 = arith.constant 0.000000e+00 : f32
    %30 = vector.broadcast %cst_15 : f32 to vector<16x64xf32>
    %31 = arith.cmpf ogt, %29, %30 : vector<16x64xf32>
    %32 = vector.broadcast %5 : f32 to vector<16x64xf32>
    %33 = arith.mulf %32, %29 : vector<16x64xf32>
    %34 = arith.select %31, %29, %33 : vector<16x64xi1>, vector<16x64xf32>
    %c0_16 = arith.constant 0 : index
    %c0_17 = arith.constant 0 : index
    %35 = vector.load %arg6[%c0_16, %c0_17] : memref<16x64xf32, #tpu.memory_space<vmem>>, vector<16x64xf32>
    tpu.vector_store %arg6[%c0_16, %c0_17], %34 {strides = array<i32>} : memref<16x64xf32, #tpu.memory_space<vmem>>, vector<16x64xf32>,
    return
  }
}

module attributes {stable_mosaic.version = 11 : i64} {
  func.func @_dual_conv_bn_prelu_kernel(%arg0: memref<16x64xbf16, #tpu.memory_space<vmem>>, %arg1: memref<4x16xbf16, #tpu.memory_space<vmem>>, %arg2: memref<4x1xf32, #tpu.memory_space<vmem>>, %arg3: memref<4x1xf32, #tpu.memory_space<vmem>>, %arg4: memref<4x1xf32, #tpu.memory_space<vmem>>, %arg5: memref<1xf32, #tpu.memory_space<smem>>, %arg6: memref<144x16xbf16, #tpu.memory_space<vmem>>, %arg7: memref<16x144xbf16, #tpu.memory_space<vmem>>, %arg8: memref<16x1xf32, #tpu.memory_space<vmem>>, %arg9: memref<16x1xf32, #tpu.memory_space<vmem>>, %arg10: memref<16x1xf32, #tpu.memory_space<vmem>>, %arg11: memref<1xf32, #tpu.memory_space<smem>>, %arg12: memref<4x64xf32, #tpu.memory_space<vmem>>, %arg13: memref<16x16xf32, #tpu.memory_space<vmem>>) attributes {dimension_semantics = [], scalar_prefetch = 0 : i64, scratch_operands = 0 : i64, tpu.core_type = #tpu.core_type<tc>} {
    %c0 = arith.constant 0 : index
    %c0_0 = arith.constant 0 : index
    %0 = vector.load %arg0[%c0, %c0_0] : memref<16x64xbf16, #tpu.memory_space<vmem>>, vector<16x64xbf16>
    %c0_1 = arith.constant 0 : index
    %c0_2 = arith.constant 0 : index
    %1 = vector.load %arg1[%c0_1, %c0_2] : memref<4x16xbf16, #tpu.memory_space<vmem>>, vector<4x16xbf16>
    %c0_3 = arith.constant 0 : index
    %c0_4 = arith.constant 0 : index
    %2 = vector.load %arg2[%c0_3, %c0_4] : memref<4x1xf32, #tpu.memory_space<vmem>>, vector<4x1xf32>
    %c0_5 = arith.constant 0 : index
    %c0_6 = arith.constant 0 : index
    %3 = vector.load %arg3[%c0_5, %c0_6] : memref<4x1xf32, #tpu.memory_space<vmem>>, vector<4x1xf32>
    %c0_7 = arith.constant 0 : index
    %c0_8 = arith.constant 0 : index
    %4 = vector.load %arg4[%c0_7, %c0_8] : memref<4x1xf32, #tpu.memory_space<vmem>>, vector<4x1xf32>
    %c0_9 = arith.constant 0 : index
    %5 = memref.load %arg5[%c0_9] : memref<1xf32, #tpu.memory_space<smem>>
    %cst = arith.constant dense<0.000000e+00> : vector<4x64xf32>
    %6 = tpu.matmul %1, %0, %cst {dimension_numbers = #tpu.dot_dimension_numbers<[1], [0], [0], [1], [0, 0, 1, 1], [], []>} : vector<4x16xbf16>, vector<16x64xbf16>, vector<4x64xf32> -> vector<4x64xf32>
    %7 = vector.broadcast %2 : vector<4x1xf32> to vector<4x64xf32>
    %8 = arith.addf %6, %7 : vector<4x64xf32>
    %cst_10 = arith.constant dense<0.000000e+00> : vector<4xf32>
    %9 = vector.multi_reduction <add>, %8, %cst_10 [1] : vector<4x64xf32> to vector<4xf32>
    %10 = vector.shape_cast %9 : vector<4xf32> to vector<4x1xf32>
    %cst_11 = arith.constant 6.400000e+01 : f32
    %11 = vector.broadcast %cst_11 : f32 to vector<4x1xf32>
    %12 = arith.divf %10, %11 : vector<4x1xf32>
    %13 = vector.broadcast %12 : vector<4x1xf32> to vector<4x64xf32>
    %14 = arith.subf %8, %13 : vector<4x64xf32>
    %15 = arith.mulf %14, %14 : vector<4x64xf32>
    %cst_12 = arith.constant dense<0.000000e+00> : vector<4xf32>
    %16 = vector.multi_reduction <add>, %15, %cst_12 [1] : vector<4x64xf32> to vector<4xf32>
    %17 = vector.shape_cast %16 : vector<4xf32> to vector<4x1xf32>
    %cst_13 = arith.constant 6.400000e+01 : f32
    %18 = vector.broadcast %cst_13 : f32 to vector<4x1xf32>
    %19 = arith.divf %17, %18 : vector<4x1xf32>
    %cst_14 = arith.constant 9.99999974E-6 : f32
    %20 = vector.broadcast %cst_14 : f32 to vector<4x1xf32>
    %21 = arith.addf %19, %20 : vector<4x1xf32>
    %22 = math.rsqrt %21 : vector<4x1xf32>
    %23 = arith.mulf %3, %22 : vector<4x1xf32>
    %24 = vector.broadcast %23 : vector<4x1xf32> to vector<4x64xf32>
    %25 = arith.mulf %8, %24 : vector<4x64xf32>
    %26 = arith.mulf %12, %23 : vector<4x1xf32>
    %27 = arith.subf %4, %26 : vector<4x1xf32>
    %28 = vector.broadcast %27 : vector<4x1xf32> to vector<4x64xf32>
    %29 = arith.addf %25, %28 : vector<4x64xf32>
    %cst_15 = arith.constant 0.000000e+00 : f32
    %30 = vector.broadcast %cst_15 : f32 to vector<4x64xf32>
    %31 = arith.cmpf ogt, %29, %30 : vector<4x64xf32>
    %32 = vector.broadcast %5 : f32 to vector<4x64xf32>
    %33 = arith.mulf %32, %29 : vector<4x64xf32>
    %34 = arith.select %31, %29, %33 : vector<4x64xi1>, vector<4x64xf32>
    %c0_16 = arith.constant 0 : index
    %c0_17 = arith.constant 0 : index
    %35 = vector.load %arg12[%c0_16, %c0_17] : memref<4x64xf32, #tpu.memory_space<vmem>>, vector<4x64xf32>
    tpu.vector_store %arg12[%c0_16, %c0_17], %34 {strides = array<i32>} : memref<4x64xf32, #tpu.memory_space<vmem>>, vector<4x64xf32>,
    %c0_18 = arith.constant 0 : index
    %c0_19 = arith.constant 0 : index
    %36 = vector.load %arg6[%c0_18, %c0_19] : memref<144x16xbf16, #tpu.memory_space<vmem>>, vector<144x16xbf16>
    %c0_20 = arith.constant 0 : index
    %c0_21 = arith.constant 0 : index
    %37 = vector.load %arg7[%c0_20, %c0_21] : memref<16x144xbf16, #tpu.memory_space<vmem>>, vector<16x144xbf16>
    %c0_22 = arith.constant 0 : index
    %c0_23 = arith.constant 0 : index
    %38 = vector.load %arg8[%c0_22, %c0_23] : memref<16x1xf32, #tpu.memory_space<vmem>>, vector<16x1xf32>
    %c0_24 = arith.constant 0 : index
    %c0_25 = arith.constant 0 : index
    %39 = vector.load %arg9[%c0_24, %c0_25] : memref<16x1xf32, #tpu.memory_space<vmem>>, vector<16x1xf32>
    %c0_26 = arith.constant 0 : index
    %c0_27 = arith.constant 0 : index
    %40 = vector.load %arg10[%c0_26, %c0_27] : memref<16x1xf32, #tpu.memory_space<vmem>>, vector<16x1xf32>
    %c0_28 = arith.constant 0 : index
    %41 = memref.load %arg11[%c0_28] : memref<1xf32, #tpu.memory_space<smem>>
    %cst_29 = arith.constant dense<0.000000e+00> : vector<16x16xf32>
    %42 = tpu.matmul %37, %36, %cst_29 {dimension_numbers = #tpu.dot_dimension_numbers<[1], [0], [0], [1], [0, 0, 1, 1], [], []>} : vector<16x144xbf16>, vector<144x16xbf16>, vector<16x16xf32> -> vector<16x16xf32>
    %43 = vector.broadcast %38 : vector<16x1xf32> to vector<16x16xf32>
    %44 = arith.addf %42, %43 : vector<16x16xf32>
    %cst_30 = arith.constant dense<0.000000e+00> : vector<16xf32>
    %45 = vector.multi_reduction <add>, %44, %cst_30 [1] : vector<16x16xf32> to vector<16xf32>
    %46 = vector.shape_cast %45 : vector<16xf32> to vector<16x1xf32>
    %cst_31 = arith.constant 1.600000e+01 : f32
    %47 = vector.broadcast %cst_31 : f32 to vector<16x1xf32>
    %48 = arith.divf %46, %47 : vector<16x1xf32>
    %49 = vector.broadcast %48 : vector<16x1xf32> to vector<16x16xf32>
    %50 = arith.subf %44, %49 : vector<16x16xf32>
    %51 = arith.mulf %50, %50 : vector<16x16xf32>
    %cst_32 = arith.constant dense<0.000000e+00> : vector<16xf32>
    %52 = vector.multi_reduction <add>, %51, %cst_32 [1] : vector<16x16xf32> to vector<16xf32>
    %53 = vector.shape_cast %52 : vector<16xf32> to vector<16x1xf32>
    %cst_33 = arith.constant 1.600000e+01 : f32
    %54 = vector.broadcast %cst_33 : f32 to vector<16x1xf32>
    %55 = arith.divf %53, %54 : vector<16x1xf32>
    %cst_34 = arith.constant 9.99999974E-6 : f32
    %56 = vector.broadcast %cst_34 : f32 to vector<16x1xf32>
    %57 = arith.addf %55, %56 : vector<16x1xf32>
    %58 = math.rsqrt %57 : vector<16x1xf32>
    %59 = arith.mulf %39, %58 : vector<16x1xf32>
    %60 = vector.broadcast %59 : vector<16x1xf32> to vector<16x16xf32>
    %61 = arith.mulf %44, %60 : vector<16x16xf32>
    %62 = arith.mulf %48, %59 : vector<16x1xf32>
    %63 = arith.subf %40, %62 : vector<16x1xf32>
    %64 = vector.broadcast %63 : vector<16x1xf32> to vector<16x16xf32>
    %65 = arith.addf %61, %64 : vector<16x16xf32>
    %cst_35 = arith.constant 0.000000e+00 : f32
    %66 = vector.broadcast %cst_35 : f32 to vector<16x16xf32>
    %67 = arith.cmpf ogt, %65, %66 : vector<16x16xf32>
    %68 = vector.broadcast %41 : f32 to vector<16x16xf32>
    %69 = arith.mulf %68, %65 : vector<16x16xf32>
    %70 = arith.select %67, %65, %69 : vector<16x16xi1>, vector<16x16xf32>
    %c0_36 = arith.constant 0 : index
    %c0_37 = arith.constant 0 : index
    %71 = vector.load %arg13[%c0_36, %c0_37] : memref<16x16xf32, #tpu.memory_space<vmem>>, vector<16x16xf32>
    tpu.vector_store %arg13[%c0_36, %c0_37], %70 {strides = array<i32>} : memref<16x16xf32, #tpu.memory_space<vmem>>, vector<16x16xf32>,
    return
  }
}

module attributes {stable_mosaic.version = 11 : i64} {
  func.func @_conv_bn_prelu_kernel(%arg0: memref<144x16xbf16, #tpu.memory_space<vmem>>, %arg1: memref<16x144xbf16, #tpu.memory_space<vmem>>, %arg2: memref<16x1xf32, #tpu.memory_space<vmem>>, %arg3: memref<16x1xf32, #tpu.memory_space<vmem>>, %arg4: memref<16x1xf32, #tpu.memory_space<vmem>>, %arg5: memref<1xf32, #tpu.memory_space<smem>>, %arg6: memref<16x16xf32, #tpu.memory_space<vmem>>) attributes {dimension_semantics = [], scalar_prefetch = 0 : i64, scratch_operands = 0 : i64, tpu.core_type = #tpu.core_type<tc>} {
    %c0 = arith.constant 0 : index
    %c0_0 = arith.constant 0 : index
    %0 = vector.load %arg0[%c0, %c0_0] : memref<144x16xbf16, #tpu.memory_space<vmem>>, vector<144x16xbf16>
    %c0_1 = arith.constant 0 : index
    %c0_2 = arith.constant 0 : index
    %1 = vector.load %arg1[%c0_1, %c0_2] : memref<16x144xbf16, #tpu.memory_space<vmem>>, vector<16x144xbf16>
    %c0_3 = arith.constant 0 : index
    %c0_4 = arith.constant 0 : index
    %2 = vector.load %arg2[%c0_3, %c0_4] : memref<16x1xf32, #tpu.memory_space<vmem>>, vector<16x1xf32>
    %c0_5 = arith.constant 0 : index
    %c0_6 = arith.constant 0 : index
    %3 = vector.load %arg3[%c0_5, %c0_6] : memref<16x1xf32, #tpu.memory_space<vmem>>, vector<16x1xf32>
    %c0_7 = arith.constant 0 : index
    %c0_8 = arith.constant 0 : index
    %4 = vector.load %arg4[%c0_7, %c0_8] : memref<16x1xf32, #tpu.memory_space<vmem>>, vector<16x1xf32>
    %c0_9 = arith.constant 0 : index
    %5 = memref.load %arg5[%c0_9] : memref<1xf32, #tpu.memory_space<smem>>
    %cst = arith.constant dense<0.000000e+00> : vector<16x16xf32>
    %6 = tpu.matmul %1, %0, %cst {dimension_numbers = #tpu.dot_dimension_numbers<[1], [0], [0], [1], [0, 0, 1, 1], [], []>} : vector<16x144xbf16>, vector<144x16xbf16>, vector<16x16xf32> -> vector<16x16xf32>
    %7 = vector.broadcast %2 : vector<16x1xf32> to vector<16x16xf32>
    %8 = arith.addf %6, %7 : vector<16x16xf32>
    %cst_10 = arith.constant dense<0.000000e+00> : vector<16xf32>
    %9 = vector.multi_reduction <add>, %8, %cst_10 [1] : vector<16x16xf32> to vector<16xf32>
    %10 = vector.shape_cast %9 : vector<16xf32> to vector<16x1xf32>
    %cst_11 = arith.constant 1.600000e+01 : f32
    %11 = vector.broadcast %cst_11 : f32 to vector<16x1xf32>
    %12 = arith.divf %10, %11 : vector<16x1xf32>
    %13 = vector.broadcast %12 : vector<16x1xf32> to vector<16x16xf32>
    %14 = arith.subf %8, %13 : vector<16x16xf32>
    %15 = arith.mulf %14, %14 : vector<16x16xf32>
    %cst_12 = arith.constant dense<0.000000e+00> : vector<16xf32>
    %16 = vector.multi_reduction <add>, %15, %cst_12 [1] : vector<16x16xf32> to vector<16xf32>
    %17 = vector.shape_cast %16 : vector<16xf32> to vector<16x1xf32>
    %cst_13 = arith.constant 1.600000e+01 : f32
    %18 = vector.broadcast %cst_13 : f32 to vector<16x1xf32>
    %19 = arith.divf %17, %18 : vector<16x1xf32>
    %cst_14 = arith.constant 9.99999974E-6 : f32
    %20 = vector.broadcast %cst_14 : f32 to vector<16x1xf32>
    %21 = arith.addf %19, %20 : vector<16x1xf32>
    %22 = math.rsqrt %21 : vector<16x1xf32>
    %23 = arith.mulf %3, %22 : vector<16x1xf32>
    %24 = vector.broadcast %23 : vector<16x1xf32> to vector<16x16xf32>
    %25 = arith.mulf %8, %24 : vector<16x16xf32>
    %26 = arith.mulf %12, %23 : vector<16x1xf32>
    %27 = arith.subf %4, %26 : vector<16x1xf32>
    %28 = vector.broadcast %27 : vector<16x1xf32> to vector<16x16xf32>
    %29 = arith.addf %25, %28 : vector<16x16xf32>
    %cst_15 = arith.constant 0.000000e+00 : f32
    %30 = vector.broadcast %cst_15 : f32 to vector<16x16xf32>
    %31 = arith.cmpf ogt, %29, %30 : vector<16x16xf32>
    %32 = vector.broadcast %5 : f32 to vector<16x16xf32>
    %33 = arith.mulf %32, %29 : vector<16x16xf32>
    %34 = arith.select %31, %29, %33 : vector<16x16xi1>, vector<16x16xf32>
    %c0_16 = arith.constant 0 : index
    %c0_17 = arith.constant 0 : index
    %35 = vector.load %arg6[%c0_16, %c0_17] : memref<16x16xf32, #tpu.memory_space<vmem>>, vector<16x16xf32>
    tpu.vector_store %arg6[%c0_16, %c0_17], %34 {strides = array<i32>} : memref<16x16xf32, #tpu.memory_space<vmem>>, vector<16x16xf32>,
    return
  }
}

module attributes {stable_mosaic.version = 11 : i64} {
  func.func @_dual_conv_bn_prelu_kernel(%arg0: memref<16x16xbf16, #tpu.memory_space<vmem>>, %arg1: memref<4x16xbf16, #tpu.memory_space<vmem>>, %arg2: memref<4x1xf32, #tpu.memory_space<vmem>>, %arg3: memref<4x1xf32, #tpu.memory_space<vmem>>, %arg4: memref<4x1xf32, #tpu.memory_space<vmem>>, %arg5: memref<1xf32, #tpu.memory_space<smem>>, %arg6: memref<144x4xbf16, #tpu.memory_space<vmem>>, %arg7: memref<16x144xbf16, #tpu.memory_space<vmem>>, %arg8: memref<16x1xf32, #tpu.memory_space<vmem>>, %arg9: memref<16x1xf32, #tpu.memory_space<vmem>>, %arg10: memref<16x1xf32, #tpu.memory_space<vmem>>, %arg11: memref<1xf32, #tpu.memory_space<smem>>, %arg12: memref<4x16xf32, #tpu.memory_space<vmem>>, %arg13: memref<16x4xf32, #tpu.memory_space<vmem>>) attributes {dimension_semantics = [], scalar_prefetch = 0 : i64, scratch_operands = 0 : i64, tpu.core_type = #tpu.core_type<tc>} {
    %c0 = arith.constant 0 : index
    %c0_0 = arith.constant 0 : index
    %0 = vector.load %arg0[%c0, %c0_0] : memref<16x16xbf16, #tpu.memory_space<vmem>>, vector<16x16xbf16>
    %c0_1 = arith.constant 0 : index
    %c0_2 = arith.constant 0 : index
    %1 = vector.load %arg1[%c0_1, %c0_2] : memref<4x16xbf16, #tpu.memory_space<vmem>>, vector<4x16xbf16>
    %c0_3 = arith.constant 0 : index
    %c0_4 = arith.constant 0 : index
    %2 = vector.load %arg2[%c0_3, %c0_4] : memref<4x1xf32, #tpu.memory_space<vmem>>, vector<4x1xf32>
    %c0_5 = arith.constant 0 : index
    %c0_6 = arith.constant 0 : index
    %3 = vector.load %arg3[%c0_5, %c0_6] : memref<4x1xf32, #tpu.memory_space<vmem>>, vector<4x1xf32>
    %c0_7 = arith.constant 0 : index
    %c0_8 = arith.constant 0 : index
    %4 = vector.load %arg4[%c0_7, %c0_8] : memref<4x1xf32, #tpu.memory_space<vmem>>, vector<4x1xf32>
    %c0_9 = arith.constant 0 : index
    %5 = memref.load %arg5[%c0_9] : memref<1xf32, #tpu.memory_space<smem>>
    %cst = arith.constant dense<0.000000e+00> : vector<4x16xf32>
    %6 = tpu.matmul %1, %0, %cst {dimension_numbers = #tpu.dot_dimension_numbers<[1], [0], [0], [1], [0, 0, 1, 1], [], []>} : vector<4x16xbf16>, vector<16x16xbf16>, vector<4x16xf32> -> vector<4x16xf32>
    %7 = vector.broadcast %2 : vector<4x1xf32> to vector<4x16xf32>
    %8 = arith.addf %6, %7 : vector<4x16xf32>
    %cst_10 = arith.constant dense<0.000000e+00> : vector<4xf32>
    %9 = vector.multi_reduction <add>, %8, %cst_10 [1] : vector<4x16xf32> to vector<4xf32>
    %10 = vector.shape_cast %9 : vector<4xf32> to vector<4x1xf32>
    %cst_11 = arith.constant 1.600000e+01 : f32
    %11 = vector.broadcast %cst_11 : f32 to vector<4x1xf32>
    %12 = arith.divf %10, %11 : vector<4x1xf32>
    %13 = vector.broadcast %12 : vector<4x1xf32> to vector<4x16xf32>
    %14 = arith.subf %8, %13 : vector<4x16xf32>
    %15 = arith.mulf %14, %14 : vector<4x16xf32>
    %cst_12 = arith.constant dense<0.000000e+00> : vector<4xf32>
    %16 = vector.multi_reduction <add>, %15, %cst_12 [1] : vector<4x16xf32> to vector<4xf32>
    %17 = vector.shape_cast %16 : vector<4xf32> to vector<4x1xf32>
    %cst_13 = arith.constant 1.600000e+01 : f32
    %18 = vector.broadcast %cst_13 : f32 to vector<4x1xf32>
    %19 = arith.divf %17, %18 : vector<4x1xf32>
    %cst_14 = arith.constant 9.99999974E-6 : f32
    %20 = vector.broadcast %cst_14 : f32 to vector<4x1xf32>
    %21 = arith.addf %19, %20 : vector<4x1xf32>
    %22 = math.rsqrt %21 : vector<4x1xf32>
    %23 = arith.mulf %3, %22 : vector<4x1xf32>
    %24 = vector.broadcast %23 : vector<4x1xf32> to vector<4x16xf32>
    %25 = arith.mulf %8, %24 : vector<4x16xf32>
    %26 = arith.mulf %12, %23 : vector<4x1xf32>
    %27 = arith.subf %4, %26 : vector<4x1xf32>
    %28 = vector.broadcast %27 : vector<4x1xf32> to vector<4x16xf32>
    %29 = arith.addf %25, %28 : vector<4x16xf32>
    %cst_15 = arith.constant 0.000000e+00 : f32
    %30 = vector.broadcast %cst_15 : f32 to vector<4x16xf32>
    %31 = arith.cmpf ogt, %29, %30 : vector<4x16xf32>
    %32 = vector.broadcast %5 : f32 to vector<4x16xf32>
    %33 = arith.mulf %32, %29 : vector<4x16xf32>
    %34 = arith.select %31, %29, %33 : vector<4x16xi1>, vector<4x16xf32>
    %c0_16 = arith.constant 0 : index
    %c0_17 = arith.constant 0 : index
    %35 = vector.load %arg12[%c0_16, %c0_17] : memref<4x16xf32, #tpu.memory_space<vmem>>, vector<4x16xf32>
    tpu.vector_store %arg12[%c0_16, %c0_17], %34 {strides = array<i32>} : memref<4x16xf32, #tpu.memory_space<vmem>>, vector<4x16xf32>,
    %c0_18 = arith.constant 0 : index
    %c0_19 = arith.constant 0 : index
    %36 = vector.load %arg6[%c0_18, %c0_19] : memref<144x4xbf16, #tpu.memory_space<vmem>>, vector<144x4xbf16>
    %c0_20 = arith.constant 0 : index
    %c0_21 = arith.constant 0 : index
    %37 = vector.load %arg7[%c0_20, %c0_21] : memref<16x144xbf16, #tpu.memory_space<vmem>>, vector<16x144xbf16>
    %c0_22 = arith.constant 0 : index
    %c0_23 = arith.constant 0 : index
    %38 = vector.load %arg8[%c0_22, %c0_23] : memref<16x1xf32, #tpu.memory_space<vmem>>, vector<16x1xf32>
    %c0_24 = arith.constant 0 : index
    %c0_25 = arith.constant 0 : index
    %39 = vector.load %arg9[%c0_24, %c0_25] : memref<16x1xf32, #tpu.memory_space<vmem>>, vector<16x1xf32>
    %c0_26 = arith.constant 0 : index
    %c0_27 = arith.constant 0 : index
    %40 = vector.load %arg10[%c0_26, %c0_27] : memref<16x1xf32, #tpu.memory_space<vmem>>, vector<16x1xf32>
    %c0_28 = arith.constant 0 : index
    %41 = memref.load %arg11[%c0_28] : memref<1xf32, #tpu.memory_space<smem>>
    %cst_29 = arith.constant dense<0.000000e+00> : vector<16x4xf32>
    %42 = tpu.matmul %37, %36, %cst_29 {dimension_numbers = #tpu.dot_dimension_numbers<[1], [0], [0], [1], [0, 0, 1, 1], [], []>} : vector<16x144xbf16>, vector<144x4xbf16>, vector<16x4xf32> -> vector<16x4xf32>
    %43 = vector.broadcast %38 : vector<16x1xf32> to vector<16x4xf32>
    %44 = arith.addf %42, %43 : vector<16x4xf32>
    %cst_30 = arith.constant dense<0.000000e+00> : vector<16xf32>
    %45 = vector.multi_reduction <add>, %44, %cst_30 [1] : vector<16x4xf32> to vector<16xf32>
    %46 = vector.shape_cast %45 : vector<16xf32> to vector<16x1xf32>
    %cst_31 = arith.constant 4.000000e+00 : f32
    %47 = vector.broadcast %cst_31 : f32 to vector<16x1xf32>
    %48 = arith.divf %46, %47 : vector<16x1xf32>
    %49 = vector.broadcast %48 : vector<16x1xf32> to vector<16x4xf32>
    %50 = arith.subf %44, %49 : vector<16x4xf32>
    %51 = arith.mulf %50, %50 : vector<16x4xf32>
    %cst_32 = arith.constant dense<0.000000e+00> : vector<16xf32>
    %52 = vector.multi_reduction <add>, %51, %cst_32 [1] : vector<16x4xf32> to vector<16xf32>
    %53 = vector.shape_cast %52 : vector<16xf32> to vector<16x1xf32>
    %cst_33 = arith.constant 4.000000e+00 : f32
    %54 = vector.broadcast %cst_33 : f32 to vector<16x1xf32>
    %55 = arith.divf %53, %54 : vector<16x1xf32>
    %cst_34 = arith.constant 9.99999974E-6 : f32
    %56 = vector.broadcast %cst_34 : f32 to vector<16x1xf32>
    %57 = arith.addf %55, %56 : vector<16x1xf32>
    %58 = math.rsqrt %57 : vector<16x1xf32>
    %59 = arith.mulf %39, %58 : vector<16x1xf32>
    %60 = vector.broadcast %59 : vector<16x1xf32> to vector<16x4xf32>
    %61 = arith.mulf %44, %60 : vector<16x4xf32>
    %62 = arith.mulf %48, %59 : vector<16x1xf32>
    %63 = arith.subf %40, %62 : vector<16x1xf32>
    %64 = vector.broadcast %63 : vector<16x1xf32> to vector<16x4xf32>
    %65 = arith.addf %61, %64 : vector<16x4xf32>
    %cst_35 = arith.constant 0.000000e+00 : f32
    %66 = vector.broadcast %cst_35 : f32 to vector<16x4xf32>
    %67 = arith.cmpf ogt, %65, %66 : vector<16x4xf32>
    %68 = vector.broadcast %41 : f32 to vector<16x4xf32>
    %69 = arith.mulf %68, %65 : vector<16x4xf32>
    %70 = arith.select %67, %65, %69 : vector<16x4xi1>, vector<16x4xf32>
    %c0_36 = arith.constant 0 : index
    %c0_37 = arith.constant 0 : index
    %71 = vector.load %arg13[%c0_36, %c0_37] : memref<16x4xf32, #tpu.memory_space<vmem>>, vector<16x4xf32>
    tpu.vector_store %arg13[%c0_36, %c0_37], %70 {strides = array<i32>} : memref<16x4xf32, #tpu.memory_space<vmem>>, vector<16x4xf32>,
    return
  }
}

module attributes {stable_mosaic.version = 11 : i64} {
  func.func @_conv_bn_prelu_kernel(%arg0: memref<144x4xbf16, #tpu.memory_space<vmem>>, %arg1: memref<16x144xbf16, #tpu.memory_space<vmem>>, %arg2: memref<16x1xf32, #tpu.memory_space<vmem>>, %arg3: memref<16x1xf32, #tpu.memory_space<vmem>>, %arg4: memref<16x1xf32, #tpu.memory_space<vmem>>, %arg5: memref<1xf32, #tpu.memory_space<smem>>, %arg6: memref<16x4xf32, #tpu.memory_space<vmem>>) attributes {dimension_semantics = [], scalar_prefetch = 0 : i64, scratch_operands = 0 : i64, tpu.core_type = #tpu.core_type<tc>} {
    %c0 = arith.constant 0 : index
    %c0_0 = arith.constant 0 : index
    %0 = vector.load %arg0[%c0, %c0_0] : memref<144x4xbf16, #tpu.memory_space<vmem>>, vector<144x4xbf16>
    %c0_1 = arith.constant 0 : index
    %c0_2 = arith.constant 0 : index
    %1 = vector.load %arg1[%c0_1, %c0_2] : memref<16x144xbf16, #tpu.memory_space<vmem>>, vector<16x144xbf16>
    %c0_3 = arith.constant 0 : index
    %c0_4 = arith.constant 0 : index
    %2 = vector.load %arg2[%c0_3, %c0_4] : memref<16x1xf32, #tpu.memory_space<vmem>>, vector<16x1xf32>
    %c0_5 = arith.constant 0 : index
    %c0_6 = arith.constant 0 : index
    %3 = vector.load %arg3[%c0_5, %c0_6] : memref<16x1xf32, #tpu.memory_space<vmem>>, vector<16x1xf32>
    %c0_7 = arith.constant 0 : index
    %c0_8 = arith.constant 0 : index
    %4 = vector.load %arg4[%c0_7, %c0_8] : memref<16x1xf32, #tpu.memory_space<vmem>>, vector<16x1xf32>
    %c0_9 = arith.constant 0 : index
    %5 = memref.load %arg5[%c0_9] : memref<1xf32, #tpu.memory_space<smem>>
    %cst = arith.constant dense<0.000000e+00> : vector<16x4xf32>
    %6 = tpu.matmul %1, %0, %cst {dimension_numbers = #tpu.dot_dimension_numbers<[1], [0], [0], [1], [0, 0, 1, 1], [], []>} : vector<16x144xbf16>, vector<144x4xbf16>, vector<16x4xf32> -> vector<16x4xf32>
    %7 = vector.broadcast %2 : vector<16x1xf32> to vector<16x4xf32>
    %8 = arith.addf %6, %7 : vector<16x4xf32>
    %cst_10 = arith.constant dense<0.000000e+00> : vector<16xf32>
    %9 = vector.multi_reduction <add>, %8, %cst_10 [1] : vector<16x4xf32> to vector<16xf32>
    %10 = vector.shape_cast %9 : vector<16xf32> to vector<16x1xf32>
    %cst_11 = arith.constant 4.000000e+00 : f32
    %11 = vector.broadcast %cst_11 : f32 to vector<16x1xf32>
    %12 = arith.divf %10, %11 : vector<16x1xf32>
    %13 = vector.broadcast %12 : vector<16x1xf32> to vector<16x4xf32>
    %14 = arith.subf %8, %13 : vector<16x4xf32>
    %15 = arith.mulf %14, %14 : vector<16x4xf32>
    %cst_12 = arith.constant dense<0.000000e+00> : vector<16xf32>
    %16 = vector.multi_reduction <add>, %15, %cst_12 [1] : vector<16x4xf32> to vector<16xf32>
    %17 = vector.shape_cast %16 : vector<16xf32> to vector<16x1xf32>
    %cst_13 = arith.constant 4.000000e+00 : f32
    %18 = vector.broadcast %cst_13 : f32 to vector<16x1xf32>
    %19 = arith.divf %17, %18 : vector<16x1xf32>
    %cst_14 = arith.constant 9.99999974E-6 : f32
    %20 = vector.broadcast %cst_14 : f32 to vector<16x1xf32>
    %21 = arith.addf %19, %20 : vector<16x1xf32>
    %22 = math.rsqrt %21 : vector<16x1xf32>
    %23 = arith.mulf %3, %22 : vector<16x1xf32>
    %24 = vector.broadcast %23 : vector<16x1xf32> to vector<16x4xf32>
    %25 = arith.mulf %8, %24 : vector<16x4xf32>
    %26 = arith.mulf %12, %23 : vector<16x1xf32>
    %27 = arith.subf %4, %26 : vector<16x1xf32>
    %28 = vector.broadcast %27 : vector<16x1xf32> to vector<16x4xf32>
    %29 = arith.addf %25, %28 : vector<16x4xf32>
    %cst_15 = arith.constant 0.000000e+00 : f32
    %30 = vector.broadcast %cst_15 : f32 to vector<16x4xf32>
    %31 = arith.cmpf ogt, %29, %30 : vector<16x4xf32>
    %32 = vector.broadcast %5 : f32 to vector<16x4xf32>
    %33 = arith.mulf %32, %29 : vector<16x4xf32>
    %34 = arith.select %31, %29, %33 : vector<16x4xi1>, vector<16x4xf32>
    %c0_16 = arith.constant 0 : index
    %c0_17 = arith.constant 0 : index
    %35 = vector.load %arg6[%c0_16, %c0_17] : memref<16x4xf32, #tpu.memory_space<vmem>>, vector<16x4xf32>
    tpu.vector_store %arg6[%c0_16, %c0_17], %34 {strides = array<i32>} : memref<16x4xf32, #tpu.memory_space<vmem>>, vector<16x4xf32>,
    return
  }
}

module attributes {stable_mosaic.version = 11 : i64} {
  func.func @_dual_conv_bn_prelu_kernel(%arg0: memref<16x4xbf16, #tpu.memory_space<vmem>>, %arg1: memref<4x16xbf16, #tpu.memory_space<vmem>>, %arg2: memref<4x1xf32, #tpu.memory_space<vmem>>, %arg3: memref<4x1xf32, #tpu.memory_space<vmem>>, %arg4: memref<4x1xf32, #tpu.memory_space<vmem>>, %arg5: memref<1xf32, #tpu.memory_space<smem>>, %arg6: memref<144x1xbf16, #tpu.memory_space<vmem>>, %arg7: memref<16x144xbf16, #tpu.memory_space<vmem>>, %arg8: memref<16x1xf32, #tpu.memory_space<vmem>>, %arg9: memref<16x1xf32, #tpu.memory_space<vmem>>, %arg10: memref<16x1xf32, #tpu.memory_space<vmem>>, %arg11: memref<1xf32, #tpu.memory_space<smem>>, %arg12: memref<4x4xf32, #tpu.memory_space<vmem>>, %arg13: memref<16x1xf32, #tpu.memory_space<vmem>>) attributes {dimension_semantics = [], scalar_prefetch = 0 : i64, scratch_operands = 0 : i64, tpu.core_type = #tpu.core_type<tc>} {
    %c0 = arith.constant 0 : index
    %c0_0 = arith.constant 0 : index
    %0 = vector.load %arg0[%c0, %c0_0] : memref<16x4xbf16, #tpu.memory_space<vmem>>, vector<16x4xbf16>
    %c0_1 = arith.constant 0 : index
    %c0_2 = arith.constant 0 : index
    %1 = vector.load %arg1[%c0_1, %c0_2] : memref<4x16xbf16, #tpu.memory_space<vmem>>, vector<4x16xbf16>
    %c0_3 = arith.constant 0 : index
    %c0_4 = arith.constant 0 : index
    %2 = vector.load %arg2[%c0_3, %c0_4] : memref<4x1xf32, #tpu.memory_space<vmem>>, vector<4x1xf32>
    %c0_5 = arith.constant 0 : index
    %c0_6 = arith.constant 0 : index
    %3 = vector.load %arg3[%c0_5, %c0_6] : memref<4x1xf32, #tpu.memory_space<vmem>>, vector<4x1xf32>
    %c0_7 = arith.constant 0 : index
    %c0_8 = arith.constant 0 : index
    %4 = vector.load %arg4[%c0_7, %c0_8] : memref<4x1xf32, #tpu.memory_space<vmem>>, vector<4x1xf32>
    %c0_9 = arith.constant 0 : index
    %5 = memref.load %arg5[%c0_9] : memref<1xf32, #tpu.memory_space<smem>>
    %cst = arith.constant dense<0.000000e+00> : vector<4x4xf32>
    %6 = tpu.matmul %1, %0, %cst {dimension_numbers = #tpu.dot_dimension_numbers<[1], [0], [0], [1], [0, 0, 1, 1], [], []>} : vector<4x16xbf16>, vector<16x4xbf16>, vector<4x4xf32> -> vector<4x4xf32>
    %7 = vector.broadcast %2 : vector<4x1xf32> to vector<4x4xf32>
    %8 = arith.addf %6, %7 : vector<4x4xf32>
    %cst_10 = arith.constant dense<0.000000e+00> : vector<4xf32>
    %9 = vector.multi_reduction <add>, %8, %cst_10 [1] : vector<4x4xf32> to vector<4xf32>
    %10 = vector.shape_cast %9 : vector<4xf32> to vector<4x1xf32>
    %cst_11 = arith.constant 4.000000e+00 : f32
    %11 = vector.broadcast %cst_11 : f32 to vector<4x1xf32>
    %12 = arith.divf %10, %11 : vector<4x1xf32>
    %13 = vector.broadcast %12 : vector<4x1xf32> to vector<4x4xf32>
    %14 = arith.subf %8, %13 : vector<4x4xf32>
    %15 = arith.mulf %14, %14 : vector<4x4xf32>
    %cst_12 = arith.constant dense<0.000000e+00> : vector<4xf32>
    %16 = vector.multi_reduction <add>, %15, %cst_12 [1] : vector<4x4xf32> to vector<4xf32>
    %17 = vector.shape_cast %16 : vector<4xf32> to vector<4x1xf32>
    %cst_13 = arith.constant 4.000000e+00 : f32
    %18 = vector.broadcast %cst_13 : f32 to vector<4x1xf32>
    %19 = arith.divf %17, %18 : vector<4x1xf32>
    %cst_14 = arith.constant 9.99999974E-6 : f32
    %20 = vector.broadcast %cst_14 : f32 to vector<4x1xf32>
    %21 = arith.addf %19, %20 : vector<4x1xf32>
    %22 = math.rsqrt %21 : vector<4x1xf32>
    %23 = arith.mulf %3, %22 : vector<4x1xf32>
    %24 = vector.broadcast %23 : vector<4x1xf32> to vector<4x4xf32>
    %25 = arith.mulf %8, %24 : vector<4x4xf32>
    %26 = arith.mulf %12, %23 : vector<4x1xf32>
    %27 = arith.subf %4, %26 : vector<4x1xf32>
    %28 = vector.broadcast %27 : vector<4x1xf32> to vector<4x4xf32>
    %29 = arith.addf %25, %28 : vector<4x4xf32>
    %cst_15 = arith.constant 0.000000e+00 : f32
    %30 = vector.broadcast %cst_15 : f32 to vector<4x4xf32>
    %31 = arith.cmpf ogt, %29, %30 : vector<4x4xf32>
    %32 = vector.broadcast %5 : f32 to vector<4x4xf32>
    %33 = arith.mulf %32, %29 : vector<4x4xf32>
    %34 = arith.select %31, %29, %33 : vector<4x4xi1>, vector<4x4xf32>
    %c0_16 = arith.constant 0 : index
    %c0_17 = arith.constant 0 : index
    %35 = vector.load %arg12[%c0_16, %c0_17] : memref<4x4xf32, #tpu.memory_space<vmem>>, vector<4x4xf32>
    tpu.vector_store %arg12[%c0_16, %c0_17], %34 {strides = array<i32>} : memref<4x4xf32, #tpu.memory_space<vmem>>, vector<4x4xf32>,
    %c0_18 = arith.constant 0 : index
    %c0_19 = arith.constant 0 : index
    %36 = vector.load %arg6[%c0_18, %c0_19] : memref<144x1xbf16, #tpu.memory_space<vmem>>, vector<144x1xbf16>
    %c0_20 = arith.constant 0 : index
    %c0_21 = arith.constant 0 : index
    %37 = vector.load %arg7[%c0_20, %c0_21] : memref<16x144xbf16, #tpu.memory_space<vmem>>, vector<16x144xbf16>
    %c0_22 = arith.constant 0 : index
    %c0_23 = arith.constant 0 : index
    %38 = vector.load %arg8[%c0_22, %c0_23] : memref<16x1xf32, #tpu.memory_space<vmem>>, vector<16x1xf32>
    %c0_24 = arith.constant 0 : index
    %c0_25 = arith.constant 0 : index
    %39 = vector.load %arg9[%c0_24, %c0_25] : memref<16x1xf32, #tpu.memory_space<vmem>>, vector<16x1xf32>
    %c0_26 = arith.constant 0 : index
    %c0_27 = arith.constant 0 : index
    %40 = vector.load %arg10[%c0_26, %c0_27] : memref<16x1xf32, #tpu.memory_space<vmem>>, vector<16x1xf32>
    %c0_28 = arith.constant 0 : index
    %41 = memref.load %arg11[%c0_28] : memref<1xf32, #tpu.memory_space<smem>>
    %cst_29 = arith.constant dense<0.000000e+00> : vector<16x1xf32>
    %42 = tpu.matmul %37, %36, %cst_29 {dimension_numbers = #tpu.dot_dimension_numbers<[1], [0], [0], [1], [0, 0, 1, 1], [], []>} : vector<16x144xbf16>, vector<144x1xbf16>, vector<16x1xf32> -> vector<16x1xf32>
    %43 = arith.addf %42, %38 : vector<16x1xf32>
    %cst_30 = arith.constant dense<0.000000e+00> : vector<16xf32>
    %44 = vector.multi_reduction <add>, %43, %cst_30 [1] : vector<16x1xf32> to vector<16xf32>
    %45 = vector.shape_cast %44 : vector<16xf32> to vector<16x1xf32>
    %cst_31 = arith.constant 1.000000e+00 : f32
    %46 = vector.broadcast %cst_31 : f32 to vector<16x1xf32>
    %47 = arith.divf %45, %46 : vector<16x1xf32>
    %48 = arith.subf %43, %47 : vector<16x1xf32>
    %49 = arith.mulf %48, %48 : vector<16x1xf32>
    %cst_32 = arith.constant dense<0.000000e+00> : vector<16xf32>
    %50 = vector.multi_reduction <add>, %49, %cst_32 [1] : vector<16x1xf32> to vector<16xf32>
    %51 = vector.shape_cast %50 : vector<16xf32> to vector<16x1xf32>
    %cst_33 = arith.constant 1.000000e+00 : f32
    %52 = vector.broadcast %cst_33 : f32 to vector<16x1xf32>
    %53 = arith.divf %51, %52 : vector<16x1xf32>
    %cst_34 = arith.constant 9.99999974E-6 : f32
    %54 = vector.broadcast %cst_34 : f32 to vector<16x1xf32>
    %55 = arith.addf %53, %54 : vector<16x1xf32>
    %56 = math.rsqrt %55 : vector<16x1xf32>
    %57 = arith.mulf %39, %56 : vector<16x1xf32>
    %58 = arith.mulf %43, %57 : vector<16x1xf32>
    %59 = arith.mulf %47, %57 : vector<16x1xf32>
    %60 = arith.subf %40, %59 : vector<16x1xf32>
    %61 = arith.addf %58, %60 : vector<16x1xf32>
    %cst_35 = arith.constant 0.000000e+00 : f32
    %62 = vector.broadcast %cst_35 : f32 to vector<16x1xf32>
    %63 = arith.cmpf ogt, %61, %62 : vector<16x1xf32>
    %64 = vector.broadcast %41 : f32 to vector<16x1xf32>
    %65 = arith.mulf %64, %61 : vector<16x1xf32>
    %66 = arith.select %63, %61, %65 : vector<16x1xi1>, vector<16x1xf32>
    %c0_36 = arith.constant 0 : index
    %c0_37 = arith.constant 0 : index
    %67 = vector.load %arg13[%c0_36, %c0_37] : memref<16x1xf32, #tpu.memory_space<vmem>>, vector<16x1xf32>
    tpu.vector_store %arg13[%c0_36, %c0_37], %66 {strides = array<i32>} : memref<16x1xf32, #tpu.memory_space<vmem>>, vector<16x1xf32>,
    return
  }
}

module attributes {stable_mosaic.version = 11 : i64} {
  func.func @_upsample_bn_kernel(%arg0: memref<16x1xf32, #tpu.memory_space<vmem>>, %arg1: memref<1x4xf32, #tpu.memory_space<vmem>>, %arg2: memref<16x1xf32, #tpu.memory_space<vmem>>, %arg3: memref<16x1xf32, #tpu.memory_space<vmem>>, %arg4: memref<16x4xf32, #tpu.memory_space<vmem>>) attributes {dimension_semantics = [], scalar_prefetch = 0 : i64, scratch_operands = 0 : i64, tpu.core_type = #tpu.core_type<tc>} {
    %c0 = arith.constant 0 : index
    %c0_0 = arith.constant 0 : index
    %0 = vector.load %arg0[%c0, %c0_0] : memref<16x1xf32, #tpu.memory_space<vmem>>, vector<16x1xf32>
    %c0_1 = arith.constant 0 : index
    %c0_2 = arith.constant 0 : index
    %1 = vector.load %arg1[%c0_1, %c0_2] : memref<1x4xf32, #tpu.memory_space<vmem>>, vector<1x4xf32>
    %cst = arith.constant dense<0.000000e+00> : vector<16x4xf32>
    %2 = tpu.matmul %0, %1, %cst {dimension_numbers = #tpu.dot_dimension_numbers<[1], [0], [0], [1], [0, 0, 1, 1], [], []>} : vector<16x1xf32>, vector<1x4xf32>, vector<16x4xf32> -> vector<16x4xf32>
    %c0_3 = arith.constant 0 : index
    %c0_4 = arith.constant 0 : index
    %3 = vector.load %arg2[%c0_3, %c0_4] : memref<16x1xf32, #tpu.memory_space<vmem>>, vector<16x1xf32>
    %c0_5 = arith.constant 0 : index
    %c0_6 = arith.constant 0 : index
    %4 = vector.load %arg3[%c0_5, %c0_6] : memref<16x1xf32, #tpu.memory_space<vmem>>, vector<16x1xf32>
    %cst_7 = arith.constant dense<0.000000e+00> : vector<16xf32>
    %5 = vector.multi_reduction <add>, %2, %cst_7 [1] : vector<16x4xf32> to vector<16xf32>
    %6 = vector.shape_cast %5 : vector<16xf32> to vector<16x1xf32>
    %cst_8 = arith.constant 4.000000e+00 : f32
    %7 = vector.broadcast %cst_8 : f32 to vector<16x1xf32>
    %8 = arith.divf %6, %7 : vector<16x1xf32>
    %9 = vector.broadcast %8 : vector<16x1xf32> to vector<16x4xf32>
    %10 = arith.subf %2, %9 : vector<16x4xf32>
    %11 = arith.mulf %10, %10 : vector<16x4xf32>
    %cst_9 = arith.constant dense<0.000000e+00> : vector<16xf32>
    %12 = vector.multi_reduction <add>, %11, %cst_9 [1] : vector<16x4xf32> to vector<16xf32>
    %13 = vector.shape_cast %12 : vector<16xf32> to vector<16x1xf32>
    %cst_10 = arith.constant 4.000000e+00 : f32
    %14 = vector.broadcast %cst_10 : f32 to vector<16x1xf32>
    %15 = arith.divf %13, %14 : vector<16x1xf32>
    %cst_11 = arith.constant 9.99999974E-6 : f32
    %16 = vector.broadcast %cst_11 : f32 to vector<16x1xf32>
    %17 = arith.addf %15, %16 : vector<16x1xf32>
    %18 = math.rsqrt %17 : vector<16x1xf32>
    %19 = arith.mulf %3, %18 : vector<16x1xf32>
    %20 = vector.broadcast %19 : vector<16x1xf32> to vector<16x4xf32>
    %21 = arith.mulf %2, %20 : vector<16x4xf32>
    %22 = arith.mulf %8, %19 : vector<16x1xf32>
    %23 = arith.subf %4, %22 : vector<16x1xf32>
    %24 = vector.broadcast %23 : vector<16x1xf32> to vector<16x4xf32>
    %25 = arith.addf %21, %24 : vector<16x4xf32>
    %c0_12 = arith.constant 0 : index
    %c0_13 = arith.constant 0 : index
    %26 = vector.load %arg4[%c0_12, %c0_13] : memref<16x4xf32, #tpu.memory_space<vmem>>, vector<16x4xf32>
    tpu.vector_store %arg4[%c0_12, %c0_13], %25 {strides = array<i32>} : memref<16x4xf32, #tpu.memory_space<vmem>>, vector<16x4xf32>,
    return
  }
}

module attributes {stable_mosaic.version = 11 : i64} {
  func.func @_up_double_conv_kernel(%arg0: memref<180x4xbf16, #tpu.memory_space<vmem>>, %arg1: memref<16x180xbf16, #tpu.memory_space<vmem>>, %arg2: memref<16x1xf32, #tpu.memory_space<vmem>>, %arg3: memref<16x1xf32, #tpu.memory_space<vmem>>, %arg4: memref<16x1xf32, #tpu.memory_space<vmem>>, %arg5: memref<1xf32, #tpu.memory_space<smem>>, %arg6: memref<16x16xbf16, #tpu.memory_space<vmem>>, %arg7: memref<16x1xf32, #tpu.memory_space<vmem>>, %arg8: memref<16x1xf32, #tpu.memory_space<vmem>>, %arg9: memref<16x1xf32, #tpu.memory_space<vmem>>, %arg10: memref<1xf32, #tpu.memory_space<smem>>, %arg11: memref<16x4xf32, #tpu.memory_space<vmem>>) attributes {dimension_semantics = [], scalar_prefetch = 0 : i64, scratch_operands = 0 : i64, tpu.core_type = #tpu.core_type<tc>} {
    %c0 = arith.constant 0 : index
    %c0_0 = arith.constant 0 : index
    %0 = vector.load %arg0[%c0, %c0_0] : memref<180x4xbf16, #tpu.memory_space<vmem>>, vector<180x4xbf16>
    %c0_1 = arith.constant 0 : index
    %c0_2 = arith.constant 0 : index
    %1 = vector.load %arg1[%c0_1, %c0_2] : memref<16x180xbf16, #tpu.memory_space<vmem>>, vector<16x180xbf16>
    %c0_3 = arith.constant 0 : index
    %c0_4 = arith.constant 0 : index
    %2 = vector.load %arg2[%c0_3, %c0_4] : memref<16x1xf32, #tpu.memory_space<vmem>>, vector<16x1xf32>
    %c0_5 = arith.constant 0 : index
    %c0_6 = arith.constant 0 : index
    %3 = vector.load %arg3[%c0_5, %c0_6] : memref<16x1xf32, #tpu.memory_space<vmem>>, vector<16x1xf32>
    %c0_7 = arith.constant 0 : index
    %c0_8 = arith.constant 0 : index
    %4 = vector.load %arg4[%c0_7, %c0_8] : memref<16x1xf32, #tpu.memory_space<vmem>>, vector<16x1xf32>
    %c0_9 = arith.constant 0 : index
    %5 = memref.load %arg5[%c0_9] : memref<1xf32, #tpu.memory_space<smem>>
    %cst = arith.constant dense<0.000000e+00> : vector<16x4xf32>
    %6 = tpu.matmul %1, %0, %cst {dimension_numbers = #tpu.dot_dimension_numbers<[1], [0], [0], [1], [0, 0, 1, 1], [], []>} : vector<16x180xbf16>, vector<180x4xbf16>, vector<16x4xf32> -> vector<16x4xf32>
    %7 = vector.broadcast %2 : vector<16x1xf32> to vector<16x4xf32>
    %8 = arith.addf %6, %7 : vector<16x4xf32>
    %cst_10 = arith.constant dense<0.000000e+00> : vector<16xf32>
    %9 = vector.multi_reduction <add>, %8, %cst_10 [1] : vector<16x4xf32> to vector<16xf32>
    %10 = vector.shape_cast %9 : vector<16xf32> to vector<16x1xf32>
    %cst_11 = arith.constant 4.000000e+00 : f32
    %11 = vector.broadcast %cst_11 : f32 to vector<16x1xf32>
    %12 = arith.divf %10, %11 : vector<16x1xf32>
    %13 = vector.broadcast %12 : vector<16x1xf32> to vector<16x4xf32>
    %14 = arith.subf %8, %13 : vector<16x4xf32>
    %15 = arith.mulf %14, %14 : vector<16x4xf32>
    %cst_12 = arith.constant dense<0.000000e+00> : vector<16xf32>
    %16 = vector.multi_reduction <add>, %15, %cst_12 [1] : vector<16x4xf32> to vector<16xf32>
    %17 = vector.shape_cast %16 : vector<16xf32> to vector<16x1xf32>
    %cst_13 = arith.constant 4.000000e+00 : f32
    %18 = vector.broadcast %cst_13 : f32 to vector<16x1xf32>
    %19 = arith.divf %17, %18 : vector<16x1xf32>
    %cst_14 = arith.constant 9.99999974E-6 : f32
    %20 = vector.broadcast %cst_14 : f32 to vector<16x1xf32>
    %21 = arith.addf %19, %20 : vector<16x1xf32>
    %22 = math.rsqrt %21 : vector<16x1xf32>
    %23 = arith.mulf %3, %22 : vector<16x1xf32>
    %24 = vector.broadcast %23 : vector<16x1xf32> to vector<16x4xf32>
    %25 = arith.mulf %8, %24 : vector<16x4xf32>
    %26 = arith.mulf %12, %23 : vector<16x1xf32>
    %27 = arith.subf %4, %26 : vector<16x1xf32>
    %28 = vector.broadcast %27 : vector<16x1xf32> to vector<16x4xf32>
    %29 = arith.addf %25, %28 : vector<16x4xf32>
    %cst_15 = arith.constant 0.000000e+00 : f32
    %30 = vector.broadcast %cst_15 : f32 to vector<16x4xf32>
    %31 = arith.cmpf ogt, %29, %30 : vector<16x4xf32>
    %32 = vector.broadcast %5 : f32 to vector<16x4xf32>
    %33 = arith.mulf %32, %29 : vector<16x4xf32>
    %34 = arith.select %31, %29, %33 : vector<16x4xi1>, vector<16x4xf32>
    %35 = arith.truncf %34 : vector<16x4xf32> to vector<16x4xbf16>
    %c0_16 = arith.constant 0 : index
    %c0_17 = arith.constant 0 : index
    %36 = vector.load %arg6[%c0_16, %c0_17] : memref<16x16xbf16, #tpu.memory_space<vmem>>, vector<16x16xbf16>
    %c0_18 = arith.constant 0 : index
    %c0_19 = arith.constant 0 : index
    %37 = vector.load %arg7[%c0_18, %c0_19] : memref<16x1xf32, #tpu.memory_space<vmem>>, vector<16x1xf32>
    %c0_20 = arith.constant 0 : index
    %c0_21 = arith.constant 0 : index
    %38 = vector.load %arg8[%c0_20, %c0_21] : memref<16x1xf32, #tpu.memory_space<vmem>>, vector<16x1xf32>
    %c0_22 = arith.constant 0 : index
    %c0_23 = arith.constant 0 : index
    %39 = vector.load %arg9[%c0_22, %c0_23] : memref<16x1xf32, #tpu.memory_space<vmem>>, vector<16x1xf32>
    %c0_24 = arith.constant 0 : index
    %40 = memref.load %arg10[%c0_24] : memref<1xf32, #tpu.memory_space<smem>>
    %cst_25 = arith.constant dense<0.000000e+00> : vector<16x4xf32>
    %41 = tpu.matmul %36, %35, %cst_25 {dimension_numbers = #tpu.dot_dimension_numbers<[1], [0], [0], [1], [0, 0, 1, 1], [], []>} : vector<16x16xbf16>, vector<16x4xbf16>, vector<16x4xf32> -> vector<16x4xf32>
    %42 = vector.broadcast %37 : vector<16x1xf32> to vector<16x4xf32>
    %43 = arith.addf %41, %42 : vector<16x4xf32>
    %cst_26 = arith.constant dense<0.000000e+00> : vector<16xf32>
    %44 = vector.multi_reduction <add>, %43, %cst_26 [1] : vector<16x4xf32> to vector<16xf32>
    %45 = vector.shape_cast %44 : vector<16xf32> to vector<16x1xf32>
    %cst_27 = arith.constant 4.000000e+00 : f32
    %46 = vector.broadcast %cst_27 : f32 to vector<16x1xf32>
    %47 = arith.divf %45, %46 : vector<16x1xf32>
    %48 = vector.broadcast %47 : vector<16x1xf32> to vector<16x4xf32>
    %49 = arith.subf %43, %48 : vector<16x4xf32>
    %50 = arith.mulf %49, %49 : vector<16x4xf32>
    %cst_28 = arith.constant dense<0.000000e+00> : vector<16xf32>
    %51 = vector.multi_reduction <add>, %50, %cst_28 [1] : vector<16x4xf32> to vector<16xf32>
    %52 = vector.shape_cast %51 : vector<16xf32> to vector<16x1xf32>
    %cst_29 = arith.constant 4.000000e+00 : f32
    %53 = vector.broadcast %cst_29 : f32 to vector<16x1xf32>
    %54 = arith.divf %52, %53 : vector<16x1xf32>
    %cst_30 = arith.constant 9.99999974E-6 : f32
    %55 = vector.broadcast %cst_30 : f32 to vector<16x1xf32>
    %56 = arith.addf %54, %55 : vector<16x1xf32>
    %57 = math.rsqrt %56 : vector<16x1xf32>
    %58 = arith.mulf %38, %57 : vector<16x1xf32>
    %59 = vector.broadcast %58 : vector<16x1xf32> to vector<16x4xf32>
    %60 = arith.mulf %43, %59 : vector<16x4xf32>
    %61 = arith.mulf %47, %58 : vector<16x1xf32>
    %62 = arith.subf %39, %61 : vector<16x1xf32>
    %63 = vector.broadcast %62 : vector<16x1xf32> to vector<16x4xf32>
    %64 = arith.addf %60, %63 : vector<16x4xf32>
    %cst_31 = arith.constant 0.000000e+00 : f32
    %65 = vector.broadcast %cst_31 : f32 to vector<16x4xf32>
    %66 = arith.cmpf ogt, %64, %65 : vector<16x4xf32>
    %67 = vector.broadcast %40 : f32 to vector<16x4xf32>
    %68 = arith.mulf %67, %64 : vector<16x4xf32>
    %69 = arith.select %66, %64, %68 : vector<16x4xi1>, vector<16x4xf32>
    %c0_32 = arith.constant 0 : index
    %c0_33 = arith.constant 0 : index
    %70 = vector.load %arg11[%c0_32, %c0_33] : memref<16x4xf32, #tpu.memory_space<vmem>>, vector<16x4xf32>
    tpu.vector_store %arg11[%c0_32, %c0_33], %69 {strides = array<i32>} : memref<16x4xf32, #tpu.memory_space<vmem>>, vector<16x4xf32>,
    return
  }
}

module attributes {stable_mosaic.version = 11 : i64} {
  func.func @_upsample_bn_kernel(%arg0: memref<16x4xf32, #tpu.memory_space<vmem>>, %arg1: memref<4x16xf32, #tpu.memory_space<vmem>>, %arg2: memref<16x1xf32, #tpu.memory_space<vmem>>, %arg3: memref<16x1xf32, #tpu.memory_space<vmem>>, %arg4: memref<16x16xf32, #tpu.memory_space<vmem>>) attributes {dimension_semantics = [], scalar_prefetch = 0 : i64, scratch_operands = 0 : i64, tpu.core_type = #tpu.core_type<tc>} {
    %c0 = arith.constant 0 : index
    %c0_0 = arith.constant 0 : index
    %0 = vector.load %arg0[%c0, %c0_0] : memref<16x4xf32, #tpu.memory_space<vmem>>, vector<16x4xf32>
    %c0_1 = arith.constant 0 : index
    %c0_2 = arith.constant 0 : index
    %1 = vector.load %arg1[%c0_1, %c0_2] : memref<4x16xf32, #tpu.memory_space<vmem>>, vector<4x16xf32>
    %cst = arith.constant dense<0.000000e+00> : vector<16x16xf32>
    %2 = tpu.matmul %0, %1, %cst {dimension_numbers = #tpu.dot_dimension_numbers<[1], [0], [0], [1], [0, 0, 1, 1], [], []>} : vector<16x4xf32>, vector<4x16xf32>, vector<16x16xf32> -> vector<16x16xf32>
    %c0_3 = arith.constant 0 : index
    %c0_4 = arith.constant 0 : index
    %3 = vector.load %arg2[%c0_3, %c0_4] : memref<16x1xf32, #tpu.memory_space<vmem>>, vector<16x1xf32>
    %c0_5 = arith.constant 0 : index
    %c0_6 = arith.constant 0 : index
    %4 = vector.load %arg3[%c0_5, %c0_6] : memref<16x1xf32, #tpu.memory_space<vmem>>, vector<16x1xf32>
    %cst_7 = arith.constant dense<0.000000e+00> : vector<16xf32>
    %5 = vector.multi_reduction <add>, %2, %cst_7 [1] : vector<16x16xf32> to vector<16xf32>
    %6 = vector.shape_cast %5 : vector<16xf32> to vector<16x1xf32>
    %cst_8 = arith.constant 1.600000e+01 : f32
    %7 = vector.broadcast %cst_8 : f32 to vector<16x1xf32>
    %8 = arith.divf %6, %7 : vector<16x1xf32>
    %9 = vector.broadcast %8 : vector<16x1xf32> to vector<16x16xf32>
    %10 = arith.subf %2, %9 : vector<16x16xf32>
    %11 = arith.mulf %10, %10 : vector<16x16xf32>
    %cst_9 = arith.constant dense<0.000000e+00> : vector<16xf32>
    %12 = vector.multi_reduction <add>, %11, %cst_9 [1] : vector<16x16xf32> to vector<16xf32>
    %13 = vector.shape_cast %12 : vector<16xf32> to vector<16x1xf32>
    %cst_10 = arith.constant 1.600000e+01 : f32
    %14 = vector.broadcast %cst_10 : f32 to vector<16x1xf32>
    %15 = arith.divf %13, %14 : vector<16x1xf32>
    %cst_11 = arith.constant 9.99999974E-6 : f32
    %16 = vector.broadcast %cst_11 : f32 to vector<16x1xf32>
    %17 = arith.addf %15, %16 : vector<16x1xf32>
    %18 = math.rsqrt %17 : vector<16x1xf32>
    %19 = arith.mulf %3, %18 : vector<16x1xf32>
    %20 = vector.broadcast %19 : vector<16x1xf32> to vector<16x16xf32>
    %21 = arith.mulf %2, %20 : vector<16x16xf32>
    %22 = arith.mulf %8, %19 : vector<16x1xf32>
    %23 = arith.subf %4, %22 : vector<16x1xf32>
    %24 = vector.broadcast %23 : vector<16x1xf32> to vector<16x16xf32>
    %25 = arith.addf %21, %24 : vector<16x16xf32>
    %c0_12 = arith.constant 0 : index
    %c0_13 = arith.constant 0 : index
    %26 = vector.load %arg4[%c0_12, %c0_13] : memref<16x16xf32, #tpu.memory_space<vmem>>, vector<16x16xf32>
    tpu.vector_store %arg4[%c0_12, %c0_13], %25 {strides = array<i32>} : memref<16x16xf32, #tpu.memory_space<vmem>>, vector<16x16xf32>,
    return
  }
}

module attributes {stable_mosaic.version = 11 : i64} {
  func.func @_up_double_conv_kernel(%arg0: memref<180x16xbf16, #tpu.memory_space<vmem>>, %arg1: memref<16x180xbf16, #tpu.memory_space<vmem>>, %arg2: memref<16x1xf32, #tpu.memory_space<vmem>>, %arg3: memref<16x1xf32, #tpu.memory_space<vmem>>, %arg4: memref<16x1xf32, #tpu.memory_space<vmem>>, %arg5: memref<1xf32, #tpu.memory_space<smem>>, %arg6: memref<16x16xbf16, #tpu.memory_space<vmem>>, %arg7: memref<16x1xf32, #tpu.memory_space<vmem>>, %arg8: memref<16x1xf32, #tpu.memory_space<vmem>>, %arg9: memref<16x1xf32, #tpu.memory_space<vmem>>, %arg10: memref<1xf32, #tpu.memory_space<smem>>, %arg11: memref<16x16xf32, #tpu.memory_space<vmem>>) attributes {dimension_semantics = [], scalar_prefetch = 0 : i64, scratch_operands = 0 : i64, tpu.core_type = #tpu.core_type<tc>} {
    %c0 = arith.constant 0 : index
    %c0_0 = arith.constant 0 : index
    %0 = vector.load %arg0[%c0, %c0_0] : memref<180x16xbf16, #tpu.memory_space<vmem>>, vector<180x16xbf16>
    %c0_1 = arith.constant 0 : index
    %c0_2 = arith.constant 0 : index
    %1 = vector.load %arg1[%c0_1, %c0_2] : memref<16x180xbf16, #tpu.memory_space<vmem>>, vector<16x180xbf16>
    %c0_3 = arith.constant 0 : index
    %c0_4 = arith.constant 0 : index
    %2 = vector.load %arg2[%c0_3, %c0_4] : memref<16x1xf32, #tpu.memory_space<vmem>>, vector<16x1xf32>
    %c0_5 = arith.constant 0 : index
    %c0_6 = arith.constant 0 : index
    %3 = vector.load %arg3[%c0_5, %c0_6] : memref<16x1xf32, #tpu.memory_space<vmem>>, vector<16x1xf32>
    %c0_7 = arith.constant 0 : index
    %c0_8 = arith.constant 0 : index
    %4 = vector.load %arg4[%c0_7, %c0_8] : memref<16x1xf32, #tpu.memory_space<vmem>>, vector<16x1xf32>
    %c0_9 = arith.constant 0 : index
    %5 = memref.load %arg5[%c0_9] : memref<1xf32, #tpu.memory_space<smem>>
    %cst = arith.constant dense<0.000000e+00> : vector<16x16xf32>
    %6 = tpu.matmul %1, %0, %cst {dimension_numbers = #tpu.dot_dimension_numbers<[1], [0], [0], [1], [0, 0, 1, 1], [], []>} : vector<16x180xbf16>, vector<180x16xbf16>, vector<16x16xf32> -> vector<16x16xf32>
    %7 = vector.broadcast %2 : vector<16x1xf32> to vector<16x16xf32>
    %8 = arith.addf %6, %7 : vector<16x16xf32>
    %cst_10 = arith.constant dense<0.000000e+00> : vector<16xf32>
    %9 = vector.multi_reduction <add>, %8, %cst_10 [1] : vector<16x16xf32> to vector<16xf32>
    %10 = vector.shape_cast %9 : vector<16xf32> to vector<16x1xf32>
    %cst_11 = arith.constant 1.600000e+01 : f32
    %11 = vector.broadcast %cst_11 : f32 to vector<16x1xf32>
    %12 = arith.divf %10, %11 : vector<16x1xf32>
    %13 = vector.broadcast %12 : vector<16x1xf32> to vector<16x16xf32>
    %14 = arith.subf %8, %13 : vector<16x16xf32>
    %15 = arith.mulf %14, %14 : vector<16x16xf32>
    %cst_12 = arith.constant dense<0.000000e+00> : vector<16xf32>
    %16 = vector.multi_reduction <add>, %15, %cst_12 [1] : vector<16x16xf32> to vector<16xf32>
    %17 = vector.shape_cast %16 : vector<16xf32> to vector<16x1xf32>
    %cst_13 = arith.constant 1.600000e+01 : f32
    %18 = vector.broadcast %cst_13 : f32 to vector<16x1xf32>
    %19 = arith.divf %17, %18 : vector<16x1xf32>
    %cst_14 = arith.constant 9.99999974E-6 : f32
    %20 = vector.broadcast %cst_14 : f32 to vector<16x1xf32>
    %21 = arith.addf %19, %20 : vector<16x1xf32>
    %22 = math.rsqrt %21 : vector<16x1xf32>
    %23 = arith.mulf %3, %22 : vector<16x1xf32>
    %24 = vector.broadcast %23 : vector<16x1xf32> to vector<16x16xf32>
    %25 = arith.mulf %8, %24 : vector<16x16xf32>
    %26 = arith.mulf %12, %23 : vector<16x1xf32>
    %27 = arith.subf %4, %26 : vector<16x1xf32>
    %28 = vector.broadcast %27 : vector<16x1xf32> to vector<16x16xf32>
    %29 = arith.addf %25, %28 : vector<16x16xf32>
    %cst_15 = arith.constant 0.000000e+00 : f32
    %30 = vector.broadcast %cst_15 : f32 to vector<16x16xf32>
    %31 = arith.cmpf ogt, %29, %30 : vector<16x16xf32>
    %32 = vector.broadcast %5 : f32 to vector<16x16xf32>
    %33 = arith.mulf %32, %29 : vector<16x16xf32>
    %34 = arith.select %31, %29, %33 : vector<16x16xi1>, vector<16x16xf32>
    %35 = arith.truncf %34 : vector<16x16xf32> to vector<16x16xbf16>
    %c0_16 = arith.constant 0 : index
    %c0_17 = arith.constant 0 : index
    %36 = vector.load %arg6[%c0_16, %c0_17] : memref<16x16xbf16, #tpu.memory_space<vmem>>, vector<16x16xbf16>
    %c0_18 = arith.constant 0 : index
    %c0_19 = arith.constant 0 : index
    %37 = vector.load %arg7[%c0_18, %c0_19] : memref<16x1xf32, #tpu.memory_space<vmem>>, vector<16x1xf32>
    %c0_20 = arith.constant 0 : index
    %c0_21 = arith.constant 0 : index
    %38 = vector.load %arg8[%c0_20, %c0_21] : memref<16x1xf32, #tpu.memory_space<vmem>>, vector<16x1xf32>
    %c0_22 = arith.constant 0 : index
    %c0_23 = arith.constant 0 : index
    %39 = vector.load %arg9[%c0_22, %c0_23] : memref<16x1xf32, #tpu.memory_space<vmem>>, vector<16x1xf32>
    %c0_24 = arith.constant 0 : index
    %40 = memref.load %arg10[%c0_24] : memref<1xf32, #tpu.memory_space<smem>>
    %cst_25 = arith.constant dense<0.000000e+00> : vector<16x16xf32>
    %41 = tpu.matmul %36, %35, %cst_25 {dimension_numbers = #tpu.dot_dimension_numbers<[1], [0], [0], [1], [0, 0, 1, 1], [], []>} : vector<16x16xbf16>, vector<16x16xbf16>, vector<16x16xf32> -> vector<16x16xf32>
    %42 = vector.broadcast %37 : vector<16x1xf32> to vector<16x16xf32>
    %43 = arith.addf %41, %42 : vector<16x16xf32>
    %cst_26 = arith.constant dense<0.000000e+00> : vector<16xf32>
    %44 = vector.multi_reduction <add>, %43, %cst_26 [1] : vector<16x16xf32> to vector<16xf32>
    %45 = vector.shape_cast %44 : vector<16xf32> to vector<16x1xf32>
    %cst_27 = arith.constant 1.600000e+01 : f32
    %46 = vector.broadcast %cst_27 : f32 to vector<16x1xf32>
    %47 = arith.divf %45, %46 : vector<16x1xf32>
    %48 = vector.broadcast %47 : vector<16x1xf32> to vector<16x16xf32>
    %49 = arith.subf %43, %48 : vector<16x16xf32>
    %50 = arith.mulf %49, %49 : vector<16x16xf32>
    %cst_28 = arith.constant dense<0.000000e+00> : vector<16xf32>
    %51 = vector.multi_reduction <add>, %50, %cst_28 [1] : vector<16x16xf32> to vector<16xf32>
    %52 = vector.shape_cast %51 : vector<16xf32> to vector<16x1xf32>
    %cst_29 = arith.constant 1.600000e+01 : f32
    %53 = vector.broadcast %cst_29 : f32 to vector<16x1xf32>
    %54 = arith.divf %52, %53 : vector<16x1xf32>
    %cst_30 = arith.constant 9.99999974E-6 : f32
    %55 = vector.broadcast %cst_30 : f32 to vector<16x1xf32>
    %56 = arith.addf %54, %55 : vector<16x1xf32>
    %57 = math.rsqrt %56 : vector<16x1xf32>
    %58 = arith.mulf %38, %57 : vector<16x1xf32>
    %59 = vector.broadcast %58 : vector<16x1xf32> to vector<16x16xf32>
    %60 = arith.mulf %43, %59 : vector<16x16xf32>
    %61 = arith.mulf %47, %58 : vector<16x1xf32>
    %62 = arith.subf %39, %61 : vector<16x1xf32>
    %63 = vector.broadcast %62 : vector<16x1xf32> to vector<16x16xf32>
    %64 = arith.addf %60, %63 : vector<16x16xf32>
    %cst_31 = arith.constant 0.000000e+00 : f32
    %65 = vector.broadcast %cst_31 : f32 to vector<16x16xf32>
    %66 = arith.cmpf ogt, %64, %65 : vector<16x16xf32>
    %67 = vector.broadcast %40 : f32 to vector<16x16xf32>
    %68 = arith.mulf %67, %64 : vector<16x16xf32>
    %69 = arith.select %66, %64, %68 : vector<16x16xi1>, vector<16x16xf32>
    %c0_32 = arith.constant 0 : index
    %c0_33 = arith.constant 0 : index
    %70 = vector.load %arg11[%c0_32, %c0_33] : memref<16x16xf32, #tpu.memory_space<vmem>>, vector<16x16xf32>
    tpu.vector_store %arg11[%c0_32, %c0_33], %69 {strides = array<i32>} : memref<16x16xf32, #tpu.memory_space<vmem>>, vector<16x16xf32>,
    return
  }
}

module attributes {stable_mosaic.version = 11 : i64} {
  func.func @_upsample_bn_kernel(%arg0: memref<16x16xf32, #tpu.memory_space<vmem>>, %arg1: memref<16x64xf32, #tpu.memory_space<vmem>>, %arg2: memref<16x1xf32, #tpu.memory_space<vmem>>, %arg3: memref<16x1xf32, #tpu.memory_space<vmem>>, %arg4: memref<16x64xf32, #tpu.memory_space<vmem>>) attributes {dimension_semantics = [], scalar_prefetch = 0 : i64, scratch_operands = 0 : i64, tpu.core_type = #tpu.core_type<tc>} {
    %c0 = arith.constant 0 : index
    %c0_0 = arith.constant 0 : index
    %0 = vector.load %arg0[%c0, %c0_0] : memref<16x16xf32, #tpu.memory_space<vmem>>, vector<16x16xf32>
    %c0_1 = arith.constant 0 : index
    %c0_2 = arith.constant 0 : index
    %1 = vector.load %arg1[%c0_1, %c0_2] : memref<16x64xf32, #tpu.memory_space<vmem>>, vector<16x64xf32>
    %cst = arith.constant dense<0.000000e+00> : vector<16x64xf32>
    %2 = tpu.matmul %0, %1, %cst {dimension_numbers = #tpu.dot_dimension_numbers<[1], [0], [0], [1], [0, 0, 1, 1], [], []>} : vector<16x16xf32>, vector<16x64xf32>, vector<16x64xf32> -> vector<16x64xf32>
    %c0_3 = arith.constant 0 : index
    %c0_4 = arith.constant 0 : index
    %3 = vector.load %arg2[%c0_3, %c0_4] : memref<16x1xf32, #tpu.memory_space<vmem>>, vector<16x1xf32>
    %c0_5 = arith.constant 0 : index
    %c0_6 = arith.constant 0 : index
    %4 = vector.load %arg3[%c0_5, %c0_6] : memref<16x1xf32, #tpu.memory_space<vmem>>, vector<16x1xf32>
    %cst_7 = arith.constant dense<0.000000e+00> : vector<16xf32>
    %5 = vector.multi_reduction <add>, %2, %cst_7 [1] : vector<16x64xf32> to vector<16xf32>
    %6 = vector.shape_cast %5 : vector<16xf32> to vector<16x1xf32>
    %cst_8 = arith.constant 6.400000e+01 : f32
    %7 = vector.broadcast %cst_8 : f32 to vector<16x1xf32>
    %8 = arith.divf %6, %7 : vector<16x1xf32>
    %9 = vector.broadcast %8 : vector<16x1xf32> to vector<16x64xf32>
    %10 = arith.subf %2, %9 : vector<16x64xf32>
    %11 = arith.mulf %10, %10 : vector<16x64xf32>
    %cst_9 = arith.constant dense<0.000000e+00> : vector<16xf32>
    %12 = vector.multi_reduction <add>, %11, %cst_9 [1] : vector<16x64xf32> to vector<16xf32>
    %13 = vector.shape_cast %12 : vector<16xf32> to vector<16x1xf32>
    %cst_10 = arith.constant 6.400000e+01 : f32
    %14 = vector.broadcast %cst_10 : f32 to vector<16x1xf32>
    %15 = arith.divf %13, %14 : vector<16x1xf32>
    %cst_11 = arith.constant 9.99999974E-6 : f32
    %16 = vector.broadcast %cst_11 : f32 to vector<16x1xf32>
    %17 = arith.addf %15, %16 : vector<16x1xf32>
    %18 = math.rsqrt %17 : vector<16x1xf32>
    %19 = arith.mulf %3, %18 : vector<16x1xf32>
    %20 = vector.broadcast %19 : vector<16x1xf32> to vector<16x64xf32>
    %21 = arith.mulf %2, %20 : vector<16x64xf32>
    %22 = arith.mulf %8, %19 : vector<16x1xf32>
    %23 = arith.subf %4, %22 : vector<16x1xf32>
    %24 = vector.broadcast %23 : vector<16x1xf32> to vector<16x64xf32>
    %25 = arith.addf %21, %24 : vector<16x64xf32>
    %c0_12 = arith.constant 0 : index
    %c0_13 = arith.constant 0 : index
    %26 = vector.load %arg4[%c0_12, %c0_13] : memref<16x64xf32, #tpu.memory_space<vmem>>, vector<16x64xf32>
    tpu.vector_store %arg4[%c0_12, %c0_13], %25 {strides = array<i32>} : memref<16x64xf32, #tpu.memory_space<vmem>>, vector<16x64xf32>,
    return
  }
}

module attributes {stable_mosaic.version = 11 : i64} {
  func.func @_up_double_conv_kernel(%arg0: memref<180x64xbf16, #tpu.memory_space<vmem>>, %arg1: memref<16x180xbf16, #tpu.memory_space<vmem>>, %arg2: memref<16x1xf32, #tpu.memory_space<vmem>>, %arg3: memref<16x1xf32, #tpu.memory_space<vmem>>, %arg4: memref<16x1xf32, #tpu.memory_space<vmem>>, %arg5: memref<1xf32, #tpu.memory_space<smem>>, %arg6: memref<16x16xbf16, #tpu.memory_space<vmem>>, %arg7: memref<16x1xf32, #tpu.memory_space<vmem>>, %arg8: memref<16x1xf32, #tpu.memory_space<vmem>>, %arg9: memref<16x1xf32, #tpu.memory_space<vmem>>, %arg10: memref<1xf32, #tpu.memory_space<smem>>, %arg11: memref<16x64xf32, #tpu.memory_space<vmem>>) attributes {dimension_semantics = [], scalar_prefetch = 0 : i64, scratch_operands = 0 : i64, tpu.core_type = #tpu.core_type<tc>} {
    %c0 = arith.constant 0 : index
    %c0_0 = arith.constant 0 : index
    %0 = vector.load %arg0[%c0, %c0_0] : memref<180x64xbf16, #tpu.memory_space<vmem>>, vector<180x64xbf16>
    %c0_1 = arith.constant 0 : index
    %c0_2 = arith.constant 0 : index
    %1 = vector.load %arg1[%c0_1, %c0_2] : memref<16x180xbf16, #tpu.memory_space<vmem>>, vector<16x180xbf16>
    %c0_3 = arith.constant 0 : index
    %c0_4 = arith.constant 0 : index
    %2 = vector.load %arg2[%c0_3, %c0_4] : memref<16x1xf32, #tpu.memory_space<vmem>>, vector<16x1xf32>
    %c0_5 = arith.constant 0 : index
    %c0_6 = arith.constant 0 : index
    %3 = vector.load %arg3[%c0_5, %c0_6] : memref<16x1xf32, #tpu.memory_space<vmem>>, vector<16x1xf32>
    %c0_7 = arith.constant 0 : index
    %c0_8 = arith.constant 0 : index
    %4 = vector.load %arg4[%c0_7, %c0_8] : memref<16x1xf32, #tpu.memory_space<vmem>>, vector<16x1xf32>
    %c0_9 = arith.constant 0 : index
    %5 = memref.load %arg5[%c0_9] : memref<1xf32, #tpu.memory_space<smem>>
    %cst = arith.constant dense<0.000000e+00> : vector<16x64xf32>
    %6 = tpu.matmul %1, %0, %cst {dimension_numbers = #tpu.dot_dimension_numbers<[1], [0], [0], [1], [0, 0, 1, 1], [], []>} : vector<16x180xbf16>, vector<180x64xbf16>, vector<16x64xf32> -> vector<16x64xf32>
    %7 = vector.broadcast %2 : vector<16x1xf32> to vector<16x64xf32>
    %8 = arith.addf %6, %7 : vector<16x64xf32>
    %cst_10 = arith.constant dense<0.000000e+00> : vector<16xf32>
    %9 = vector.multi_reduction <add>, %8, %cst_10 [1] : vector<16x64xf32> to vector<16xf32>
    %10 = vector.shape_cast %9 : vector<16xf32> to vector<16x1xf32>
    %cst_11 = arith.constant 6.400000e+01 : f32
    %11 = vector.broadcast %cst_11 : f32 to vector<16x1xf32>
    %12 = arith.divf %10, %11 : vector<16x1xf32>
    %13 = vector.broadcast %12 : vector<16x1xf32> to vector<16x64xf32>
    %14 = arith.subf %8, %13 : vector<16x64xf32>
    %15 = arith.mulf %14, %14 : vector<16x64xf32>
    %cst_12 = arith.constant dense<0.000000e+00> : vector<16xf32>
    %16 = vector.multi_reduction <add>, %15, %cst_12 [1] : vector<16x64xf32> to vector<16xf32>
    %17 = vector.shape_cast %16 : vector<16xf32> to vector<16x1xf32>
    %cst_13 = arith.constant 6.400000e+01 : f32
    %18 = vector.broadcast %cst_13 : f32 to vector<16x1xf32>
    %19 = arith.divf %17, %18 : vector<16x1xf32>
    %cst_14 = arith.constant 9.99999974E-6 : f32
    %20 = vector.broadcast %cst_14 : f32 to vector<16x1xf32>
    %21 = arith.addf %19, %20 : vector<16x1xf32>
    %22 = math.rsqrt %21 : vector<16x1xf32>
    %23 = arith.mulf %3, %22 : vector<16x1xf32>
    %24 = vector.broadcast %23 : vector<16x1xf32> to vector<16x64xf32>
    %25 = arith.mulf %8, %24 : vector<16x64xf32>
    %26 = arith.mulf %12, %23 : vector<16x1xf32>
    %27 = arith.subf %4, %26 : vector<16x1xf32>
    %28 = vector.broadcast %27 : vector<16x1xf32> to vector<16x64xf32>
    %29 = arith.addf %25, %28 : vector<16x64xf32>
    %cst_15 = arith.constant 0.000000e+00 : f32
    %30 = vector.broadcast %cst_15 : f32 to vector<16x64xf32>
    %31 = arith.cmpf ogt, %29, %30 : vector<16x64xf32>
    %32 = vector.broadcast %5 : f32 to vector<16x64xf32>
    %33 = arith.mulf %32, %29 : vector<16x64xf32>
    %34 = arith.select %31, %29, %33 : vector<16x64xi1>, vector<16x64xf32>
    %35 = arith.truncf %34 : vector<16x64xf32> to vector<16x64xbf16>
    %c0_16 = arith.constant 0 : index
    %c0_17 = arith.constant 0 : index
    %36 = vector.load %arg6[%c0_16, %c0_17] : memref<16x16xbf16, #tpu.memory_space<vmem>>, vector<16x16xbf16>
    %c0_18 = arith.constant 0 : index
    %c0_19 = arith.constant 0 : index
    %37 = vector.load %arg7[%c0_18, %c0_19] : memref<16x1xf32, #tpu.memory_space<vmem>>, vector<16x1xf32>
    %c0_20 = arith.constant 0 : index
    %c0_21 = arith.constant 0 : index
    %38 = vector.load %arg8[%c0_20, %c0_21] : memref<16x1xf32, #tpu.memory_space<vmem>>, vector<16x1xf32>
    %c0_22 = arith.constant 0 : index
    %c0_23 = arith.constant 0 : index
    %39 = vector.load %arg9[%c0_22, %c0_23] : memref<16x1xf32, #tpu.memory_space<vmem>>, vector<16x1xf32>
    %c0_24 = arith.constant 0 : index
    %40 = memref.load %arg10[%c0_24] : memref<1xf32, #tpu.memory_space<smem>>
    %cst_25 = arith.constant dense<0.000000e+00> : vector<16x64xf32>
    %41 = tpu.matmul %36, %35, %cst_25 {dimension_numbers = #tpu.dot_dimension_numbers<[1], [0], [0], [1], [0, 0, 1, 1], [], []>} : vector<16x16xbf16>, vector<16x64xbf16>, vector<16x64xf32> -> vector<16x64xf32>
    %42 = vector.broadcast %37 : vector<16x1xf32> to vector<16x64xf32>
    %43 = arith.addf %41, %42 : vector<16x64xf32>
    %cst_26 = arith.constant dense<0.000000e+00> : vector<16xf32>
    %44 = vector.multi_reduction <add>, %43, %cst_26 [1] : vector<16x64xf32> to vector<16xf32>
    %45 = vector.shape_cast %44 : vector<16xf32> to vector<16x1xf32>
    %cst_27 = arith.constant 6.400000e+01 : f32
    %46 = vector.broadcast %cst_27 : f32 to vector<16x1xf32>
    %47 = arith.divf %45, %46 : vector<16x1xf32>
    %48 = vector.broadcast %47 : vector<16x1xf32> to vector<16x64xf32>
    %49 = arith.subf %43, %48 : vector<16x64xf32>
    %50 = arith.mulf %49, %49 : vector<16x64xf32>
    %cst_28 = arith.constant dense<0.000000e+00> : vector<16xf32>
    %51 = vector.multi_reduction <add>, %50, %cst_28 [1] : vector<16x64xf32> to vector<16xf32>
    %52 = vector.shape_cast %51 : vector<16xf32> to vector<16x1xf32>
    %cst_29 = arith.constant 6.400000e+01 : f32
    %53 = vector.broadcast %cst_29 : f32 to vector<16x1xf32>
    %54 = arith.divf %52, %53 : vector<16x1xf32>
    %cst_30 = arith.constant 9.99999974E-6 : f32
    %55 = vector.broadcast %cst_30 : f32 to vector<16x1xf32>
    %56 = arith.addf %54, %55 : vector<16x1xf32>
    %57 = math.rsqrt %56 : vector<16x1xf32>
    %58 = arith.mulf %38, %57 : vector<16x1xf32>
    %59 = vector.broadcast %58 : vector<16x1xf32> to vector<16x64xf32>
    %60 = arith.mulf %43, %59 : vector<16x64xf32>
    %61 = arith.mulf %47, %58 : vector<16x1xf32>
    %62 = arith.subf %39, %61 : vector<16x1xf32>
    %63 = vector.broadcast %62 : vector<16x1xf32> to vector<16x64xf32>
    %64 = arith.addf %60, %63 : vector<16x64xf32>
    %cst_31 = arith.constant 0.000000e+00 : f32
    %65 = vector.broadcast %cst_31 : f32 to vector<16x64xf32>
    %66 = arith.cmpf ogt, %64, %65 : vector<16x64xf32>
    %67 = vector.broadcast %40 : f32 to vector<16x64xf32>
    %68 = arith.mulf %67, %64 : vector<16x64xf32>
    %69 = arith.select %66, %64, %68 : vector<16x64xi1>, vector<16x64xf32>
    %c0_32 = arith.constant 0 : index
    %c0_33 = arith.constant 0 : index
    %70 = vector.load %arg11[%c0_32, %c0_33] : memref<16x64xf32, #tpu.memory_space<vmem>>, vector<16x64xf32>
    tpu.vector_store %arg11[%c0_32, %c0_33], %69 {strides = array<i32>} : memref<16x64xf32, #tpu.memory_space<vmem>>, vector<16x64xf32>,
    return
  }
}

module attributes {stable_mosaic.version = 11 : i64} {
  func.func @_upsample_bn_kernel(%arg0: memref<16x64xf32, #tpu.memory_space<vmem>>, %arg1: memref<64x256xf32, #tpu.memory_space<vmem>>, %arg2: memref<16x1xf32, #tpu.memory_space<vmem>>, %arg3: memref<16x1xf32, #tpu.memory_space<vmem>>, %arg4: memref<16x256xf32, #tpu.memory_space<vmem>>) attributes {dimension_semantics = [], scalar_prefetch = 0 : i64, scratch_operands = 0 : i64, tpu.core_type = #tpu.core_type<tc>} {
    %c0 = arith.constant 0 : index
    %c0_0 = arith.constant 0 : index
    %0 = vector.load %arg0[%c0, %c0_0] : memref<16x64xf32, #tpu.memory_space<vmem>>, vector<16x64xf32>
    %c0_1 = arith.constant 0 : index
    %c0_2 = arith.constant 0 : index
    %1 = vector.load %arg1[%c0_1, %c0_2] : memref<64x256xf32, #tpu.memory_space<vmem>>, vector<64x256xf32>
    %cst = arith.constant dense<0.000000e+00> : vector<16x256xf32>
    %2 = tpu.matmul %0, %1, %cst {dimension_numbers = #tpu.dot_dimension_numbers<[1], [0], [0], [1], [0, 0, 1, 1], [], []>} : vector<16x64xf32>, vector<64x256xf32>, vector<16x256xf32> -> vector<16x256xf32>
    %c0_3 = arith.constant 0 : index
    %c0_4 = arith.constant 0 : index
    %3 = vector.load %arg2[%c0_3, %c0_4] : memref<16x1xf32, #tpu.memory_space<vmem>>, vector<16x1xf32>
    %c0_5 = arith.constant 0 : index
    %c0_6 = arith.constant 0 : index
    %4 = vector.load %arg3[%c0_5, %c0_6] : memref<16x1xf32, #tpu.memory_space<vmem>>, vector<16x1xf32>
    %cst_7 = arith.constant dense<0.000000e+00> : vector<16xf32>
    %5 = vector.multi_reduction <add>, %2, %cst_7 [1] : vector<16x256xf32> to vector<16xf32>
    %6 = vector.shape_cast %5 : vector<16xf32> to vector<16x1xf32>
    %cst_8 = arith.constant 2.560000e+02 : f32
    %7 = vector.broadcast %cst_8 : f32 to vector<16x1xf32>
    %8 = arith.divf %6, %7 : vector<16x1xf32>
    %9 = vector.broadcast %8 : vector<16x1xf32> to vector<16x256xf32>
    %10 = arith.subf %2, %9 : vector<16x256xf32>
    %11 = arith.mulf %10, %10 : vector<16x256xf32>
    %cst_9 = arith.constant dense<0.000000e+00> : vector<16xf32>
    %12 = vector.multi_reduction <add>, %11, %cst_9 [1] : vector<16x256xf32> to vector<16xf32>
    %13 = vector.shape_cast %12 : vector<16xf32> to vector<16x1xf32>
    %cst_10 = arith.constant 2.560000e+02 : f32
    %14 = vector.broadcast %cst_10 : f32 to vector<16x1xf32>
    %15 = arith.divf %13, %14 : vector<16x1xf32>
    %cst_11 = arith.constant 9.99999974E-6 : f32
    %16 = vector.broadcast %cst_11 : f32 to vector<16x1xf32>
    %17 = arith.addf %15, %16 : vector<16x1xf32>
    %18 = math.rsqrt %17 : vector<16x1xf32>
    %19 = arith.mulf %3, %18 : vector<16x1xf32>
    %20 = vector.broadcast %19 : vector<16x1xf32> to vector<16x256xf32>
    %21 = arith.mulf %2, %20 : vector<16x256xf32>
    %22 = arith.mulf %8, %19 : vector<16x1xf32>
    %23 = arith.subf %4, %22 : vector<16x1xf32>
    %24 = vector.broadcast %23 : vector<16x1xf32> to vector<16x256xf32>
    %25 = arith.addf %21, %24 : vector<16x256xf32>
    %c0_12 = arith.constant 0 : index
    %c0_13 = arith.constant 0 : index
    %26 = vector.load %arg4[%c0_12, %c0_13] : memref<16x256xf32, #tpu.memory_space<vmem>>, vector<16x256xf32>
    tpu.vector_store %arg4[%c0_12, %c0_13], %25 {strides = array<i32>} : memref<16x256xf32, #tpu.memory_space<vmem>>, vector<16x256xf32>,
    return
  }
}

module attributes {stable_mosaic.version = 11 : i64} {
  func.func @_up_double_conv_kernel(%arg0: memref<180x256xbf16, #tpu.memory_space<vmem>>, %arg1: memref<16x180xbf16, #tpu.memory_space<vmem>>, %arg2: memref<16x1xf32, #tpu.memory_space<vmem>>, %arg3: memref<16x1xf32, #tpu.memory_space<vmem>>, %arg4: memref<16x1xf32, #tpu.memory_space<vmem>>, %arg5: memref<1xf32, #tpu.memory_space<smem>>, %arg6: memref<16x16xbf16, #tpu.memory_space<vmem>>, %arg7: memref<16x1xf32, #tpu.memory_space<vmem>>, %arg8: memref<16x1xf32, #tpu.memory_space<vmem>>, %arg9: memref<16x1xf32, #tpu.memory_space<vmem>>, %arg10: memref<1xf32, #tpu.memory_space<smem>>, %arg11: memref<16x256xf32, #tpu.memory_space<vmem>>) attributes {dimension_semantics = [], scalar_prefetch = 0 : i64, scratch_operands = 0 : i64, tpu.core_type = #tpu.core_type<tc>} {
    %c0 = arith.constant 0 : index
    %c0_0 = arith.constant 0 : index
    %0 = vector.load %arg0[%c0, %c0_0] : memref<180x256xbf16, #tpu.memory_space<vmem>>, vector<180x256xbf16>
    %c0_1 = arith.constant 0 : index
    %c0_2 = arith.constant 0 : index
    %1 = vector.load %arg1[%c0_1, %c0_2] : memref<16x180xbf16, #tpu.memory_space<vmem>>, vector<16x180xbf16>
    %c0_3 = arith.constant 0 : index
    %c0_4 = arith.constant 0 : index
    %2 = vector.load %arg2[%c0_3, %c0_4] : memref<16x1xf32, #tpu.memory_space<vmem>>, vector<16x1xf32>
    %c0_5 = arith.constant 0 : index
    %c0_6 = arith.constant 0 : index
    %3 = vector.load %arg3[%c0_5, %c0_6] : memref<16x1xf32, #tpu.memory_space<vmem>>, vector<16x1xf32>
    %c0_7 = arith.constant 0 : index
    %c0_8 = arith.constant 0 : index
    %4 = vector.load %arg4[%c0_7, %c0_8] : memref<16x1xf32, #tpu.memory_space<vmem>>, vector<16x1xf32>
    %c0_9 = arith.constant 0 : index
    %5 = memref.load %arg5[%c0_9] : memref<1xf32, #tpu.memory_space<smem>>
    %cst = arith.constant dense<0.000000e+00> : vector<16x256xf32>
    %6 = tpu.matmul %1, %0, %cst {dimension_numbers = #tpu.dot_dimension_numbers<[1], [0], [0], [1], [0, 0, 1, 1], [], []>} : vector<16x180xbf16>, vector<180x256xbf16>, vector<16x256xf32> -> vector<16x256xf32>
    %7 = vector.broadcast %2 : vector<16x1xf32> to vector<16x256xf32>
    %8 = arith.addf %6, %7 : vector<16x256xf32>
    %cst_10 = arith.constant dense<0.000000e+00> : vector<16xf32>
    %9 = vector.multi_reduction <add>, %8, %cst_10 [1] : vector<16x256xf32> to vector<16xf32>
    %10 = vector.shape_cast %9 : vector<16xf32> to vector<16x1xf32>
    %cst_11 = arith.constant 2.560000e+02 : f32
    %11 = vector.broadcast %cst_11 : f32 to vector<16x1xf32>
    %12 = arith.divf %10, %11 : vector<16x1xf32>
    %13 = vector.broadcast %12 : vector<16x1xf32> to vector<16x256xf32>
    %14 = arith.subf %8, %13 : vector<16x256xf32>
    %15 = arith.mulf %14, %14 : vector<16x256xf32>
    %cst_12 = arith.constant dense<0.000000e+00> : vector<16xf32>
    %16 = vector.multi_reduction <add>, %15, %cst_12 [1] : vector<16x256xf32> to vector<16xf32>
    %17 = vector.shape_cast %16 : vector<16xf32> to vector<16x1xf32>
    %cst_13 = arith.constant 2.560000e+02 : f32
    %18 = vector.broadcast %cst_13 : f32 to vector<16x1xf32>
    %19 = arith.divf %17, %18 : vector<16x1xf32>
    %cst_14 = arith.constant 9.99999974E-6 : f32
    %20 = vector.broadcast %cst_14 : f32 to vector<16x1xf32>
    %21 = arith.addf %19, %20 : vector<16x1xf32>
    %22 = math.rsqrt %21 : vector<16x1xf32>
    %23 = arith.mulf %3, %22 : vector<16x1xf32>
    %24 = vector.broadcast %23 : vector<16x1xf32> to vector<16x256xf32>
    %25 = arith.mulf %8, %24 : vector<16x256xf32>
    %26 = arith.mulf %12, %23 : vector<16x1xf32>
    %27 = arith.subf %4, %26 : vector<16x1xf32>
    %28 = vector.broadcast %27 : vector<16x1xf32> to vector<16x256xf32>
    %29 = arith.addf %25, %28 : vector<16x256xf32>
    %cst_15 = arith.constant 0.000000e+00 : f32
    %30 = vector.broadcast %cst_15 : f32 to vector<16x256xf32>
    %31 = arith.cmpf ogt, %29, %30 : vector<16x256xf32>
    %32 = vector.broadcast %5 : f32 to vector<16x256xf32>
    %33 = arith.mulf %32, %29 : vector<16x256xf32>
    %34 = arith.select %31, %29, %33 : vector<16x256xi1>, vector<16x256xf32>
    %35 = arith.truncf %34 : vector<16x256xf32> to vector<16x256xbf16>
    %c0_16 = arith.constant 0 : index
    %c0_17 = arith.constant 0 : index
    %36 = vector.load %arg6[%c0_16, %c0_17] : memref<16x16xbf16, #tpu.memory_space<vmem>>, vector<16x16xbf16>
    %c0_18 = arith.constant 0 : index
    %c0_19 = arith.constant 0 : index
    %37 = vector.load %arg7[%c0_18, %c0_19] : memref<16x1xf32, #tpu.memory_space<vmem>>, vector<16x1xf32>
    %c0_20 = arith.constant 0 : index
    %c0_21 = arith.constant 0 : index
    %38 = vector.load %arg8[%c0_20, %c0_21] : memref<16x1xf32, #tpu.memory_space<vmem>>, vector<16x1xf32>
    %c0_22 = arith.constant 0 : index
    %c0_23 = arith.constant 0 : index
    %39 = vector.load %arg9[%c0_22, %c0_23] : memref<16x1xf32, #tpu.memory_space<vmem>>, vector<16x1xf32>
    %c0_24 = arith.constant 0 : index
    %40 = memref.load %arg10[%c0_24] : memref<1xf32, #tpu.memory_space<smem>>
    %cst_25 = arith.constant dense<0.000000e+00> : vector<16x256xf32>
    %41 = tpu.matmul %36, %35, %cst_25 {dimension_numbers = #tpu.dot_dimension_numbers<[1], [0], [0], [1], [0, 0, 1, 1], [], []>} : vector<16x16xbf16>, vector<16x256xbf16>, vector<16x256xf32> -> vector<16x256xf32>
    %42 = vector.broadcast %37 : vector<16x1xf32> to vector<16x256xf32>
    %43 = arith.addf %41, %42 : vector<16x256xf32>
    %cst_26 = arith.constant dense<0.000000e+00> : vector<16xf32>
    %44 = vector.multi_reduction <add>, %43, %cst_26 [1] : vector<16x256xf32> to vector<16xf32>
    %45 = vector.shape_cast %44 : vector<16xf32> to vector<16x1xf32>
    %cst_27 = arith.constant 2.560000e+02 : f32
    %46 = vector.broadcast %cst_27 : f32 to vector<16x1xf32>
    %47 = arith.divf %45, %46 : vector<16x1xf32>
    %48 = vector.broadcast %47 : vector<16x1xf32> to vector<16x256xf32>
    %49 = arith.subf %43, %48 : vector<16x256xf32>
    %50 = arith.mulf %49, %49 : vector<16x256xf32>
    %cst_28 = arith.constant dense<0.000000e+00> : vector<16xf32>
    %51 = vector.multi_reduction <add>, %50, %cst_28 [1] : vector<16x256xf32> to vector<16xf32>
    %52 = vector.shape_cast %51 : vector<16xf32> to vector<16x1xf32>
    %cst_29 = arith.constant 2.560000e+02 : f32
    %53 = vector.broadcast %cst_29 : f32 to vector<16x1xf32>
    %54 = arith.divf %52, %53 : vector<16x1xf32>
    %cst_30 = arith.constant 9.99999974E-6 : f32
    %55 = vector.broadcast %cst_30 : f32 to vector<16x1xf32>
    %56 = arith.addf %54, %55 : vector<16x1xf32>
    %57 = math.rsqrt %56 : vector<16x1xf32>
    %58 = arith.mulf %38, %57 : vector<16x1xf32>
    %59 = vector.broadcast %58 : vector<16x1xf32> to vector<16x256xf32>
    %60 = arith.mulf %43, %59 : vector<16x256xf32>
    %61 = arith.mulf %47, %58 : vector<16x1xf32>
    %62 = arith.subf %39, %61 : vector<16x1xf32>
    %63 = vector.broadcast %62 : vector<16x1xf32> to vector<16x256xf32>
    %64 = arith.addf %60, %63 : vector<16x256xf32>
    %cst_31 = arith.constant 0.000000e+00 : f32
    %65 = vector.broadcast %cst_31 : f32 to vector<16x256xf32>
    %66 = arith.cmpf ogt, %64, %65 : vector<16x256xf32>
    %67 = vector.broadcast %40 : f32 to vector<16x256xf32>
    %68 = arith.mulf %67, %64 : vector<16x256xf32>
    %69 = arith.select %66, %64, %68 : vector<16x256xi1>, vector<16x256xf32>
    %c0_32 = arith.constant 0 : index
    %c0_33 = arith.constant 0 : index
    %70 = vector.load %arg11[%c0_32, %c0_33] : memref<16x256xf32, #tpu.memory_space<vmem>>, vector<16x256xf32>
    tpu.vector_store %arg11[%c0_32, %c0_33], %69 {strides = array<i32>} : memref<16x256xf32, #tpu.memory_space<vmem>>, vector<16x256xf32>,
    return
  }
}

module attributes {stable_mosaic.version = 11 : i64} {
  func.func @_upsample_bn_kernel(%arg0: memref<16x256xf32, #tpu.memory_space<vmem>>, %arg1: memref<256x1024xf32, #tpu.memory_space<vmem>>, %arg2: memref<16x1xf32, #tpu.memory_space<vmem>>, %arg3: memref<16x1xf32, #tpu.memory_space<vmem>>, %arg4: memref<16x1024xf32, #tpu.memory_space<vmem>>) attributes {dimension_semantics = [], scalar_prefetch = 0 : i64, scratch_operands = 0 : i64, tpu.core_type = #tpu.core_type<tc>} {
    %c0 = arith.constant 0 : index
    %c0_0 = arith.constant 0 : index
    %0 = vector.load %arg0[%c0, %c0_0] : memref<16x256xf32, #tpu.memory_space<vmem>>, vector<16x256xf32>
    %c0_1 = arith.constant 0 : index
    %c0_2 = arith.constant 0 : index
    %1 = vector.load %arg1[%c0_1, %c0_2] : memref<256x1024xf32, #tpu.memory_space<vmem>>, vector<256x1024xf32>
    %cst = arith.constant dense<0.000000e+00> : vector<16x1024xf32>
    %2 = tpu.matmul %0, %1, %cst {dimension_numbers = #tpu.dot_dimension_numbers<[1], [0], [0], [1], [0, 0, 1, 1], [], []>} : vector<16x256xf32>, vector<256x1024xf32>, vector<16x1024xf32> -> vector<16x1024xf32>
    %c0_3 = arith.constant 0 : index
    %c0_4 = arith.constant 0 : index
    %3 = vector.load %arg2[%c0_3, %c0_4] : memref<16x1xf32, #tpu.memory_space<vmem>>, vector<16x1xf32>
    %c0_5 = arith.constant 0 : index
    %c0_6 = arith.constant 0 : index
    %4 = vector.load %arg3[%c0_5, %c0_6] : memref<16x1xf32, #tpu.memory_space<vmem>>, vector<16x1xf32>
    %cst_7 = arith.constant dense<0.000000e+00> : vector<16xf32>
    %5 = vector.multi_reduction <add>, %2, %cst_7 [1] : vector<16x1024xf32> to vector<16xf32>
    %6 = vector.shape_cast %5 : vector<16xf32> to vector<16x1xf32>
    %cst_8 = arith.constant 1.024000e+03 : f32
    %7 = vector.broadcast %cst_8 : f32 to vector<16x1xf32>
    %8 = arith.divf %6, %7 : vector<16x1xf32>
    %9 = vector.broadcast %8 : vector<16x1xf32> to vector<16x1024xf32>
    %10 = arith.subf %2, %9 : vector<16x1024xf32>
    %11 = arith.mulf %10, %10 : vector<16x1024xf32>
    %cst_9 = arith.constant dense<0.000000e+00> : vector<16xf32>
    %12 = vector.multi_reduction <add>, %11, %cst_9 [1] : vector<16x1024xf32> to vector<16xf32>
    %13 = vector.shape_cast %12 : vector<16xf32> to vector<16x1xf32>
    %cst_10 = arith.constant 1.024000e+03 : f32
    %14 = vector.broadcast %cst_10 : f32 to vector<16x1xf32>
    %15 = arith.divf %13, %14 : vector<16x1xf32>
    %cst_11 = arith.constant 9.99999974E-6 : f32
    %16 = vector.broadcast %cst_11 : f32 to vector<16x1xf32>
    %17 = arith.addf %15, %16 : vector<16x1xf32>
    %18 = math.rsqrt %17 : vector<16x1xf32>
    %19 = arith.mulf %3, %18 : vector<16x1xf32>
    %20 = vector.broadcast %19 : vector<16x1xf32> to vector<16x1024xf32>
    %21 = arith.mulf %2, %20 : vector<16x1024xf32>
    %22 = arith.mulf %8, %19 : vector<16x1xf32>
    %23 = arith.subf %4, %22 : vector<16x1xf32>
    %24 = vector.broadcast %23 : vector<16x1xf32> to vector<16x1024xf32>
    %25 = arith.addf %21, %24 : vector<16x1024xf32>
    %c0_12 = arith.constant 0 : index
    %c0_13 = arith.constant 0 : index
    %26 = vector.load %arg4[%c0_12, %c0_13] : memref<16x1024xf32, #tpu.memory_space<vmem>>, vector<16x1024xf32>
    tpu.vector_store %arg4[%c0_12, %c0_13], %25 {strides = array<i32>} : memref<16x1024xf32, #tpu.memory_space<vmem>>, vector<16x1024xf32>,
    return
  }
}

module attributes {stable_mosaic.version = 11 : i64} {
  func.func @_up_double_conv_final_kernel(%arg0: memref<180x1024xbf16, #tpu.memory_space<vmem>>, %arg1: memref<16x180xbf16, #tpu.memory_space<vmem>>, %arg2: memref<16x1xf32, #tpu.memory_space<vmem>>, %arg3: memref<16x1xf32, #tpu.memory_space<vmem>>, %arg4: memref<16x1xf32, #tpu.memory_space<vmem>>, %arg5: memref<1xf32, #tpu.memory_space<smem>>, %arg6: memref<16x16xbf16, #tpu.memory_space<vmem>>, %arg7: memref<16x1xf32, #tpu.memory_space<vmem>>, %arg8: memref<16x1xf32, #tpu.memory_space<vmem>>, %arg9: memref<16x1xf32, #tpu.memory_space<vmem>>, %arg10: memref<1xf32, #tpu.memory_space<smem>>, %arg11: memref<1x16xbf16, #tpu.memory_space<vmem>>, %arg12: memref<1x1xf32, #tpu.memory_space<vmem>>, %arg13: memref<1x1024xf32, #tpu.memory_space<vmem>>) attributes {dimension_semantics = [], scalar_prefetch = 0 : i64, scratch_operands = 0 : i64, tpu.core_type = #tpu.core_type<tc>} {
    %c0 = arith.constant 0 : index
    %c0_0 = arith.constant 0 : index
    %0 = vector.load %arg0[%c0, %c0_0] : memref<180x1024xbf16, #tpu.memory_space<vmem>>, vector<180x1024xbf16>
    %c0_1 = arith.constant 0 : index
    %c0_2 = arith.constant 0 : index
    %1 = vector.load %arg1[%c0_1, %c0_2] : memref<16x180xbf16, #tpu.memory_space<vmem>>, vector<16x180xbf16>
    %c0_3 = arith.constant 0 : index
    %c0_4 = arith.constant 0 : index
    %2 = vector.load %arg2[%c0_3, %c0_4] : memref<16x1xf32, #tpu.memory_space<vmem>>, vector<16x1xf32>
    %c0_5 = arith.constant 0 : index
    %c0_6 = arith.constant 0 : index
    %3 = vector.load %arg3[%c0_5, %c0_6] : memref<16x1xf32, #tpu.memory_space<vmem>>, vector<16x1xf32>
    %c0_7 = arith.constant 0 : index
    %c0_8 = arith.constant 0 : index
    %4 = vector.load %arg4[%c0_7, %c0_8] : memref<16x1xf32, #tpu.memory_space<vmem>>, vector<16x1xf32>
    %c0_9 = arith.constant 0 : index
    %5 = memref.load %arg5[%c0_9] : memref<1xf32, #tpu.memory_space<smem>>
    %cst = arith.constant dense<0.000000e+00> : vector<16x1024xf32>
    %6 = tpu.matmul %1, %0, %cst {dimension_numbers = #tpu.dot_dimension_numbers<[1], [0], [0], [1], [0, 0, 1, 1], [], []>} : vector<16x180xbf16>, vector<180x1024xbf16>, vector<16x1024xf32> -> vector<16x1024xf32>
    %7 = vector.broadcast %2 : vector<16x1xf32> to vector<16x1024xf32>
    %8 = arith.addf %6, %7 : vector<16x1024xf32>
    %cst_10 = arith.constant dense<0.000000e+00> : vector<16xf32>
    %9 = vector.multi_reduction <add>, %8, %cst_10 [1] : vector<16x1024xf32> to vector<16xf32>
    %10 = vector.shape_cast %9 : vector<16xf32> to vector<16x1xf32>
    %cst_11 = arith.constant 1.024000e+03 : f32
    %11 = vector.broadcast %cst_11 : f32 to vector<16x1xf32>
    %12 = arith.divf %10, %11 : vector<16x1xf32>
    %13 = vector.broadcast %12 : vector<16x1xf32> to vector<16x1024xf32>
    %14 = arith.subf %8, %13 : vector<16x1024xf32>
    %15 = arith.mulf %14, %14 : vector<16x1024xf32>
    %cst_12 = arith.constant dense<0.000000e+00> : vector<16xf32>
    %16 = vector.multi_reduction <add>, %15, %cst_12 [1] : vector<16x1024xf32> to vector<16xf32>
    %17 = vector.shape_cast %16 : vector<16xf32> to vector<16x1xf32>
    %cst_13 = arith.constant 1.024000e+03 : f32
    %18 = vector.broadcast %cst_13 : f32 to vector<16x1xf32>
    %19 = arith.divf %17, %18 : vector<16x1xf32>
    %cst_14 = arith.constant 9.99999974E-6 : f32
    %20 = vector.broadcast %cst_14 : f32 to vector<16x1xf32>
    %21 = arith.addf %19, %20 : vector<16x1xf32>
    %22 = math.rsqrt %21 : vector<16x1xf32>
    %23 = arith.mulf %3, %22 : vector<16x1xf32>
    %24 = vector.broadcast %23 : vector<16x1xf32> to vector<16x1024xf32>
    %25 = arith.mulf %8, %24 : vector<16x1024xf32>
    %26 = arith.mulf %12, %23 : vector<16x1xf32>
    %27 = arith.subf %4, %26 : vector<16x1xf32>
    %28 = vector.broadcast %27 : vector<16x1xf32> to vector<16x1024xf32>
    %29 = arith.addf %25, %28 : vector<16x1024xf32>
    %cst_15 = arith.constant 0.000000e+00 : f32
    %30 = vector.broadcast %cst_15 : f32 to vector<16x1024xf32>
    %31 = arith.cmpf ogt, %29, %30 : vector<16x1024xf32>
    %32 = vector.broadcast %5 : f32 to vector<16x1024xf32>
    %33 = arith.mulf %32, %29 : vector<16x1024xf32>
    %34 = arith.select %31, %29, %33 : vector<16x1024xi1>, vector<16x1024xf32>
    %35 = arith.truncf %34 : vector<16x1024xf32> to vector<16x1024xbf16>
    %c0_16 = arith.constant 0 : index
    %c0_17 = arith.constant 0 : index
    %36 = vector.load %arg6[%c0_16, %c0_17] : memref<16x16xbf16, #tpu.memory_space<vmem>>, vector<16x16xbf16>
    %c0_18 = arith.constant 0 : index
    %c0_19 = arith.constant 0 : index
    %37 = vector.load %arg7[%c0_18, %c0_19] : memref<16x1xf32, #tpu.memory_space<vmem>>, vector<16x1xf32>
    %c0_20 = arith.constant 0 : index
    %c0_21 = arith.constant 0 : index
    %38 = vector.load %arg8[%c0_20, %c0_21] : memref<16x1xf32, #tpu.memory_space<vmem>>, vector<16x1xf32>
    %c0_22 = arith.constant 0 : index
    %c0_23 = arith.constant 0 : index
    %39 = vector.load %arg9[%c0_22, %c0_23] : memref<16x1xf32, #tpu.memory_space<vmem>>, vector<16x1xf32>
    %c0_24 = arith.constant 0 : index
    %40 = memref.load %arg10[%c0_24] : memref<1xf32, #tpu.memory_space<smem>>
    %cst_25 = arith.constant dense<0.000000e+00> : vector<16x1024xf32>
    %41 = tpu.matmul %36, %35, %cst_25 {dimension_numbers = #tpu.dot_dimension_numbers<[1], [0], [0], [1], [0, 0, 1, 1], [], []>} : vector<16x16xbf16>, vector<16x1024xbf16>, vector<16x1024xf32> -> vector<16x1024xf32>
    %42 = vector.broadcast %37 : vector<16x1xf32> to vector<16x1024xf32>
    %43 = arith.addf %41, %42 : vector<16x1024xf32>
    %cst_26 = arith.constant dense<0.000000e+00> : vector<16xf32>
    %44 = vector.multi_reduction <add>, %43, %cst_26 [1] : vector<16x1024xf32> to vector<16xf32>
    %45 = vector.shape_cast %44 : vector<16xf32> to vector<16x1xf32>
    %cst_27 = arith.constant 1.024000e+03 : f32
    %46 = vector.broadcast %cst_27 : f32 to vector<16x1xf32>
    %47 = arith.divf %45, %46 : vector<16x1xf32>
    %48 = vector.broadcast %47 : vector<16x1xf32> to vector<16x1024xf32>
    %49 = arith.subf %43, %48 : vector<16x1024xf32>
    %50 = arith.mulf %49, %49 : vector<16x1024xf32>
    %cst_28 = arith.constant dense<0.000000e+00> : vector<16xf32>
    %51 = vector.multi_reduction <add>, %50, %cst_28 [1] : vector<16x1024xf32> to vector<16xf32>
    %52 = vector.shape_cast %51 : vector<16xf32> to vector<16x1xf32>
    %cst_29 = arith.constant 1.024000e+03 : f32
    %53 = vector.broadcast %cst_29 : f32 to vector<16x1xf32>
    %54 = arith.divf %52, %53 : vector<16x1xf32>
    %cst_30 = arith.constant 9.99999974E-6 : f32
    %55 = vector.broadcast %cst_30 : f32 to vector<16x1xf32>
    %56 = arith.addf %54, %55 : vector<16x1xf32>
    %57 = math.rsqrt %56 : vector<16x1xf32>
    %58 = arith.mulf %38, %57 : vector<16x1xf32>
    %59 = vector.broadcast %58 : vector<16x1xf32> to vector<16x1024xf32>
    %60 = arith.mulf %43, %59 : vector<16x1024xf32>
    %61 = arith.mulf %47, %58 : vector<16x1xf32>
    %62 = arith.subf %39, %61 : vector<16x1xf32>
    %63 = vector.broadcast %62 : vector<16x1xf32> to vector<16x1024xf32>
    %64 = arith.addf %60, %63 : vector<16x1024xf32>
    %cst_31 = arith.constant 0.000000e+00 : f32
    %65 = vector.broadcast %cst_31 : f32 to vector<16x1024xf32>
    %66 = arith.cmpf ogt, %64, %65 : vector<16x1024xf32>
    %67 = vector.broadcast %40 : f32 to vector<16x1024xf32>
    %68 = arith.mulf %67, %64 : vector<16x1024xf32>
    %69 = arith.select %66, %64, %68 : vector<16x1024xi1>, vector<16x1024xf32>
    %c0_32 = arith.constant 0 : index
    %c0_33 = arith.constant 0 : index
    %70 = vector.load %arg11[%c0_32, %c0_33] : memref<1x16xbf16, #tpu.memory_space<vmem>>, vector<1x16xbf16>
    %71 = arith.truncf %69 : vector<16x1024xf32> to vector<16x1024xbf16>
    %cst_34 = arith.constant dense<0.000000e+00> : vector<1x1024xf32>
    %72 = tpu.matmul %70, %71, %cst_34 {dimension_numbers = #tpu.dot_dimension_numbers<[1], [0], [0], [1], [0, 0, 1, 1], [], []>} : vector<1x16xbf16>, vector<16x1024xbf16>, vector<1x1024xf32> -> vector<1x1024xf32>
    %c0_35 = arith.constant 0 : index
    %c0_36 = arith.constant 0 : index
    %73 = vector.load %arg12[%c0_35, %c0_36] : memref<1x1xf32, #tpu.memory_space<vmem>>, vector<1x1xf32>
    %74 = vector.broadcast %73 : vector<1x1xf32> to vector<1x1024xf32>
    %75 = arith.addf %72, %74 : vector<1x1024xf32>
    %c0_37 = arith.constant 0 : index
    %c0_38 = arith.constant 0 : index
    %76 = vector.load %arg13[%c0_37, %c0_38] : memref<1x1024xf32, #tpu.memory_space<vmem>>, vector<1x1024xf32>
    tpu.vector_store %arg13[%c0_37, %c0_38], %75 {strides = array<i32>} : memref<1x1024xf32, #tpu.memory_space<vmem>>, vector<1x1024xf32>,
    return
  }
}

</mosaic_0001>

<bundles_post_ra>
// kernel: unet2_forward.19
= control target key start
LH: loop header
LB: loop body
LE: loop exit
PB: predicated region body
PF: predicated region fallthrough
CT: control target
= control target key end

     0   :  { %v744_v2 = vmov 0   ;;  %vm104_vm0 = vcmask 130048   ;;  %vm272_vm1 = vcmask 1043456   ;;  %s1082_s0 = inlined_call_operand.vmem [shape: bf16[16,1024], index: 0, kind: input, shape index: {}]   ;;  %s1083_s6 = inlined_call_operand.vmem [shape: bf16[144,256], index: 6, kind: input, shape index: {}]   ;;  %s1084_s1 = inlined_call_operand.vmem [shape: bf16[4,16], index: 1, kind: input, shape index: {}]   ;;  %s1085_s7 = inlined_call_operand.vmem [shape: bf16[16,144], index: 7, kind: input, shape index: {}]   ;;  %s1086_s2 = inlined_call_operand.vmem [shape: f32[4,1], index: 2, kind: input, shape index: {}]   ;;  %s1087_s8 = inlined_call_operand.vmem [shape: f32[16,1], index: 8, kind: input, shape index: {}]   ;;  %s1088_s9 = inlined_call_operand.vmem [shape: f32[16,1], index: 9, kind: input, shape index: {}]   ;;  %s1089_s3 = inlined_call_operand.vmem [shape: f32[4,1], index: 3, kind: input, shape index: {}]   ;;  %s1090_s4 = inlined_call_operand.vmem [shape: f32[4,1], index: 4, kind: input, shape index: {}]   ;;  %s1091_s10 = inlined_call_operand.vmem [shape: f32[16,1], index: 10, kind: input, shape index: {}]   ;;  %s1092_s5 = inlined_call_operand.<no memory space> [shape: f32[1], index: 5, kind: input, shape index: {}]   ;;  %s1093_s11 = inlined_call_operand.<no memory space> [shape: f32[1], index: 11, kind: input, shape index: {}]   ;;  %s1094_s12 = inlined_call_operand.vmem [shape: f32[4,1024], index: 12, kind: output, shape index: {0}]   ;;  %s1095_s13 = inlined_call_operand.vmem [shape: f32[16,256], index: 13, kind: output, shape index: {1}]  }
   0x1   :  { %v46_v0 = vld [vmem:[%s1082_s0] sm:$0xff]  ;;  %140 = vmatprep.mubr.bf16.mxu1 %v744_v2  ;;  %706 = vset.pattern.permute.xlu0 %v744_v2  ;;  %v47_v8 = vld [vmem:[%s1082_s0 + $0x8] sm:$0xff]  ;;  %v711_v11 = vld [vmem:[%s1083_s6 + $0x14] ss:$8 sps:$4 sm:$0xff]  }
   0x2   :  { %v50_v1 = vld [vmem:[%s1082_s0 + $0x20] sm:$0xff]  ;;  %707 = vset.pattern.permute.xlu1 %v744_v2  ;;  %v51_v9 = vld [vmem:[%s1082_s0 + $0x28] sm:$0xff]  ;;  %v713_v13 = vld [vmem:[%s1083_s6 + $0x10] ss:$8 sps:$4 sm:$0xff]  }
   0x3   :  { %v673_v3 = vcombine.high %v46_v0, %v50_v1  ;;  %v708_v4 = vld [vmem:[%s1083_s6 + $0x4] ss:$8 sps:$4 sm:$0xff]   ;;  %v672_v5 = vcombine.low %v46_v0, %v50_v1  ;;  %v710_v6 = vld [vmem:[%s1083_s6] ss:$8 sps:$4 sm:$0xff]   ;;  %v675_v10 = vcombine.high %v47_v8, %v51_v9  ;;  %v674_v12 = vcombine.low %v47_v8, %v51_v9  ;;  %v48_v15 = vld [vmem:[%s1082_s0 + $0x10] sm:$0xff] }
   0x4   :  { %v833_v7 = vld [vmem:[%s1084_s1] sm:$0x3]  ;;  %541 = vmatprep.subr.bf16.mxu0 %v708_v4  ;;  %v714_v14 = vld [vmem:[%s1083_s6 + $0x24] ss:$8 sps:$4 sm:$0xff]   ;;  %v52_v16 = vld [vmem:[%s1082_s0 + $0x30] sm:$0xff] }
   0x5   :  { %108 = vmatprep.subr.bf16.mxu1 %v673_v3  ;;  %542 = vmatpush1.bf16.msra.mxu0 %v710_v6  ;;  %v677_v17 = vcombine.high %v48_v15, %v52_v16  ;;  %v716_v18 = vld [vmem:[%s1083_s6 + $0x20] ss:$8 sps:$4 sm:$0xff]   ;;  %v717_v19 = vld [vmem:[%s1083_s6 + $0x34] ss:$8 sps:$4 sm:$0xff]   ;;  %v676_v22 = vcombine.low %v48_v15, %v52_v16  ;;  %v719_v23 = vld [vmem:[%s1083_s6 + $0x30] ss:$8 sps:$4 sm:$0xff]  }
   0x6   :  { %109 = vmatpush1.bf16.msra.mxu1 %v672_v5  ;;  %543 = vmatprep.subr.bf16.mxu0 %v711_v11  ;;  %v49_v20 = vld [vmem:[%s1082_s0 + $0x18] sm:$0xff]  ;;  %v720_v24 = vld [vmem:[%s1083_s6 + $0x44] ss:$8 sps:$4 sm:$0xff]   ;;  %v722_v26 = vld [vmem:[%s1083_s6 + $0x40] ss:$8 sps:$4 sm:$0xff]  }
   0x7   :  { %149 = vmatprep.subr.bf16.mxu1 %v675_v10  ;;  %v53_v21 = vld [vmem:[%s1082_s0 + $0x38] sm:$0xff]  ;;  %v737_v27 = vld [vmem:[%s1085_s7 + $0x4] ss:$8 sps:$4 sm:$0xff]   ;;  %v55_v28 = vld [vmem:[%s1086_s2] sm:$0xf] }
   0x8   :  { %v679_v25 = vcombine.high %v49_v20, %v53_v21  ;;  %v723_v29 = vld [vmem:[%s1083_s6 + $0x54] ss:$8 sps:$4 sm:$0xff]   ;;  %v423_v30 = vld [vmem:[%s1087_s8 + $0x8] sm:$0xff]  ;;  %704 = vmatprep.mubr.msk.bf16.mxu0 %vm104_vm0, %v737_v27  ;;  %61 = vperm.xlu0 %706, %v55_v28   ;;  %v678_v31 = vcombine.low %v49_v20, %v53_v21  ;;  %v725_v32 = vld [vmem:[%s1083_s6 + $0x50] ss:$8 sps:$4 sm:$0xff]  }
   0x9   :  { %680 = vmatmul.mubr.msk.bf16.vlgmr.msra.gmra.mrb[0].mxu1 %vm104_vm0, %v833_v7  ;;  %544 = vmatpush1.bf16.msra.mxu0 %v713_v13  ;;  %v422_v33 = vld [vmem:[%s1087_s8] sm:$0xff]  ;;  %v729_v36 = vld [vmem:[%s1083_s6 + $0x74] ss:$8 sps:$4 sm:$0xff]   ;;  %v731_v37 = vld [vmem:[%s1083_s6 + $0x70] ss:$8 sps:$4 sm:$0xff]  }
   0xa   :  { %150 = vmatpush1.bf16.msra.mxu1 %v674_v12  ;;  %545 = vmatprep.subr.bf16.mxu0 %v714_v14  ;;  %v726_v34 = vld [vmem:[%s1083_s6 + $0x64] ss:$8 sps:$4 sm:$0xff]   ;;  %v728_v35 = vld [vmem:[%s1083_s6 + $0x60] ss:$8 sps:$4 sm:$0xff]  }
   0xb   :  { %181 = vmatprep.mubr.bf16.mxu1 %v744_v2  ;;  %190 = vmatprep.subr.bf16.mxu1 %v677_v17  ;;  %v732_v38 = vld [vmem:[%s1083_s6 + $0x84] ss:$8 sps:$4 sm:$0xff]   ;;  %v734_v39 = vld [vmem:[%s1083_s6 + $0x80] ss:$8 sps:$4 sm:$0xff]  }
   0xc   :  { %436 = vperm.xlu1 %707, %v423_v30   ;;  %431 = vperm.xlu0 %706, %v422_v33   ;;  %v735_v40 = vld [vmem:[%s1085_s7] ss:$8 sps:$4 sm:$0xff]  }
   0xd   :  { %546 = vmatpush1.bf16.msra.mxu0 %v716_v18 }
   0xe   :  { %547 = vmatprep.subr.bf16.mxu0 %v717_v19 }
  0x11   :  { %681 = vmatmul.mubr.msk.bf16.vlgmr.msra.gmra.mrb[4].mxu1 %vm104_vm0, %v833_v7  ;;  %548 = vmatpush1.bf16.msra.mxu0 %v719_v23 }
  0x12   :  { %191 = vmatpush1.bf16.msra.mxu1 %v676_v22  ;;  %549 = vmatprep.subr.bf16.mxu0 %v720_v24 }
  0x13   :  { %222 = vmatprep.mubr.bf16.mxu1 %v744_v2  ;;  %231 = vmatprep.subr.bf16.mxu1 %v679_v25 }
  0x15   :  { %550 = vmatpush1.bf16.msra.mxu0 %v722_v26 }
  0x16   :  { %551 = vmatprep.subr.bf16.mxu0 %v723_v29 }
  0x19   :  { %682 = vmatmul.mubr.msk.bf16.vlgmr.msra.gmra.mrb[8].mxu1 %vm104_vm0, %v833_v7  ;;  %552 = vmatpush1.bf16.msra.mxu0 %v725_v32 }
  0x1a   :  { %232 = vmatpush1.bf16.msra.mxu1 %v678_v31  ;;  %553 = vmatprep.subr.bf16.mxu0 %v726_v34 }
  0x1b   :  { %263 = vmatprep.mubr.bf16.mxu1 %v744_v2 }
  0x1d   :  { %554 = vmatpush1.bf16.msra.mxu0 %v728_v35 }
  0x1e   :  { %555 = vmatprep.subr.bf16.mxu0 %v729_v36 }
  0x21   :  { %683 = vmatmul.mubr.msk.bf16.vlgmr.msra.gmra.mrb[12].mxu1 %vm104_vm0, %v833_v7  ;;  %556 = vmatpush1.bf16.msra.mxu0 %v731_v37 }
  0x22   :  { %557 = vmatprep.subr.bf16.mxu0 %v732_v38 }
  0x25   :  { %558 = vmatpush1.bf16.msra.mxu0 %v734_v39 }
  0x28   :  { %574 = vmatmul.mubr.bf16.vlgmr.msra.gmra.mrb[0].mxu0 %v735_v40 }
  0x87   :  { %v62_v45 = vpop.permute.xlu0 %61 }
  0x8b   :  { %v437_v17 = vpop.permute.xlu1 %436  ;;  %v432_v18 = vpop.permute.xlu0 %431 }
  0xdc   :  { %v142_v41 = vpop.f32.mrb[0].mxu1 }
  0xdd   :  { %v144_v42 = vpop.f32.mrb[1].mxu1  ;;  %v928_v46 = vadd.f32 %v142_v41, %v62_v45 }
  0xde   :  { %v146_v43 = vpop.f32.mrb[2].mxu1  ;;  %v930_v47 = vadd.f32 %v144_v42, %v62_v45 }
  0xdf   :  { %v147_v44 = vpop.f32.mrb[3].mxu1  ;;  %v273_v52 = vsel %vm272_vm1, %v928_v46, 0.0 }
  0xe0   :  { %v274_v53 = vsel %vm272_vm1, %v930_v47, 0.0 }
  0xe1   :  { %v275_v57 = vadd.f32 %v274_v53, %v273_v52 }
  0xe4   :  { %v183_v48 = vpop.f32.mrb[4].mxu1 }
  0xe5   :  { %v932_v49 = vadd.f32 %v183_v48, %v62_v45  ;;  %v185_v50 = vpop.f32.mrb[5].mxu1 }
  0xe6   :  { %v187_v51 = vpop.f32.mrb[6].mxu1  ;;  %v940_v56 = vadd.f32 %v185_v50, %v62_v45 }
  0xe7   :  { %v188_v54 = vpop.f32.mrb[7].mxu1  ;;  %v276_v55 = vsel %vm272_vm1, %v932_v49, 0.0 }
  0xe8   :  { %v277_v58 = vadd.f32 %v276_v55, %v275_v57  ;;  %v278_v60 = vsel %vm272_vm1, %v940_v56, 0.0 }
  0xea   :  { %v279_v3 = vadd.f32 %v278_v60, %v277_v58 }
  0xec   :  { %v224_v59 = vpop.f32.mrb[8].mxu1 }
  0xed   :  { %v944_v61 = vadd.f32 %v224_v59, %v62_v45  ;;  %v226_v62 = vpop.f32.mrb[9].mxu1 }
  0xee   :  { %v228_v63 = vpop.f32.mrb[10].mxu1  ;;  %v948_v1 = vadd.f32 %v226_v62, %v62_v45 }
  0xef   :  { %v280_v0 = vsel %vm272_vm1, %v944_v61, 0.0  ;;  %v229_v2 = vpop.f32.mrb[11].mxu1 }
  0xf0   :  { %v281_v4 = vadd.f32 %v280_v0, %v279_v3  ;;  %v282_v5 = vsel %vm272_vm1, %v948_v1, 0.0 }
  0xf2   :  { %v283_v11 = vadd.f32 %v282_v5, %v281_v4 }
  0xf4   :  { %v265_v6 = vpop.f32.mrb[12].mxu1 }
  0xf5   :  { %v952_v7 = vadd.f32 %v265_v6, %v62_v45  ;;  %v267_v8 = vpop.f32.mrb[13].mxu1 }
  0xf6   :  { %v954_v9 = vadd.f32 %v267_v8, %v62_v45  ;;  %v269_v10 = vpop.f32.mrb[14].mxu1 }
  0xf7   :  { %v270_v12 = vpop.f32.mrb[15].mxu1  ;;  %v284_v13 = vsel %vm272_vm1, %v952_v7, 0.0 }
  0xf8   :  { %v285_v14 = vadd.f32 %v284_v13, %v283_v11  ;;  %v286_v15 = vsel %vm272_vm1, %v954_v9, 0.0 }
  0xfa   :  { %v287_v16 = vadd.f32 %v286_v15, %v285_v14 }
  0xfb   :  { %v575_v19 = vpop.f32.mrb[0].mxu0 }
  0xfc   :  { %288 = vadd.xlane.f32.xlu1 %v287_v16  ;;  %v960_v20 = vadd.f32 %v575_v19, %v432_v18  ;;  %v577_v21 = vpop.f32.mrb[1].mxu0 }
  0xfd   :  { %v962_v22 = vadd.f32 %v577_v21, %v432_v18  ;;  %v579_v23 = vpop.f32.mrb[2].mxu0 }
  0xfe   :  { %v964_v24 = vadd.f32 %v579_v23, %v437_v17  ;;  %v581_v25 = vpop.f32.mrb[3].mxu0 }
  0xff   :  { %v966_v26 = vadd.f32 %v581_v25, %v437_v17  ;;  %v584_v27 = vadd.f32 %v962_v22, %v960_v20 }
 0x101   :  { %585 = vadd.xlane.f32.xlu0 %v584_v27  ;;  %v587_v28 = vadd.f32 %v966_v26, %v964_v24 }
 0x105   :  { %588 = vadd.xlane.f32.xlu0 %v587_v28 }
 0x189   :  { %v289_v29 = vpop.xlane.xlu1 %288 }
 0x18a   :  { %v972_v30 = vmul.f32 0.0009765625, %v289_v29 }
 0x18c   :  { %v292_v31 = vsub.f32 %v928_v46, %v972_v30  ;;  %v293_v32 = vsub.f32 %v930_v47, %v972_v30  ;;  %v294_v33 = vsub.f32 %v932_v49, %v972_v30  ;;  %v295_v34 = vsub.f32 %v940_v56, %v972_v30 }
 0x18d   :  { %v296_v35 = vsub.f32 %v944_v61, %v972_v30  ;;  %v297_v40 = vsub.f32 %v948_v1, %v972_v30  ;;  %v298_v45 = vsub.f32 %v952_v7, %v972_v30  ;;  %v299_v55 = vsub.f32 %v954_v9, %v972_v30 }
 0x18e   :  { %v300_v36 = vmul.f32 %v292_v31, %v292_v31  ;;  %v301_v37 = vmul.f32 %v293_v32, %v293_v32  ;;  %v302_v38 = vmul.f32 %v294_v33, %v294_v33  ;;  %v586_v39 = vpop.xlane.xlu0 %585  ;;  %v303_v42 = vmul.f32 %v295_v34, %v295_v34  ;;  %v424_v33 = vld [vmem:[%s1088_s9] sm:$0xff] }
 0x18f   :  { %v986_v41 = vmul.f32 0.00390625, %v586_v39  ;;  %v304_v52 = vmul.f32 %v296_v35, %v296_v35  ;;  %v305_v60 = vmul.f32 %v297_v40, %v297_v40  ;;  %v306_v3 = vmul.f32 %v298_v45, %v298_v45  ;;  %v57_v40 = vld [vmem:[%s1090_s4] sm:$0xf] }
 0x190   :  { %v308_v43 = vsel %vm272_vm1, %v300_v36, 0.0  ;;  %v309_v44 = vsel %vm272_vm1, %v301_v37, 0.0  ;;  %v311_v53 = vsel %vm272_vm1, %v302_v38, 0.0  ;;  %v313_v62 = vsel %vm272_vm1, %v303_v42, 0.0  ;;  %v56_v37 = vld [vmem:[%s1089_s3] sm:$0xf] }
 0x191   :  { %v310_v48 = vadd.f32 %v309_v44, %v308_v43  ;;  %v593_v50 = vsub.f32 %v960_v20, %v986_v41  ;;  %v594_v51 = vsub.f32 %v962_v22, %v986_v41  ;;  %v315_v4 = vsel %vm272_vm1, %v304_v52, 0.0  ;;  %v425_v42 = vld [vmem:[%s1088_s9 + $0x8] sm:$0xff] }
 0x192   :  { %v589_v54 = vpop.xlane.xlu0 %588  ;;  %v307_v6 = vmul.f32 %v299_v55, %v299_v55  ;;  %v317_v8 = vsel %vm272_vm1, %v305_v60, 0.0  ;;  %v319_v13 = vsel %vm272_vm1, %v306_v3, 0.0 }
 0x193   :  { %v312_v57 = vadd.f32 %v311_v53, %v310_v48  ;;  %v597_v58 = vmul.f32 %v593_v50, %v593_v50  ;;  %v598_v59 = vmul.f32 %v594_v51, %v594_v51  ;;  %v592_v63 = vmul.f32 0.00390625, %v589_v54  ;;  %v426_v51 = vld [vmem:[%s1091_s10] sm:$0xff]  ;;  %v427_v54 = vld [vmem:[%s1091_s10 + $0x8] sm:$0xff] }
 0x194   :  { %v321_v15 = vsel %vm272_vm1, %v307_v6, 0.0 }
 0x195   :  { %v314_v0 = vadd.f32 %v313_v62, %v312_v57  ;;  %v601_v2 = vadd.f32 %v598_v59, %v597_v58  ;;  %v595_v11 = vsub.f32 %v964_v24, %v592_v63  ;;  %v596_v12 = vsub.f32 %v966_v26, %v592_v63 }
 0x196   :  { %v1032_v58 = vstv %s1093_s11 }
 0x197   :  { %v316_v5 = vadd.f32 %v315_v4, %v314_v0  ;;  %602 = vadd.xlane.f32.xlu0 %v601_v2  ;;  %v599_v17 = vmul.f32 %v595_v11, %v595_v11  ;;  %v600_v18 = vmul.f32 %v596_v12, %v596_v12 }
 0x199   :  { %v318_v10 = vadd.f32 %v317_v8, %v316_v5  ;;  %v604_v19 = vadd.f32 %v600_v18, %v599_v17 }
 0x19b   :  { %v320_v14 = vadd.f32 %v319_v13, %v318_v10 }
 0x19d   :  { %v322_v16 = vadd.f32 %v321_v15, %v320_v14 }
 0x19f   :  { %323 = vadd.xlane.f32.xlu1 %v322_v16 }
 0x1a3   :  { %605 = vadd.xlane.f32.xlu1 %v604_v19 }
 0x224   :  { %v603_v21 = vpop.xlane.xlu0 %602 }
 0x225   :  { %v607_v23 = vmul.f32 0.00390625, %v603_v21 }
 0x227   :  { %v609_v25 = vadd.f32 1e-05, %v607_v23 }
 0x229   :  { %738 = vrsqrt.f32 %v609_v25 }
 0x22c   :  { %v324_v27 = vpop.xlane.xlu1 %323 }
 0x22d   :  { %v325_v28 = vmul.f32 0.0009765625, %v324_v27 }
 0x22f   :  { %v326_v29 = vadd.f32 1e-05, %v325_v28 }
 0x230   :  { %v606_v31 = vpop.xlane.xlu1 %605 }
 0x231   :  { %740 = vrsqrt.f32 %v326_v29  ;;  %v608_v32 = vmul.f32 0.00390625, %v606_v31 }
 0x233   :  { %v610_v34 = vadd.f32 1e-05, %v608_v32  ;;  %v739_v35 = vpop.eup %738 }
 0x234   :  { %v613_v36 = vmul.f32 %v739_v35, %v424_v33 }
 0x235   :  { %742 = vrsqrt.f32 %v610_v34 }
 0x236   :  { %617 = vperm.xlu1 %707, %v613_v36   ;;  %v629_v50 = vmul.f32 %v613_v36, %v986_v41  ;;  %v365_v41 = vstv %s1092_s5 }
 0x238   :  { %v631_v52 = vsub.f32 %v426_v51, %v629_v50 }
 0x23b   :  { %v741_v38 = vpop.eup %740 }
 0x23c   :  { %v328_v39 = vmul.f32 %v741_v38, %v56_v37 }
 0x23e   :  { %v342_v43 = vmul.f32 %v328_v39, %v972_v30 }
 0x23f   :  { %v743_v44 = vpop.eup %742 }
 0x240   :  { %v343_v45 = vsub.f32 %v57_v40, %v342_v43  ;;  %v614_v48 = vmul.f32 %v743_v44, %v425_v42 }
 0x242   :  { %346 = vperm.xlu1 %707, %v343_v45   ;;  %622 = vperm.xlu0 %706, %v614_v48   ;;  %v630_v53 = vmul.f32 %v614_v48, %v592_v63 }
 0x244   :  { %v632_v30 = vsub.f32 %v427_v54, %v630_v53 }
 0x246   :  { %635 = vperm.xlu1 %707, %v631_v52   ;;  %331 = vperm.xlu0 %706, %v328_v39  }
 0x24a   :  { %640 = vperm.xlu0 %706, %v632_v30  }
 0x2b5   :  { %v618_v57 = vpop.permute.xlu1 %617 }
 0x2b6   :  { %v625_v59 = vmul.f32 %v618_v57, %v960_v20  ;;  %v626_v60 = vmul.f32 %v618_v57, %v962_v22 }
 0x2c1   :  { %v623_v55 = vpop.permute.xlu0 %622  ;;  %v347_v6 = vpop.permute.xlu1 %346 }
 0x2c2   :  { %v627_v62 = vmul.f32 %v623_v55, %v964_v24  ;;  %v628_v63 = vmul.f32 %v623_v55, %v966_v26 }
 0x2c5   :  { %v332_v0 = vpop.permute.xlu0 %331  ;;  %v636_v23 = vpop.permute.xlu1 %635 }
 0x2c6   :  { %v334_v2 = vmul.f32 %v332_v0, %v928_v46  ;;  %v335_v3 = vmul.f32 %v332_v0, %v930_v47  ;;  %v336_v4 = vmul.f32 %v332_v0, %v932_v49  ;;  %v337_v5 = vmul.f32 %v332_v0, %v940_v56 }
 0x2c7   :  { %v338_v8 = vmul.f32 %v332_v0, %v944_v61  ;;  %v339_v20 = vmul.f32 %v332_v0, %v948_v1  ;;  %v340_v22 = vmul.f32 %v332_v0, %v952_v7  ;;  %v341_v24 = vmul.f32 %v332_v0, %v954_v9 }
 0x2c8   :  { %v349_v10 = vadd.f32 %v347_v6, %v334_v2  ;;  %v350_v26 = vadd.f32 %v347_v6, %v335_v3  ;;  %v351_v11 = vadd.f32 %v347_v6, %v336_v4  ;;  %v352_v12 = vadd.f32 %v347_v6, %v337_v5 }
 0x2c9   :  { %v353_v46 = vadd.f32 %v347_v6, %v338_v8  ;;  %v354_v13 = vadd.f32 %v347_v6, %v339_v20  ;;  %v355_v47 = vadd.f32 %v347_v6, %v340_v22  ;;  %v356_v14 = vadd.f32 %v347_v6, %v341_v24  ;;  %v641_v25 = vpop.permute.xlu0 %640 }
 0x2ca   :  { %vm357_vm2 = vcmp.gt.f32.partialorder %v349_v10, 0.0  ;;  %vm358_vm3 = vcmp.gt.f32.partialorder %v350_v26, 0.0  ;;  %vm359_vm4 = vcmp.gt.f32.partialorder %v351_v11, 0.0  ;;  %vm360_vm5 = vcmp.gt.f32.partialorder %v352_v12, 0.0 }
 0x2cb   :  { %vm361_vm6 = vcmp.gt.f32.partialorder %v353_v46, 0.0  ;;  %vm362_vm7 = vcmp.gt.f32.partialorder %v354_v13, 0.0  ;;  %vm363_vm8 = vcmp.gt.f32.partialorder %v355_v47, 0.0  ;;  %vm364_vm9 = vcmp.gt.f32.partialorder %v356_v14, 0.0 }
 0x2cc   :  { %v366_v49 = vmul.f32 %v365_v41, %v349_v10  ;;  %v367_v56 = vmul.f32 %v365_v41, %v350_v26  ;;  %v368_v61 = vmul.f32 %v365_v41, %v351_v11  ;;  %v369_v1 = vmul.f32 %v365_v41, %v352_v12 }
 0x2cd   :  { %v370_v7 = vmul.f32 %v365_v41, %v353_v46  ;;  %v371_v9 = vmul.f32 %v365_v41, %v354_v13  ;;  %v372_v15 = vmul.f32 %v365_v41, %v355_v47  ;;  %v373_v16 = vmul.f32 %v365_v41, %v356_v14 }
 0x2ce   :  { %v374_v17 = vsel %vm357_vm2, %v349_v10, %v366_v49  ;;  %v375_v18 = vsel %vm358_vm3, %v350_v26, %v367_v56  ;;  %v376_v19 = vsel %vm359_vm4, %v351_v11, %v368_v61  ;;  %v377_v21 = vsel %vm360_vm5, %v352_v12, %v369_v1 }
 0x2cf   :  { %v378_v27 = vsel %vm361_vm6, %v353_v46, %v370_v7  ;;  %v379_v28 = vsel %vm362_vm7, %v354_v13, %v371_v9  ;;  %v380_v29 = vsel %vm363_vm8, %v355_v47, %v372_v15  ;;  %v381_v31 = vsel %vm364_vm9, %v356_v14, %v373_v16 }
 0x2d0   :  { %v390_v32 = vcombine.low %v374_v17, %v375_v18  ;;  %v391_v33 = vcombine.low %v376_v19, %v377_v21  ;;  %v392_v34 = vcombine.low %v378_v27, %v379_v28  ;;  %v393_v35 = vcombine.low %v380_v29, %v381_v31 }
 0x2d1   :  { %v643_v36 = vadd.f32 %v636_v23, %v625_v59  ;;  %v644_v37 = vadd.f32 %v636_v23, %v626_v60  ;;  %v645_v38 = vadd.f32 %v641_v25, %v627_v62  ;;  %v646_v39 = vadd.f32 %v641_v25, %v628_v63 }
 0x2d2   :  { %398 = vst [vmem:[%s1094_s12] sm:$0xff] %v390_v32  ;;  %399 = vst [vmem:[%s1094_s12 + $0x8] sm:$0xff] %v391_v33 }
 0x2d3   :  { %400 = vst [vmem:[%s1094_s12 + $0x10] sm:$0xff] %v392_v34  ;;  %401 = vst [vmem:[%s1094_s12 + $0x18] sm:$0xff] %v393_v35  ;;  %vm647_vm10 = vcmp.gt.f32.partialorder %v643_v36, 0.0  ;;  %vm648_vm11 = vcmp.gt.f32.partialorder %v644_v37, 0.0  ;;  %v652_v40 = vmul.f32 %v1032_v58, %v643_v36  ;;  %v653_v42 = vmul.f32 %v1032_v58, %v644_v37 }
 0x2d4   :  { %vm649_vm12 = vcmp.gt.f32.partialorder %v645_v38, 0.0  ;;  %vm650_vm13 = vcmp.gt.f32.partialorder %v646_v39, 0.0  ;;  %v654_v43 = vmul.f32 %v1032_v58, %v645_v38  ;;  %v655_v44 = vmul.f32 %v1032_v58, %v646_v39 }
 0x2d5   :  { %v656_v45 = vsel %vm647_vm10, %v643_v36, %v652_v40  ;;  %v657_v48 = vsel %vm648_vm11, %v644_v37, %v653_v42 }
 0x2d6   :  { %660 = vst [vmem:[%s1095_s13] sm:$0xff] %v656_v45  ;;  %661 = vst [vmem:[%s1095_s13 + $0x8] sm:$0xff] %v657_v48  ;;  %v658_v50 = vsel %vm649_vm12, %v645_v38, %v654_v43  ;;  %v659_v51 = vsel %vm650_vm13, %v646_v39, %v655_v44 }
 0x2d7   :  { %662 = vst [vmem:[%s1095_s13 + $0x10] sm:$0xff] %v658_v50  ;;  %663 = vst [vmem:[%s1095_s13 + $0x18] sm:$0xff] %v659_v51 }

// kernel: unet2_forward.20
= control target key start
LH: loop header
LB: loop body
LE: loop exit
PB: predicated region body
PF: predicated region fallthrough
CT: control target
= control target key end

     0   :  { %v350_v1 = vmov 0   ;;  %vm161_vm0 = vcmask 130048   ;;  %s479_s0 = inlined_call_operand.vmem [shape: bf16[144,256], index: 0, kind: input, shape index: {}]   ;;  %s480_s1 = inlined_call_operand.vmem [shape: bf16[16,144], index: 1, kind: input, shape index: {}]   ;;  %s481_s2 = inlined_call_operand.vmem [shape: f32[16,1], index: 2, kind: input, shape index: {}]   ;;  %s482_s3 = inlined_call_operand.vmem [shape: f32[16,1], index: 3, kind: input, shape index: {}]   ;;  %s483_s4 = inlined_call_operand.vmem [shape: f32[16,1], index: 4, kind: input, shape index: {}]   ;;  %s484_s5 = inlined_call_operand.<no memory space> [shape: f32[1], index: 5, kind: input, shape index: {}]   ;;  %s485_s6 = inlined_call_operand.vmem [shape: f32[16,256], index: 6, kind: output, shape index: {}]  }
   0x1   :  { %v316_v0 = vld [vmem:[%s479_s0 + $0x4] ss:$8 sps:$4 sm:$0xff]   ;;  %314 = vset.pattern.permute.xlu0 %v350_v1  ;;  %315 = vset.pattern.permute.xlu1 %v350_v1  ;;  %v318_v2 = vld [vmem:[%s479_s0] ss:$8 sps:$4 sm:$0xff]   ;;  %v319_v3 = vld [vmem:[%s479_s0 + $0x14] ss:$8 sps:$4 sm:$0xff]  }
   0x2   :  { %165 = vmatprep.subr.bf16.mxu0 %v316_v0  ;;  %v321_v4 = vld [vmem:[%s479_s0 + $0x10] ss:$8 sps:$4 sm:$0xff]   ;;  %v322_v5 = vld [vmem:[%s479_s0 + $0x24] ss:$8 sps:$4 sm:$0xff]   ;;  %v324_v6 = vld [vmem:[%s479_s0 + $0x20] ss:$8 sps:$4 sm:$0xff]  }
   0x3   :  { %166 = vmatpush1.bf16.msra.mxu0 %v318_v2  ;;  %v325_v7 = vld [vmem:[%s479_s0 + $0x34] ss:$8 sps:$4 sm:$0xff]   ;;  %v327_v8 = vld [vmem:[%s479_s0 + $0x30] ss:$8 sps:$4 sm:$0xff]   ;;  %v328_v9 = vld [vmem:[%s479_s0 + $0x44] ss:$8 sps:$4 sm:$0xff]  }
   0x4   :  { %167 = vmatprep.subr.bf16.mxu0 %v319_v3  ;;  %v345_v10 = vld [vmem:[%s480_s1 + $0x4] ss:$8 sps:$4 sm:$0xff]   ;;  %v330_v12 = vld [vmem:[%s479_s0 + $0x40] ss:$8 sps:$4 sm:$0xff]   ;;  %v331_v14 = vld [vmem:[%s479_s0 + $0x54] ss:$8 sps:$4 sm:$0xff]  }
   0x5   :  { %v45_v11 = vld [vmem:[%s481_s2] sm:$0xff]  ;;  %312 = vmatprep.mubr.msk.bf16.mxu0 %vm161_vm0, %v345_v10  ;;  %v46_v13 = vld [vmem:[%s481_s2 + $0x8] sm:$0xff]  ;;  %v333_v15 = vld [vmem:[%s479_s0 + $0x50] ss:$8 sps:$4 sm:$0xff]  }
   0x6   :  { %54 = vperm.xlu0 %314, %v45_v11   ;;  %v334_v16 = vld [vmem:[%s479_s0 + $0x64] ss:$8 sps:$4 sm:$0xff]   ;;  %v336_v17 = vld [vmem:[%s479_s0 + $0x60] ss:$8 sps:$4 sm:$0xff]   ;;  %v337_v18 = vld [vmem:[%s479_s0 + $0x74] ss:$8 sps:$4 sm:$0xff]  }
   0x7   :  { %168 = vmatpush1.bf16.msra.mxu0 %v321_v4  ;;  %v339_v19 = vld [vmem:[%s479_s0 + $0x70] ss:$8 sps:$4 sm:$0xff]   ;;  %v340_v20 = vld [vmem:[%s479_s0 + $0x84] ss:$8 sps:$4 sm:$0xff]   ;;  %v342_v21 = vld [vmem:[%s479_s0 + $0x80] ss:$8 sps:$4 sm:$0xff]  }
   0x8   :  { %169 = vmatprep.subr.bf16.mxu0 %v322_v5  ;;  %v343_v22 = vld [vmem:[%s480_s1] ss:$8 sps:$4 sm:$0xff]  }
   0x9   :  { %v47_v55 = vld [vmem:[%s482_s3] sm:$0xff]  ;;  %v48_v58 = vld [vmem:[%s482_s3 + $0x8] sm:$0xff] }
   0xa   :  { %59 = vperm.xlu0 %314, %v46_v13   ;;  %v49_v62 = vld [vmem:[%s483_s4] sm:$0xff]  ;;  %v50_v1 = vld [vmem:[%s483_s4 + $0x8] sm:$0xff] }
   0xb   :  { %170 = vmatpush1.bf16.msra.mxu0 %v324_v6 }
   0xc   :  { %171 = vmatprep.subr.bf16.mxu0 %v325_v7  ;;  %v275_v7 = vstv %s484_s5 }
   0xf   :  { %172 = vmatpush1.bf16.msra.mxu0 %v327_v8 }
  0x10   :  { %173 = vmatprep.subr.bf16.mxu0 %v328_v9 }
  0x13   :  { %174 = vmatpush1.bf16.msra.mxu0 %v330_v12 }
  0x14   :  { %175 = vmatprep.subr.bf16.mxu0 %v331_v14 }
  0x17   :  { %176 = vmatpush1.bf16.msra.mxu0 %v333_v15 }
  0x18   :  { %177 = vmatprep.subr.bf16.mxu0 %v334_v16 }
  0x1b   :  { %178 = vmatpush1.bf16.msra.mxu0 %v336_v17 }
  0x1c   :  { %179 = vmatprep.subr.bf16.mxu0 %v337_v18 }
  0x1f   :  { %180 = vmatpush1.bf16.msra.mxu0 %v339_v19 }
  0x20   :  { %181 = vmatprep.subr.bf16.mxu0 %v340_v20 }
  0x23   :  { %182 = vmatpush1.bf16.msra.mxu0 %v342_v21 }
  0x26   :  { %198 = vmatmul.mubr.bf16.vlgmr.msra.gmra.mrb[0].mxu0 %v343_v22 }
  0x85   :  { %v55_v23 = vpop.permute.xlu0 %54 }
  0x89   :  { %v60_v26 = vpop.permute.xlu0 %59 }
  0xf9   :  { %v199_v24 = vpop.f32.mrb[0].mxu0 }
  0xfa   :  { %v200_v25 = vadd.f32 %v199_v24, %v55_v23  ;;  %v201_v27 = vpop.f32.mrb[1].mxu0 }
  0xfb   :  { %v202_v28 = vadd.f32 %v201_v27, %v55_v23  ;;  %v203_v29 = vpop.f32.mrb[2].mxu0 }
  0xfc   :  { %v205_v30 = vpop.f32.mrb[3].mxu0  ;;  %v204_v31 = vadd.f32 %v203_v29, %v60_v26 }
  0xfd   :  { %v206_v32 = vadd.f32 %v205_v30, %v60_v26  ;;  %v208_v33 = vadd.f32 %v202_v28, %v200_v25 }
  0xff   :  { %209 = vadd.xlane.f32.xlu1 %v208_v33  ;;  %v211_v34 = vadd.f32 %v206_v32, %v204_v31 }
 0x103   :  { %212 = vadd.xlane.f32.xlu1 %v211_v34 }
 0x18c   :  { %v210_v35 = vpop.xlane.xlu1 %209 }
 0x18d   :  { %v215_v36 = vmul.f32 0.00390625, %v210_v35 }
 0x18f   :  { %v217_v37 = vsub.f32 %v200_v25, %v215_v36  ;;  %v218_v38 = vsub.f32 %v202_v28, %v215_v36 }
 0x190   :  { %v213_v39 = vpop.xlane.xlu1 %212 }
 0x191   :  { %v216_v40 = vmul.f32 0.00390625, %v213_v39  ;;  %v221_v41 = vmul.f32 %v217_v37, %v217_v37  ;;  %v222_v42 = vmul.f32 %v218_v38, %v218_v38 }
 0x193   :  { %v225_v43 = vadd.f32 %v222_v42, %v221_v41  ;;  %v219_v44 = vsub.f32 %v204_v31, %v216_v40  ;;  %v220_v45 = vsub.f32 %v206_v32, %v216_v40 }
 0x195   :  { %226 = vadd.xlane.f32.xlu0 %v225_v43  ;;  %v223_v46 = vmul.f32 %v219_v44, %v219_v44  ;;  %v224_v47 = vmul.f32 %v220_v45, %v220_v45 }
 0x197   :  { %v228_v48 = vadd.f32 %v224_v47, %v223_v46 }
 0x199   :  { %229 = vadd.xlane.f32.xlu1 %v228_v48 }
 0x222   :  { %v227_v49 = vpop.xlane.xlu0 %226 }
 0x223   :  { %v231_v50 = vmul.f32 0.00390625, %v227_v49 }
 0x225   :  { %v233_v51 = vadd.f32 1e-05, %v231_v50 }
 0x226   :  { %v230_v52 = vpop.xlane.xlu1 %229 }
 0x227   :  { %346 = vrsqrt.f32 %v233_v51  ;;  %v232_v53 = vmul.f32 0.00390625, %v230_v52 }
 0x229   :  { %v234_v54 = vadd.f32 1e-05, %v232_v53 }
 0x22b   :  { %348 = vrsqrt.f32 %v234_v54 }
 0x231   :  { %v347_v56 = vpop.eup %346 }
 0x232   :  { %v237_v57 = vmul.f32 %v347_v56, %v47_v55 }
 0x234   :  { %241 = vperm.xlu1 %315, %v237_v57   ;;  %v253_v61 = vmul.f32 %v237_v57, %v215_v36 }
 0x235   :  { %v349_v59 = vpop.eup %348 }
 0x236   :  { %v238_v60 = vmul.f32 %v349_v59, %v48_v58  ;;  %v255_v63 = vsub.f32 %v49_v62, %v253_v61 }
 0x238   :  { %246 = vperm.xlu1 %315, %v238_v60   ;;  %v254_v0 = vmul.f32 %v238_v60, %v216_v40 }
 0x23a   :  { %v256_v2 = vsub.f32 %v50_v1, %v254_v0 }
 0x23c   :  { %259 = vperm.xlu1 %315, %v255_v63  }
 0x240   :  { %264 = vperm.xlu1 %315, %v256_v2  }
 0x2b3   :  { %v242_v3 = vpop.permute.xlu1 %241 }
 0x2b4   :  { %v249_v5 = vmul.f32 %v242_v3, %v200_v25  ;;  %v250_v6 = vmul.f32 %v242_v3, %v202_v28 }
 0x2b7   :  { %v247_v4 = vpop.permute.xlu1 %246 }
 0x2b8   :  { %v251_v11 = vmul.f32 %v247_v4, %v204_v31  ;;  %v252_v12 = vmul.f32 %v247_v4, %v206_v32 }
 0x2bb   :  { %v260_v8 = vpop.permute.xlu1 %259 }
 0x2bc   :  { %v267_v9 = vadd.f32 %v260_v8, %v249_v5  ;;  %v268_v10 = vadd.f32 %v260_v8, %v250_v6 }
 0x2be   :  { %vm271_vm1 = vcmp.gt.f32.partialorder %v267_v9, 0.0  ;;  %vm272_vm2 = vcmp.gt.f32.partialorder %v268_v10, 0.0  ;;  %v276_v13 = vmul.f32 %v275_v7, %v267_v9  ;;  %v277_v14 = vmul.f32 %v275_v7, %v268_v10 }
 0x2bf   :  { %v265_v15 = vpop.permute.xlu1 %264 }
 0x2c0   :  { %v280_v16 = vsel %vm271_vm1, %v267_v9, %v276_v13  ;;  %v281_v17 = vsel %vm272_vm2, %v268_v10, %v277_v14  ;;  %v269_v18 = vadd.f32 %v265_v15, %v251_v11  ;;  %v270_v19 = vadd.f32 %v265_v15, %v252_v12 }
 0x2c1   :  { %284 = vst [vmem:[%s485_s6] sm:$0xff] %v280_v16  ;;  %285 = vst [vmem:[%s485_s6 + $0x8] sm:$0xff] %v281_v17 }
 0x2c2   :  { %vm273_vm3 = vcmp.gt.f32.partialorder %v269_v18, 0.0  ;;  %vm274_vm4 = vcmp.gt.f32.partialorder %v270_v19, 0.0  ;;  %v278_v20 = vmul.f32 %v275_v7, %v269_v18  ;;  %v279_v21 = vmul.f32 %v275_v7, %v270_v19 }
 0x2c4   :  { %v282_v22 = vsel %vm273_vm3, %v269_v18, %v278_v20  ;;  %v283_v23 = vsel %vm274_vm4, %v270_v19, %v279_v21 }
 0x2c5   :  { %286 = vst [vmem:[%s485_s6 + $0x10] sm:$0xff] %v282_v22  ;;  %287 = vst [vmem:[%s485_s6 + $0x18] sm:$0xff] %v283_v23 }

// kernel: unet2_forward.21
= control target key start
LH: loop header
LB: loop body
LE: loop exit
PB: predicated region body
PF: predicated region fallthrough
CT: control target
= control target key end

     0   :  { %v418_v0 = vmov 0   ;;  %vm68_vm0 = vcmask 130048   ;;  %vm113_vm1 = vcmask 1043456   ;;  %vm306_vm2 = vcmask 523264   ;;  %s605_s0 = inlined_call_operand.vmem [shape: bf16[16,256], index: 0, kind: input, shape index: {}]   ;;  %s606_s6 = inlined_call_operand.vmem [shape: bf16[144,64], index: 6, kind: input, shape index: {}]   ;;  %s607_s1 = inlined_call_operand.vmem [shape: bf16[4,16], index: 1, kind: input, shape index: {}]   ;;  %s608_s7 = inlined_call_operand.vmem [shape: bf16[16,144], index: 7, kind: input, shape index: {}]   ;;  %s609_s2 = inlined_call_operand.vmem [shape: f32[4,1], index: 2, kind: input, shape index: {}]   ;;  %s610_s8 = inlined_call_operand.vmem [shape: f32[16,1], index: 8, kind: input, shape index: {}]   ;;  %s611_s3 = inlined_call_operand.vmem [shape: f32[4,1], index: 3, kind: input, shape index: {}]   ;;  %s612_s4 = inlined_call_operand.vmem [shape: f32[4,1], index: 4, kind: input, shape index: {}]   ;;  %s613_s9 = inlined_call_operand.vmem [shape: f32[16,1], index: 9, kind: input, shape index: {}]   ;;  %s614_s10 = inlined_call_operand.vmem [shape: f32[16,1], index: 10, kind: input, shape index: {}]   ;;  %s615_s5 = inlined_call_operand.<no memory space> [shape: f32[1], index: 5, kind: input, shape index: {}]   ;;  %s616_s12 = inlined_call_operand.vmem [shape: f32[4,256], index: 12, kind: output, shape index: {0}]   ;;  %s617_s11 = inlined_call_operand.<no memory space> [shape: f32[1], index: 11, kind: input, shape index: {}]   ;;  %s618_s13 = inlined_call_operand.vmem [shape: f32[16,64], index: 13, kind: output, shape index: {1}]  }
   0x1   :  { %265 = vmatprep.subr.bf16.mxu1 %v418_v0  ;;  %v397_v1 = vld [vmem:[%s605_s0 + $0x4] ss:$8 sps:$4 sm:$0xff]   ;;  %104 = vmatprep.mubr.bf16.mxu0 %v418_v0  ;;  %v400_v3 = vld [vmem:[%s605_s0] ss:$8 sps:$4 sm:$0xff]   ;;  %v402_v6 = vld [vmem:[%s606_s6 + $0x10] sm:$0xff]  }
   0x2   :  { %v399_v2 = vld [vmem:[%s606_s6] sm:$0xff]   ;;  %395 = vset.pattern.permute.xlu0 %v418_v0  ;;  %396 = vset.pattern.permute.xlu1 %v418_v0  ;;  %v401_v4 = vld [vmem:[%s606_s6 + $0x8] sm:$0xff]   ;;  %v403_v7 = vld [vmem:[%s606_s6 + $0x18] sm:$0xff]  }
   0x3   :  { %72 = vmatprep.subr.bf16.mxu0 %v397_v1  ;;  %266 = vmatpush1.bf16.msra.mxu1 %v399_v2  ;;  %v48_v5 = vld [vmem:[%s607_s1] sm:$0x3]  ;;  %v411_v8 = vld [vmem:[%s608_s7 + $0x4] ss:$8 sps:$4 sm:$0xff]   ;;  %v406_v14 = vld [vmem:[%s606_s6 + $0x30] sm:$0xff]  }
   0x4   :  { %73 = vmatpush1.bf16.msra.mxu0 %v400_v3  ;;  %267 = vmatprep.subr.bf16.mxu1 %v418_v0  ;;  %v49_v9 = vld [vmem:[%s609_s2] sm:$0xf]  ;;  %v183_v10 = vld [vmem:[%s610_s8 + $0x8] sm:$0xff]  ;;  %v407_v15 = vld [vmem:[%s606_s6 + $0x38] sm:$0xff]  }
   0x5   :  { %393 = vmatprep.mubr.msk.bf16.mxu1 %vm68_vm0, %v411_v8  ;;  %55 = vperm.xlu0 %395, %v49_v9   ;;  %v182_v11 = vld [vmem:[%s610_s8] sm:$0xff]  ;;  %v405_v13 = vld [vmem:[%s606_s6 + $0x28] sm:$0xff]  }
   0x6   :  { %196 = vperm.xlu1 %396, %v183_v10   ;;  %v404_v12 = vld [vmem:[%s606_s6 + $0x20] sm:$0xff]  }
   0x7   :  { %381 = vmatmul.mubr.msk.bf16.vlgmr.msra.gmra.mrb[0].mxu0 %vm68_vm0, %v48_v5  ;;  %268 = vmatpush1.bf16.msra.mxu1 %v401_v4  ;;  %v408_v16 = vld [vmem:[%s606_s6 + $0x40] sm:$0xff]  }
   0x8   :  { %269 = vmatprep.subr.bf16.mxu1 %v418_v0  ;;  %v409_v17 = vld [vmem:[%s608_s7] ss:$8 sps:$4 sm:$0xff]  }
   0x9   :  { %191 = vperm.xlu0 %395, %v182_v11   ;;  %v50_v60 = vld [vmem:[%s611_s3] sm:$0xf] }
   0xa   :  { %v51_v63 = vld [vmem:[%s612_s4] sm:$0xf] }
   0xb   :  { %270 = vmatpush1.bf16.msra.mxu1 %v402_v6  ;;  %v184_v8 = vld [vmem:[%s613_s9] sm:$0xff] }
   0xc   :  { %271 = vmatprep.subr.bf16.mxu1 %v418_v0  ;;  %v186_v11 = vld [vmem:[%s614_s10] sm:$0xff] }
   0xf   :  { %272 = vmatpush1.bf16.msra.mxu1 %v403_v7 }
  0x10   :  { %273 = vmatprep.subr.bf16.mxu1 %v418_v0 }
  0x13   :  { %274 = vmatpush1.bf16.msra.mxu1 %v404_v12  ;;  %v185_v12 = vld [vmem:[%s613_s9 + $0x8] sm:$0xff] }
  0x14   :  { %275 = vmatprep.subr.bf16.mxu1 %v418_v0 }
  0x17   :  { %276 = vmatpush1.bf16.msra.mxu1 %v405_v13 }
  0x18   :  { %277 = vmatprep.subr.bf16.mxu1 %v418_v0 }
  0x1b   :  { %278 = vmatpush1.bf16.msra.mxu1 %v406_v14 }
  0x1c   :  { %279 = vmatprep.subr.bf16.mxu1 %v418_v0 }
  0x1f   :  { %280 = vmatpush1.bf16.msra.mxu1 %v407_v15 }
  0x20   :  { %281 = vmatprep.subr.bf16.mxu1 %v418_v0 }
  0x23   :  { %282 = vmatpush1.bf16.msra.mxu1 %v408_v16 }
  0x26   :  { %298 = vmatmul.mubr.bf16.vlgmr.msra.gmra.mrb[0].mxu1 %v409_v17  ;;  %v187_v17 = vld [vmem:[%s614_s10 + $0x8] sm:$0xff] }
  0x84   :  { %v56_v18 = vpop.permute.xlu0 %55 }
  0x85   :  { %v197_v28 = vpop.permute.xlu1 %196 }
  0x88   :  { %v192_v29 = vpop.permute.xlu0 %191 }
  0xda   :  { %v106_v19 = vpop.f32.mrb[0].mxu0 }
  0xdb   :  { %v542_v20 = vadd.f32 %v106_v19, %v56_v18  ;;  %v108_v21 = vpop.f32.mrb[1].mxu0 }
  0xdc   :  { %v544_v22 = vadd.f32 %v108_v21, %v56_v18  ;;  %v110_v23 = vpop.f32.mrb[2].mxu0 }
  0xdd   :  { %v114_v24 = vsel %vm113_vm1, %v542_v20, 0.0  ;;  %v111_v25 = vpop.f32.mrb[3].mxu0 }
  0xde   :  { %v115_v26 = vsel %vm113_vm1, %v544_v22, 0.0  ;;  %v152_v25 = vstv %s615_s5 }
  0xdf   :  { %v116_v27 = vadd.f32 %v115_v26, %v114_v24 }
  0xe1   :  { %117 = vadd.xlane.f32.xlu1 %v116_v27 }
  0xf9   :  { %v299_v30 = vpop.f32.mrb[0].mxu1 }
  0xfa   :  { %v550_v31 = vadd.f32 %v299_v30, %v192_v29  ;;  %v301_v32 = vpop.f32.mrb[1].mxu1 }
  0xfb   :  { %v302_v33 = vpop.f32.mrb[2].mxu1 }
  0xfc   :  { %v552_v34 = vadd.f32 %v302_v33, %v197_v28  ;;  %v304_v35 = vpop.f32.mrb[3].mxu1  ;;  %v307_v36 = vsel %vm306_vm2, %v550_v31, 0.0 }
  0xfd   :  { %308 = vadd.xlane.f32.xlu0 %v307_v36 }
  0xfe   :  { %v310_v37 = vsel %vm306_vm2, %v552_v34, 0.0 }
 0x101   :  { %311 = vadd.xlane.f32.xlu0 %v310_v37  ;;  %v364_v37 = vstv %s617_s11 }
 0x16e   :  { %v118_v38 = vpop.xlane.xlu1 %117 }
 0x16f   :  { %v120_v39 = vmul.f32 0.00390625, %v118_v38 }
 0x171   :  { %v121_v40 = vsub.f32 %v542_v20, %v120_v39  ;;  %v122_v41 = vsub.f32 %v544_v22, %v120_v39 }
 0x173   :  { %v123_v42 = vmul.f32 %v121_v40, %v121_v40  ;;  %v124_v43 = vmul.f32 %v122_v41, %v122_v41 }
 0x175   :  { %v125_v44 = vsel %vm113_vm1, %v123_v42, 0.0  ;;  %v126_v45 = vsel %vm113_vm1, %v124_v43, 0.0 }
 0x176   :  { %v127_v46 = vadd.f32 %v126_v45, %v125_v44 }
 0x178   :  { %128 = vadd.xlane.f32.xlu1 %v127_v46 }
 0x18a   :  { %v309_v47 = vpop.xlane.xlu0 %308 }
 0x18b   :  { %v314_v48 = vmul.f32 0.015625, %v309_v47 }
 0x18d   :  { %v316_v49 = vsub.f32 %v550_v31, %v314_v48 }
 0x18e   :  { %v312_v50 = vpop.xlane.xlu0 %311 }
 0x18f   :  { %v315_v51 = vmul.f32 0.015625, %v312_v50  ;;  %v318_v52 = vmul.f32 %v316_v49, %v316_v49 }
 0x191   :  { %v317_v53 = vsub.f32 %v552_v34, %v315_v51  ;;  %v320_v54 = vsel %vm306_vm2, %v318_v52, 0.0 }
 0x192   :  { %321 = vadd.xlane.f32.xlu0 %v320_v54 }
 0x193   :  { %v319_v55 = vmul.f32 %v317_v53, %v317_v53 }
 0x195   :  { %v323_v56 = vsel %vm306_vm2, %v319_v55, 0.0 }
 0x196   :  { %324 = vadd.xlane.f32.xlu1 %v323_v56 }
 0x205   :  { %v129_v57 = vpop.xlane.xlu1 %128 }
 0x206   :  { %v130_v58 = vmul.f32 0.00390625, %v129_v57 }
 0x208   :  { %v131_v59 = vadd.f32 1e-05, %v130_v58 }
 0x20a   :  { %412 = vrsqrt.f32 %v131_v59 }
 0x214   :  { %v413_v61 = vpop.eup %412 }
 0x215   :  { %v133_v62 = vmul.f32 %v413_v61, %v50_v60 }
 0x217   :  { %136 = vperm.xlu0 %395, %v133_v62   ;;  %v141_v0 = vmul.f32 %v133_v62, %v120_v39 }
 0x219   :  { %v142_v1 = vsub.f32 %v51_v63, %v141_v0 }
 0x21b   :  { %145 = vperm.xlu1 %396, %v142_v1  }
 0x21f   :  { %v322_v2 = vpop.xlane.xlu0 %321 }
 0x220   :  { %v326_v3 = vmul.f32 0.015625, %v322_v2 }
 0x222   :  { %v328_v4 = vadd.f32 1e-05, %v326_v3 }
 0x223   :  { %v325_v5 = vpop.xlane.xlu1 %324 }
 0x224   :  { %414 = vrsqrt.f32 %v328_v4  ;;  %v327_v6 = vmul.f32 0.015625, %v325_v5 }
 0x226   :  { %v329_v7 = vadd.f32 1e-05, %v327_v6 }
 0x228   :  { %416 = vrsqrt.f32 %v329_v7 }
 0x22e   :  { %v415_v9 = vpop.eup %414 }
 0x22f   :  { %v332_v10 = vmul.f32 %v415_v9, %v184_v8 }
 0x231   :  { %336 = vperm.xlu1 %396, %v332_v10   ;;  %v346_v13 = vmul.f32 %v332_v10, %v314_v48 }
 0x232   :  { %v417_v14 = vpop.eup %416 }
 0x233   :  { %v348_v15 = vsub.f32 %v186_v11, %v346_v13  ;;  %v333_v16 = vmul.f32 %v417_v14, %v185_v12 }
 0x235   :  { %352 = vperm.xlu1 %396, %v348_v15   ;;  %341 = vperm.xlu0 %395, %v333_v16   ;;  %v347_v18 = vmul.f32 %v333_v16, %v315_v51 }
 0x237   :  { %v349_v19 = vsub.f32 %v187_v17, %v347_v18 }
 0x239   :  { %357 = vperm.xlu0 %395, %v349_v19  }
 0x296   :  { %v137_v21 = vpop.permute.xlu0 %136 }
 0x297   :  { %v139_v23 = vmul.f32 %v137_v21, %v542_v20  ;;  %v140_v24 = vmul.f32 %v137_v21, %v544_v22 }
 0x29a   :  { %v146_v26 = vpop.permute.xlu1 %145 }
 0x29b   :  { %v148_v27 = vadd.f32 %v146_v26, %v139_v23  ;;  %v149_v28 = vadd.f32 %v146_v26, %v140_v24 }
 0x29d   :  { %vm150_vm3 = vcmp.gt.f32.partialorder %v148_v27, 0.0  ;;  %vm151_vm4 = vcmp.gt.f32.partialorder %v149_v28, 0.0  ;;  %v153_v29 = vmul.f32 %v152_v25, %v148_v27  ;;  %v154_v30 = vmul.f32 %v152_v25, %v149_v28 }
 0x29f   :  { %v155_v32 = vsel %vm150_vm3, %v148_v27, %v153_v29  ;;  %v156_v33 = vsel %vm151_vm4, %v149_v28, %v154_v30 }
 0x2a0   :  { %v159_v35 = vcombine.low %v155_v32, %v156_v33 }
 0x2a2   :  { %161 = vst [vmem:[%s616_s12] sm:$0xff] %v159_v35 }
 0x2b0   :  { %v337_v20 = vpop.permute.xlu1 %336 }
 0x2b1   :  { %v344_v22 = vmul.f32 %v337_v20, %v550_v31 }
 0x2b4   :  { %v342_v36 = vpop.permute.xlu0 %341  ;;  %v353_v38 = vpop.permute.xlu1 %352 }
 0x2b5   :  { %v360_v39 = vadd.f32 %v353_v38, %v344_v22  ;;  %v345_v40 = vmul.f32 %v342_v36, %v552_v34 }
 0x2b7   :  { %vm362_vm5 = vcmp.gt.f32.partialorder %v360_v39, 0.0  ;;  %v365_v41 = vmul.f32 %v364_v37, %v360_v39 }
 0x2b8   :  { %v358_v42 = vpop.permute.xlu0 %357 }
 0x2b9   :  { %v367_v43 = vsel %vm362_vm5, %v360_v39, %v365_v41  ;;  %v361_v44 = vadd.f32 %v358_v42, %v345_v40 }
 0x2ba   :  { %369 = vst.msk [vmem:[%s618_s13] sm:$0xff] %vm306_vm2, %v367_v43 }
 0x2bb   :  { %vm363_vm6 = vcmp.gt.f32.partialorder %v361_v44, 0.0  ;;  %v366_v31 = vmul.f32 %v364_v37, %v361_v44 }
 0x2bd   :  { %v368_v45 = vsel %vm363_vm6, %v361_v44, %v366_v31 }
 0x2be   :  { %370 = vst.msk [vmem:[%s618_s13 + $0x8] sm:$0xff] %vm306_vm2, %v368_v45 }

// kernel: unet2_forward.22
= control target key start
LH: loop header
LB: loop body
LE: loop exit
PB: predicated region body
PF: predicated region fallthrough
CT: control target
= control target key end

     0   :  { %v270_v0 = vmov 0   ;;  %vm125_vm0 = vcmask 130048   ;;  %vm170_vm1 = vcmask 523264   ;;  %s372_s0 = inlined_call_operand.vmem [shape: bf16[144,64], index: 0, kind: input, shape index: {}]   ;;  %s373_s1 = inlined_call_operand.vmem [shape: bf16[16,144], index: 1, kind: input, shape index: {}]   ;;  %s374_s2 = inlined_call_operand.vmem [shape: f32[16,1], index: 2, kind: input, shape index: {}]   ;;  %s375_s3 = inlined_call_operand.vmem [shape: f32[16,1], index: 3, kind: input, shape index: {}]   ;;  %s376_s4 = inlined_call_operand.vmem [shape: f32[16,1], index: 4, kind: input, shape index: {}]   ;;  %s377_s5 = inlined_call_operand.<no memory space> [shape: f32[1], index: 5, kind: input, shape index: {}]   ;;  %s378_s6 = inlined_call_operand.vmem [shape: f32[16,64], index: 6, kind: output, shape index: {}]  }
   0x1   :  { %129 = vmatprep.subr.bf16.mxu0 %v270_v0  ;;  %v254_v1 = vld [vmem:[%s372_s0] sm:$0xff]   ;;  %252 = vset.pattern.permute.xlu0 %v270_v0  ;;  %v255_v2 = vld [vmem:[%s372_s0 + $0x8] sm:$0xff]   ;;  %v256_v3 = vld [vmem:[%s372_s0 + $0x10] sm:$0xff]   ;;  %v228_v55 = vstv %s377_s5 }
   0x2   :  { %253 = vset.pattern.permute.xlu1 %v270_v0  ;;  %130 = vmatpush1.bf16.msra.mxu0 %v254_v1  ;;  %v257_v4 = vld [vmem:[%s372_s0 + $0x18] sm:$0xff]   ;;  %v265_v5 = vld [vmem:[%s373_s1 + $0x4] ss:$8 sps:$4 sm:$0xff]   ;;  %v260_v10 = vld [vmem:[%s372_s0 + $0x30] sm:$0xff]  }
   0x3   :  { %131 = vmatprep.subr.bf16.mxu0 %v270_v0  ;;  %v45_v6 = vld [vmem:[%s374_s2] sm:$0xff]  ;;  %250 = vmatprep.mubr.msk.bf16.mxu0 %vm125_vm0, %v265_v5  ;;  %v46_v7 = vld [vmem:[%s374_s2 + $0x8] sm:$0xff]  ;;  %v261_v11 = vld [vmem:[%s372_s0 + $0x38] sm:$0xff]  }
   0x4   :  { %54 = vperm.xlu0 %252, %v45_v6   ;;  %v258_v8 = vld [vmem:[%s372_s0 + $0x20] sm:$0xff]   ;;  %v259_v9 = vld [vmem:[%s372_s0 + $0x28] sm:$0xff]  }
   0x5   :  { %v262_v12 = vld [vmem:[%s372_s0 + $0x40] sm:$0xff]   ;;  %v48_v43 = vld [vmem:[%s375_s3 + $0x8] sm:$0xff] }
   0x6   :  { %132 = vmatpush1.bf16.msra.mxu0 %v255_v2  ;;  %v263_v13 = vld [vmem:[%s373_s1] ss:$8 sps:$4 sm:$0xff]  }
   0x7   :  { %133 = vmatprep.subr.bf16.mxu0 %v270_v0  ;;  %v47_v40 = vld [vmem:[%s375_s3] sm:$0xff]  ;;  %v50_v50 = vld [vmem:[%s376_s4 + $0x8] sm:$0xff] }
   0x8   :  { %59 = vperm.xlu0 %252, %v46_v7   ;;  %v49_v47 = vld [vmem:[%s376_s4] sm:$0xff] }
   0xa   :  { %134 = vmatpush1.bf16.msra.mxu0 %v256_v3 }
   0xb   :  { %135 = vmatprep.subr.bf16.mxu0 %v270_v0 }
   0xe   :  { %136 = vmatpush1.bf16.msra.mxu0 %v257_v4 }
   0xf   :  { %137 = vmatprep.subr.bf16.mxu0 %v270_v0 }
  0x12   :  { %138 = vmatpush1.bf16.msra.mxu0 %v258_v8 }
  0x13   :  { %139 = vmatprep.subr.bf16.mxu0 %v270_v0 }
  0x16   :  { %140 = vmatpush1.bf16.msra.mxu0 %v259_v9 }
  0x17   :  { %141 = vmatprep.subr.bf16.mxu0 %v270_v0 }
  0x1a   :  { %142 = vmatpush1.bf16.msra.mxu0 %v260_v10 }
  0x1b   :  { %143 = vmatprep.subr.bf16.mxu0 %v270_v0 }
  0x1e   :  { %144 = vmatpush1.bf16.msra.mxu0 %v261_v11 }
  0x1f   :  { %145 = vmatprep.subr.bf16.mxu0 %v270_v0 }
  0x22   :  { %146 = vmatpush1.bf16.msra.mxu0 %v262_v12 }
  0x25   :  { %162 = vmatmul.mubr.bf16.vlgmr.msra.gmra.mrb[0].mxu0 %v263_v13 }
  0x83   :  { %v55_v14 = vpop.permute.xlu0 %54 }
  0x87   :  { %v60_v18 = vpop.permute.xlu0 %59 }
  0xf8   :  { %v163_v15 = vpop.f32.mrb[0].mxu0 }
  0xf9   :  { %v164_v16 = vadd.f32 %v163_v15, %v55_v14  ;;  %v165_v17 = vpop.f32.mrb[1].mxu0 }
  0xfa   :  { %v166_v19 = vpop.f32.mrb[2].mxu0 }
  0xfb   :  { %v167_v20 = vadd.f32 %v166_v19, %v60_v18  ;;  %v168_v21 = vpop.f32.mrb[3].mxu0  ;;  %v171_v22 = vsel %vm170_vm1, %v164_v16, 0.0 }
  0xfc   :  { %172 = vadd.xlane.f32.xlu1 %v171_v22 }
  0xfd   :  { %v174_v23 = vsel %vm170_vm1, %v167_v20, 0.0 }
 0x100   :  { %175 = vadd.xlane.f32.xlu1 %v174_v23 }
 0x189   :  { %v173_v24 = vpop.xlane.xlu1 %172 }
 0x18a   :  { %v178_v25 = vmul.f32 0.015625, %v173_v24 }
 0x18c   :  { %v180_v26 = vsub.f32 %v164_v16, %v178_v25 }
 0x18d   :  { %v176_v27 = vpop.xlane.xlu1 %175 }
 0x18e   :  { %v179_v28 = vmul.f32 0.015625, %v176_v27  ;;  %v182_v29 = vmul.f32 %v180_v26, %v180_v26 }
 0x190   :  { %v181_v30 = vsub.f32 %v167_v20, %v179_v28  ;;  %v184_v31 = vsel %vm170_vm1, %v182_v29, 0.0 }
 0x191   :  { %185 = vadd.xlane.f32.xlu0 %v184_v31 }
 0x192   :  { %v183_v32 = vmul.f32 %v181_v30, %v181_v30 }
 0x194   :  { %v187_v33 = vsel %vm170_vm1, %v183_v32, 0.0 }
 0x195   :  { %188 = vadd.xlane.f32.xlu1 %v187_v33 }
 0x21e   :  { %v186_v34 = vpop.xlane.xlu0 %185 }
 0x21f   :  { %v190_v35 = vmul.f32 0.015625, %v186_v34 }
 0x221   :  { %v192_v36 = vadd.f32 1e-05, %v190_v35 }
 0x222   :  { %v189_v37 = vpop.xlane.xlu1 %188 }
 0x223   :  { %266 = vrsqrt.f32 %v192_v36  ;;  %v191_v38 = vmul.f32 0.015625, %v189_v37 }
 0x225   :  { %v193_v39 = vadd.f32 1e-05, %v191_v38 }
 0x227   :  { %268 = vrsqrt.f32 %v193_v39 }
 0x22d   :  { %v267_v41 = vpop.eup %266 }
 0x22e   :  { %v196_v42 = vmul.f32 %v267_v41, %v47_v40 }
 0x230   :  { %200 = vperm.xlu1 %253, %v196_v42   ;;  %v210_v46 = vmul.f32 %v196_v42, %v178_v25 }
 0x231   :  { %v269_v44 = vpop.eup %268 }
 0x232   :  { %v197_v45 = vmul.f32 %v269_v44, %v48_v43  ;;  %v212_v48 = vsub.f32 %v49_v47, %v210_v46 }
 0x234   :  { %205 = vperm.xlu1 %253, %v197_v45   ;;  %v211_v49 = vmul.f32 %v197_v45, %v179_v28 }
 0x236   :  { %v213_v51 = vsub.f32 %v50_v50, %v211_v49 }
 0x238   :  { %216 = vperm.xlu1 %253, %v212_v48  }
 0x23c   :  { %221 = vperm.xlu1 %253, %v213_v51  }
 0x2af   :  { %v201_v52 = vpop.permute.xlu1 %200 }
 0x2b0   :  { %v208_v54 = vmul.f32 %v201_v52, %v164_v16 }
 0x2b3   :  { %v206_v53 = vpop.permute.xlu1 %205 }
 0x2b4   :  { %v209_v58 = vmul.f32 %v206_v53, %v167_v20 }
 0x2b7   :  { %v217_v56 = vpop.permute.xlu1 %216 }
 0x2b8   :  { %v224_v57 = vadd.f32 %v217_v56, %v208_v54 }
 0x2ba   :  { %vm226_vm2 = vcmp.gt.f32.partialorder %v224_v57, 0.0  ;;  %v229_v59 = vmul.f32 %v228_v55, %v224_v57 }
 0x2bb   :  { %v222_v60 = vpop.permute.xlu1 %221 }
 0x2bc   :  { %v231_v61 = vsel %vm226_vm2, %v224_v57, %v229_v59  ;;  %v225_v62 = vadd.f32 %v222_v60, %v209_v58 }
 0x2bd   :  { %233 = vst.msk [vmem:[%s378_s6] sm:$0xff] %vm170_vm1, %v231_v61 }
 0x2be   :  { %vm227_vm3 = vcmp.gt.f32.partialorder %v225_v62, 0.0  ;;  %v230_v63 = vmul.f32 %v228_v55, %v225_v62 }
 0x2c0   :  { %v232_v0 = vsel %vm227_vm3, %v225_v62, %v230_v63 }
 0x2c1   :  { %234 = vst.msk [vmem:[%s378_s6 + $0x8] sm:$0xff] %vm170_vm1, %v232_v0 }

// kernel: unet2_forward.23
= control target key start
LH: loop header
LB: loop body
LE: loop exit
PB: predicated region body
PF: predicated region fallthrough
CT: control target
= control target key end

     0   :  { %v404_v0 = vmov 0.0   ;;  %v405_v1 = vmov 0   ;;  %vm406_vm0 = vmmov 0   ;;  %vm64_vm1 = vcmask 130048   ;;  %s584_s0 = inlined_call_operand.vmem [shape: bf16[16,64], index: 0, kind: input, shape index: {}]   ;;  %s585_s6 = inlined_call_operand.vmem [shape: bf16[144,16], index: 6, kind: input, shape index: {}]   ;;  %s586_s1 = inlined_call_operand.vmem [shape: bf16[4,16], index: 1, kind: input, shape index: {}]   ;;  %s587_s7 = inlined_call_operand.vmem [shape: bf16[16,144], index: 7, kind: input, shape index: {}]   ;;  %s588_s2 = inlined_call_operand.vmem [shape: f32[4,1], index: 2, kind: input, shape index: {}]   ;;  %s589_s8 = inlined_call_operand.vmem [shape: f32[16,1], index: 8, kind: input, shape index: {}]   ;;  %s590_s3 = inlined_call_operand.vmem [shape: f32[4,1], index: 3, kind: input, shape index: {}]   ;;  %s591_s4 = inlined_call_operand.vmem [shape: f32[4,1], index: 4, kind: input, shape index: {}]   ;;  %s592_s9 = inlined_call_operand.vmem [shape: f32[16,1], index: 9, kind: input, shape index: {}]   ;;  %s593_s10 = inlined_call_operand.vmem [shape: f32[16,1], index: 10, kind: input, shape index: {}]   ;;  %s594_s5 = inlined_call_operand.<no memory space> [shape: f32[1], index: 5, kind: input, shape index: {}]   ;;  %s595_s12 = inlined_call_operand.vmem [shape: f32[4,64], index: 12, kind: output, shape index: {0}]   ;;  %s596_s11 = inlined_call_operand.<no memory space> [shape: f32[1], index: 11, kind: input, shape index: {}]   ;;  %s597_s13 = inlined_call_operand.vmem [shape: f32[16,16], index: 13, kind: output, shape index: {1}]  }
   0x1   :  { %374 = vmatprep.subr.bf16.mxu0 %v404_v0  ;;  %245 = vmatprep.subr.bf16.mxu1 %v405_v1  ;;  %v385_v2 = vld [vmem:[%s584_s0] sm:$0xff]   ;;  %v387_v5 = vld [vmem:[%s585_s6 + $0x8] sm:$0xff]   ;;  %v388_v6 = vld [vmem:[%s585_s6 + $0x10] sm:$0xff]   ;;  %vm108_vm2 = vcmask 519168  }
   0x2   :  { %v386_v3 = vld [vmem:[%s585_s6] sm:$0xff]   ;;  %376 = vmatprep.mubr.msk.bf16.mxu0 %vm406_vm0, %v404_v0  ;;  %383 = vset.pattern.permute.xlu0 %v405_v1  ;;  %v389_v7 = vld [vmem:[%s585_s6 + $0x18] sm:$0xff]   ;;  %v163_v10 = vld [vmem:[%s589_s8 + $0x8] sm:$0xff] }
   0x3   :  { %375 = vmatpush3.bf16.msra.mxu0 %v385_v2  ;;  %v48_v4 = vld [vmem:[%s586_s1] sm:$0x3]  ;;  %384 = vset.pattern.permute.xlu1 %v405_v1  ;;  %v397_v8 = vld [vmem:[%s587_s7 + $0x4] ss:$8 sps:$4 sm:$0xff]   ;;  %v392_v14 = vld [vmem:[%s585_s6 + $0x30] sm:$0xff]  }
   0x4   :  { %246 = vmatpush1.bf16.msra.mxu1 %v386_v3  ;;  %v49_v9 = vld [vmem:[%s588_s2] sm:$0xf]  ;;  %371 = vmatprep.mubr.msk.bf16.mxu1 %vm64_vm1, %v397_v8  ;;  %v391_v13 = vld [vmem:[%s585_s6 + $0x28] sm:$0xff]   ;;  %v393_v15 = vld [vmem:[%s585_s6 + $0x38] sm:$0xff]  }
   0x5   :  { %247 = vmatprep.subr.bf16.mxu1 %v405_v1  ;;  %55 = vperm.xlu0 %383, %v49_v9   ;;  %v162_v11 = vld [vmem:[%s589_s8] sm:$0xff]  ;;  %v167_v9 = vld [vmem:[%s593_s10 + $0x8] sm:$0xff] }
   0x6   :  { %377 = vmatmul.mubr.msk.bf16.vlgmr.msra.gmra.mrb[0].mxu0 %vm64_vm1, %v48_v4  ;;  %176 = vperm.xlu1 %384, %v163_v10   ;;  %v390_v12 = vld [vmem:[%s585_s6 + $0x20] sm:$0xff]   ;;  %v165_v4 = vld [vmem:[%s592_s9 + $0x8] sm:$0xff] }
   0x7   :  { %v394_v16 = vld [vmem:[%s585_s6 + $0x40] sm:$0xff]  }
   0x8   :  { %248 = vmatpush1.bf16.msra.mxu1 %v387_v5  ;;  %v395_v17 = vld [vmem:[%s587_s7] ss:$8 sps:$4 sm:$0xff]  }
   0x9   :  { %249 = vmatprep.subr.bf16.mxu1 %v405_v1  ;;  %171 = vperm.xlu0 %383, %v162_v11   ;;  %v50_v53 = vld [vmem:[%s590_s3] sm:$0xf] }
   0xa   :  { %v51_v56 = vld [vmem:[%s591_s4] sm:$0xf] }
   0xb   :  { %v166_v8 = vld [vmem:[%s593_s10] sm:$0xff] }
   0xc   :  { %250 = vmatpush1.bf16.msra.mxu1 %v388_v6 }
   0xd   :  { %251 = vmatprep.subr.bf16.mxu1 %v405_v1 }
  0x10   :  { %252 = vmatpush1.bf16.msra.mxu1 %v389_v7 }
  0x11   :  { %253 = vmatprep.subr.bf16.mxu1 %v405_v1 }
  0x14   :  { %254 = vmatpush1.bf16.msra.mxu1 %v390_v12 }
  0x15   :  { %255 = vmatprep.subr.bf16.mxu1 %v405_v1 }
  0x18   :  { %256 = vmatpush1.bf16.msra.mxu1 %v391_v13 }
  0x19   :  { %257 = vmatprep.subr.bf16.mxu1 %v405_v1 }
  0x1c   :  { %258 = vmatpush1.bf16.msra.mxu1 %v392_v14 }
  0x1d   :  { %259 = vmatprep.subr.bf16.mxu1 %v405_v1 }
  0x20   :  { %260 = vmatpush1.bf16.msra.mxu1 %v393_v15  ;;  %v138_v15 = vstv %s594_s5 }
  0x21   :  { %261 = vmatprep.subr.bf16.mxu1 %v405_v1  ;;  %v164_v1 = vld [vmem:[%s592_s9] sm:$0xff] }
  0x24   :  { %262 = vmatpush1.bf16.msra.mxu1 %v394_v16 }
  0x27   :  { %278 = vmatmul.mubr.bf16.vlgmr.msra.gmra.mrb[0].mxu1 %v395_v17 }
  0x84   :  { %v56_v18 = vpop.permute.xlu0 %55 }
  0x85   :  { %v177_v25 = vpop.permute.xlu1 %176 }
  0x88   :  { %v172_v26 = vpop.permute.xlu0 %171 }
  0xd9   :  { %v102_v19 = vpop.f32.mrb[0].mxu0 }
  0xda   :  { %v527_v20 = vadd.f32 %v102_v19, %v56_v18  ;;  %v378_v21 = vpop.f32.mrb[1].mxu0 }
  0xdb   :  { %v105_v22 = vpop.f32.mrb[2].mxu0 }
  0xdc   :  { %v109_v23 = vsel %vm108_vm2, %v527_v20, 0.0  ;;  %v379_v24 = vpop.f32.mrb[3].mxu0 }
  0xdd   :  { %110 = vadd.xlane.f32.xlu1 %v109_v23  ;;  %v343_v24 = vstv %s596_s11 }
  0xfa   :  { %v279_v27 = vpop.f32.mrb[0].mxu1 }
  0xfb   :  { %v531_v28 = vadd.f32 %v279_v27, %v172_v26  ;;  %v281_v29 = vpop.f32.mrb[1].mxu1 }
  0xfc   :  { %v282_v30 = vpop.f32.mrb[2].mxu1 }
  0xfd   :  { %v533_v31 = vadd.f32 %v282_v30, %v177_v25  ;;  %v284_v32 = vpop.f32.mrb[3].mxu1  ;;  %v286_v33 = vsel %vm64_vm1, %v531_v28, 0.0 }
  0xfe   :  { %287 = vadd.xlane.f32.xlu0 %v286_v33 }
  0xff   :  { %v289_v34 = vsel %vm64_vm1, %v533_v31, 0.0 }
 0x102   :  { %290 = vadd.xlane.f32.xlu0 %v289_v34 }
 0x16a   :  { %v111_v35 = vpop.xlane.xlu1 %110 }
 0x16b   :  { %v113_v36 = vmul.f32 0.015625, %v111_v35 }
 0x16d   :  { %v114_v37 = vsub.f32 %v527_v20, %v113_v36 }
 0x16f   :  { %v115_v38 = vmul.f32 %v114_v37, %v114_v37 }
 0x171   :  { %v116_v39 = vsel %vm108_vm2, %v115_v38, 0.0 }
 0x172   :  { %117 = vadd.xlane.f32.xlu1 %v116_v39 }
 0x18b   :  { %v288_v40 = vpop.xlane.xlu0 %287 }
 0x18c   :  { %v293_v41 = vmul.f32 0.0625, %v288_v40 }
 0x18e   :  { %v295_v42 = vsub.f32 %v531_v28, %v293_v41 }
 0x18f   :  { %v291_v43 = vpop.xlane.xlu0 %290 }
 0x190   :  { %v294_v44 = vmul.f32 0.0625, %v291_v43  ;;  %v297_v45 = vmul.f32 %v295_v42, %v295_v42 }
 0x192   :  { %v296_v46 = vsub.f32 %v533_v31, %v294_v44  ;;  %v299_v47 = vsel %vm64_vm1, %v297_v45, 0.0 }
 0x193   :  { %300 = vadd.xlane.f32.xlu0 %v299_v47 }
 0x194   :  { %v298_v48 = vmul.f32 %v296_v46, %v296_v46 }
 0x196   :  { %v302_v49 = vsel %vm64_vm1, %v298_v48, 0.0 }
 0x197   :  { %303 = vadd.xlane.f32.xlu1 %v302_v49 }
 0x1ff   :  { %v118_v50 = vpop.xlane.xlu1 %117 }
 0x200   :  { %v119_v51 = vmul.f32 0.015625, %v118_v50 }
 0x202   :  { %v120_v52 = vadd.f32 1e-05, %v119_v51 }
 0x204   :  { %398 = vrsqrt.f32 %v120_v52 }
 0x20e   :  { %v399_v54 = vpop.eup %398 }
 0x20f   :  { %v122_v55 = vmul.f32 %v399_v54, %v50_v53 }
 0x211   :  { %125 = vperm.xlu0 %383, %v122_v55   ;;  %v129_v57 = vmul.f32 %v122_v55, %v113_v36 }
 0x213   :  { %v130_v58 = vsub.f32 %v51_v56, %v129_v57 }
 0x215   :  { %133 = vperm.xlu0 %383, %v130_v58  }
 0x220   :  { %v301_v59 = vpop.xlane.xlu0 %300 }
 0x221   :  { %v305_v60 = vmul.f32 0.0625, %v301_v59 }
 0x223   :  { %v307_v61 = vadd.f32 1e-05, %v305_v60 }
 0x224   :  { %v304_v62 = vpop.xlane.xlu1 %303 }
 0x225   :  { %400 = vrsqrt.f32 %v307_v61  ;;  %v306_v63 = vmul.f32 0.0625, %v304_v62 }
 0x227   :  { %v308_v0 = vadd.f32 1e-05, %v306_v63 }
 0x229   :  { %402 = vrsqrt.f32 %v308_v0 }
 0x22f   :  { %v401_v2 = vpop.eup %400 }
 0x230   :  { %v311_v3 = vmul.f32 %v401_v2, %v164_v1 }
 0x232   :  { %315 = vperm.xlu1 %384, %v311_v3   ;;  %v325_v7 = vmul.f32 %v311_v3, %v293_v41 }
 0x233   :  { %v403_v5 = vpop.eup %402 }
 0x234   :  { %v312_v6 = vmul.f32 %v403_v5, %v165_v4  ;;  %v327_v11 = vsub.f32 %v166_v8, %v325_v7 }
 0x236   :  { %320 = vperm.xlu1 %384, %v312_v6   ;;  %v326_v10 = vmul.f32 %v312_v6, %v294_v44 }
 0x238   :  { %v328_v12 = vsub.f32 %v167_v9, %v326_v10 }
 0x23a   :  { %331 = vperm.xlu1 %384, %v327_v11   ;;  %336 = vperm.xlu0 %383, %v328_v12  }
 0x290   :  { %v126_v13 = vpop.permute.xlu0 %125 }
 0x291   :  { %v128_v14 = vmul.f32 %v126_v13, %v527_v20 }
 0x294   :  { %v134_v16 = vpop.permute.xlu0 %133 }
 0x295   :  { %v136_v17 = vadd.f32 %v134_v16, %v128_v14 }
 0x297   :  { %vm137_vm3 = vcmp.gt.f32.partialorder %v136_v17, 0.0  ;;  %v139_v18 = vmul.f32 %v138_v15, %v136_v17 }
 0x299   :  { %v140_v19 = vsel %vm137_vm3, %v136_v17, %v139_v18 }
 0x29a   :  { %141 = vst.msk [vmem:[%s595_s12] sm:$0xf] %vm108_vm2, %v140_v19 }
 0x2b1   :  { %v316_v21 = vpop.permute.xlu1 %315 }
 0x2b2   :  { %v323_v23 = vmul.f32 %v316_v21, %v531_v28 }
 0x2b5   :  { %v321_v22 = vpop.permute.xlu1 %320 }
 0x2b6   :  { %v324_v20 = vmul.f32 %v321_v22, %v533_v31 }
 0x2b9   :  { %v337_v25 = vpop.permute.xlu0 %336  ;;  %v332_v26 = vpop.permute.xlu1 %331 }
 0x2ba   :  { %v340_v27 = vadd.f32 %v337_v25, %v324_v20  ;;  %v339_v29 = vadd.f32 %v332_v26, %v323_v23 }
 0x2bc   :  { %vm342_vm4 = vcmp.gt.f32.partialorder %v340_v27, 0.0  ;;  %v345_v30 = vmul.f32 %v343_v24, %v340_v27  ;;  %vm341_vm5 = vcmp.gt.f32.partialorder %v339_v29, 0.0  ;;  %v344_v32 = vmul.f32 %v343_v24, %v339_v29 }
 0x2be   :  { %v347_v33 = vsel %vm342_vm4, %v340_v27, %v345_v30  ;;  %v346_v34 = vsel %vm341_vm5, %v339_v29, %v344_v32 }
 0x2bf   :  { %349 = vst.msk [vmem:[%s597_s13 + $0x8] sm:$0xff] %vm64_vm1, %v347_v33  ;;  %348 = vst.msk [vmem:[%s597_s13] sm:$0xff] %vm64_vm1, %v346_v34 }

// kernel: unet2_forward.24
= control target key start
LH: loop header
LB: loop body
LE: loop exit
PB: predicated region body
PF: predicated region fallthrough
CT: control target
= control target key end

     0   :  { %v269_v0 = vmov 0   ;;  %vm125_vm0 = vcmask 130048   ;;  %s372_s0 = inlined_call_operand.vmem [shape: bf16[144,16], index: 0, kind: input, shape index: {}]   ;;  %s373_s1 = inlined_call_operand.vmem [shape: bf16[16,144], index: 1, kind: input, shape index: {}]   ;;  %s374_s2 = inlined_call_operand.vmem [shape: f32[16,1], index: 2, kind: input, shape index: {}]   ;;  %s375_s3 = inlined_call_operand.vmem [shape: f32[16,1], index: 3, kind: input, shape index: {}]   ;;  %s376_s4 = inlined_call_operand.vmem [shape: f32[16,1], index: 4, kind: input, shape index: {}]   ;;  %s377_s5 = inlined_call_operand.<no memory space> [shape: f32[1], index: 5, kind: input, shape index: {}]   ;;  %s378_s6 = inlined_call_operand.vmem [shape: f32[16,16], index: 6, kind: output, shape index: {}]  }
   0x1   :  { %129 = vmatprep.subr.bf16.mxu0 %v269_v0  ;;  %v253_v1 = vld [vmem:[%s372_s0] sm:$0xff]   ;;  %251 = vset.pattern.permute.xlu0 %v269_v0  ;;  %v254_v2 = vld [vmem:[%s372_s0 + $0x8] sm:$0xff]   ;;  %v255_v3 = vld [vmem:[%s372_s0 + $0x10] sm:$0xff]   ;;  %v227_v55 = vstv %s377_s5 }
   0x2   :  { %252 = vset.pattern.permute.xlu1 %v269_v0  ;;  %130 = vmatpush1.bf16.msra.mxu0 %v253_v1  ;;  %v256_v4 = vld [vmem:[%s372_s0 + $0x18] sm:$0xff]   ;;  %v264_v5 = vld [vmem:[%s373_s1 + $0x4] ss:$8 sps:$4 sm:$0xff]   ;;  %v259_v10 = vld [vmem:[%s372_s0 + $0x30] sm:$0xff]  }
   0x3   :  { %131 = vmatprep.subr.bf16.mxu0 %v269_v0  ;;  %v45_v6 = vld [vmem:[%s374_s2] sm:$0xff]  ;;  %249 = vmatprep.mubr.msk.bf16.mxu0 %vm125_vm0, %v264_v5  ;;  %v46_v7 = vld [vmem:[%s374_s2 + $0x8] sm:$0xff]  ;;  %v260_v11 = vld [vmem:[%s372_s0 + $0x38] sm:$0xff]  }
   0x4   :  { %54 = vperm.xlu0 %251, %v45_v6   ;;  %v257_v8 = vld [vmem:[%s372_s0 + $0x20] sm:$0xff]   ;;  %v258_v9 = vld [vmem:[%s372_s0 + $0x28] sm:$0xff]  }
   0x5   :  { %v261_v12 = vld [vmem:[%s372_s0 + $0x40] sm:$0xff]   ;;  %v48_v43 = vld [vmem:[%s375_s3 + $0x8] sm:$0xff] }
   0x6   :  { %132 = vmatpush1.bf16.msra.mxu0 %v254_v2  ;;  %v262_v13 = vld [vmem:[%s373_s1] ss:$8 sps:$4 sm:$0xff]  }
   0x7   :  { %133 = vmatprep.subr.bf16.mxu0 %v269_v0  ;;  %v47_v40 = vld [vmem:[%s375_s3] sm:$0xff]  ;;  %v50_v50 = vld [vmem:[%s376_s4 + $0x8] sm:$0xff] }
   0x8   :  { %59 = vperm.xlu0 %251, %v46_v7   ;;  %v49_v47 = vld [vmem:[%s376_s4] sm:$0xff] }
   0xa   :  { %134 = vmatpush1.bf16.msra.mxu0 %v255_v3 }
   0xb   :  { %135 = vmatprep.subr.bf16.mxu0 %v269_v0 }
   0xe   :  { %136 = vmatpush1.bf16.msra.mxu0 %v256_v4 }
   0xf   :  { %137 = vmatprep.subr.bf16.mxu0 %v269_v0 }
  0x12   :  { %138 = vmatpush1.bf16.msra.mxu0 %v257_v8 }
  0x13   :  { %139 = vmatprep.subr.bf16.mxu0 %v269_v0 }
  0x16   :  { %140 = vmatpush1.bf16.msra.mxu0 %v258_v9 }
  0x17   :  { %141 = vmatprep.subr.bf16.mxu0 %v269_v0 }
  0x1a   :  { %142 = vmatpush1.bf16.msra.mxu0 %v259_v10 }
  0x1b   :  { %143 = vmatprep.subr.bf16.mxu0 %v269_v0 }
  0x1e   :  { %144 = vmatpush1.bf16.msra.mxu0 %v260_v11 }
  0x1f   :  { %145 = vmatprep.subr.bf16.mxu0 %v269_v0 }
  0x22   :  { %146 = vmatpush1.bf16.msra.mxu0 %v261_v12 }
  0x25   :  { %162 = vmatmul.mubr.bf16.vlgmr.msra.gmra.mrb[0].mxu0 %v262_v13 }
  0x83   :  { %v55_v14 = vpop.permute.xlu0 %54 }
  0x87   :  { %v60_v18 = vpop.permute.xlu0 %59 }
  0xf8   :  { %v163_v15 = vpop.f32.mrb[0].mxu0 }
  0xf9   :  { %v164_v16 = vadd.f32 %v163_v15, %v55_v14  ;;  %v165_v17 = vpop.f32.mrb[1].mxu0 }
  0xfa   :  { %v166_v19 = vpop.f32.mrb[2].mxu0 }
  0xfb   :  { %v167_v20 = vadd.f32 %v166_v19, %v60_v18  ;;  %v168_v21 = vpop.f32.mrb[3].mxu0  ;;  %v170_v22 = vsel %vm125_vm0, %v164_v16, 0.0 }
  0xfc   :  { %171 = vadd.xlane.f32.xlu1 %v170_v22 }
  0xfd   :  { %v173_v23 = vsel %vm125_vm0, %v167_v20, 0.0 }
 0x100   :  { %174 = vadd.xlane.f32.xlu1 %v173_v23 }
 0x189   :  { %v172_v24 = vpop.xlane.xlu1 %171 }
 0x18a   :  { %v177_v25 = vmul.f32 0.0625, %v172_v24 }
 0x18c   :  { %v179_v26 = vsub.f32 %v164_v16, %v177_v25 }
 0x18d   :  { %v175_v27 = vpop.xlane.xlu1 %174 }
 0x18e   :  { %v178_v28 = vmul.f32 0.0625, %v175_v27  ;;  %v181_v29 = vmul.f32 %v179_v26, %v179_v26 }
 0x190   :  { %v180_v30 = vsub.f32 %v167_v20, %v178_v28  ;;  %v183_v31 = vsel %vm125_vm0, %v181_v29, 0.0 }
 0x191   :  { %184 = vadd.xlane.f32.xlu0 %v183_v31 }
 0x192   :  { %v182_v32 = vmul.f32 %v180_v30, %v180_v30 }
 0x194   :  { %v186_v33 = vsel %vm125_vm0, %v182_v32, 0.0 }
 0x195   :  { %187 = vadd.xlane.f32.xlu1 %v186_v33 }
 0x21e   :  { %v185_v34 = vpop.xlane.xlu0 %184 }
 0x21f   :  { %v189_v35 = vmul.f32 0.0625, %v185_v34 }
 0x221   :  { %v191_v36 = vadd.f32 1e-05, %v189_v35 }
 0x222   :  { %v188_v37 = vpop.xlane.xlu1 %187 }
 0x223   :  { %265 = vrsqrt.f32 %v191_v36  ;;  %v190_v38 = vmul.f32 0.0625, %v188_v37 }
 0x225   :  { %v192_v39 = vadd.f32 1e-05, %v190_v38 }
 0x227   :  { %267 = vrsqrt.f32 %v192_v39 }
 0x22d   :  { %v266_v41 = vpop.eup %265 }
 0x22e   :  { %v195_v42 = vmul.f32 %v266_v41, %v47_v40 }
 0x230   :  { %199 = vperm.xlu1 %252, %v195_v42   ;;  %v209_v46 = vmul.f32 %v195_v42, %v177_v25 }
 0x231   :  { %v268_v44 = vpop.eup %267 }
 0x232   :  { %v196_v45 = vmul.f32 %v268_v44, %v48_v43  ;;  %v211_v48 = vsub.f32 %v49_v47, %v209_v46 }
 0x234   :  { %204 = vperm.xlu1 %252, %v196_v45   ;;  %v210_v49 = vmul.f32 %v196_v45, %v178_v28 }
 0x236   :  { %v212_v51 = vsub.f32 %v50_v50, %v210_v49 }
 0x238   :  { %215 = vperm.xlu1 %252, %v211_v48  }
 0x23c   :  { %220 = vperm.xlu1 %252, %v212_v51  }
 0x2af   :  { %v200_v52 = vpop.permute.xlu1 %199 }
 0x2b0   :  { %v207_v54 = vmul.f32 %v200_v52, %v164_v16 }
 0x2b3   :  { %v205_v53 = vpop.permute.xlu1 %204 }
 0x2b4   :  { %v208_v58 = vmul.f32 %v205_v53, %v167_v20 }
 0x2b7   :  { %v216_v56 = vpop.permute.xlu1 %215 }
 0x2b8   :  { %v223_v57 = vadd.f32 %v216_v56, %v207_v54 }
 0x2ba   :  { %vm225_vm1 = vcmp.gt.f32.partialorder %v223_v57, 0.0  ;;  %v228_v59 = vmul.f32 %v227_v55, %v223_v57 }
 0x2bb   :  { %v221_v60 = vpop.permute.xlu1 %220 }
 0x2bc   :  { %v230_v61 = vsel %vm225_vm1, %v223_v57, %v228_v59  ;;  %v224_v62 = vadd.f32 %v221_v60, %v208_v58 }
 0x2bd   :  { %232 = vst.msk [vmem:[%s378_s6] sm:$0xff] %vm125_vm0, %v230_v61 }
 0x2be   :  { %vm226_vm2 = vcmp.gt.f32.partialorder %v224_v62, 0.0  ;;  %v229_v63 = vmul.f32 %v227_v55, %v224_v62 }
 0x2c0   :  { %v231_v0 = vsel %vm226_vm2, %v224_v62, %v229_v63 }
 0x2c1   :  { %233 = vst.msk [vmem:[%s378_s6 + $0x8] sm:$0xff] %vm125_vm0, %v231_v0 }

// kernel: mul.61
= control target key start
LH: loop header
LB: loop body
LE: loop exit
PB: predicated region body
PF: predicated region fallthrough
CT: control target
= control target key end

     0   :  { %s34_s0 = inlined_call_operand.vmem [shape: f32[1,4], index: 0, kind: input, shape index: {}]   ;;  %s35_s1 = inlined_call_operand.vmem [shape: f32[1,4], index: 1, kind: input, shape index: {}]   ;;  %s36_s2 = inlined_call_operand.vmem [shape: f32[1,4], index: 2, kind: output, shape index: {}]  }
   0x1   :  { %v3_v0 = vld [vmem:[%s34_s0] sm:$0x1] }
   0x2   :  { %v4_v1 = vld [vmem:[%s35_s1] sm:$0x1] }
   0x3   :  { %v7_v2 = vmul.f32 %v4_v1, %v3_v0 }
   0x5   :  { %9 = vst [vmem:[%s36_s2] sm:$0x1] %v7_v2 }

// kernel: unet2_forward.25
= control target key start
LH: loop header
LB: loop body
LE: loop exit
PB: predicated region body
PF: predicated region fallthrough
CT: control target
= control target key end

     0   :  { %v405_v0 = vmov 0.0   ;;  %v406_v1 = vmov 0   ;;  %vm407_vm0 = vmmov 0   ;;  %vm64_vm1 = vcmask 130048   ;;  %s585_s0 = inlined_call_operand.vmem [shape: bf16[16,16], index: 0, kind: input, shape index: {}]   ;;  %s586_s6 = inlined_call_operand.vmem [shape: bf16[144,4], index: 6, kind: input, shape index: {}]   ;;  %s587_s1 = inlined_call_operand.vmem [shape: bf16[4,16], index: 1, kind: input, shape index: {}]   ;;  %s588_s7 = inlined_call_operand.vmem [shape: bf16[16,144], index: 7, kind: input, shape index: {}]   ;;  %s589_s2 = inlined_call_operand.vmem [shape: f32[4,1], index: 2, kind: input, shape index: {}]   ;;  %s590_s8 = inlined_call_operand.vmem [shape: f32[16,1], index: 8, kind: input, shape index: {}]   ;;  %s591_s3 = inlined_call_operand.vmem [shape: f32[4,1], index: 3, kind: input, shape index: {}]   ;;  %s592_s4 = inlined_call_operand.vmem [shape: f32[4,1], index: 4, kind: input, shape index: {}]   ;;  %s593_s9 = inlined_call_operand.vmem [shape: f32[16,1], index: 9, kind: input, shape index: {}]   ;;  %s594_s10 = inlined_call_operand.vmem [shape: f32[16,1], index: 10, kind: input, shape index: {}]   ;;  %s595_s5 = inlined_call_operand.<no memory space> [shape: f32[1], index: 5, kind: input, shape index: {}]   ;;  %s596_s12 = inlined_call_operand.vmem [shape: f32[4,16], index: 12, kind: output, shape index: {0}]   ;;  %s597_s11 = inlined_call_operand.<no memory space> [shape: f32[1], index: 11, kind: input, shape index: {}]   ;;  %s598_s13 = inlined_call_operand.vmem [shape: f32[16,4], index: 13, kind: output, shape index: {1}]  }
   0x1   :  { %375 = vmatprep.subr.bf16.mxu0 %v405_v0  ;;  %245 = vmatprep.subr.bf16.mxu1 %v406_v1  ;;  %v386_v2 = vld [vmem:[%s585_s0] sm:$0xff]   ;;  %v388_v5 = vld [vmem:[%s586_s6 + $0x8] sm:$0xff]   ;;  %v389_v6 = vld [vmem:[%s586_s6 + $0x10] sm:$0xff]   ;;  %vm108_vm2 = vcmask 125952   ;;  %vm286_vm3 = vcmask 31744  }
   0x2   :  { %v387_v3 = vld [vmem:[%s586_s6] sm:$0xff]   ;;  %377 = vmatprep.mubr.msk.bf16.mxu0 %vm407_vm0, %v405_v0  ;;  %384 = vset.pattern.permute.xlu0 %v406_v1  ;;  %v390_v7 = vld [vmem:[%s586_s6 + $0x18] sm:$0xff]   ;;  %v163_v10 = vld [vmem:[%s590_s8 + $0x8] sm:$0xff] }
   0x3   :  { %376 = vmatpush3.bf16.msra.mxu0 %v386_v2  ;;  %v48_v4 = vld [vmem:[%s587_s1] sm:$0x3]  ;;  %385 = vset.pattern.permute.xlu1 %v406_v1  ;;  %v398_v8 = vld [vmem:[%s588_s7 + $0x4] ss:$8 sps:$4 sm:$0xff]   ;;  %v393_v14 = vld [vmem:[%s586_s6 + $0x30] sm:$0xff]  }
   0x4   :  { %246 = vmatpush1.bf16.msra.mxu1 %v387_v3  ;;  %v49_v9 = vld [vmem:[%s589_s2] sm:$0xf]  ;;  %372 = vmatprep.mubr.msk.bf16.mxu1 %vm64_vm1, %v398_v8  ;;  %v392_v13 = vld [vmem:[%s586_s6 + $0x28] sm:$0xff]   ;;  %v394_v15 = vld [vmem:[%s586_s6 + $0x38] sm:$0xff]  }
   0x5   :  { %247 = vmatprep.subr.bf16.mxu1 %v406_v1  ;;  %55 = vperm.xlu0 %384, %v49_v9   ;;  %v162_v11 = vld [vmem:[%s590_s8] sm:$0xff]  ;;  %v167_v9 = vld [vmem:[%s594_s10 + $0x8] sm:$0xff] }
   0x6   :  { %378 = vmatmul.mubr.msk.bf16.vlgmr.msra.gmra.mrb[0].mxu0 %vm64_vm1, %v48_v4  ;;  %176 = vperm.xlu1 %385, %v163_v10   ;;  %v391_v12 = vld [vmem:[%s586_s6 + $0x20] sm:$0xff]   ;;  %v165_v4 = vld [vmem:[%s593_s9 + $0x8] sm:$0xff] }
   0x7   :  { %v395_v16 = vld [vmem:[%s586_s6 + $0x40] sm:$0xff]  }
   0x8   :  { %248 = vmatpush1.bf16.msra.mxu1 %v388_v5  ;;  %v396_v17 = vld [vmem:[%s588_s7] ss:$8 sps:$4 sm:$0xff]  }
   0x9   :  { %249 = vmatprep.subr.bf16.mxu1 %v406_v1  ;;  %171 = vperm.xlu0 %384, %v162_v11   ;;  %v50_v53 = vld [vmem:[%s591_s3] sm:$0xf] }
   0xa   :  { %v51_v56 = vld [vmem:[%s592_s4] sm:$0xf] }
   0xb   :  { %v166_v8 = vld [vmem:[%s594_s10] sm:$0xff] }
   0xc   :  { %250 = vmatpush1.bf16.msra.mxu1 %v389_v6 }
   0xd   :  { %251 = vmatprep.subr.bf16.mxu1 %v406_v1 }
  0x10   :  { %252 = vmatpush1.bf16.msra.mxu1 %v390_v7 }
  0x11   :  { %253 = vmatprep.subr.bf16.mxu1 %v406_v1 }
  0x14   :  { %254 = vmatpush1.bf16.msra.mxu1 %v391_v12 }
  0x15   :  { %255 = vmatprep.subr.bf16.mxu1 %v406_v1 }
  0x18   :  { %256 = vmatpush1.bf16.msra.mxu1 %v392_v13 }
  0x19   :  { %257 = vmatprep.subr.bf16.mxu1 %v406_v1 }
  0x1c   :  { %258 = vmatpush1.bf16.msra.mxu1 %v393_v14 }
  0x1d   :  { %259 = vmatprep.subr.bf16.mxu1 %v406_v1 }
  0x20   :  { %260 = vmatpush1.bf16.msra.mxu1 %v394_v15  ;;  %v138_v15 = vstv %s595_s5 }
  0x21   :  { %261 = vmatprep.subr.bf16.mxu1 %v406_v1  ;;  %v164_v1 = vld [vmem:[%s593_s9] sm:$0xff] }
  0x24   :  { %262 = vmatpush1.bf16.msra.mxu1 %v395_v16 }
  0x27   :  { %278 = vmatmul.mubr.bf16.vlgmr.msra.gmra.mrb[0].mxu1 %v396_v17 }
  0x84   :  { %v56_v18 = vpop.permute.xlu0 %55 }
  0x85   :  { %v177_v25 = vpop.permute.xlu1 %176 }
  0x88   :  { %v172_v26 = vpop.permute.xlu0 %171 }
  0xd9   :  { %v102_v19 = vpop.f32.mrb[0].mxu0 }
  0xda   :  { %v528_v20 = vadd.f32 %v102_v19, %v56_v18  ;;  %v379_v21 = vpop.f32.mrb[1].mxu0 }
  0xdb   :  { %v105_v22 = vpop.f32.mrb[2].mxu0 }
  0xdc   :  { %v109_v23 = vsel %vm108_vm2, %v528_v20, 0.0  ;;  %v380_v24 = vpop.f32.mrb[3].mxu0 }
  0xdd   :  { %110 = vadd.xlane.f32.xlu1 %v109_v23  ;;  %v344_v24 = vstv %s597_s11 }
  0xfa   :  { %v279_v27 = vpop.f32.mrb[0].mxu1 }
  0xfb   :  { %v532_v28 = vadd.f32 %v279_v27, %v172_v26  ;;  %v281_v29 = vpop.f32.mrb[1].mxu1 }
  0xfc   :  { %v282_v30 = vpop.f32.mrb[2].mxu1 }
  0xfd   :  { %v534_v31 = vadd.f32 %v282_v30, %v177_v25  ;;  %v284_v32 = vpop.f32.mrb[3].mxu1  ;;  %v287_v33 = vsel %vm286_vm3, %v532_v28, 0.0 }
  0xfe   :  { %288 = vadd.xlane.f32.xlu0 %v287_v33 }
  0xff   :  { %v290_v34 = vsel %vm286_vm3, %v534_v31, 0.0 }
 0x102   :  { %291 = vadd.xlane.f32.xlu0 %v290_v34 }
 0x16a   :  { %v111_v35 = vpop.xlane.xlu1 %110 }
 0x16b   :  { %v113_v36 = vmul.f32 0.0625, %v111_v35 }
 0x16d   :  { %v114_v37 = vsub.f32 %v528_v20, %v113_v36 }
 0x16f   :  { %v115_v38 = vmul.f32 %v114_v37, %v114_v37 }
 0x171   :  { %v116_v39 = vsel %vm108_vm2, %v115_v38, 0.0 }
 0x172   :  { %117 = vadd.xlane.f32.xlu1 %v116_v39 }
 0x18b   :  { %v289_v40 = vpop.xlane.xlu0 %288 }
 0x18c   :  { %v294_v41 = vmul.f32 0.25, %v289_v40 }
 0x18e   :  { %v296_v42 = vsub.f32 %v532_v28, %v294_v41 }
 0x18f   :  { %v292_v43 = vpop.xlane.xlu0 %291 }
 0x190   :  { %v295_v44 = vmul.f32 0.25, %v292_v43  ;;  %v298_v45 = vmul.f32 %v296_v42, %v296_v42 }
 0x192   :  { %v297_v46 = vsub.f32 %v534_v31, %v295_v44  ;;  %v300_v47 = vsel %vm286_vm3, %v298_v45, 0.0 }
 0x193   :  { %301 = vadd.xlane.f32.xlu0 %v300_v47 }
 0x194   :  { %v299_v48 = vmul.f32 %v297_v46, %v297_v46 }
 0x196   :  { %v303_v49 = vsel %vm286_vm3, %v299_v48, 0.0 }
 0x197   :  { %304 = vadd.xlane.f32.xlu1 %v303_v49 }
 0x1ff   :  { %v118_v50 = vpop.xlane.xlu1 %117 }
 0x200   :  { %v119_v51 = vmul.f32 0.0625, %v118_v50 }
 0x202   :  { %v120_v52 = vadd.f32 1e-05, %v119_v51 }
 0x204   :  { %399 = vrsqrt.f32 %v120_v52 }
 0x20e   :  { %v400_v54 = vpop.eup %399 }
 0x20f   :  { %v122_v55 = vmul.f32 %v400_v54, %v50_v53 }
 0x211   :  { %125 = vperm.xlu0 %384, %v122_v55   ;;  %v129_v57 = vmul.f32 %v122_v55, %v113_v36 }
 0x213   :  { %v130_v58 = vsub.f32 %v51_v56, %v129_v57 }
 0x215   :  { %133 = vperm.xlu0 %384, %v130_v58  }
 0x220   :  { %v302_v59 = vpop.xlane.xlu0 %301 }
 0x221   :  { %v306_v60 = vmul.f32 0.25, %v302_v59 }
 0x223   :  { %v308_v61 = vadd.f32 1e-05, %v306_v60 }
 0x224   :  { %v305_v62 = vpop.xlane.xlu1 %304 }
 0x225   :  { %401 = vrsqrt.f32 %v308_v61  ;;  %v307_v63 = vmul.f32 0.25, %v305_v62 }
 0x227   :  { %v309_v0 = vadd.f32 1e-05, %v307_v63 }
 0x229   :  { %403 = vrsqrt.f32 %v309_v0 }
 0x22f   :  { %v402_v2 = vpop.eup %401 }
 0x230   :  { %v312_v3 = vmul.f32 %v402_v2, %v164_v1 }
 0x232   :  { %316 = vperm.xlu1 %385, %v312_v3   ;;  %v326_v7 = vmul.f32 %v312_v3, %v294_v41 }
 0x233   :  { %v404_v5 = vpop.eup %403 }
 0x234   :  { %v313_v6 = vmul.f32 %v404_v5, %v165_v4  ;;  %v328_v11 = vsub.f32 %v166_v8, %v326_v7 }
 0x236   :  { %321 = vperm.xlu1 %385, %v313_v6   ;;  %v327_v10 = vmul.f32 %v313_v6, %v295_v44 }
 0x238   :  { %v329_v12 = vsub.f32 %v167_v9, %v327_v10 }
 0x23a   :  { %332 = vperm.xlu1 %385, %v328_v11   ;;  %337 = vperm.xlu0 %384, %v329_v12  }
 0x290   :  { %v126_v13 = vpop.permute.xlu0 %125 }
 0x291   :  { %v128_v14 = vmul.f32 %v126_v13, %v528_v20 }
 0x294   :  { %v134_v16 = vpop.permute.xlu0 %133 }
 0x295   :  { %v136_v17 = vadd.f32 %v134_v16, %v128_v14 }
 0x297   :  { %vm137_vm4 = vcmp.gt.f32.partialorder %v136_v17, 0.0  ;;  %v139_v18 = vmul.f32 %v138_v15, %v136_v17 }
 0x299   :  { %v140_v19 = vsel %vm137_vm4, %v136_v17, %v139_v18 }
 0x29a   :  { %141 = vst.msk [vmem:[%s596_s12] sm:$0xf] %vm108_vm2, %v140_v19 }
 0x2b1   :  { %v317_v21 = vpop.permute.xlu1 %316 }
 0x2b2   :  { %v324_v23 = vmul.f32 %v317_v21, %v532_v28 }
 0x2b5   :  { %v322_v22 = vpop.permute.xlu1 %321 }
 0x2b6   :  { %v325_v20 = vmul.f32 %v322_v22, %v534_v31 }
 0x2b9   :  { %v338_v25 = vpop.permute.xlu0 %337  ;;  %v333_v26 = vpop.permute.xlu1 %332 }
 0x2ba   :  { %v341_v27 = vadd.f32 %v338_v25, %v325_v20  ;;  %v340_v29 = vadd.f32 %v333_v26, %v324_v23 }
 0x2bc   :  { %vm343_vm5 = vcmp.gt.f32.partialorder %v341_v27, 0.0  ;;  %v346_v30 = vmul.f32 %v344_v24, %v341_v27  ;;  %vm342_vm6 = vcmp.gt.f32.partialorder %v340_v29, 0.0  ;;  %v345_v32 = vmul.f32 %v344_v24, %v340_v29 }
 0x2be   :  { %v348_v33 = vsel %vm343_vm5, %v341_v27, %v346_v30  ;;  %v347_v34 = vsel %vm342_vm6, %v340_v29, %v345_v32 }
 0x2bf   :  { %350 = vst.msk [vmem:[%s598_s13 + $0x8] sm:$0xff] %vm286_vm3, %v348_v33  ;;  %349 = vst.msk [vmem:[%s598_s13] sm:$0xff] %vm286_vm3, %v347_v34 }

// kernel: unet2_forward.26
= control target key start
LH: loop header
LB: loop body
LE: loop exit
PB: predicated region body
PF: predicated region fallthrough
CT: control target
= control target key end

     0   :  { %v270_v0 = vmov 0   ;;  %vm125_vm0 = vcmask 130048   ;;  %vm170_vm1 = vcmask 31744   ;;  %s372_s0 = inlined_call_operand.vmem [shape: bf16[144,4], index: 0, kind: input, shape index: {}]   ;;  %s373_s1 = inlined_call_operand.vmem [shape: bf16[16,144], index: 1, kind: input, shape index: {}]   ;;  %s374_s2 = inlined_call_operand.vmem [shape: f32[16,1], index: 2, kind: input, shape index: {}]   ;;  %s375_s3 = inlined_call_operand.vmem [shape: f32[16,1], index: 3, kind: input, shape index: {}]   ;;  %s376_s4 = inlined_call_operand.vmem [shape: f32[16,1], index: 4, kind: input, shape index: {}]   ;;  %s377_s5 = inlined_call_operand.<no memory space> [shape: f32[1], index: 5, kind: input, shape index: {}]   ;;  %s378_s6 = inlined_call_operand.vmem [shape: f32[16,4], index: 6, kind: output, shape index: {}]  }
   0x1   :  { %129 = vmatprep.subr.bf16.mxu0 %v270_v0  ;;  %v254_v1 = vld [vmem:[%s372_s0] sm:$0xff]   ;;  %252 = vset.pattern.permute.xlu0 %v270_v0  ;;  %v255_v2 = vld [vmem:[%s372_s0 + $0x8] sm:$0xff]   ;;  %v256_v3 = vld [vmem:[%s372_s0 + $0x10] sm:$0xff]   ;;  %v228_v55 = vstv %s377_s5 }
   0x2   :  { %253 = vset.pattern.permute.xlu1 %v270_v0  ;;  %130 = vmatpush1.bf16.msra.mxu0 %v254_v1  ;;  %v257_v4 = vld [vmem:[%s372_s0 + $0x18] sm:$0xff]   ;;  %v265_v5 = vld [vmem:[%s373_s1 + $0x4] ss:$8 sps:$4 sm:$0xff]   ;;  %v260_v10 = vld [vmem:[%s372_s0 + $0x30] sm:$0xff]  }
   0x3   :  { %131 = vmatprep.subr.bf16.mxu0 %v270_v0  ;;  %v45_v6 = vld [vmem:[%s374_s2] sm:$0xff]  ;;  %250 = vmatprep.mubr.msk.bf16.mxu0 %vm125_vm0, %v265_v5  ;;  %v46_v7 = vld [vmem:[%s374_s2 + $0x8] sm:$0xff]  ;;  %v261_v11 = vld [vmem:[%s372_s0 + $0x38] sm:$0xff]  }
   0x4   :  { %54 = vperm.xlu0 %252, %v45_v6   ;;  %v258_v8 = vld [vmem:[%s372_s0 + $0x20] sm:$0xff]   ;;  %v259_v9 = vld [vmem:[%s372_s0 + $0x28] sm:$0xff]  }
   0x5   :  { %v262_v12 = vld [vmem:[%s372_s0 + $0x40] sm:$0xff]   ;;  %v48_v43 = vld [vmem:[%s375_s3 + $0x8] sm:$0xff] }
   0x6   :  { %132 = vmatpush1.bf16.msra.mxu0 %v255_v2  ;;  %v263_v13 = vld [vmem:[%s373_s1] ss:$8 sps:$4 sm:$0xff]  }
   0x7   :  { %133 = vmatprep.subr.bf16.mxu0 %v270_v0  ;;  %v47_v40 = vld [vmem:[%s375_s3] sm:$0xff]  ;;  %v50_v50 = vld [vmem:[%s376_s4 + $0x8] sm:$0xff] }
   0x8   :  { %59 = vperm.xlu0 %252, %v46_v7   ;;  %v49_v47 = vld [vmem:[%s376_s4] sm:$0xff] }
   0xa   :  { %134 = vmatpush1.bf16.msra.mxu0 %v256_v3 }
   0xb   :  { %135 = vmatprep.subr.bf16.mxu0 %v270_v0 }
   0xe   :  { %136 = vmatpush1.bf16.msra.mxu0 %v257_v4 }
   0xf   :  { %137 = vmatprep.subr.bf16.mxu0 %v270_v0 }
  0x12   :  { %138 = vmatpush1.bf16.msra.mxu0 %v258_v8 }
  0x13   :  { %139 = vmatprep.subr.bf16.mxu0 %v270_v0 }
  0x16   :  { %140 = vmatpush1.bf16.msra.mxu0 %v259_v9 }
  0x17   :  { %141 = vmatprep.subr.bf16.mxu0 %v270_v0 }
  0x1a   :  { %142 = vmatpush1.bf16.msra.mxu0 %v260_v10 }
  0x1b   :  { %143 = vmatprep.subr.bf16.mxu0 %v270_v0 }
  0x1e   :  { %144 = vmatpush1.bf16.msra.mxu0 %v261_v11 }
  0x1f   :  { %145 = vmatprep.subr.bf16.mxu0 %v270_v0 }
  0x22   :  { %146 = vmatpush1.bf16.msra.mxu0 %v262_v12 }
  0x25   :  { %162 = vmatmul.mubr.bf16.vlgmr.msra.gmra.mrb[0].mxu0 %v263_v13 }
  0x83   :  { %v55_v14 = vpop.permute.xlu0 %54 }
  0x87   :  { %v60_v18 = vpop.permute.xlu0 %59 }
  0xf8   :  { %v163_v15 = vpop.f32.mrb[0].mxu0 }
  0xf9   :  { %v164_v16 = vadd.f32 %v163_v15, %v55_v14  ;;  %v165_v17 = vpop.f32.mrb[1].mxu0 }
  0xfa   :  { %v166_v19 = vpop.f32.mrb[2].mxu0 }
  0xfb   :  { %v167_v20 = vadd.f32 %v166_v19, %v60_v18  ;;  %v168_v21 = vpop.f32.mrb[3].mxu0  ;;  %v171_v22 = vsel %vm170_vm1, %v164_v16, 0.0 }
  0xfc   :  { %172 = vadd.xlane.f32.xlu1 %v171_v22 }
  0xfd   :  { %v174_v23 = vsel %vm170_vm1, %v167_v20, 0.0 }
 0x100   :  { %175 = vadd.xlane.f32.xlu1 %v174_v23 }
 0x189   :  { %v173_v24 = vpop.xlane.xlu1 %172 }
 0x18a   :  { %v178_v25 = vmul.f32 0.25, %v173_v24 }
 0x18c   :  { %v180_v26 = vsub.f32 %v164_v16, %v178_v25 }
 0x18d   :  { %v176_v27 = vpop.xlane.xlu1 %175 }
 0x18e   :  { %v179_v28 = vmul.f32 0.25, %v176_v27  ;;  %v182_v29 = vmul.f32 %v180_v26, %v180_v26 }
 0x190   :  { %v181_v30 = vsub.f32 %v167_v20, %v179_v28  ;;  %v184_v31 = vsel %vm170_vm1, %v182_v29, 0.0 }
 0x191   :  { %185 = vadd.xlane.f32.xlu0 %v184_v31 }
 0x192   :  { %v183_v32 = vmul.f32 %v181_v30, %v181_v30 }
 0x194   :  { %v187_v33 = vsel %vm170_vm1, %v183_v32, 0.0 }
 0x195   :  { %188 = vadd.xlane.f32.xlu1 %v187_v33 }
 0x21e   :  { %v186_v34 = vpop.xlane.xlu0 %185 }
 0x21f   :  { %v190_v35 = vmul.f32 0.25, %v186_v34 }
 0x221   :  { %v192_v36 = vadd.f32 1e-05, %v190_v35 }
 0x222   :  { %v189_v37 = vpop.xlane.xlu1 %188 }
 0x223   :  { %266 = vrsqrt.f32 %v192_v36  ;;  %v191_v38 = vmul.f32 0.25, %v189_v37 }
 0x225   :  { %v193_v39 = vadd.f32 1e-05, %v191_v38 }
 0x227   :  { %268 = vrsqrt.f32 %v193_v39 }
 0x22d   :  { %v267_v41 = vpop.eup %266 }
 0x22e   :  { %v196_v42 = vmul.f32 %v267_v41, %v47_v40 }
 0x230   :  { %200 = vperm.xlu1 %253, %v196_v42   ;;  %v210_v46 = vmul.f32 %v196_v42, %v178_v25 }
 0x231   :  { %v269_v44 = vpop.eup %268 }
 0x232   :  { %v197_v45 = vmul.f32 %v269_v44, %v48_v43  ;;  %v212_v48 = vsub.f32 %v49_v47, %v210_v46 }
 0x234   :  { %205 = vperm.xlu1 %253, %v197_v45   ;;  %v211_v49 = vmul.f32 %v197_v45, %v179_v28 }
 0x236   :  { %v213_v51 = vsub.f32 %v50_v50, %v211_v49 }
 0x238   :  { %216 = vperm.xlu1 %253, %v212_v48  }
 0x23c   :  { %221 = vperm.xlu1 %253, %v213_v51  }
 0x2af   :  { %v201_v52 = vpop.permute.xlu1 %200 }
 0x2b0   :  { %v208_v54 = vmul.f32 %v201_v52, %v164_v16 }
 0x2b3   :  { %v206_v53 = vpop.permute.xlu1 %205 }
 0x2b4   :  { %v209_v58 = vmul.f32 %v206_v53, %v167_v20 }
 0x2b7   :  { %v217_v56 = vpop.permute.xlu1 %216 }
 0x2b8   :  { %v224_v57 = vadd.f32 %v217_v56, %v208_v54 }
 0x2ba   :  { %vm226_vm2 = vcmp.gt.f32.partialorder %v224_v57, 0.0  ;;  %v229_v59 = vmul.f32 %v228_v55, %v224_v57 }
 0x2bb   :  { %v222_v60 = vpop.permute.xlu1 %221 }
 0x2bc   :  { %v231_v61 = vsel %vm226_vm2, %v224_v57, %v229_v59  ;;  %v225_v62 = vadd.f32 %v222_v60, %v209_v58 }
 0x2bd   :  { %233 = vst.msk [vmem:[%s378_s6] sm:$0xff] %vm170_vm1, %v231_v61 }
 0x2be   :  { %vm227_vm3 = vcmp.gt.f32.partialorder %v225_v62, 0.0  ;;  %v230_v63 = vmul.f32 %v228_v55, %v225_v62 }
 0x2c0   :  { %v232_v0 = vsel %vm227_vm3, %v225_v62, %v230_v63 }
 0x2c1   :  { %234 = vst.msk [vmem:[%s378_s6 + $0x8] sm:$0xff] %vm170_vm1, %v232_v0 }

// kernel: unet2_forward.27
= control target key start
LH: loop header
LB: loop body
LE: loop exit
PB: predicated region body
PF: predicated region fallthrough
CT: control target
= control target key end

     0   :  { %v362_v0 = vmov 0.0   ;;  %vm363_vm0 = vmmov 0   ;;  %v364_v2 = vmov 0   ;;  %vm64_vm1 = vcmask 130048   ;;  %s526_s0 = inlined_call_operand.vmem [shape: bf16[16,4], index: 0, kind: input, shape index: {}]   ;;  %s527_s1 = inlined_call_operand.vmem [shape: bf16[4,16], index: 1, kind: input, shape index: {}]   ;;  %s528_s2 = inlined_call_operand.vmem [shape: f32[4,1], index: 2, kind: input, shape index: {}]   ;;  %s529_s6 = inlined_call_operand.vmem [shape: bf16[144,1], index: 6, kind: input, shape index: {}]   ;;  %s530_s7 = inlined_call_operand.vmem [shape: bf16[16,144], index: 7, kind: input, shape index: {}]   ;;  %s531_s8 = inlined_call_operand.vmem [shape: f32[16,1], index: 8, kind: input, shape index: {}]   ;;  %s532_s9 = inlined_call_operand.vmem [shape: f32[16,1], index: 9, kind: input, shape index: {}]   ;;  %s533_s10 = inlined_call_operand.vmem [shape: f32[16,1], index: 10, kind: input, shape index: {}]   ;;  %s534_s11 = inlined_call_operand.<no memory space> [shape: f32[1], index: 11, kind: input, shape index: {}]   ;;  %s535_s13 = inlined_call_operand.vmem [shape: f32[16,1], index: 13, kind: output, shape index: {1}]   ;;  %s536_s3 = inlined_call_operand.vmem [shape: f32[4,1], index: 3, kind: input, shape index: {}]   ;;  %s537_s4 = inlined_call_operand.vmem [shape: f32[4,1], index: 4, kind: input, shape index: {}]   ;;  %s538_s5 = inlined_call_operand.<no memory space> [shape: f32[1], index: 5, kind: input, shape index: {}]   ;;  %s539_s12 = inlined_call_operand.vmem [shape: f32[4,4], index: 12, kind: output, shape index: {0}]  }
   0x1   :  { %332 = vmatprep.subr.bf16.mxu0 %v362_v0  ;;  %v343_v1 = vld [vmem:[%s526_s0] sm:$0xff]   ;;  %334 = vmatprep.mubr.msk.bf16.mxu0 %vm363_vm0, %v362_v0  ;;  %vm108_vm2 = vcmask 27648   ;;  %v345_v13 = vld [vmem:[%s529_s6 + $0x8] sm:$0xff]   ;;  %v346_v14 = vld [vmem:[%s529_s6 + $0x10] sm:$0xff]   ;;  %v300_v53 = vstv %s534_s11  ;;  %vm305_vm4 = vcmask 7168  }
   0x2   :  { %341 = vset.pattern.permute.xlu0 %v364_v2  ;;  %v49_v3 = vld [vmem:[%s528_s2] sm:$0xf]  ;;  %235 = vmatprep.subr.bf16.mxu1 %v364_v2  ;;  %v347_v15 = vld [vmem:[%s529_s6 + $0x18] sm:$0xff]   ;;  %v355_v16 = vld [vmem:[%s530_s7 + $0x4] ss:$8 sps:$4 sm:$0xff]  }
   0x3   :  { %333 = vmatpush3.bf16.msra.mxu0 %v343_v1  ;;  %v48_v4 = vld [vmem:[%s527_s1] sm:$0x3]  ;;  %55 = vperm.xlu0 %341, %v49_v3   ;;  %v349_v18 = vld [vmem:[%s529_s6 + $0x28] sm:$0xff]   ;;  %v350_v19 = vld [vmem:[%s529_s6 + $0x30] sm:$0xff]  }
   0x4   :  { %342 = vset.pattern.permute.xlu1 %v364_v2  ;;  %v344_v5 = vld [vmem:[%s529_s6] sm:$0xff]   ;;  %329 = vmatprep.mubr.msk.bf16.mxu1 %vm64_vm1, %v355_v16  ;;  %v351_v20 = vld [vmem:[%s529_s6 + $0x38] sm:$0xff]   ;;  %v163_v30 = vld [vmem:[%s531_s8 + $0x8] sm:$0xff] }
   0x5   :  { %236 = vmatpush1.bf16.msra.mxu1 %v344_v5  ;;  %v348_v17 = vld [vmem:[%s529_s6 + $0x20] sm:$0xff]   ;;  %v165_v44 = vld [vmem:[%s532_s9 + $0x8] sm:$0xff] }
   0x6   :  { %335 = vmatmul.mubr.msk.bf16.vlgmr.msra.gmra.mrb[0].mxu0 %vm64_vm1, %v48_v4  ;;  %237 = vmatprep.subr.bf16.mxu1 %v364_v2  ;;  %v352_v21 = vld [vmem:[%s529_s6 + $0x40] sm:$0xff]   ;;  %v167_v50 = vld [vmem:[%s533_s10 + $0x8] sm:$0xff] }
   0x7   :  { %v353_v22 = vld [vmem:[%s530_s7] ss:$8 sps:$4 sm:$0xff]  }
   0x8   :  { %v162_v28 = vld [vmem:[%s531_s8] sm:$0xff] }
   0x9   :  { %238 = vmatpush1.bf16.msra.mxu1 %v345_v13  ;;  %v164_v42 = vld [vmem:[%s532_s9] sm:$0xff] }
   0xa   :  { %239 = vmatprep.subr.bf16.mxu1 %v364_v2  ;;  %v166_v47 = vld [vmem:[%s533_s10] sm:$0xff] }
   0xb   :  { %v50_v0 = vld [vmem:[%s536_s3] sm:$0xf] }
   0xc   :  { %v51_v3 = vld [vmem:[%s537_s4] sm:$0xf] }
   0xd   :  { %240 = vmatpush1.bf16.msra.mxu1 %v346_v14 }
   0xe   :  { %241 = vmatprep.subr.bf16.mxu1 %v364_v2 }
  0x11   :  { %242 = vmatpush1.bf16.msra.mxu1 %v347_v15 }
  0x12   :  { %243 = vmatprep.subr.bf16.mxu1 %v364_v2 }
  0x15   :  { %244 = vmatpush1.bf16.msra.mxu1 %v348_v17 }
  0x16   :  { %245 = vmatprep.subr.bf16.mxu1 %v364_v2 }
  0x19   :  { %246 = vmatpush1.bf16.msra.mxu1 %v349_v18 }
  0x1a   :  { %247 = vmatprep.subr.bf16.mxu1 %v364_v2 }
  0x1d   :  { %248 = vmatpush1.bf16.msra.mxu1 %v350_v19 }
  0x1e   :  { %249 = vmatprep.subr.bf16.mxu1 %v364_v2 }
  0x21   :  { %250 = vmatpush1.bf16.msra.mxu1 %v351_v20 }
  0x22   :  { %251 = vmatprep.subr.bf16.mxu1 %v364_v2 }
  0x25   :  { %252 = vmatpush1.bf16.msra.mxu1 %v352_v21 }
  0x28   :  { %268 = vmatmul.mubr.bf16.vlgmr.msra.gmra.mrb[0].mxu1 %v353_v22 }
  0x82   :  { %v56_v6 = vpop.permute.xlu0 %55 }
  0xd9   :  { %v102_v7 = vpop.f32.mrb[0].mxu0 }
  0xda   :  { %v448_v8 = vadd.f32 %v102_v7, %v56_v6  ;;  %v336_v9 = vpop.f32.mrb[1].mxu0 }
  0xdb   :  { %v105_v10 = vpop.f32.mrb[2].mxu0  ;;  %v138_v9 = vstv %s538_s5 }
  0xdc   :  { %v337_v11 = vpop.f32.mrb[3].mxu0  ;;  %v109_v12 = vsel %vm108_vm2, %v448_v8, 0.0 }
  0xdd   :  { %110 = vadd.xlane.f32.xlu0 %v109_v12 }
  0xfb   :  { %v269_v29 = vpop.f32.mrb[0].mxu1 }
  0xfc   :  { %v270_v31 = vadd.f32 %v269_v29, %v162_v28  ;;  %v271_v32 = vpop.f32.mrb[1].mxu1 }
  0xfd   :  { %v272_v33 = vpop.f32.mrb[2].mxu1 }
  0xfe   :  { %v278_v34 = vsub.f32 %v270_v31, %v270_v31  ;;  %v273_v35 = vadd.f32 %v272_v33, %v163_v30  ;;  %v274_v36 = vpop.f32.mrb[3].mxu1 }
 0x100   :  { %v280_v37 = vmul.f32 %v278_v34, %v278_v34  ;;  %v279_v38 = vsub.f32 %v273_v35, %v273_v35 }
 0x102   :  { %v284_v39 = vadd.f32 1e-05, %v280_v37  ;;  %v281_v40 = vmul.f32 %v279_v38, %v279_v38 }
 0x104   :  { %356 = vrsqrt.f32 %v284_v39  ;;  %v285_v41 = vadd.f32 1e-05, %v281_v40 }
 0x106   :  { %358 = vrsqrt.f32 %v285_v41 }
 0x10e   :  { %v357_v43 = vpop.eup %356 }
 0x10f   :  { %v288_v45 = vmul.f32 %v357_v43, %v164_v42 }
 0x110   :  { %v359_v46 = vpop.eup %358 }
 0x111   :  { %v290_v48 = vmul.f32 %v288_v45, %v270_v31  ;;  %v289_v49 = vmul.f32 %v359_v46, %v165_v44 }
 0x113   :  { %v294_v51 = vsub.f32 %v166_v47, %v290_v48  ;;  %v291_v52 = vmul.f32 %v289_v49, %v273_v35 }
 0x115   :  { %v296_v54 = vadd.f32 %v294_v51, %v290_v48  ;;  %v295_v55 = vsub.f32 %v167_v50, %v291_v52 }
 0x117   :  { %vm298_vm3 = vcmp.gt.f32.partialorder %v296_v54, 0.0  ;;  %v301_v56 = vmul.f32 %v300_v53, %v296_v54  ;;  %v297_v57 = vadd.f32 %v295_v55, %v291_v52 }
 0x119   :  { %v303_v58 = vsel %vm298_vm3, %v296_v54, %v301_v56  ;;  %vm299_vm5 = vcmp.gt.f32.partialorder %v297_v57, 0.0  ;;  %v302_v59 = vmul.f32 %v300_v53, %v297_v57 }
 0x11a   :  { %306 = vst.msk [vmem:[%s535_s13] sm:$0xff] %vm305_vm4, %v303_v58 }
 0x11b   :  { %v304_v62 = vsel %vm299_vm5, %v297_v57, %v302_v59 }
 0x11c   :  { %307 = vst.msk [vmem:[%s535_s13 + $0x8] sm:$0xff] %vm305_vm4, %v304_v62 }
 0x16a   :  { %v111_v23 = vpop.xlane.xlu0 %110 }
 0x16b   :  { %v113_v24 = vmul.f32 0.25, %v111_v23 }
 0x16d   :  { %v114_v25 = vsub.f32 %v448_v8, %v113_v24 }
 0x16f   :  { %v115_v26 = vmul.f32 %v114_v25, %v114_v25 }
 0x171   :  { %v116_v27 = vsel %vm108_vm2, %v115_v26, 0.0 }
 0x172   :  { %117 = vadd.xlane.f32.xlu1 %v116_v27 }
 0x1ff   :  { %v118_v60 = vpop.xlane.xlu1 %117 }
 0x200   :  { %v119_v61 = vmul.f32 0.25, %v118_v60 }
 0x202   :  { %v120_v63 = vadd.f32 1e-05, %v119_v61 }
 0x204   :  { %360 = vrsqrt.f32 %v120_v63 }
 0x20e   :  { %v361_v1 = vpop.eup %360 }
 0x20f   :  { %v122_v2 = vmul.f32 %v361_v1, %v50_v0 }
 0x211   :  { %125 = vperm.xlu1 %342, %v122_v2   ;;  %v129_v4 = vmul.f32 %v122_v2, %v113_v24 }
 0x213   :  { %v130_v5 = vsub.f32 %v51_v3, %v129_v4 }
 0x215   :  { %133 = vperm.xlu1 %342, %v130_v5  }
 0x290   :  { %v126_v6 = vpop.permute.xlu1 %125 }
 0x291   :  { %v128_v7 = vmul.f32 %v126_v6, %v448_v8 }
 0x294   :  { %v134_v10 = vpop.permute.xlu1 %133 }
 0x295   :  { %v136_v11 = vadd.f32 %v134_v10, %v128_v7 }
 0x297   :  { %vm137_vm6 = vcmp.gt.f32.partialorder %v136_v11, 0.0  ;;  %v139_v12 = vmul.f32 %v138_v9, %v136_v11 }
 0x299   :  { %v140_v13 = vsel %vm137_vm6, %v136_v11, %v139_v12 }
 0x29a   :  { %141 = vst.msk [vmem:[%s539_s12] sm:$0xf] %vm108_vm2, %v140_v13 }

// kernel: unet2_forward.28
= control target key start
LH: loop header
LB: loop body
LE: loop exit
PB: predicated region body
PF: predicated region fallthrough
CT: control target
= control target key end

     0   :  { %vm27_vm0 = vcmask 1040384   ;;  %vm20_vm1 = vcmask 7168   ;;  %vm110_vm2 = vcmask 31744   ;;  %v190_v17 = vmov 0   ;;  %s249_s1 = inlined_call_operand.vmem [shape: f32[1,4], index: 1, kind: input, shape index: {}]   ;;  %s250_s0 = inlined_call_operand.vmem [shape: f32[16,1], index: 0, kind: input, shape index: {}]   ;;  %s251_s2 = inlined_call_operand.vmem [shape: f32[16,1], index: 2, kind: input, shape index: {}]   ;;  %s252_s3 = inlined_call_operand.vmem [shape: f32[16,1], index: 3, kind: input, shape index: {}]   ;;  %s253_s4 = inlined_call_operand.vmem [shape: f32[16,4], index: 4, kind: output, shape index: {}]  }
   0x1   :  { %v19_v0 = vld [vmem:[%s249_s1] sm:$0x1]  ;;  %v18_v2 = vld [vmem:[%s250_s0 + $0x8] sm:$0xff]  ;;  %184 = vset.pattern.permute.xlu0 %v190_v17  ;;  %185 = vset.pattern.permute.xlu1 %v190_v17 }
   0x2   :  { %v17_v1 = vld [vmem:[%s250_s0] sm:$0xff]  ;;  %178 = vmatprep.subr.msk.mxu0 %vm27_vm0, %v19_v0  ;;  %v107_v27 = vld [vmem:[%s251_s2 + $0x8] sm:$0xff] }
   0x3   :  { %180 = vmatprep.mubr.msk.f32.mxu0 %vm20_vm1, %v17_v1  ;;  %179 = vmatpush3.msk.msra.mxu0 %vm27_vm0, %v19_v0  ;;  %v106_v24 = vld [vmem:[%s251_s2] sm:$0xff]  ;;  %v109_v34 = vld [vmem:[%s252_s3 + $0x8] sm:$0xff] }
   0x4   :  { %181 = vmatmul.mubr.msk.f32.vlgmr.msra.gmra.mrb[0].mxu0 %vm20_vm1, %v18_v2  ;;  %v108_v31 = vld [vmem:[%s252_s3] sm:$0xff] }
  0xd7   :  { %v182_v3 = vpop.f32.mrb[0].mxu0 }
  0xd8   :  { %v97_v4 = vpop.f32.mrb[1].mxu0  ;;  %v114_v6 = vsel %vm110_vm2, %v182_v3, 0.0 }
  0xd9   :  { %v111_v5 = vsel %vm110_vm2, %v97_v4, 0.0 }
  0xda   :  { %112 = vadd.xlane.f32.xlu0 %v111_v5 }
  0xde   :  { %115 = vadd.xlane.f32.xlu0 %v114_v6 }
 0x167   :  { %v113_v7 = vpop.xlane.xlu0 %112 }
 0x168   :  { %v118_v8 = vmul.f32 0.25, %v113_v7 }
 0x16a   :  { %v120_v9 = vsub.f32 %v97_v4, %v118_v8 }
 0x16b   :  { %v116_v10 = vpop.xlane.xlu0 %115 }
 0x16c   :  { %v119_v11 = vmul.f32 0.25, %v116_v10  ;;  %v122_v12 = vmul.f32 %v120_v9, %v120_v9 }
 0x16e   :  { %v121_v13 = vsub.f32 %v182_v3, %v119_v11  ;;  %v124_v14 = vsel %vm110_vm2, %v122_v12, 0.0 }
 0x16f   :  { %125 = vadd.xlane.f32.xlu1 %v124_v14 }
 0x170   :  { %v123_v15 = vmul.f32 %v121_v13, %v121_v13 }
 0x172   :  { %v127_v16 = vsel %vm110_vm2, %v123_v15, 0.0 }
 0x173   :  { %128 = vadd.xlane.f32.xlu1 %v127_v16 }
 0x1fc   :  { %v126_v18 = vpop.xlane.xlu1 %125 }
 0x1fd   :  { %v130_v19 = vmul.f32 0.25, %v126_v18 }
 0x1ff   :  { %v132_v20 = vadd.f32 1e-05, %v130_v19 }
 0x200   :  { %v129_v21 = vpop.xlane.xlu1 %128 }
 0x201   :  { %186 = vrsqrt.f32 %v132_v20  ;;  %v131_v22 = vmul.f32 0.25, %v129_v21 }
 0x203   :  { %v133_v23 = vadd.f32 1e-05, %v131_v22 }
 0x205   :  { %188 = vrsqrt.f32 %v133_v23 }
 0x20b   :  { %v187_v25 = vpop.eup %186 }
 0x20c   :  { %v136_v26 = vmul.f32 %v187_v25, %v106_v24 }
 0x20e   :  { %140 = vperm.xlu0 %184, %v136_v26   ;;  %v150_v30 = vmul.f32 %v136_v26, %v118_v8 }
 0x20f   :  { %v189_v28 = vpop.eup %188 }
 0x210   :  { %v137_v29 = vmul.f32 %v189_v28, %v107_v27  ;;  %v152_v32 = vsub.f32 %v108_v31, %v150_v30 }
 0x212   :  { %145 = vperm.xlu1 %185, %v137_v29   ;;  %v151_v33 = vmul.f32 %v137_v29, %v119_v11 }
 0x214   :  { %v153_v35 = vsub.f32 %v109_v34, %v151_v33 }
 0x216   :  { %156 = vperm.xlu1 %185, %v152_v32  }
 0x21a   :  { %161 = vperm.xlu1 %185, %v153_v35  }
 0x28d   :  { %v141_v36 = vpop.permute.xlu0 %140 }
 0x28e   :  { %v148_v38 = vmul.f32 %v141_v36, %v97_v4 }
 0x291   :  { %v146_v37 = vpop.permute.xlu1 %145 }
 0x292   :  { %v149_v41 = vmul.f32 %v182_v3, %v146_v37 }
 0x295   :  { %v157_v39 = vpop.permute.xlu1 %156 }
 0x296   :  { %v164_v40 = vadd.f32 %v157_v39, %v148_v38 }
 0x298   :  { %166 = vst.msk [vmem:[%s253_s4] sm:$0xff] %vm110_vm2, %v164_v40 }
 0x299   :  { %v162_v42 = vpop.permute.xlu1 %161 }
 0x29a   :  { %v165_v43 = vadd.f32 %v162_v42, %v149_v41 }
 0x29c   :  { %167 = vst.msk [vmem:[%s253_s4 + $0x8] sm:$0xff] %vm110_vm2, %v165_v43 }

// kernel: unet2_forward.29
= control target key start
LH: loop header
LB: loop body
LE: loop exit
PB: predicated region body
PF: predicated region fallthrough
CT: control target
= control target key end

     0   :  { %v464_v0 = vmov 0   ;;  %vm161_vm0 = vcmask 424960   ;;  %vm165_vm1 = vcmask 1041408   ;;  %vm210_vm2 = vcmask 31744   ;;  %s630_s0 = inlined_call_operand.vmem [shape: bf16[180,4], index: 0, kind: input, shape index: {}]   ;;  %s631_s1 = inlined_call_operand.vmem [shape: bf16[16,180], index: 1, kind: input, shape index: {}]   ;;  %s632_s2 = inlined_call_operand.vmem [shape: f32[16,1], index: 2, kind: input, shape index: {}]   ;;  %s633_s7 = inlined_call_operand.vmem [shape: f32[16,1], index: 7, kind: input, shape index: {}]   ;;  %s634_s3 = inlined_call_operand.vmem [shape: f32[16,1], index: 3, kind: input, shape index: {}]   ;;  %s635_s4 = inlined_call_operand.vmem [shape: f32[16,1], index: 4, kind: input, shape index: {}]   ;;  %s636_s6 = inlined_call_operand.vmem [shape: bf16[16,16], index: 6, kind: input, shape index: {}]   ;;  %s637_s5 = inlined_call_operand.<no memory space> [shape: f32[1], index: 5, kind: input, shape index: {}]   ;;  %s638_s8 = inlined_call_operand.vmem [shape: f32[16,1], index: 8, kind: input, shape index: {}]   ;;  %s639_s9 = inlined_call_operand.vmem [shape: f32[16,1], index: 9, kind: input, shape index: {}]   ;;  %s640_s10 = inlined_call_operand.<no memory space> [shape: f32[1], index: 10, kind: input, shape index: {}]   ;;  %s641_s11 = inlined_call_operand.vmem [shape: f32[16,4], index: 11, kind: output, shape index: {}]  }
   0x1   :  { %169 = vmatprep.subr.bf16.mxu0 %v464_v0  ;;  %v440_v1 = vld [vmem:[%s630_s0] sm:$0xff]   ;;  %438 = vset.pattern.permute.xlu0 %v464_v0  ;;  %v441_v2 = vld [vmem:[%s630_s0 + $0x8] sm:$0xff]   ;;  %v442_v3 = vld [vmem:[%s630_s0 + $0x10] sm:$0xff]   ;;  %v465_v58 = vmov 0.0   ;;  %vm466_vm3 = vmmov 0   ;;  %vm298_vm6 = vcmask 130048  }
   0x2   :  { %439 = vset.pattern.permute.xlu1 %v464_v0  ;;  %170 = vmatpush1.bf16.msra.mxu0 %v440_v1  ;;  %v443_v4 = vld [vmem:[%s630_s0 + $0x18] sm:$0xff]   ;;  %v454_v5 = vld [vmem:[%s631_s1 + $0x4] ss:$8 sps:$4 sm:$0xff]   ;;  %v446_v10 = vld [vmem:[%s630_s0 + $0x30] sm:$0xff]  }
   0x3   :  { %171 = vmatprep.subr.bf16.mxu0 %v464_v0  ;;  %v66_v6 = vld [vmem:[%s632_s2] sm:$0xff]  ;;  %424 = vmatprep.mubr.msk.bf16.mxu0 %vm161_vm0, %v454_v5  ;;  %v67_v8 = vld [vmem:[%s632_s2 + $0x8] sm:$0xff]  ;;  %v447_v11 = vld [vmem:[%s630_s0 + $0x38] sm:$0xff]  }
   0x4   :  { %v444_v7 = vld [vmem:[%s630_s0 + $0x20] sm:$0xff]   ;;  %75 = vperm.xlu0 %438, %v66_v6   ;;  %v445_v9 = vld [vmem:[%s630_s0 + $0x28] sm:$0xff]   ;;  %v450_v14 = vld [vmem:[%s630_s0 + $0x50] sm:$0xff]   ;;  %429 = vmatprep.subr.bf16.mxu1 %v465_v58 }
   0x5   :  { %v448_v12 = vld [vmem:[%s630_s0 + $0x40] sm:$0xff]   ;;  %v449_v13 = vld [vmem:[%s630_s0 + $0x48] sm:$0xff]   ;;  %v451_v15 = vld [vmem:[%s630_s0 + $0x58] ss:$0 sps:$4 sm:$0x33]   ;;  %431 = vmatprep.mubr.msk.bf16.mxu1 %vm466_vm3, %v465_v58 }
   0x6   :  { %172 = vmatpush1.bf16.msra.mxu0 %v441_v2  ;;  %v167_v16 = vsel %vm165_vm1, %v451_v15, 0  ;;  %v452_v17 = vld [vmem:[%s631_s1] ss:$8 sps:$4 sm:$0xff]  }
   0x7   :  { %173 = vmatprep.subr.bf16.mxu0 %v464_v0  ;;  %v276_v38 = vld [vmem:[%s633_s7] sm:$0xff]  ;;  %v69_v48 = vld [vmem:[%s634_s3 + $0x8] sm:$0xff] }
   0x8   :  { %80 = vperm.xlu0 %438, %v67_v8   ;;  %v68_v45 = vld [vmem:[%s634_s3] sm:$0xff]  ;;  %v71_v55 = vld [vmem:[%s635_s4 + $0x8] sm:$0xff] }
   0x9   :  { %v70_v52 = vld [vmem:[%s635_s4] sm:$0xff]  ;;  %v277_v57 = vld [vmem:[%s633_s7 + $0x8] sm:$0xff] }
   0xa   :  { %174 = vmatpush1.bf16.msra.mxu0 %v442_v3 }
   0xb   :  { %175 = vmatprep.subr.bf16.mxu0 %v464_v0 }
   0xe   :  { %176 = vmatpush1.bf16.msra.mxu0 %v443_v4 }
   0xf   :  { %177 = vmatprep.subr.bf16.mxu0 %v464_v0 }
  0x12   :  { %178 = vmatpush1.bf16.msra.mxu0 %v444_v7 }
  0x13   :  { %179 = vmatprep.subr.bf16.mxu0 %v464_v0 }
  0x16   :  { %180 = vmatpush1.bf16.msra.mxu0 %v445_v9  ;;  %v455_v9 = vld [vmem:[%s636_s6] sm:$0xff]  }
  0x17   :  { %181 = vmatprep.subr.bf16.mxu0 %v464_v0 }
  0x1a   :  { %182 = vmatpush1.bf16.msra.mxu0 %v446_v10 }
  0x1b   :  { %183 = vmatprep.subr.bf16.mxu0 %v464_v0 }
  0x1e   :  { %184 = vmatpush1.bf16.msra.mxu0 %v447_v11 }
  0x1f   :  { %185 = vmatprep.subr.bf16.mxu0 %v464_v0 }
  0x22   :  { %186 = vmatpush1.bf16.msra.mxu0 %v448_v12 }
  0x23   :  { %187 = vmatprep.subr.bf16.mxu0 %v464_v0 }
  0x26   :  { %188 = vmatpush1.bf16.msra.mxu0 %v449_v13 }
  0x27   :  { %189 = vmatprep.subr.bf16.mxu0 %v464_v0 }
  0x2a   :  { %190 = vmatpush1.bf16.msra.mxu0 %v450_v14 }
  0x2b   :  { %191 = vmatprep.subr.bf16.mxu0 %v464_v0  ;;  %v268_v0 = vstv %s637_s5 }
  0x2e   :  { %192 = vmatpush1.bf16.msra.mxu0 %v167_v16 }
  0x31   :  { %202 = vmatmul.mubr.bf16.vlgmr.msra.gmra.mrb[0].mxu0 %v452_v17 }
  0x83   :  { %v76_v18 = vpop.permute.xlu0 %75 }
  0x87   :  { %v81_v22 = vpop.permute.xlu0 %80 }
 0x104   :  { %v203_v19 = vpop.f32.mrb[0].mxu0 }
 0x105   :  { %v204_v20 = vadd.f32 %v203_v19, %v76_v18  ;;  %v205_v21 = vpop.f32.mrb[1].mxu0 }
 0x106   :  { %v206_v23 = vpop.f32.mrb[2].mxu0 }
 0x107   :  { %v207_v24 = vadd.f32 %v206_v23, %v81_v22  ;;  %v208_v25 = vpop.f32.mrb[3].mxu0  ;;  %v211_v26 = vsel %vm210_vm2, %v204_v20, 0.0 }
 0x108   :  { %212 = vadd.xlane.f32.xlu1 %v211_v26 }
 0x109   :  { %v214_v27 = vsel %vm210_vm2, %v207_v24, 0.0 }
 0x10c   :  { %215 = vadd.xlane.f32.xlu1 %v214_v27 }
 0x195   :  { %v213_v28 = vpop.xlane.xlu1 %212 }
 0x196   :  { %v218_v29 = vmul.f32 0.25, %v213_v28 }
 0x198   :  { %v220_v30 = vsub.f32 %v204_v20, %v218_v29 }
 0x199   :  { %v216_v31 = vpop.xlane.xlu1 %215 }
 0x19a   :  { %v219_v32 = vmul.f32 0.25, %v216_v31  ;;  %v222_v33 = vmul.f32 %v220_v30, %v220_v30 }
 0x19c   :  { %v221_v34 = vsub.f32 %v207_v24, %v219_v32  ;;  %v224_v35 = vsel %vm210_vm2, %v222_v33, 0.0 }
 0x19d   :  { %225 = vadd.xlane.f32.xlu0 %v224_v35 }
 0x19e   :  { %v223_v36 = vmul.f32 %v221_v34, %v221_v34 }
 0x1a0   :  { %v227_v37 = vsel %vm210_vm2, %v223_v36, 0.0  ;;  %v278_v36 = vld [vmem:[%s638_s8] sm:$0xff] }
 0x1a1   :  { %228 = vadd.xlane.f32.xlu1 %v227_v37 }
 0x1b3   :  { %285 = vperm.xlu0 %438, %v276_v38  }
 0x22a   :  { %v226_v39 = vpop.xlane.xlu0 %225 }
 0x22b   :  { %v230_v40 = vmul.f32 0.25, %v226_v39  ;;  %v280_v39 = vld [vmem:[%s639_s9] sm:$0xff] }
 0x22d   :  { %v232_v41 = vadd.f32 1e-05, %v230_v40  ;;  %v279_v40 = vld [vmem:[%s638_s8 + $0x8] sm:$0xff] }
 0x22e   :  { %v229_v42 = vpop.xlane.xlu1 %228 }
 0x22f   :  { %456 = vrsqrt.f32 %v232_v41  ;;  %v231_v43 = vmul.f32 0.25, %v229_v42 }
 0x231   :  { %v233_v44 = vadd.f32 1e-05, %v231_v43 }
 0x232   :  { %v286_v10 = vpop.permute.xlu0 %285 }
 0x233   :  { %458 = vrsqrt.f32 %v233_v44 }
 0x239   :  { %v457_v46 = vpop.eup %456 }
 0x23a   :  { %v236_v47 = vmul.f32 %v457_v46, %v68_v45  ;;  %v281_v45 = vld [vmem:[%s639_s9 + $0x8] sm:$0xff] }
 0x23c   :  { %240 = vperm.xlu1 %439, %v236_v47   ;;  %v250_v51 = vmul.f32 %v236_v47, %v218_v29 }
 0x23d   :  { %v459_v49 = vpop.eup %458 }
 0x23e   :  { %v237_v50 = vmul.f32 %v459_v49, %v69_v48  ;;  %v252_v53 = vsub.f32 %v70_v52, %v250_v51  ;;  %v399_v51 = vstv %s640_s10 }
 0x240   :  { %245 = vperm.xlu1 %439, %v237_v50   ;;  %v251_v54 = vmul.f32 %v237_v50, %v219_v32 }
 0x242   :  { %v253_v56 = vsub.f32 %v71_v55, %v251_v54 }
 0x244   :  { %256 = vperm.xlu1 %439, %v252_v53  }
 0x248   :  { %261 = vperm.xlu1 %439, %v253_v56  }
 0x24c   :  { %290 = vperm.xlu1 %439, %v277_v57  }
 0x2bb   :  { %v241_v59 = vpop.permute.xlu1 %240 }
 0x2bc   :  { %v248_v61 = vmul.f32 %v241_v59, %v204_v20 }
 0x2bf   :  { %v246_v60 = vpop.permute.xlu1 %245 }
 0x2c0   :  { %v249_v1 = vmul.f32 %v246_v60, %v207_v24 }
 0x2c3   :  { %v257_v62 = vpop.permute.xlu1 %256 }
 0x2c4   :  { %v264_v63 = vadd.f32 %v257_v62, %v248_v61 }
 0x2c6   :  { %v269_v3 = vmul.f32 %v268_v0, %v264_v63  ;;  %vm266_vm4 = vcmp.gt.f32.partialorder %v264_v63, 0.0 }
 0x2c7   :  { %v262_v2 = vpop.permute.xlu1 %261 }
 0x2c8   :  { %v265_v4 = vadd.f32 %v262_v2, %v249_v1  ;;  %v271_v6 = vsel %vm266_vm4, %v264_v63, %v269_v3 }
 0x2ca   :  { %v270_v5 = vmul.f32 %v268_v0, %v265_v4  ;;  %vm267_vm5 = vcmp.gt.f32.partialorder %v265_v4, 0.0 }
 0x2cb   :  { %v291_v14 = vpop.permute.xlu1 %290 }
 0x2cc   :  { %v272_v7 = vsel %vm267_vm5, %v265_v4, %v270_v5 }
 0x2cd   :  { %v273_v8 = vpack.c.bf16 %v272_v7, %v271_v6 }
 0x2cf   :  { %430 = vmatpush3.bf16.msra.mxu1 %v273_v8 }
 0x2d2   :  { %432 = vmatmul.mubr.msk.bf16.vlgmr.msra.gmra.mrb[0].mxu1 %vm298_vm6, %v455_v9 }
 0x3a5   :  { %v336_v11 = vpop.f32.mrb[0].mxu1 }
 0x3a6   :  { %v337_v12 = vadd.f32 %v336_v11, %v286_v10  ;;  %v433_v13 = vpop.f32.mrb[1].mxu1 }
 0x3a7   :  { %v339_v15 = vpop.f32.mrb[2].mxu1 }
 0x3a8   :  { %v340_v16 = vadd.f32 %v339_v15, %v291_v14  ;;  %v434_v17 = vpop.f32.mrb[3].mxu1  ;;  %v343_v18 = vsel %vm210_vm2, %v337_v12, 0.0 }
 0x3a9   :  { %344 = vadd.xlane.f32.xlu1 %v343_v18 }
 0x3aa   :  { %v346_v19 = vsel %vm210_vm2, %v340_v16, 0.0 }
 0x3ab   :  { %347 = vadd.xlane.f32.xlu0 %v346_v19 }
 0x436   :  { %v345_v20 = vpop.xlane.xlu1 %344 }
 0x437   :  { %v349_v21 = vmul.f32 0.25, %v345_v20 }
 0x438   :  { %v348_v22 = vpop.xlane.xlu0 %347 }
 0x439   :  { %v351_v23 = vsub.f32 %v337_v12, %v349_v21  ;;  %v350_v24 = vmul.f32 0.25, %v348_v22 }
 0x43b   :  { %v352_v25 = vsub.f32 %v340_v16, %v350_v24  ;;  %v353_v26 = vmul.f32 %v351_v23, %v351_v23 }
 0x43d   :  { %v355_v27 = vsel %vm210_vm2, %v353_v26, 0.0  ;;  %v354_v28 = vmul.f32 %v352_v25, %v352_v25 }
 0x43e   :  { %356 = vadd.xlane.f32.xlu1 %v355_v27 }
 0x43f   :  { %v358_v29 = vsel %vm210_vm2, %v354_v28, 0.0 }
 0x442   :  { %359 = vadd.xlane.f32.xlu1 %v358_v29 }
 0x4cb   :  { %v357_v30 = vpop.xlane.xlu1 %356 }
 0x4cc   :  { %v361_v31 = vmul.f32 0.25, %v357_v30 }
 0x4ce   :  { %v363_v32 = vadd.f32 1e-05, %v361_v31 }
 0x4cf   :  { %v360_v33 = vpop.xlane.xlu1 %359 }
 0x4d0   :  { %460 = vrsqrt.f32 %v363_v32  ;;  %v362_v34 = vmul.f32 0.25, %v360_v33 }
 0x4d2   :  { %v364_v35 = vadd.f32 1e-05, %v362_v34 }
 0x4d4   :  { %462 = vrsqrt.f32 %v364_v35 }
 0x4da   :  { %v461_v37 = vpop.eup %460 }
 0x4db   :  { %v367_v38 = vmul.f32 %v461_v37, %v278_v36 }
 0x4dd   :  { %371 = vperm.xlu1 %439, %v367_v38   ;;  %v381_v41 = vmul.f32 %v367_v38, %v349_v21 }
 0x4de   :  { %v463_v42 = vpop.eup %462 }
 0x4df   :  { %v383_v43 = vsub.f32 %v280_v39, %v381_v41  ;;  %v368_v44 = vmul.f32 %v463_v42, %v279_v40 }
 0x4e1   :  { %387 = vperm.xlu1 %439, %v383_v43   ;;  %376 = vperm.xlu0 %438, %v368_v44   ;;  %v382_v46 = vmul.f32 %v368_v44, %v350_v24 }
 0x4e3   :  { %v384_v47 = vsub.f32 %v281_v45, %v382_v46 }
 0x4e5   :  { %392 = vperm.xlu1 %439, %v384_v47  }
 0x55c   :  { %v372_v48 = vpop.permute.xlu1 %371 }
 0x55d   :  { %v379_v49 = vmul.f32 %v372_v48, %v337_v12 }
 0x560   :  { %v377_v50 = vpop.permute.xlu0 %376  ;;  %v388_v52 = vpop.permute.xlu1 %387 }
 0x561   :  { %v395_v53 = vadd.f32 %v388_v52, %v379_v49  ;;  %v380_v54 = vmul.f32 %v377_v50, %v340_v16 }
 0x563   :  { %vm397_vm7 = vcmp.gt.f32.partialorder %v395_v53, 0.0  ;;  %v400_v55 = vmul.f32 %v399_v51, %v395_v53 }
 0x564   :  { %v393_v56 = vpop.permute.xlu1 %392 }
 0x565   :  { %v402_v57 = vsel %vm397_vm7, %v395_v53, %v400_v55  ;;  %v396_v58 = vadd.f32 %v393_v56, %v380_v54 }
 0x566   :  { %404 = vst.msk [vmem:[%s641_s11] sm:$0xff] %vm210_vm2, %v402_v57 }
 0x567   :  { %vm398_vm8 = vcmp.gt.f32.partialorder %v396_v58, 0.0  ;;  %v401_v59 = vmul.f32 %v399_v51, %v396_v58 }
 0x569   :  { %v403_v60 = vsel %vm398_vm8, %v396_v58, %v401_v59 }
 0x56a   :  { %405 = vst.msk [vmem:[%s641_s11 + $0x8] sm:$0xff] %vm210_vm2, %v403_v60 }

// kernel: unet2_forward.30
= control target key start
LH: loop header
LB: loop body
LE: loop exit
PB: predicated region body
PF: predicated region fallthrough
CT: control target
= control target key end

     0   :  { %vm27_vm0 = vcmask 1043456   ;;  %vm20_vm1 = vcmask 31744   ;;  %vm110_vm2 = vcmask 130048   ;;  %v190_v17 = vmov 0   ;;  %s249_s1 = inlined_call_operand.vmem [shape: f32[4,16], index: 1, kind: input, shape index: {}]   ;;  %s250_s0 = inlined_call_operand.vmem [shape: f32[16,4], index: 0, kind: input, shape index: {}]   ;;  %s251_s2 = inlined_call_operand.vmem [shape: f32[16,1], index: 2, kind: input, shape index: {}]   ;;  %s252_s3 = inlined_call_operand.vmem [shape: f32[16,1], index: 3, kind: input, shape index: {}]   ;;  %s253_s4 = inlined_call_operand.vmem [shape: f32[16,16], index: 4, kind: output, shape index: {}]  }
   0x1   :  { %v19_v0 = vld [vmem:[%s249_s1] sm:$0xf]  ;;  %v18_v2 = vld [vmem:[%s250_s0 + $0x8] sm:$0xff]  ;;  %184 = vset.pattern.permute.xlu0 %v190_v17  ;;  %185 = vset.pattern.permute.xlu1 %v190_v17 }
   0x2   :  { %v17_v1 = vld [vmem:[%s250_s0] sm:$0xff]  ;;  %178 = vmatprep.subr.msk.mxu0 %vm27_vm0, %v19_v0  ;;  %v107_v27 = vld [vmem:[%s251_s2 + $0x8] sm:$0xff] }
   0x3   :  { %180 = vmatprep.mubr.msk.f32.mxu0 %vm20_vm1, %v17_v1  ;;  %179 = vmatpush3.msk.msra.mxu0 %vm27_vm0, %v19_v0  ;;  %v106_v24 = vld [vmem:[%s251_s2] sm:$0xff]  ;;  %v109_v34 = vld [vmem:[%s252_s3 + $0x8] sm:$0xff] }
   0x4   :  { %181 = vmatmul.mubr.msk.f32.vlgmr.msra.gmra.mrb[0].mxu0 %vm20_vm1, %v18_v2  ;;  %v108_v31 = vld [vmem:[%s252_s3] sm:$0xff] }
  0xd7   :  { %v182_v3 = vpop.f32.mrb[0].mxu0 }
  0xd8   :  { %v97_v4 = vpop.f32.mrb[1].mxu0  ;;  %v114_v6 = vsel %vm110_vm2, %v182_v3, 0.0 }
  0xd9   :  { %v111_v5 = vsel %vm110_vm2, %v97_v4, 0.0 }
  0xda   :  { %112 = vadd.xlane.f32.xlu0 %v111_v5 }
  0xde   :  { %115 = vadd.xlane.f32.xlu0 %v114_v6 }
 0x167   :  { %v113_v7 = vpop.xlane.xlu0 %112 }
 0x168   :  { %v118_v8 = vmul.f32 0.0625, %v113_v7 }
 0x16a   :  { %v120_v9 = vsub.f32 %v97_v4, %v118_v8 }
 0x16b   :  { %v116_v10 = vpop.xlane.xlu0 %115 }
 0x16c   :  { %v119_v11 = vmul.f32 0.0625, %v116_v10  ;;  %v122_v12 = vmul.f32 %v120_v9, %v120_v9 }
 0x16e   :  { %v121_v13 = vsub.f32 %v182_v3, %v119_v11  ;;  %v124_v14 = vsel %vm110_vm2, %v122_v12, 0.0 }
 0x16f   :  { %125 = vadd.xlane.f32.xlu1 %v124_v14 }
 0x170   :  { %v123_v15 = vmul.f32 %v121_v13, %v121_v13 }
 0x172   :  { %v127_v16 = vsel %vm110_vm2, %v123_v15, 0.0 }
 0x173   :  { %128 = vadd.xlane.f32.xlu1 %v127_v16 }
 0x1fc   :  { %v126_v18 = vpop.xlane.xlu1 %125 }
 0x1fd   :  { %v130_v19 = vmul.f32 0.0625, %v126_v18 }
 0x1ff   :  { %v132_v20 = vadd.f32 1e-05, %v130_v19 }
 0x200   :  { %v129_v21 = vpop.xlane.xlu1 %128 }
 0x201   :  { %186 = vrsqrt.f32 %v132_v20  ;;  %v131_v22 = vmul.f32 0.0625, %v129_v21 }
 0x203   :  { %v133_v23 = vadd.f32 1e-05, %v131_v22 }
 0x205   :  { %188 = vrsqrt.f32 %v133_v23 }
 0x20b   :  { %v187_v25 = vpop.eup %186 }
 0x20c   :  { %v136_v26 = vmul.f32 %v187_v25, %v106_v24 }
 0x20e   :  { %140 = vperm.xlu0 %184, %v136_v26   ;;  %v150_v30 = vmul.f32 %v136_v26, %v118_v8 }
 0x20f   :  { %v189_v28 = vpop.eup %188 }
 0x210   :  { %v137_v29 = vmul.f32 %v189_v28, %v107_v27  ;;  %v152_v32 = vsub.f32 %v108_v31, %v150_v30 }
 0x212   :  { %145 = vperm.xlu1 %185, %v137_v29   ;;  %v151_v33 = vmul.f32 %v137_v29, %v119_v11 }
 0x214   :  { %v153_v35 = vsub.f32 %v109_v34, %v151_v33 }
 0x216   :  { %156 = vperm.xlu1 %185, %v152_v32  }
 0x21a   :  { %161 = vperm.xlu1 %185, %v153_v35  }
 0x28d   :  { %v141_v36 = vpop.permute.xlu0 %140 }
 0x28e   :  { %v148_v38 = vmul.f32 %v141_v36, %v97_v4 }
 0x291   :  { %v146_v37 = vpop.permute.xlu1 %145 }
 0x292   :  { %v149_v41 = vmul.f32 %v182_v3, %v146_v37 }
 0x295   :  { %v157_v39 = vpop.permute.xlu1 %156 }
 0x296   :  { %v164_v40 = vadd.f32 %v157_v39, %v148_v38 }
 0x298   :  { %166 = vst.msk [vmem:[%s253_s4] sm:$0xff] %vm110_vm2, %v164_v40 }
 0x299   :  { %v162_v42 = vpop.permute.xlu1 %161 }
 0x29a   :  { %v165_v43 = vadd.f32 %v162_v42, %v149_v41 }
 0x29c   :  { %167 = vst.msk [vmem:[%s253_s4 + $0x8] sm:$0xff] %vm110_vm2, %v165_v43 }

// kernel: unet2_forward.31
= control target key start
LH: loop header
LB: loop body
LE: loop exit
PB: predicated region body
PF: predicated region fallthrough
CT: control target
= control target key end

     0   :  { %v463_v0 = vmov 0   ;;  %vm161_vm0 = vcmask 424960   ;;  %vm165_vm1 = vcmask 1041408   ;;  %vm210_vm2 = vcmask 130048   ;;  %s630_s0 = inlined_call_operand.vmem [shape: bf16[180,16], index: 0, kind: input, shape index: {}]   ;;  %s631_s1 = inlined_call_operand.vmem [shape: bf16[16,180], index: 1, kind: input, shape index: {}]   ;;  %s632_s2 = inlined_call_operand.vmem [shape: f32[16,1], index: 2, kind: input, shape index: {}]   ;;  %s633_s7 = inlined_call_operand.vmem [shape: f32[16,1], index: 7, kind: input, shape index: {}]   ;;  %s634_s3 = inlined_call_operand.vmem [shape: f32[16,1], index: 3, kind: input, shape index: {}]   ;;  %s635_s4 = inlined_call_operand.vmem [shape: f32[16,1], index: 4, kind: input, shape index: {}]   ;;  %s636_s6 = inlined_call_operand.vmem [shape: bf16[16,16], index: 6, kind: input, shape index: {}]   ;;  %s637_s5 = inlined_call_operand.<no memory space> [shape: f32[1], index: 5, kind: input, shape index: {}]   ;;  %s638_s8 = inlined_call_operand.vmem [shape: f32[16,1], index: 8, kind: input, shape index: {}]   ;;  %s639_s9 = inlined_call_operand.vmem [shape: f32[16,1], index: 9, kind: input, shape index: {}]   ;;  %s640_s10 = inlined_call_operand.<no memory space> [shape: f32[1], index: 10, kind: input, shape index: {}]   ;;  %s641_s11 = inlined_call_operand.vmem [shape: f32[16,16], index: 11, kind: output, shape index: {}]  }
   0x1   :  { %169 = vmatprep.subr.bf16.mxu0 %v463_v0  ;;  %v439_v1 = vld [vmem:[%s630_s0] sm:$0xff]   ;;  %437 = vset.pattern.permute.xlu0 %v463_v0  ;;  %v440_v2 = vld [vmem:[%s630_s0 + $0x8] sm:$0xff]   ;;  %v441_v3 = vld [vmem:[%s630_s0 + $0x10] sm:$0xff]   ;;  %v464_v58 = vmov 0.0   ;;  %vm465_vm3 = vmmov 0  }
   0x2   :  { %438 = vset.pattern.permute.xlu1 %v463_v0  ;;  %170 = vmatpush1.bf16.msra.mxu0 %v439_v1  ;;  %v442_v4 = vld [vmem:[%s630_s0 + $0x18] sm:$0xff]   ;;  %v453_v5 = vld [vmem:[%s631_s1 + $0x4] ss:$8 sps:$4 sm:$0xff]   ;;  %v445_v10 = vld [vmem:[%s630_s0 + $0x30] sm:$0xff]  }
   0x3   :  { %171 = vmatprep.subr.bf16.mxu0 %v463_v0  ;;  %v66_v6 = vld [vmem:[%s632_s2] sm:$0xff]  ;;  %423 = vmatprep.mubr.msk.bf16.mxu0 %vm161_vm0, %v453_v5  ;;  %v67_v8 = vld [vmem:[%s632_s2 + $0x8] sm:$0xff]  ;;  %v446_v11 = vld [vmem:[%s630_s0 + $0x38] sm:$0xff]  }
   0x4   :  { %v443_v7 = vld [vmem:[%s630_s0 + $0x20] sm:$0xff]   ;;  %75 = vperm.xlu0 %437, %v66_v6   ;;  %v444_v9 = vld [vmem:[%s630_s0 + $0x28] sm:$0xff]   ;;  %v449_v14 = vld [vmem:[%s630_s0 + $0x50] sm:$0xff]   ;;  %428 = vmatprep.subr.bf16.mxu1 %v464_v58 }
   0x5   :  { %v447_v12 = vld [vmem:[%s630_s0 + $0x40] sm:$0xff]   ;;  %v448_v13 = vld [vmem:[%s630_s0 + $0x48] sm:$0xff]   ;;  %v450_v15 = vld [vmem:[%s630_s0 + $0x58] ss:$0 sps:$4 sm:$0x33]   ;;  %430 = vmatprep.mubr.msk.bf16.mxu1 %vm465_vm3, %v464_v58 }
   0x6   :  { %172 = vmatpush1.bf16.msra.mxu0 %v440_v2  ;;  %v167_v16 = vsel %vm165_vm1, %v450_v15, 0  ;;  %v451_v17 = vld [vmem:[%s631_s1] ss:$8 sps:$4 sm:$0xff]  }
   0x7   :  { %173 = vmatprep.subr.bf16.mxu0 %v463_v0  ;;  %v276_v38 = vld [vmem:[%s633_s7] sm:$0xff]  ;;  %v69_v48 = vld [vmem:[%s634_s3 + $0x8] sm:$0xff] }
   0x8   :  { %80 = vperm.xlu0 %437, %v67_v8   ;;  %v68_v45 = vld [vmem:[%s634_s3] sm:$0xff]  ;;  %v71_v55 = vld [vmem:[%s635_s4 + $0x8] sm:$0xff] }
   0x9   :  { %v70_v52 = vld [vmem:[%s635_s4] sm:$0xff]  ;;  %v277_v57 = vld [vmem:[%s633_s7 + $0x8] sm:$0xff] }
   0xa   :  { %174 = vmatpush1.bf16.msra.mxu0 %v441_v3 }
   0xb   :  { %175 = vmatprep.subr.bf16.mxu0 %v463_v0 }
   0xe   :  { %176 = vmatpush1.bf16.msra.mxu0 %v442_v4 }
   0xf   :  { %177 = vmatprep.subr.bf16.mxu0 %v463_v0 }
  0x12   :  { %178 = vmatpush1.bf16.msra.mxu0 %v443_v7 }
  0x13   :  { %179 = vmatprep.subr.bf16.mxu0 %v463_v0 }
  0x16   :  { %180 = vmatpush1.bf16.msra.mxu0 %v444_v9  ;;  %v454_v9 = vld [vmem:[%s636_s6] sm:$0xff]  }
  0x17   :  { %181 = vmatprep.subr.bf16.mxu0 %v463_v0 }
  0x1a   :  { %182 = vmatpush1.bf16.msra.mxu0 %v445_v10 }
  0x1b   :  { %183 = vmatprep.subr.bf16.mxu0 %v463_v0 }
  0x1e   :  { %184 = vmatpush1.bf16.msra.mxu0 %v446_v11 }
  0x1f   :  { %185 = vmatprep.subr.bf16.mxu0 %v463_v0 }
  0x22   :  { %186 = vmatpush1.bf16.msra.mxu0 %v447_v12 }
  0x23   :  { %187 = vmatprep.subr.bf16.mxu0 %v463_v0 }
  0x26   :  { %188 = vmatpush1.bf16.msra.mxu0 %v448_v13 }
  0x27   :  { %189 = vmatprep.subr.bf16.mxu0 %v463_v0 }
  0x2a   :  { %190 = vmatpush1.bf16.msra.mxu0 %v449_v14 }
  0x2b   :  { %191 = vmatprep.subr.bf16.mxu0 %v463_v0  ;;  %v268_v0 = vstv %s637_s5 }
  0x2e   :  { %192 = vmatpush1.bf16.msra.mxu0 %v167_v16 }
  0x31   :  { %202 = vmatmul.mubr.bf16.vlgmr.msra.gmra.mrb[0].mxu0 %v451_v17 }
  0x83   :  { %v76_v18 = vpop.permute.xlu0 %75 }
  0x87   :  { %v81_v22 = vpop.permute.xlu0 %80 }
 0x104   :  { %v203_v19 = vpop.f32.mrb[0].mxu0 }
 0x105   :  { %v204_v20 = vadd.f32 %v203_v19, %v76_v18  ;;  %v205_v21 = vpop.f32.mrb[1].mxu0 }
 0x106   :  { %v206_v23 = vpop.f32.mrb[2].mxu0 }
 0x107   :  { %v207_v24 = vadd.f32 %v206_v23, %v81_v22  ;;  %v208_v25 = vpop.f32.mrb[3].mxu0  ;;  %v211_v26 = vsel %vm210_vm2, %v204_v20, 0.0 }
 0x108   :  { %212 = vadd.xlane.f32.xlu1 %v211_v26 }
 0x109   :  { %v214_v27 = vsel %vm210_vm2, %v207_v24, 0.0 }
 0x10c   :  { %215 = vadd.xlane.f32.xlu1 %v214_v27 }
 0x195   :  { %v213_v28 = vpop.xlane.xlu1 %212 }
 0x196   :  { %v218_v29 = vmul.f32 0.0625, %v213_v28 }
 0x198   :  { %v220_v30 = vsub.f32 %v204_v20, %v218_v29 }
 0x199   :  { %v216_v31 = vpop.xlane.xlu1 %215 }
 0x19a   :  { %v219_v32 = vmul.f32 0.0625, %v216_v31  ;;  %v222_v33 = vmul.f32 %v220_v30, %v220_v30 }
 0x19c   :  { %v221_v34 = vsub.f32 %v207_v24, %v219_v32  ;;  %v224_v35 = vsel %vm210_vm2, %v222_v33, 0.0 }
 0x19d   :  { %225 = vadd.xlane.f32.xlu0 %v224_v35 }
 0x19e   :  { %v223_v36 = vmul.f32 %v221_v34, %v221_v34 }
 0x1a0   :  { %v227_v37 = vsel %vm210_vm2, %v223_v36, 0.0  ;;  %v278_v36 = vld [vmem:[%s638_s8] sm:$0xff] }
 0x1a1   :  { %228 = vadd.xlane.f32.xlu1 %v227_v37 }
 0x1b3   :  { %285 = vperm.xlu0 %437, %v276_v38  }
 0x22a   :  { %v226_v39 = vpop.xlane.xlu0 %225 }
 0x22b   :  { %v230_v40 = vmul.f32 0.0625, %v226_v39  ;;  %v280_v39 = vld [vmem:[%s639_s9] sm:$0xff] }
 0x22d   :  { %v232_v41 = vadd.f32 1e-05, %v230_v40  ;;  %v279_v40 = vld [vmem:[%s638_s8 + $0x8] sm:$0xff] }
 0x22e   :  { %v229_v42 = vpop.xlane.xlu1 %228 }
 0x22f   :  { %455 = vrsqrt.f32 %v232_v41  ;;  %v231_v43 = vmul.f32 0.0625, %v229_v42 }
 0x231   :  { %v233_v44 = vadd.f32 1e-05, %v231_v43 }
 0x232   :  { %v286_v10 = vpop.permute.xlu0 %285 }
 0x233   :  { %457 = vrsqrt.f32 %v233_v44 }
 0x239   :  { %v456_v46 = vpop.eup %455 }
 0x23a   :  { %v236_v47 = vmul.f32 %v456_v46, %v68_v45  ;;  %v281_v45 = vld [vmem:[%s639_s9 + $0x8] sm:$0xff] }
 0x23c   :  { %240 = vperm.xlu1 %438, %v236_v47   ;;  %v250_v51 = vmul.f32 %v236_v47, %v218_v29 }
 0x23d   :  { %v458_v49 = vpop.eup %457 }
 0x23e   :  { %v237_v50 = vmul.f32 %v458_v49, %v69_v48  ;;  %v252_v53 = vsub.f32 %v70_v52, %v250_v51  ;;  %v398_v51 = vstv %s640_s10 }
 0x240   :  { %245 = vperm.xlu1 %438, %v237_v50   ;;  %v251_v54 = vmul.f32 %v237_v50, %v219_v32 }
 0x242   :  { %v253_v56 = vsub.f32 %v71_v55, %v251_v54 }
 0x244   :  { %256 = vperm.xlu1 %438, %v252_v53  }
 0x248   :  { %261 = vperm.xlu1 %438, %v253_v56  }
 0x24c   :  { %290 = vperm.xlu1 %438, %v277_v57  }
 0x2bb   :  { %v241_v59 = vpop.permute.xlu1 %240 }
 0x2bc   :  { %v248_v61 = vmul.f32 %v241_v59, %v204_v20 }
 0x2bf   :  { %v246_v60 = vpop.permute.xlu1 %245 }
 0x2c0   :  { %v249_v1 = vmul.f32 %v246_v60, %v207_v24 }
 0x2c3   :  { %v257_v62 = vpop.permute.xlu1 %256 }
 0x2c4   :  { %v264_v63 = vadd.f32 %v257_v62, %v248_v61 }
 0x2c6   :  { %v269_v3 = vmul.f32 %v268_v0, %v264_v63  ;;  %vm266_vm4 = vcmp.gt.f32.partialorder %v264_v63, 0.0 }
 0x2c7   :  { %v262_v2 = vpop.permute.xlu1 %261 }
 0x2c8   :  { %v265_v4 = vadd.f32 %v262_v2, %v249_v1  ;;  %v271_v6 = vsel %vm266_vm4, %v264_v63, %v269_v3 }
 0x2ca   :  { %v270_v5 = vmul.f32 %v268_v0, %v265_v4  ;;  %vm267_vm5 = vcmp.gt.f32.partialorder %v265_v4, 0.0 }
 0x2cb   :  { %v291_v14 = vpop.permute.xlu1 %290 }
 0x2cc   :  { %v272_v7 = vsel %vm267_vm5, %v265_v4, %v270_v5 }
 0x2cd   :  { %v273_v8 = vpack.c.bf16 %v272_v7, %v271_v6 }
 0x2cf   :  { %429 = vmatpush3.bf16.msra.mxu1 %v273_v8 }
 0x2d2   :  { %431 = vmatmul.mubr.msk.bf16.vlgmr.msra.gmra.mrb[0].mxu1 %vm210_vm2, %v454_v9 }
 0x3a5   :  { %v335_v11 = vpop.f32.mrb[0].mxu1 }
 0x3a6   :  { %v336_v12 = vadd.f32 %v335_v11, %v286_v10  ;;  %v432_v13 = vpop.f32.mrb[1].mxu1 }
 0x3a7   :  { %v338_v15 = vpop.f32.mrb[2].mxu1 }
 0x3a8   :  { %v339_v16 = vadd.f32 %v338_v15, %v291_v14  ;;  %v433_v17 = vpop.f32.mrb[3].mxu1  ;;  %v342_v18 = vsel %vm210_vm2, %v336_v12, 0.0 }
 0x3a9   :  { %343 = vadd.xlane.f32.xlu1 %v342_v18 }
 0x3aa   :  { %v345_v19 = vsel %vm210_vm2, %v339_v16, 0.0 }
 0x3ab   :  { %346 = vadd.xlane.f32.xlu0 %v345_v19 }
 0x436   :  { %v344_v20 = vpop.xlane.xlu1 %343 }
 0x437   :  { %v348_v21 = vmul.f32 0.0625, %v344_v20 }
 0x438   :  { %v347_v22 = vpop.xlane.xlu0 %346 }
 0x439   :  { %v350_v23 = vsub.f32 %v336_v12, %v348_v21  ;;  %v349_v24 = vmul.f32 0.0625, %v347_v22 }
 0x43b   :  { %v351_v25 = vsub.f32 %v339_v16, %v349_v24  ;;  %v352_v26 = vmul.f32 %v350_v23, %v350_v23 }
 0x43d   :  { %v354_v27 = vsel %vm210_vm2, %v352_v26, 0.0  ;;  %v353_v28 = vmul.f32 %v351_v25, %v351_v25 }
 0x43e   :  { %355 = vadd.xlane.f32.xlu1 %v354_v27 }
 0x43f   :  { %v357_v29 = vsel %vm210_vm2, %v353_v28, 0.0 }
 0x442   :  { %358 = vadd.xlane.f32.xlu1 %v357_v29 }
 0x4cb   :  { %v356_v30 = vpop.xlane.xlu1 %355 }
 0x4cc   :  { %v360_v31 = vmul.f32 0.0625, %v356_v30 }
 0x4ce   :  { %v362_v32 = vadd.f32 1e-05, %v360_v31 }
 0x4cf   :  { %v359_v33 = vpop.xlane.xlu1 %358 }
 0x4d0   :  { %459 = vrsqrt.f32 %v362_v32  ;;  %v361_v34 = vmul.f32 0.0625, %v359_v33 }
 0x4d2   :  { %v363_v35 = vadd.f32 1e-05, %v361_v34 }
 0x4d4   :  { %461 = vrsqrt.f32 %v363_v35 }
 0x4da   :  { %v460_v37 = vpop.eup %459 }
 0x4db   :  { %v366_v38 = vmul.f32 %v460_v37, %v278_v36 }
 0x4dd   :  { %370 = vperm.xlu1 %438, %v366_v38   ;;  %v380_v41 = vmul.f32 %v366_v38, %v348_v21 }
 0x4de   :  { %v462_v42 = vpop.eup %461 }
 0x4df   :  { %v382_v43 = vsub.f32 %v280_v39, %v380_v41  ;;  %v367_v44 = vmul.f32 %v462_v42, %v279_v40 }
 0x4e1   :  { %386 = vperm.xlu1 %438, %v382_v43   ;;  %375 = vperm.xlu0 %437, %v367_v44   ;;  %v381_v46 = vmul.f32 %v367_v44, %v349_v24 }
 0x4e3   :  { %v383_v47 = vsub.f32 %v281_v45, %v381_v46 }
 0x4e5   :  { %391 = vperm.xlu1 %438, %v383_v47  }
 0x55c   :  { %v371_v48 = vpop.permute.xlu1 %370 }
 0x55d   :  { %v378_v49 = vmul.f32 %v371_v48, %v336_v12 }
 0x560   :  { %v376_v50 = vpop.permute.xlu0 %375  ;;  %v387_v52 = vpop.permute.xlu1 %386 }
 0x561   :  { %v394_v53 = vadd.f32 %v387_v52, %v378_v49  ;;  %v379_v54 = vmul.f32 %v376_v50, %v339_v16 }
 0x563   :  { %vm396_vm6 = vcmp.gt.f32.partialorder %v394_v53, 0.0  ;;  %v399_v55 = vmul.f32 %v398_v51, %v394_v53 }
 0x564   :  { %v392_v56 = vpop.permute.xlu1 %391 }
 0x565   :  { %v401_v57 = vsel %vm396_vm6, %v394_v53, %v399_v55  ;;  %v395_v58 = vadd.f32 %v392_v56, %v379_v54 }
 0x566   :  { %403 = vst.msk [vmem:[%s641_s11] sm:$0xff] %vm210_vm2, %v401_v57 }
 0x567   :  { %vm397_vm7 = vcmp.gt.f32.partialorder %v395_v58, 0.0  ;;  %v400_v59 = vmul.f32 %v398_v51, %v395_v58 }
 0x569   :  { %v402_v60 = vsel %vm397_vm7, %v395_v58, %v400_v59 }
 0x56a   :  { %404 = vst.msk [vmem:[%s641_s11 + $0x8] sm:$0xff] %vm210_vm2, %v402_v60 }

// kernel: unet2_forward.32
= control target key start
LH: loop header
LB: loop body
LE: loop exit
PB: predicated region body
PF: predicated region fallthrough
CT: control target
= control target key end

     0   :  { %vm21_vm0 = vcmask 130048   ;;  %vm107_vm1 = vcmask 523264   ;;  %v193_v19 = vmov 0   ;;  %s255_s1 = inlined_call_operand.vmem [shape: f32[16,64], index: 1, kind: input, shape index: {}]   ;;  %s256_s0 = inlined_call_operand.vmem [shape: f32[16,16], index: 0, kind: input, shape index: {}]   ;;  %s257_s2 = inlined_call_operand.vmem [shape: f32[16,1], index: 2, kind: input, shape index: {}]   ;;  %s258_s3 = inlined_call_operand.vmem [shape: f32[16,1], index: 3, kind: input, shape index: {}]   ;;  %s259_s4 = inlined_call_operand.vmem [shape: f32[16,64], index: 4, kind: output, shape index: {}]  }
   0x1   :  { %v19_v0 = vld [vmem:[%s255_s1] sm:$0xff]  ;;  %v20_v1 = vld [vmem:[%s255_s1 + $0x8] sm:$0xff]  ;;  %187 = vset.pattern.permute.xlu0 %v193_v19  ;;  %188 = vset.pattern.permute.xlu1 %v193_v19 }
   0x2   :  { %v17_v2 = vld [vmem:[%s256_s0] sm:$0xff]  ;;  %v182_v3 = vpack.c.bf16 %v20_v1, %v19_v0  ;;  %v18_v4 = vld [vmem:[%s256_s0 + $0x8] sm:$0xff] }
   0x3   :  { %179 = vmatprep.mubr.msk.f32.mxu0 %vm21_vm0, %v17_v2  ;;  %v103_v26 = vld [vmem:[%s257_s2] sm:$0xff]  ;;  %v104_v29 = vld [vmem:[%s257_s2 + $0x8] sm:$0xff] }
   0x4   :  { %183 = vmatprep.subr.bf16.mxu0 %v182_v3  ;;  %v105_v33 = vld [vmem:[%s258_s3] sm:$0xff]  ;;  %v106_v36 = vld [vmem:[%s258_s3 + $0x8] sm:$0xff] }
   0x5   :  { %185 = vmatpush3.bf16.msra.mxu0 %v182_v3 }
   0x8   :  { %180 = vmatmul.mubr.msk.f32.vlgmr.msra.gmra.mrb[0].mxu0 %vm21_vm0, %v18_v4 }
  0xdb   :  { %v181_v5 = vpop.f32.mrb[0].mxu0 }
  0xdc   :  { %v94_v6 = vpop.f32.mrb[1].mxu0  ;;  %v111_v8 = vsel %vm107_vm1, %v181_v5, 0.0 }
  0xdd   :  { %v108_v7 = vsel %vm107_vm1, %v94_v6, 0.0 }
  0xde   :  { %109 = vadd.xlane.f32.xlu0 %v108_v7 }
  0xe2   :  { %112 = vadd.xlane.f32.xlu0 %v111_v8 }
 0x16b   :  { %v110_v9 = vpop.xlane.xlu0 %109 }
 0x16c   :  { %v115_v10 = vmul.f32 0.015625, %v110_v9 }
 0x16e   :  { %v117_v11 = vsub.f32 %v94_v6, %v115_v10 }
 0x16f   :  { %v113_v12 = vpop.xlane.xlu0 %112 }
 0x170   :  { %v116_v13 = vmul.f32 0.015625, %v113_v12  ;;  %v119_v14 = vmul.f32 %v117_v11, %v117_v11 }
 0x172   :  { %v118_v15 = vsub.f32 %v181_v5, %v116_v13  ;;  %v121_v16 = vsel %vm107_vm1, %v119_v14, 0.0 }
 0x173   :  { %122 = vadd.xlane.f32.xlu1 %v121_v16 }
 0x174   :  { %v120_v17 = vmul.f32 %v118_v15, %v118_v15 }
 0x176   :  { %v124_v18 = vsel %vm107_vm1, %v120_v17, 0.0 }
 0x177   :  { %125 = vadd.xlane.f32.xlu1 %v124_v18 }
 0x200   :  { %v123_v20 = vpop.xlane.xlu1 %122 }
 0x201   :  { %v127_v21 = vmul.f32 0.015625, %v123_v20 }
 0x203   :  { %v129_v22 = vadd.f32 1e-05, %v127_v21 }
 0x204   :  { %v126_v23 = vpop.xlane.xlu1 %125 }
 0x205   :  { %189 = vrsqrt.f32 %v129_v22  ;;  %v128_v24 = vmul.f32 0.015625, %v126_v23 }
 0x207   :  { %v130_v25 = vadd.f32 1e-05, %v128_v24 }
 0x209   :  { %191 = vrsqrt.f32 %v130_v25 }
 0x20f   :  { %v190_v27 = vpop.eup %189 }
 0x210   :  { %v133_v28 = vmul.f32 %v190_v27, %v103_v26 }
 0x212   :  { %137 = vperm.xlu0 %187, %v133_v28   ;;  %v147_v32 = vmul.f32 %v133_v28, %v115_v10 }
 0x213   :  { %v192_v30 = vpop.eup %191 }
 0x214   :  { %v134_v31 = vmul.f32 %v192_v30, %v104_v29  ;;  %v149_v34 = vsub.f32 %v105_v33, %v147_v32 }
 0x216   :  { %142 = vperm.xlu1 %188, %v134_v31   ;;  %v148_v35 = vmul.f32 %v134_v31, %v116_v13 }
 0x218   :  { %v150_v37 = vsub.f32 %v106_v36, %v148_v35 }
 0x21a   :  { %153 = vperm.xlu1 %188, %v149_v34  }
 0x21e   :  { %158 = vperm.xlu1 %188, %v150_v37  }
 0x291   :  { %v138_v38 = vpop.permute.xlu0 %137 }
 0x292   :  { %v145_v40 = vmul.f32 %v138_v38, %v94_v6 }
 0x295   :  { %v143_v39 = vpop.permute.xlu1 %142 }
 0x296   :  { %v146_v43 = vmul.f32 %v181_v5, %v143_v39 }
 0x299   :  { %v154_v41 = vpop.permute.xlu1 %153 }
 0x29a   :  { %v161_v42 = vadd.f32 %v154_v41, %v145_v40 }
 0x29c   :  { %163 = vst.msk [vmem:[%s259_s4] sm:$0xff] %vm107_vm1, %v161_v42 }
 0x29d   :  { %v159_v44 = vpop.permute.xlu1 %158 }
 0x29e   :  { %v162_v45 = vadd.f32 %v159_v44, %v146_v43 }
 0x2a0   :  { %164 = vst.msk [vmem:[%s259_s4 + $0x8] sm:$0xff] %vm107_vm1, %v162_v45 }

// kernel: unet2_forward.33
= control target key start
LH: loop header
LB: loop body
LE: loop exit
PB: predicated region body
PF: predicated region fallthrough
CT: control target
= control target key end

     0   :  { %v464_v0 = vmov 0   ;;  %vm161_vm0 = vcmask 424960   ;;  %vm165_vm1 = vcmask 1041408   ;;  %vm210_vm2 = vcmask 523264   ;;  %s630_s0 = inlined_call_operand.vmem [shape: bf16[180,64], index: 0, kind: input, shape index: {}]   ;;  %s631_s1 = inlined_call_operand.vmem [shape: bf16[16,180], index: 1, kind: input, shape index: {}]   ;;  %s632_s2 = inlined_call_operand.vmem [shape: f32[16,1], index: 2, kind: input, shape index: {}]   ;;  %s633_s7 = inlined_call_operand.vmem [shape: f32[16,1], index: 7, kind: input, shape index: {}]   ;;  %s634_s3 = inlined_call_operand.vmem [shape: f32[16,1], index: 3, kind: input, shape index: {}]   ;;  %s635_s4 = inlined_call_operand.vmem [shape: f32[16,1], index: 4, kind: input, shape index: {}]   ;;  %s636_s6 = inlined_call_operand.vmem [shape: bf16[16,16], index: 6, kind: input, shape index: {}]   ;;  %s637_s5 = inlined_call_operand.<no memory space> [shape: f32[1], index: 5, kind: input, shape index: {}]   ;;  %s638_s8 = inlined_call_operand.vmem [shape: f32[16,1], index: 8, kind: input, shape index: {}]   ;;  %s639_s9 = inlined_call_operand.vmem [shape: f32[16,1], index: 9, kind: input, shape index: {}]   ;;  %s640_s10 = inlined_call_operand.<no memory space> [shape: f32[1], index: 10, kind: input, shape index: {}]   ;;  %s641_s11 = inlined_call_operand.vmem [shape: f32[16,64], index: 11, kind: output, shape index: {}]  }
   0x1   :  { %169 = vmatprep.subr.bf16.mxu0 %v464_v0  ;;  %v440_v1 = vld [vmem:[%s630_s0] sm:$0xff]   ;;  %438 = vset.pattern.permute.xlu0 %v464_v0  ;;  %v441_v2 = vld [vmem:[%s630_s0 + $0x8] sm:$0xff]   ;;  %v442_v3 = vld [vmem:[%s630_s0 + $0x10] sm:$0xff]   ;;  %v465_v58 = vmov 0.0   ;;  %vm466_vm3 = vmmov 0   ;;  %vm298_vm6 = vcmask 130048  }
   0x2   :  { %439 = vset.pattern.permute.xlu1 %v464_v0  ;;  %170 = vmatpush1.bf16.msra.mxu0 %v440_v1  ;;  %v443_v4 = vld [vmem:[%s630_s0 + $0x18] sm:$0xff]   ;;  %v454_v5 = vld [vmem:[%s631_s1 + $0x4] ss:$8 sps:$4 sm:$0xff]   ;;  %v446_v10 = vld [vmem:[%s630_s0 + $0x30] sm:$0xff]  }
   0x3   :  { %171 = vmatprep.subr.bf16.mxu0 %v464_v0  ;;  %v66_v6 = vld [vmem:[%s632_s2] sm:$0xff]  ;;  %424 = vmatprep.mubr.msk.bf16.mxu0 %vm161_vm0, %v454_v5  ;;  %v67_v8 = vld [vmem:[%s632_s2 + $0x8] sm:$0xff]  ;;  %v447_v11 = vld [vmem:[%s630_s0 + $0x38] sm:$0xff]  }
   0x4   :  { %v444_v7 = vld [vmem:[%s630_s0 + $0x20] sm:$0xff]   ;;  %75 = vperm.xlu0 %438, %v66_v6   ;;  %v445_v9 = vld [vmem:[%s630_s0 + $0x28] sm:$0xff]   ;;  %v450_v14 = vld [vmem:[%s630_s0 + $0x50] sm:$0xff]   ;;  %429 = vmatprep.subr.bf16.mxu1 %v465_v58 }
   0x5   :  { %v448_v12 = vld [vmem:[%s630_s0 + $0x40] sm:$0xff]   ;;  %v449_v13 = vld [vmem:[%s630_s0 + $0x48] sm:$0xff]   ;;  %v451_v15 = vld [vmem:[%s630_s0 + $0x58] ss:$0 sps:$4 sm:$0x33]   ;;  %431 = vmatprep.mubr.msk.bf16.mxu1 %vm466_vm3, %v465_v58 }
   0x6   :  { %172 = vmatpush1.bf16.msra.mxu0 %v441_v2  ;;  %v167_v16 = vsel %vm165_vm1, %v451_v15, 0  ;;  %v452_v17 = vld [vmem:[%s631_s1] ss:$8 sps:$4 sm:$0xff]  }
   0x7   :  { %173 = vmatprep.subr.bf16.mxu0 %v464_v0  ;;  %v276_v38 = vld [vmem:[%s633_s7] sm:$0xff]  ;;  %v69_v48 = vld [vmem:[%s634_s3 + $0x8] sm:$0xff] }
   0x8   :  { %80 = vperm.xlu0 %438, %v67_v8   ;;  %v68_v45 = vld [vmem:[%s634_s3] sm:$0xff]  ;;  %v71_v55 = vld [vmem:[%s635_s4 + $0x8] sm:$0xff] }
   0x9   :  { %v70_v52 = vld [vmem:[%s635_s4] sm:$0xff]  ;;  %v277_v57 = vld [vmem:[%s633_s7 + $0x8] sm:$0xff] }
   0xa   :  { %174 = vmatpush1.bf16.msra.mxu0 %v442_v3 }
   0xb   :  { %175 = vmatprep.subr.bf16.mxu0 %v464_v0 }
   0xe   :  { %176 = vmatpush1.bf16.msra.mxu0 %v443_v4 }
   0xf   :  { %177 = vmatprep.subr.bf16.mxu0 %v464_v0 }
  0x12   :  { %178 = vmatpush1.bf16.msra.mxu0 %v444_v7 }
  0x13   :  { %179 = vmatprep.subr.bf16.mxu0 %v464_v0 }
  0x16   :  { %180 = vmatpush1.bf16.msra.mxu0 %v445_v9  ;;  %v455_v9 = vld [vmem:[%s636_s6] sm:$0xff]  }
  0x17   :  { %181 = vmatprep.subr.bf16.mxu0 %v464_v0 }
  0x1a   :  { %182 = vmatpush1.bf16.msra.mxu0 %v446_v10 }
  0x1b   :  { %183 = vmatprep.subr.bf16.mxu0 %v464_v0 }
  0x1e   :  { %184 = vmatpush1.bf16.msra.mxu0 %v447_v11 }
  0x1f   :  { %185 = vmatprep.subr.bf16.mxu0 %v464_v0 }
  0x22   :  { %186 = vmatpush1.bf16.msra.mxu0 %v448_v12 }
  0x23   :  { %187 = vmatprep.subr.bf16.mxu0 %v464_v0 }
  0x26   :  { %188 = vmatpush1.bf16.msra.mxu0 %v449_v13 }
  0x27   :  { %189 = vmatprep.subr.bf16.mxu0 %v464_v0 }
  0x2a   :  { %190 = vmatpush1.bf16.msra.mxu0 %v450_v14 }
  0x2b   :  { %191 = vmatprep.subr.bf16.mxu0 %v464_v0  ;;  %v268_v0 = vstv %s637_s5 }
  0x2e   :  { %192 = vmatpush1.bf16.msra.mxu0 %v167_v16 }
  0x31   :  { %202 = vmatmul.mubr.bf16.vlgmr.msra.gmra.mrb[0].mxu0 %v452_v17 }
  0x83   :  { %v76_v18 = vpop.permute.xlu0 %75 }
  0x87   :  { %v81_v22 = vpop.permute.xlu0 %80 }
 0x104   :  { %v203_v19 = vpop.f32.mrb[0].mxu0 }
 0x105   :  { %v204_v20 = vadd.f32 %v203_v19, %v76_v18  ;;  %v205_v21 = vpop.f32.mrb[1].mxu0 }
 0x106   :  { %v206_v23 = vpop.f32.mrb[2].mxu0 }
 0x107   :  { %v207_v24 = vadd.f32 %v206_v23, %v81_v22  ;;  %v208_v25 = vpop.f32.mrb[3].mxu0  ;;  %v211_v26 = vsel %vm210_vm2, %v204_v20, 0.0 }
 0x108   :  { %212 = vadd.xlane.f32.xlu1 %v211_v26 }
 0x109   :  { %v214_v27 = vsel %vm210_vm2, %v207_v24, 0.0 }
 0x10c   :  { %215 = vadd.xlane.f32.xlu1 %v214_v27 }
 0x195   :  { %v213_v28 = vpop.xlane.xlu1 %212 }
 0x196   :  { %v218_v29 = vmul.f32 0.015625, %v213_v28 }
 0x198   :  { %v220_v30 = vsub.f32 %v204_v20, %v218_v29 }
 0x199   :  { %v216_v31 = vpop.xlane.xlu1 %215 }
 0x19a   :  { %v219_v32 = vmul.f32 0.015625, %v216_v31  ;;  %v222_v33 = vmul.f32 %v220_v30, %v220_v30 }
 0x19c   :  { %v221_v34 = vsub.f32 %v207_v24, %v219_v32  ;;  %v224_v35 = vsel %vm210_vm2, %v222_v33, 0.0 }
 0x19d   :  { %225 = vadd.xlane.f32.xlu0 %v224_v35 }
 0x19e   :  { %v223_v36 = vmul.f32 %v221_v34, %v221_v34 }
 0x1a0   :  { %v227_v37 = vsel %vm210_vm2, %v223_v36, 0.0  ;;  %v278_v36 = vld [vmem:[%s638_s8] sm:$0xff] }
 0x1a1   :  { %228 = vadd.xlane.f32.xlu1 %v227_v37 }
 0x1b3   :  { %285 = vperm.xlu0 %438, %v276_v38  }
 0x22a   :  { %v226_v39 = vpop.xlane.xlu0 %225 }
 0x22b   :  { %v230_v40 = vmul.f32 0.015625, %v226_v39  ;;  %v280_v39 = vld [vmem:[%s639_s9] sm:$0xff] }
 0x22d   :  { %v232_v41 = vadd.f32 1e-05, %v230_v40  ;;  %v279_v40 = vld [vmem:[%s638_s8 + $0x8] sm:$0xff] }
 0x22e   :  { %v229_v42 = vpop.xlane.xlu1 %228 }
 0x22f   :  { %456 = vrsqrt.f32 %v232_v41  ;;  %v231_v43 = vmul.f32 0.015625, %v229_v42 }
 0x231   :  { %v233_v44 = vadd.f32 1e-05, %v231_v43 }
 0x232   :  { %v286_v10 = vpop.permute.xlu0 %285 }
 0x233   :  { %458 = vrsqrt.f32 %v233_v44 }
 0x239   :  { %v457_v46 = vpop.eup %456 }
 0x23a   :  { %v236_v47 = vmul.f32 %v457_v46, %v68_v45  ;;  %v281_v45 = vld [vmem:[%s639_s9 + $0x8] sm:$0xff] }
 0x23c   :  { %240 = vperm.xlu1 %439, %v236_v47   ;;  %v250_v51 = vmul.f32 %v236_v47, %v218_v29 }
 0x23d   :  { %v459_v49 = vpop.eup %458 }
 0x23e   :  { %v237_v50 = vmul.f32 %v459_v49, %v69_v48  ;;  %v252_v53 = vsub.f32 %v70_v52, %v250_v51  ;;  %v399_v51 = vstv %s640_s10 }
 0x240   :  { %245 = vperm.xlu1 %439, %v237_v50   ;;  %v251_v54 = vmul.f32 %v237_v50, %v219_v32 }
 0x242   :  { %v253_v56 = vsub.f32 %v71_v55, %v251_v54 }
 0x244   :  { %256 = vperm.xlu1 %439, %v252_v53  }
 0x248   :  { %261 = vperm.xlu1 %439, %v253_v56  }
 0x24c   :  { %290 = vperm.xlu1 %439, %v277_v57  }
 0x2bb   :  { %v241_v59 = vpop.permute.xlu1 %240 }
 0x2bc   :  { %v248_v61 = vmul.f32 %v241_v59, %v204_v20 }
 0x2bf   :  { %v246_v60 = vpop.permute.xlu1 %245 }
 0x2c0   :  { %v249_v1 = vmul.f32 %v246_v60, %v207_v24 }
 0x2c3   :  { %v257_v62 = vpop.permute.xlu1 %256 }
 0x2c4   :  { %v264_v63 = vadd.f32 %v257_v62, %v248_v61 }
 0x2c6   :  { %v269_v3 = vmul.f32 %v268_v0, %v264_v63  ;;  %vm266_vm4 = vcmp.gt.f32.partialorder %v264_v63, 0.0 }
 0x2c7   :  { %v262_v2 = vpop.permute.xlu1 %261 }
 0x2c8   :  { %v265_v4 = vadd.f32 %v262_v2, %v249_v1  ;;  %v271_v6 = vsel %vm266_vm4, %v264_v63, %v269_v3 }
 0x2ca   :  { %v270_v5 = vmul.f32 %v268_v0, %v265_v4  ;;  %vm267_vm5 = vcmp.gt.f32.partialorder %v265_v4, 0.0 }
 0x2cb   :  { %v291_v14 = vpop.permute.xlu1 %290 }
 0x2cc   :  { %v272_v7 = vsel %vm267_vm5, %v265_v4, %v270_v5 }
 0x2cd   :  { %v273_v8 = vpack.c.bf16 %v272_v7, %v271_v6 }
 0x2cf   :  { %430 = vmatpush3.bf16.msra.mxu1 %v273_v8 }
 0x2d2   :  { %432 = vmatmul.mubr.msk.bf16.vlgmr.msra.gmra.mrb[0].mxu1 %vm298_vm6, %v455_v9 }
 0x3a5   :  { %v336_v11 = vpop.f32.mrb[0].mxu1 }
 0x3a6   :  { %v337_v12 = vadd.f32 %v336_v11, %v286_v10  ;;  %v433_v13 = vpop.f32.mrb[1].mxu1 }
 0x3a7   :  { %v339_v15 = vpop.f32.mrb[2].mxu1 }
 0x3a8   :  { %v340_v16 = vadd.f32 %v339_v15, %v291_v14  ;;  %v434_v17 = vpop.f32.mrb[3].mxu1  ;;  %v343_v18 = vsel %vm210_vm2, %v337_v12, 0.0 }
 0x3a9   :  { %344 = vadd.xlane.f32.xlu1 %v343_v18 }
 0x3aa   :  { %v346_v19 = vsel %vm210_vm2, %v340_v16, 0.0 }
 0x3ab   :  { %347 = vadd.xlane.f32.xlu0 %v346_v19 }
 0x436   :  { %v345_v20 = vpop.xlane.xlu1 %344 }
 0x437   :  { %v349_v21 = vmul.f32 0.015625, %v345_v20 }
 0x438   :  { %v348_v22 = vpop.xlane.xlu0 %347 }
 0x439   :  { %v351_v23 = vsub.f32 %v337_v12, %v349_v21  ;;  %v350_v24 = vmul.f32 0.015625, %v348_v22 }
 0x43b   :  { %v352_v25 = vsub.f32 %v340_v16, %v350_v24  ;;  %v353_v26 = vmul.f32 %v351_v23, %v351_v23 }
 0x43d   :  { %v355_v27 = vsel %vm210_vm2, %v353_v26, 0.0  ;;  %v354_v28 = vmul.f32 %v352_v25, %v352_v25 }
 0x43e   :  { %356 = vadd.xlane.f32.xlu1 %v355_v27 }
 0x43f   :  { %v358_v29 = vsel %vm210_vm2, %v354_v28, 0.0 }
 0x442   :  { %359 = vadd.xlane.f32.xlu1 %v358_v29 }
 0x4cb   :  { %v357_v30 = vpop.xlane.xlu1 %356 }
 0x4cc   :  { %v361_v31 = vmul.f32 0.015625, %v357_v30 }
 0x4ce   :  { %v363_v32 = vadd.f32 1e-05, %v361_v31 }
 0x4cf   :  { %v360_v33 = vpop.xlane.xlu1 %359 }
 0x4d0   :  { %460 = vrsqrt.f32 %v363_v32  ;;  %v362_v34 = vmul.f32 0.015625, %v360_v33 }
 0x4d2   :  { %v364_v35 = vadd.f32 1e-05, %v362_v34 }
 0x4d4   :  { %462 = vrsqrt.f32 %v364_v35 }
 0x4da   :  { %v461_v37 = vpop.eup %460 }
 0x4db   :  { %v367_v38 = vmul.f32 %v461_v37, %v278_v36 }
 0x4dd   :  { %371 = vperm.xlu1 %439, %v367_v38   ;;  %v381_v41 = vmul.f32 %v367_v38, %v349_v21 }
 0x4de   :  { %v463_v42 = vpop.eup %462 }
 0x4df   :  { %v383_v43 = vsub.f32 %v280_v39, %v381_v41  ;;  %v368_v44 = vmul.f32 %v463_v42, %v279_v40 }
 0x4e1   :  { %387 = vperm.xlu1 %439, %v383_v43   ;;  %376 = vperm.xlu0 %438, %v368_v44   ;;  %v382_v46 = vmul.f32 %v368_v44, %v350_v24 }
 0x4e3   :  { %v384_v47 = vsub.f32 %v281_v45, %v382_v46 }
 0x4e5   :  { %392 = vperm.xlu1 %439, %v384_v47  }
 0x55c   :  { %v372_v48 = vpop.permute.xlu1 %371 }
 0x55d   :  { %v379_v49 = vmul.f32 %v372_v48, %v337_v12 }
 0x560   :  { %v377_v50 = vpop.permute.xlu0 %376  ;;  %v388_v52 = vpop.permute.xlu1 %387 }
 0x561   :  { %v395_v53 = vadd.f32 %v388_v52, %v379_v49  ;;  %v380_v54 = vmul.f32 %v377_v50, %v340_v16 }
 0x563   :  { %vm397_vm7 = vcmp.gt.f32.partialorder %v395_v53, 0.0  ;;  %v400_v55 = vmul.f32 %v399_v51, %v395_v53 }
 0x564   :  { %v393_v56 = vpop.permute.xlu1 %392 }
 0x565   :  { %v402_v57 = vsel %vm397_vm7, %v395_v53, %v400_v55  ;;  %v396_v58 = vadd.f32 %v393_v56, %v380_v54 }
 0x566   :  { %404 = vst.msk [vmem:[%s641_s11] sm:$0xff] %vm210_vm2, %v402_v57 }
 0x567   :  { %vm398_vm8 = vcmp.gt.f32.partialorder %v396_v58, 0.0  ;;  %v401_v59 = vmul.f32 %v399_v51, %v396_v58 }
 0x569   :  { %v403_v60 = vsel %vm398_vm8, %v396_v58, %v401_v59 }
 0x56a   :  { %405 = vst.msk [vmem:[%s641_s11 + $0x8] sm:$0xff] %vm210_vm2, %v403_v60 }

// kernel: unet2_forward.34
= control target key start
LH: loop header
LB: loop body
LE: loop exit
PB: predicated region body
PF: predicated region fallthrough
CT: control target
= control target key end

     0   :  { %v228_v3 = vmov 0.0   ;;  %vm35_vm0 = vcmask 523264   ;;  %v229_v47 = vmov 0   ;;  %s333_s1 = inlined_call_operand.vmem [shape: f32[64,256], index: 1, kind: input, shape index: {}]   ;;  %s334_s0 = inlined_call_operand.vmem [shape: f32[16,64], index: 0, kind: input, shape index: {}]   ;;  %s335_s2 = inlined_call_operand.vmem [shape: f32[16,1], index: 2, kind: input, shape index: {}]   ;;  %s336_s3 = inlined_call_operand.vmem [shape: f32[16,1], index: 3, kind: input, shape index: {}]   ;;  %s337_s4 = inlined_call_operand.vmem [shape: f32[16,256], index: 4, kind: output, shape index: {}]  }
   0x1   :  { %v20_v0 = vld [vmem:[%s333_s1 + $0x8] sm:$0xff]  ;;  %v22_v1 = vld [vmem:[%s333_s1 + $0x18] sm:$0xff]  ;;  %v19_v2 = vld [vmem:[%s333_s1] sm:$0xff]  ;;  %106 = vmatprep.mubr.f32.mxu0 %v228_v3  ;;  %112 = vmatprep.mubr.f32.mxu1 %v228_v3 }
   0x2   :  { %v196_v4 = vpack.c.bf16 %v22_v1, %v20_v0  ;;  %v21_v5 = vld [vmem:[%s333_s1 + $0x10] sm:$0xff]  ;;  %v24_v6 = vld [vmem:[%s333_s1 + $0x28] sm:$0xff]  ;;  %v26_v7 = vld [vmem:[%s333_s1 + $0x38] sm:$0xff]  ;;  %222 = vset.pattern.permute.xlu0 %v229_v47  ;;  %223 = vset.pattern.permute.xlu1 %v229_v47 }
   0x3   :  { %v198_v8 = vpack.c.bf16 %v21_v5, %v19_v2  ;;  %v200_v9 = vpack.c.bf16 %v26_v7, %v24_v6  ;;  %v23_v10 = vld [vmem:[%s333_s1 + $0x20] sm:$0xff]  ;;  %v25_v11 = vld [vmem:[%s333_s1 + $0x30] sm:$0xff]  ;;  %v28_v12 = vld [vmem:[%s333_s1 + $0x48] sm:$0xff] }
   0x4   :  { %197 = vmatprep.subr.bf16.mxu0 %v196_v4  ;;  %212 = vmatprep.subr.bf16.mxu1 %v196_v4  ;;  %v30_v13 = vld [vmem:[%s333_s1 + $0x58] sm:$0xff]  ;;  %v202_v14 = vpack.c.bf16 %v25_v11, %v23_v10  ;;  %v27_v16 = vld [vmem:[%s333_s1 + $0x40] sm:$0xff]  ;;  %v29_v17 = vld [vmem:[%s333_s1 + $0x50] sm:$0xff] }
   0x5   :  { %199 = vmatpush1.bf16.msra.mxu0 %v198_v8  ;;  %216 = vmatpush1.bf16.msra.mxu1 %v198_v8  ;;  %v204_v15 = vpack.c.bf16 %v30_v13, %v28_v12  ;;  %v32_v18 = vld [vmem:[%s333_s1 + $0x68] sm:$0xff]  ;;  %v34_v19 = vld [vmem:[%s333_s1 + $0x78] sm:$0xff]  ;;  %v206_v20 = vpack.c.bf16 %v29_v17, %v27_v16  ;;  %v31_v22 = vld [vmem:[%s333_s1 + $0x60] sm:$0xff] }
   0x6   :  { %201 = vmatprep.subr.bf16.mxu0 %v200_v9  ;;  %213 = vmatprep.subr.bf16.mxu1 %v200_v9  ;;  %v208_v21 = vpack.c.bf16 %v34_v19, %v32_v18  ;;  %v33_v23 = vld [vmem:[%s333_s1 + $0x70] sm:$0xff]  ;;  %v17_v25 = vld [vmem:[%s334_s0] sm:$0xff]  ;;  %v18_v26 = vld [vmem:[%s334_s0 + $0x8] sm:$0xff] }
   0x7   :  { %v210_v24 = vpack.c.bf16 %v33_v23, %v31_v22  ;;  %v119_v54 = vld [vmem:[%s335_s2] sm:$0xff]  ;;  %v120_v57 = vld [vmem:[%s335_s2 + $0x8] sm:$0xff] }
   0x8   :  { %v121_v61 = vld [vmem:[%s336_s3] sm:$0xff]  ;;  %v122_v0 = vld [vmem:[%s336_s3 + $0x8] sm:$0xff] }
   0x9   :  { %203 = vmatpush1.bf16.msra.mxu0 %v202_v14  ;;  %217 = vmatpush1.bf16.msra.mxu1 %v202_v14 }
   0xa   :  { %205 = vmatprep.subr.bf16.mxu0 %v204_v15  ;;  %214 = vmatprep.subr.bf16.mxu1 %v204_v15 }
   0xd   :  { %207 = vmatpush1.bf16.msra.mxu0 %v206_v20  ;;  %218 = vmatpush1.bf16.msra.mxu1 %v206_v20 }
   0xe   :  { %209 = vmatprep.subr.bf16.mxu0 %v208_v21  ;;  %215 = vmatprep.subr.bf16.mxu1 %v208_v21 }
  0x11   :  { %211 = vmatpush1.bf16.msra.mxu0 %v210_v24  ;;  %219 = vmatpush1.bf16.msra.mxu1 %v210_v24 }
  0x14   :  { %194 = vmatmul.mubr.msk.f32.vlgmr.msra.gmra.mrb[0].mxu0 %vm35_vm0, %v17_v25  ;;  %195 = vmatmul.mubr.msk.f32.vlgmr.msra.gmra.mrb[0].mxu1 %vm35_vm0, %v18_v26 }
  0xe7   :  { %v108_v27 = vpop.f32.mrb[0].mxu0  ;;  %v114_v28 = vpop.f32.mrb[0].mxu1 }
  0xe8   :  { %v110_v29 = vpop.f32.mrb[1].mxu0  ;;  %v116_v30 = vpop.f32.mrb[1].mxu1 }
  0xe9   :  { %v123_v31 = vadd.f32 %v110_v29, %v108_v27  ;;  %v126_v32 = vadd.f32 %v116_v30, %v114_v28 }
  0xeb   :  { %124 = vadd.xlane.f32.xlu0 %v123_v31 }
  0xef   :  { %127 = vadd.xlane.f32.xlu0 %v126_v32 }
 0x178   :  { %v125_v33 = vpop.xlane.xlu0 %124 }
 0x179   :  { %v130_v34 = vmul.f32 0.00390625, %v125_v33 }
 0x17b   :  { %v132_v35 = vsub.f32 %v108_v27, %v130_v34  ;;  %v133_v36 = vsub.f32 %v110_v29, %v130_v34 }
 0x17c   :  { %v128_v37 = vpop.xlane.xlu0 %127 }
 0x17d   :  { %v131_v38 = vmul.f32 0.00390625, %v128_v37  ;;  %v136_v39 = vmul.f32 %v132_v35, %v132_v35  ;;  %v137_v40 = vmul.f32 %v133_v36, %v133_v36 }
 0x17f   :  { %v140_v41 = vadd.f32 %v137_v40, %v136_v39  ;;  %v134_v42 = vsub.f32 %v114_v28, %v131_v38  ;;  %v135_v43 = vsub.f32 %v116_v30, %v131_v38 }
 0x181   :  { %141 = vadd.xlane.f32.xlu1 %v140_v41  ;;  %v138_v44 = vmul.f32 %v134_v42, %v134_v42  ;;  %v139_v45 = vmul.f32 %v135_v43, %v135_v43 }
 0x183   :  { %v143_v46 = vadd.f32 %v139_v45, %v138_v44 }
 0x185   :  { %144 = vadd.xlane.f32.xlu1 %v143_v46 }
 0x20e   :  { %v142_v48 = vpop.xlane.xlu1 %141 }
 0x20f   :  { %v146_v49 = vmul.f32 0.00390625, %v142_v48 }
 0x211   :  { %v148_v50 = vadd.f32 1e-05, %v146_v49 }
 0x212   :  { %v145_v51 = vpop.xlane.xlu1 %144 }
 0x213   :  { %224 = vrsqrt.f32 %v148_v50  ;;  %v147_v52 = vmul.f32 0.00390625, %v145_v51 }
 0x215   :  { %v149_v53 = vadd.f32 1e-05, %v147_v52 }
 0x217   :  { %226 = vrsqrt.f32 %v149_v53 }
 0x21d   :  { %v225_v55 = vpop.eup %224 }
 0x21e   :  { %v152_v56 = vmul.f32 %v225_v55, %v119_v54 }
 0x220   :  { %156 = vperm.xlu0 %222, %v152_v56   ;;  %v168_v60 = vmul.f32 %v152_v56, %v130_v34 }
 0x221   :  { %v227_v58 = vpop.eup %226 }
 0x222   :  { %v153_v59 = vmul.f32 %v227_v58, %v120_v57  ;;  %v170_v62 = vsub.f32 %v121_v61, %v168_v60 }
 0x224   :  { %161 = vperm.xlu1 %223, %v153_v59   ;;  %v169_v63 = vmul.f32 %v153_v59, %v131_v38 }
 0x226   :  { %v171_v1 = vsub.f32 %v122_v0, %v169_v63 }
 0x228   :  { %174 = vperm.xlu1 %223, %v170_v62  }
 0x22c   :  { %179 = vperm.xlu1 %223, %v171_v1  }
 0x29f   :  { %v157_v2 = vpop.permute.xlu0 %156 }
 0x2a0   :  { %v164_v4 = vmul.f32 %v157_v2, %v108_v27  ;;  %v165_v5 = vmul.f32 %v157_v2, %v110_v29 }
 0x2a3   :  { %v162_v3 = vpop.permute.xlu1 %161 }
 0x2a4   :  { %v166_v9 = vmul.f32 %v162_v3, %v114_v28  ;;  %v167_v10 = vmul.f32 %v162_v3, %v116_v30 }
 0x2a7   :  { %v175_v6 = vpop.permute.xlu1 %174 }
 0x2a8   :  { %v182_v7 = vadd.f32 %v175_v6, %v164_v4  ;;  %v183_v8 = vadd.f32 %v175_v6, %v165_v5 }
 0x2aa   :  { %186 = vst [vmem:[%s337_s4] sm:$0xff] %v182_v7  ;;  %187 = vst [vmem:[%s337_s4 + $0x8] sm:$0xff] %v183_v8 }
 0x2ab   :  { %v180_v11 = vpop.permute.xlu1 %179 }
 0x2ac   :  { %v184_v12 = vadd.f32 %v180_v11, %v166_v9  ;;  %v185_v13 = vadd.f32 %v180_v11, %v167_v10 }
 0x2ae   :  { %188 = vst [vmem:[%s337_s4 + $0x10] sm:$0xff] %v184_v12  ;;  %189 = vst [vmem:[%s337_s4 + $0x18] sm:$0xff] %v185_v13 }

// kernel: unet2_forward.35
= control target key start
LH: loop header
LB: loop body
LE: loop exit
PB: predicated region body
PF: predicated region fallthrough
CT: control target
= control target key end

     0   :  { %v573_v1 = vmov 0   ;;  %vm207_vm0 = vcmask 424960   ;;  %vm211_vm1 = vcmask 1041408   ;;  %vm363_vm6 = vcmask 130048   ;;  %s776_s0 = inlined_call_operand.vmem [shape: bf16[180,256], index: 0, kind: input, shape index: {}]   ;;  %s777_s1 = inlined_call_operand.vmem [shape: bf16[16,180], index: 1, kind: input, shape index: {}]   ;;  %s778_s2 = inlined_call_operand.vmem [shape: f32[16,1], index: 2, kind: input, shape index: {}]   ;;  %s779_s7 = inlined_call_operand.vmem [shape: f32[16,1], index: 7, kind: input, shape index: {}]   ;;  %s780_s3 = inlined_call_operand.vmem [shape: f32[16,1], index: 3, kind: input, shape index: {}]   ;;  %s781_s4 = inlined_call_operand.vmem [shape: f32[16,1], index: 4, kind: input, shape index: {}]   ;;  %s782_s6 = inlined_call_operand.vmem [shape: bf16[16,16], index: 6, kind: input, shape index: {}]   ;;  %s783_s5 = inlined_call_operand.<no memory space> [shape: f32[1], index: 5, kind: input, shape index: {}]   ;;  %s784_s8 = inlined_call_operand.vmem [shape: f32[16,1], index: 8, kind: input, shape index: {}]   ;;  %s785_s9 = inlined_call_operand.vmem [shape: f32[16,1], index: 9, kind: input, shape index: {}]   ;;  %s786_s10 = inlined_call_operand.<no memory space> [shape: f32[1], index: 10, kind: input, shape index: {}]   ;;  %s787_s11 = inlined_call_operand.vmem [shape: f32[16,256], index: 11, kind: output, shape index: {}]  }
   0x1   :  { %v526_v0 = vld [vmem:[%s776_s0 + $0x4] ss:$8 sps:$4 sm:$0xff]   ;;  %524 = vset.pattern.permute.xlu0 %v573_v1  ;;  %525 = vset.pattern.permute.xlu1 %v573_v1  ;;  %v528_v2 = vld [vmem:[%s776_s0] ss:$8 sps:$4 sm:$0xff]   ;;  %v529_v3 = vld [vmem:[%s776_s0 + $0x14] ss:$8 sps:$4 sm:$0xff]  }
   0x2   :  { %399 = vmatprep.mubr.bf16.mxu1 %v573_v1  ;;  %218 = vmatprep.subr.bf16.mxu0 %v526_v0  ;;  %v531_v4 = vld [vmem:[%s776_s0 + $0x10] ss:$8 sps:$4 sm:$0xff]   ;;  %v532_v5 = vld [vmem:[%s776_s0 + $0x24] ss:$8 sps:$4 sm:$0xff]   ;;  %v534_v6 = vld [vmem:[%s776_s0 + $0x20] ss:$8 sps:$4 sm:$0xff]  }
   0x3   :  { %219 = vmatpush1.bf16.msra.mxu0 %v528_v2  ;;  %v535_v7 = vld [vmem:[%s776_s0 + $0x34] ss:$8 sps:$4 sm:$0xff]   ;;  %v537_v8 = vld [vmem:[%s776_s0 + $0x30] ss:$8 sps:$4 sm:$0xff]   ;;  %v538_v9 = vld [vmem:[%s776_s0 + $0x44] ss:$8 sps:$4 sm:$0xff]  }
   0x4   :  { %220 = vmatprep.subr.bf16.mxu0 %v529_v3  ;;  %v540_v10 = vld [vmem:[%s776_s0 + $0x40] ss:$8 sps:$4 sm:$0xff]   ;;  %v541_v11 = vld [vmem:[%s776_s0 + $0x54] ss:$8 sps:$4 sm:$0xff]   ;;  %v563_v12 = vld [vmem:[%s777_s1 + $0x4] ss:$8 sps:$4 sm:$0xff]  }
   0x5   :  { %v66_v13 = vld [vmem:[%s778_s2] sm:$0xff]  ;;  %520 = vmatprep.mubr.msk.bf16.mxu0 %vm207_vm0, %v563_v12  ;;  %v67_v14 = vld [vmem:[%s778_s2 + $0x8] sm:$0xff]  ;;  %v543_v15 = vld [vmem:[%s776_s0 + $0x50] ss:$8 sps:$4 sm:$0xff]  }
   0x6   :  { %75 = vperm.xlu0 %524, %v66_v13   ;;  %v544_v16 = vld [vmem:[%s776_s0 + $0x64] ss:$8 sps:$4 sm:$0xff]   ;;  %v546_v17 = vld [vmem:[%s776_s0 + $0x60] ss:$8 sps:$4 sm:$0xff]   ;;  %v547_v18 = vld [vmem:[%s776_s0 + $0x74] ss:$8 sps:$4 sm:$0xff]  }
   0x7   :  { %221 = vmatpush1.bf16.msra.mxu0 %v531_v4  ;;  %v549_v19 = vld [vmem:[%s776_s0 + $0x70] ss:$8 sps:$4 sm:$0xff]   ;;  %v550_v20 = vld [vmem:[%s776_s0 + $0x84] ss:$8 sps:$4 sm:$0xff]   ;;  %v552_v21 = vld [vmem:[%s776_s0 + $0x80] ss:$8 sps:$4 sm:$0xff]  }
   0x8   :  { %222 = vmatprep.subr.bf16.mxu0 %v532_v5  ;;  %v553_v22 = vld [vmem:[%s776_s0 + $0x94] ss:$8 sps:$4 sm:$0xff]   ;;  %v555_v23 = vld [vmem:[%s776_s0 + $0x90] ss:$8 sps:$4 sm:$0xff]   ;;  %v556_v24 = vld [vmem:[%s776_s0 + $0xa4] ss:$8 sps:$4 sm:$0xff]  }
   0x9   :  { %v63_v25 = vld [vmem:[%s776_s0 + $0xb0] sm:$0x33]  ;;  %v558_v26 = vld [vmem:[%s776_s0 + $0xa0] ss:$8 sps:$4 sm:$0xff]  }
   0xa   :  { %80 = vperm.xlu0 %524, %v67_v14   ;;  %v518_v27 = vcombine.high %v63_v25, %v63_v25  ;;  %v517_v28 = vcombine.low %v63_v25, %v63_v25  ;;  %v561_v30 = vld [vmem:[%s777_s1] ss:$8 sps:$4 sm:$0xff]  }
   0xb   :  { %223 = vmatpush1.bf16.msra.mxu0 %v534_v6  ;;  %v341_v57 = vld [vmem:[%s779_s7] sm:$0xff]  ;;  %v69_v3 = vld [vmem:[%s780_s3 + $0x8] sm:$0xff] }
   0xc   :  { %224 = vmatprep.subr.bf16.mxu0 %v535_v7  ;;  %v213_v29 = vsel %vm211_vm1, %v517_v28, 0  ;;  %v68_v0 = vld [vmem:[%s780_s3] sm:$0xff]  ;;  %v342_v12 = vld [vmem:[%s779_s7 + $0x8] sm:$0xff] }
   0xd   :  { %v70_v7 = vld [vmem:[%s781_s4] sm:$0xff] }
   0xf   :  { %225 = vmatpush1.bf16.msra.mxu0 %v537_v8 }
  0x10   :  { %226 = vmatprep.subr.bf16.mxu0 %v538_v9 }
  0x13   :  { %227 = vmatpush1.bf16.msra.mxu0 %v540_v10  ;;  %v71_v10 = vld [vmem:[%s781_s4 + $0x8] sm:$0xff] }
  0x14   :  { %228 = vmatprep.subr.bf16.mxu0 %v541_v11 }
  0x17   :  { %229 = vmatpush1.bf16.msra.mxu0 %v543_v15 }
  0x18   :  { %230 = vmatprep.subr.bf16.mxu0 %v544_v16 }
  0x1b   :  { %231 = vmatpush1.bf16.msra.mxu0 %v546_v17 }
  0x1c   :  { %232 = vmatprep.subr.bf16.mxu0 %v547_v18 }
  0x1f   :  { %233 = vmatpush1.bf16.msra.mxu0 %v549_v19 }
  0x20   :  { %234 = vmatprep.subr.bf16.mxu0 %v550_v20  ;;  %v328_v20 = vstv %s783_s5 }
  0x23   :  { %235 = vmatpush1.bf16.msra.mxu0 %v552_v21 }
  0x24   :  { %236 = vmatprep.subr.bf16.mxu0 %v553_v22 }
  0x27   :  { %237 = vmatpush1.bf16.msra.mxu0 %v555_v23 }
  0x28   :  { %238 = vmatprep.subr.bf16.mxu0 %v556_v24 }
  0x2b   :  { %239 = vmatpush1.bf16.msra.mxu0 %v558_v26 }
  0x2c   :  { %519 = vmatprep.subr.msk.bf16.mxu0 %vm211_vm1, %v518_v27 }
  0x2f   :  { %241 = vmatpush1.bf16.msra.mxu0 %v213_v29 }
  0x32   :  { %251 = vmatmul.mubr.bf16.vlgmr.msra.gmra.mrb[0].mxu0 %v561_v30 }
  0x85   :  { %v76_v31 = vpop.permute.xlu0 %75 }
  0x89   :  { %v81_v34 = vpop.permute.xlu0 %80 }
 0x105   :  { %v252_v32 = vpop.f32.mrb[0].mxu0 }
 0x106   :  { %v253_v33 = vadd.f32 %v252_v32, %v76_v31  ;;  %v254_v35 = vpop.f32.mrb[1].mxu0 }
 0x107   :  { %v255_v36 = vadd.f32 %v254_v35, %v76_v31  ;;  %v256_v37 = vpop.f32.mrb[2].mxu0 }
 0x108   :  { %v258_v38 = vpop.f32.mrb[3].mxu0  ;;  %v715_v39 = vadd.f32 %v256_v37, %v81_v34 }
 0x109   :  { %v717_v40 = vadd.f32 %v258_v38, %v81_v34  ;;  %v261_v41 = vadd.f32 %v255_v36, %v253_v33 }
 0x10b   :  { %262 = vadd.xlane.f32.xlu1 %v261_v41  ;;  %v264_v42 = vadd.f32 %v717_v40, %v715_v39 }
 0x10f   :  { %265 = vadd.xlane.f32.xlu1 %v264_v42 }
 0x198   :  { %v263_v43 = vpop.xlane.xlu1 %262 }
 0x199   :  { %v268_v44 = vmul.f32 0.00390625, %v263_v43 }
 0x19b   :  { %v270_v45 = vsub.f32 %v253_v33, %v268_v44  ;;  %v271_v46 = vsub.f32 %v255_v36, %v268_v44 }
 0x19c   :  { %v266_v47 = vpop.xlane.xlu1 %265 }
 0x19d   :  { %v269_v48 = vmul.f32 0.00390625, %v266_v47  ;;  %v274_v49 = vmul.f32 %v270_v45, %v270_v45  ;;  %v275_v50 = vmul.f32 %v271_v46, %v271_v46 }
 0x19f   :  { %v278_v51 = vadd.f32 %v275_v50, %v274_v49  ;;  %v272_v52 = vsub.f32 %v715_v39, %v269_v48  ;;  %v273_v53 = vsub.f32 %v717_v40, %v269_v48 }
 0x1a1   :  { %279 = vadd.xlane.f32.xlu0 %v278_v51  ;;  %v276_v54 = vmul.f32 %v272_v52, %v272_v52  ;;  %v277_v55 = vmul.f32 %v273_v53, %v273_v53 }
 0x1a3   :  { %v281_v56 = vadd.f32 %v277_v55, %v276_v54 }
 0x1a5   :  { %282 = vadd.xlane.f32.xlu1 %v281_v56 }
 0x1b7   :  { %350 = vperm.xlu0 %524, %v341_v57  }
 0x22e   :  { %v280_v58 = vpop.xlane.xlu0 %279 }
 0x22f   :  { %v284_v59 = vmul.f32 0.00390625, %v280_v58 }
 0x231   :  { %v286_v60 = vadd.f32 1e-05, %v284_v59 }
 0x232   :  { %v283_v61 = vpop.xlane.xlu1 %282 }
 0x233   :  { %565 = vrsqrt.f32 %v286_v60  ;;  %v285_v62 = vmul.f32 0.00390625, %v283_v61 }
 0x235   :  { %v287_v63 = vadd.f32 1e-05, %v285_v62 }
 0x236   :  { %v351_v37 = vpop.permute.xlu0 %350 }
 0x237   :  { %567 = vrsqrt.f32 %v287_v63 }
 0x23d   :  { %v566_v1 = vpop.eup %565 }
 0x23e   :  { %v290_v2 = vmul.f32 %v566_v1, %v68_v0 }
 0x240   :  { %294 = vperm.xlu1 %525, %v290_v2   ;;  %v306_v6 = vmul.f32 %v290_v2, %v268_v44 }
 0x241   :  { %v568_v4 = vpop.eup %567 }
 0x242   :  { %v291_v5 = vmul.f32 %v568_v4, %v69_v3  ;;  %v308_v8 = vsub.f32 %v70_v7, %v306_v6 }
 0x244   :  { %299 = vperm.xlu1 %525, %v291_v5   ;;  %v307_v9 = vmul.f32 %v291_v5, %v269_v48  ;;  %v343_v5 = vld [vmem:[%s784_s8] sm:$0xff] }
 0x246   :  { %v309_v11 = vsub.f32 %v71_v10, %v307_v9  ;;  %v344_v9 = vld [vmem:[%s784_s8 + $0x8] sm:$0xff] }
 0x248   :  { %312 = vperm.xlu1 %525, %v308_v8   ;;  %v345_v8 = vld [vmem:[%s785_s9] sm:$0xff] }
 0x24c   :  { %317 = vperm.xlu1 %525, %v309_v11  }
 0x250   :  { %355 = vperm.xlu1 %525, %v342_v12  }
 0x2bf   :  { %v295_v13 = vpop.permute.xlu1 %294 }
 0x2c0   :  { %v302_v15 = vmul.f32 %v295_v13, %v253_v33  ;;  %v303_v16 = vmul.f32 %v295_v13, %v255_v36  ;;  %v564_v36 = vld [vmem:[%s782_s6] sm:$0xff]  }
 0x2c3   :  { %v300_v14 = vpop.permute.xlu1 %299 }
 0x2c4   :  { %v304_v21 = vmul.f32 %v300_v14, %v715_v39  ;;  %v305_v22 = vmul.f32 %v300_v14, %v717_v40  ;;  %v346_v14 = vld [vmem:[%s785_s9 + $0x8] sm:$0xff] }
 0x2c7   :  { %v313_v17 = vpop.permute.xlu1 %312 }
 0x2c8   :  { %v320_v18 = vadd.f32 %v313_v17, %v302_v15  ;;  %v321_v19 = vadd.f32 %v313_v17, %v303_v16 }
 0x2ca   :  { %v329_v24 = vmul.f32 %v328_v20, %v320_v18  ;;  %v330_v27 = vmul.f32 %v328_v20, %v321_v19  ;;  %vm325_vm2 = vcmp.gt.f32.partialorder %v321_v19, 0.0  ;;  %vm324_vm3 = vcmp.gt.f32.partialorder %v320_v18, 0.0 }
 0x2cb   :  { %v318_v23 = vpop.permute.xlu1 %317 }
 0x2cc   :  { %v322_v25 = vadd.f32 %v318_v23, %v304_v21  ;;  %v323_v26 = vadd.f32 %v318_v23, %v305_v22  ;;  %v334_v30 = vsel %vm325_vm2, %v321_v19, %v330_v27  ;;  %v333_v32 = vsel %vm324_vm3, %v320_v18, %v329_v24 }
 0x2cd   :  { %v476_v21 = vstv %s786_s10 }
 0x2ce   :  { %v331_v28 = vmul.f32 %v328_v20, %v322_v25  ;;  %vm327_vm4 = vcmp.gt.f32.partialorder %v323_v26, 0.0  ;;  %v332_v29 = vmul.f32 %v328_v20, %v323_v26  ;;  %vm326_vm5 = vcmp.gt.f32.partialorder %v322_v25, 0.0 }
 0x2cf   :  { %v356_v41 = vpop.permute.xlu1 %355 }
 0x2d0   :  { %v336_v31 = vsel %vm327_vm4, %v323_v26, %v332_v29  ;;  %v335_v33 = vsel %vm326_vm5, %v322_v25, %v331_v28 }
 0x2d1   :  { %v338_v34 = vpack.c.bf16 %v336_v31, %v334_v30  ;;  %v337_v35 = vpack.c.bf16 %v335_v33, %v333_v32 }
 0x2d3   :  { %367 = vmatprep.subr.bf16.mxu1 %v338_v34 }
 0x2d4   :  { %368 = vmatpush1.bf16.msra.mxu1 %v337_v35 }
 0x2d7   :  { %522 = vmatmul.mubr.msk.bf16.vlgmr.msra.gmra.mrb[0].mxu1 %vm363_vm6, %v564_v36 }
 0x3aa   :  { %v401_v38 = vpop.f32.mrb[0].mxu1 }
 0x3ab   :  { %v402_v39 = vadd.f32 %v401_v38, %v351_v37  ;;  %v403_v40 = vpop.f32.mrb[1].mxu1 }
 0x3ac   :  { %v404_v42 = vadd.f32 %v403_v40, %v351_v37  ;;  %v405_v43 = vpop.f32.mrb[2].mxu1 }
 0x3ad   :  { %v406_v44 = vadd.f32 %v405_v43, %v356_v41  ;;  %v407_v45 = vpop.f32.mrb[3].mxu1 }
 0x3ae   :  { %v408_v46 = vadd.f32 %v407_v45, %v356_v41  ;;  %v410_v47 = vadd.f32 %v404_v42, %v402_v39 }
 0x3b0   :  { %411 = vadd.xlane.f32.xlu1 %v410_v47  ;;  %v413_v48 = vadd.f32 %v408_v46, %v406_v44 }
 0x3b2   :  { %414 = vadd.xlane.f32.xlu0 %v413_v48 }
 0x43d   :  { %v412_v49 = vpop.xlane.xlu1 %411 }
 0x43e   :  { %v416_v50 = vmul.f32 0.00390625, %v412_v49 }
 0x43f   :  { %v415_v51 = vpop.xlane.xlu0 %414 }
 0x440   :  { %v417_v52 = vmul.f32 0.00390625, %v415_v51  ;;  %v418_v53 = vsub.f32 %v402_v39, %v416_v50  ;;  %v419_v54 = vsub.f32 %v404_v42, %v416_v50 }
 0x442   :  { %v422_v55 = vmul.f32 %v418_v53, %v418_v53  ;;  %v423_v56 = vmul.f32 %v419_v54, %v419_v54  ;;  %v420_v57 = vsub.f32 %v406_v44, %v417_v52  ;;  %v421_v58 = vsub.f32 %v408_v46, %v417_v52 }
 0x444   :  { %v426_v59 = vadd.f32 %v423_v56, %v422_v55  ;;  %v424_v60 = vmul.f32 %v420_v57, %v420_v57  ;;  %v425_v61 = vmul.f32 %v421_v58, %v421_v58 }
 0x446   :  { %427 = vadd.xlane.f32.xlu1 %v426_v59  ;;  %v429_v62 = vadd.f32 %v425_v61, %v424_v60 }
 0x44a   :  { %430 = vadd.xlane.f32.xlu1 %v429_v62 }
 0x4d3   :  { %v428_v63 = vpop.xlane.xlu1 %427 }
 0x4d4   :  { %v432_v0 = vmul.f32 0.00390625, %v428_v63 }
 0x4d6   :  { %v434_v1 = vadd.f32 1e-05, %v432_v0 }
 0x4d7   :  { %v431_v2 = vpop.xlane.xlu1 %430 }
 0x4d8   :  { %569 = vrsqrt.f32 %v434_v1  ;;  %v433_v3 = vmul.f32 0.00390625, %v431_v2 }
 0x4da   :  { %v435_v4 = vadd.f32 1e-05, %v433_v3 }
 0x4dc   :  { %571 = vrsqrt.f32 %v435_v4 }
 0x4e2   :  { %v570_v6 = vpop.eup %569 }
 0x4e3   :  { %v438_v7 = vmul.f32 %v570_v6, %v343_v5 }
 0x4e5   :  { %442 = vperm.xlu1 %525, %v438_v7   ;;  %v454_v10 = vmul.f32 %v438_v7, %v416_v50 }
 0x4e6   :  { %v572_v11 = vpop.eup %571 }
 0x4e7   :  { %v456_v12 = vsub.f32 %v345_v8, %v454_v10  ;;  %v439_v13 = vmul.f32 %v572_v11, %v344_v9 }
 0x4e9   :  { %460 = vperm.xlu1 %525, %v456_v12   ;;  %447 = vperm.xlu0 %524, %v439_v13   ;;  %v455_v15 = vmul.f32 %v439_v13, %v417_v52 }
 0x4eb   :  { %v457_v16 = vsub.f32 %v346_v14, %v455_v15 }
 0x4ed   :  { %465 = vperm.xlu1 %525, %v457_v16  }
 0x564   :  { %v443_v17 = vpop.permute.xlu1 %442 }
 0x565   :  { %v450_v18 = vmul.f32 %v443_v17, %v402_v39  ;;  %v451_v19 = vmul.f32 %v443_v17, %v404_v42 }
 0x568   :  { %v448_v20 = vpop.permute.xlu0 %447  ;;  %v461_v22 = vpop.permute.xlu1 %460 }
 0x569   :  { %v468_v23 = vadd.f32 %v461_v22, %v450_v18  ;;  %v469_v24 = vadd.f32 %v461_v22, %v451_v19  ;;  %v452_v25 = vmul.f32 %v448_v20, %v406_v44  ;;  %v453_v26 = vmul.f32 %v448_v20, %v408_v46 }
 0x56b   :  { %vm472_vm7 = vcmp.gt.f32.partialorder %v468_v23, 0.0  ;;  %vm473_vm8 = vcmp.gt.f32.partialorder %v469_v24, 0.0  ;;  %v477_v27 = vmul.f32 %v476_v21, %v468_v23  ;;  %v478_v28 = vmul.f32 %v476_v21, %v469_v24 }
 0x56c   :  { %v466_v29 = vpop.permute.xlu1 %465 }
 0x56d   :  { %v481_v30 = vsel %vm472_vm7, %v468_v23, %v477_v27  ;;  %v482_v31 = vsel %vm473_vm8, %v469_v24, %v478_v28  ;;  %v470_v32 = vadd.f32 %v466_v29, %v452_v25  ;;  %v471_v33 = vadd.f32 %v466_v29, %v453_v26 }
 0x56e   :  { %485 = vst [vmem:[%s787_s11] sm:$0xff] %v481_v30  ;;  %486 = vst [vmem:[%s787_s11 + $0x8] sm:$0xff] %v482_v31 }
 0x56f   :  { %vm474_vm9 = vcmp.gt.f32.partialorder %v470_v32, 0.0  ;;  %vm475_vm10 = vcmp.gt.f32.partialorder %v471_v33, 0.0  ;;  %v479_v34 = vmul.f32 %v476_v21, %v470_v32  ;;  %v480_v35 = vmul.f32 %v476_v21, %v471_v33 }
 0x571   :  { %v483_v36 = vsel %vm474_vm9, %v470_v32, %v479_v34  ;;  %v484_v37 = vsel %vm475_vm10, %v471_v33, %v480_v35 }
 0x572   :  { %487 = vst [vmem:[%s787_s11 + $0x10] sm:$0xff] %v483_v36  ;;  %488 = vst [vmem:[%s787_s11 + $0x18] sm:$0xff] %v484_v37 }

// kernel: unet2_forward.36
= control target key start
LH: loop header
LB: loop body
LE: loop exit
PB: predicated region body
PF: predicated region fallthrough
CT: control target
= control target key end

     0   :  { %s1999_s1 = inlined_call_operand.vmem [shape: f32[256,1024], index: 1, kind: input, shape index: {}]   ;;  %s2000_s0 = inlined_call_operand.vmem [shape: f32[16,256], index: 0, kind: input, shape index: {}]   ;;  %s2001_s2 = inlined_call_operand.vmem [shape: f32[16,1], index: 2, kind: input, shape index: {}]   ;;  %s2002_s3 = inlined_call_operand.vmem [shape: f32[16,1], index: 3, kind: input, shape index: {}]   ;;  %s2003_s4 = inlined_call_operand.vmem [shape: f32[16,1024], index: 4, kind: output, shape index: {}]  }
   0x1   :  { %v22_v0 = vld [vmem:[%s1999_s1 + $0x8] sm:$0xff]  ;;  %v21_v2 = vld [vmem:[%s1999_s1] sm:$0xff]  ;;  %v24_v5 = vld [vmem:[%s1999_s1 + $0x18] sm:$0xff] }
   0x2   :  { %v30_v1 = vld [vmem:[%s1999_s1 + $0x48] sm:$0xff]  ;;  %v29_v4 = vld [vmem:[%s1999_s1 + $0x40] sm:$0xff]  ;;  %v32_v6 = vld [vmem:[%s1999_s1 + $0x58] sm:$0xff] }
   0x3   :  { %v744_v3 = vpack.c.bf16 %v30_v1, %v22_v0  ;;  %v746_v7 = vpack.c.bf16 %v29_v4, %v21_v2  ;;  %v808_v8 = vpack.c.bf16 %v32_v6, %v24_v5  ;;  %v38_v9 = vld [vmem:[%s1999_s1 + $0x88] sm:$0xff]  ;;  %v23_v11 = vld [vmem:[%s1999_s1 + $0x10] sm:$0xff]  ;;  %v37_v14 = vld [vmem:[%s1999_s1 + $0x80] sm:$0xff] }
   0x4   :  { %v46_v10 = vld [vmem:[%s1999_s1 + $0xc8] sm:$0xff]  ;;  %v31_v13 = vld [vmem:[%s1999_s1 + $0x50] sm:$0xff]  ;;  %v45_v15 = vld [vmem:[%s1999_s1 + $0xc0] sm:$0xff] }
   0x5   :  { %745 = vmatprep.subr.bf16.mxu0 %v744_v3  ;;  %v748_v12 = vpack.c.bf16 %v46_v10, %v38_v9  ;;  %809 = vmatprep.subr.bf16.mxu1 %v808_v8  ;;  %v810_v16 = vpack.c.bf16 %v31_v13, %v23_v11  ;;  %v750_v17 = vpack.c.bf16 %v45_v15, %v37_v14  ;;  %v40_v18 = vld [vmem:[%s1999_s1 + $0x98] sm:$0xff]  ;;  %v54_v20 = vld [vmem:[%s1999_s1 + $0x108] sm:$0xff]  ;;  %v39_v23 = vld [vmem:[%s1999_s1 + $0x90] sm:$0xff] }
   0x6   :  { %747 = vmatpush1.bf16.msra.mxu0 %v746_v7  ;;  %v48_v19 = vld [vmem:[%s1999_s1 + $0xd8] sm:$0xff]  ;;  %v62_v22 = vld [vmem:[%s1999_s1 + $0x148] sm:$0xff]  ;;  %v47_v24 = vld [vmem:[%s1999_s1 + $0xd0] sm:$0xff] }
   0x7   :  { %749 = vmatprep.subr.bf16.mxu0 %v748_v12  ;;  %v812_v21 = vpack.c.bf16 %v48_v19, %v40_v18  ;;  %811 = vmatpush1.bf16.msra.mxu1 %v810_v16  ;;  %v752_v25 = vpack.c.bf16 %v62_v22, %v54_v20  ;;  %v814_v26 = vpack.c.bf16 %v47_v24, %v39_v23  ;;  %v53_v27 = vld [vmem:[%s1999_s1 + $0x100] sm:$0xff]  ;;  %v56_v29 = vld [vmem:[%s1999_s1 + $0x118] sm:$0xff]  ;;  %v70_v31 = vld [vmem:[%s1999_s1 + $0x188] sm:$0xff] }
   0x8   :  { %v61_v28 = vld [vmem:[%s1999_s1 + $0x140] sm:$0xff]  ;;  %v64_v30 = vld [vmem:[%s1999_s1 + $0x158] sm:$0xff]  ;;  %v78_v32 = vld [vmem:[%s1999_s1 + $0x1c8] sm:$0xff] }
   0x9   :  { %813 = vmatprep.subr.bf16.mxu1 %v812_v21  ;;  %v754_v33 = vpack.c.bf16 %v61_v28, %v53_v27  ;;  %v816_v34 = vpack.c.bf16 %v64_v30, %v56_v29  ;;  %v55_v35 = vld [vmem:[%s1999_s1 + $0x110] sm:$0xff]  ;;  %v69_v37 = vld [vmem:[%s1999_s1 + $0x180] sm:$0xff]  ;;  %v756_v38 = vpack.c.bf16 %v78_v32, %v70_v31  ;;  %v72_v40 = vld [vmem:[%s1999_s1 + $0x198] sm:$0xff] }
   0xa   :  { %751 = vmatpush1.bf16.msra.mxu0 %v750_v17  ;;  %v63_v36 = vld [vmem:[%s1999_s1 + $0x150] sm:$0xff]  ;;  %v77_v39 = vld [vmem:[%s1999_s1 + $0x1c0] sm:$0xff]  ;;  %v80_v41 = vld [vmem:[%s1999_s1 + $0x1d8] sm:$0xff] }
   0xb   :  { %753 = vmatprep.subr.bf16.mxu0 %v752_v25  ;;  %815 = vmatpush1.bf16.msra.mxu1 %v814_v26  ;;  %v818_v42 = vpack.c.bf16 %v63_v36, %v55_v35  ;;  %v86_v43 = vld [vmem:[%s1999_s1 + $0x208] sm:$0xff]  ;;  %v820_v45 = vpack.c.bf16 %v80_v41, %v72_v40  ;;  %v71_v46 = vld [vmem:[%s1999_s1 + $0x190] sm:$0xff]  ;;  %v758_v48 = vpack.c.bf16 %v77_v39, %v69_v37  ;;  %v88_v49 = vld [vmem:[%s1999_s1 + $0x218] sm:$0xff] }
   0xc   :  { %v94_v44 = vld [vmem:[%s1999_s1 + $0x248] sm:$0xff]  ;;  %817 = vmatprep.subr.bf16.mxu1 %v816_v34  ;;  %v79_v47 = vld [vmem:[%s1999_s1 + $0x1d0] sm:$0xff]  ;;  %v96_v50 = vld [vmem:[%s1999_s1 + $0x258] sm:$0xff] }
   0xd   :  { %v760_v51 = vpack.c.bf16 %v94_v44, %v86_v43  ;;  %v85_v52 = vld [vmem:[%s1999_s1 + $0x200] sm:$0xff]  ;;  %v822_v54 = vpack.c.bf16 %v79_v47, %v71_v46  ;;  %v102_v55 = vld [vmem:[%s1999_s1 + $0x288] sm:$0xff]  ;;  %v824_v57 = vpack.c.bf16 %v96_v50, %v88_v49  ;;  %v87_v58 = vld [vmem:[%s1999_s1 + $0x210] sm:$0xff] }
   0xe   :  { %755 = vmatpush1.bf16.msra.mxu0 %v754_v33  ;;  %v93_v53 = vld [vmem:[%s1999_s1 + $0x240] sm:$0xff]  ;;  %v110_v56 = vld [vmem:[%s1999_s1 + $0x2c8] sm:$0xff]  ;;  %v95_v59 = vld [vmem:[%s1999_s1 + $0x250] sm:$0xff] }
   0xf   :  { %757 = vmatprep.subr.bf16.mxu0 %v756_v38  ;;  %819 = vmatpush1.bf16.msra.mxu1 %v818_v42  ;;  %v762_v60 = vpack.c.bf16 %v93_v53, %v85_v52  ;;  %v104_v61 = vld [vmem:[%s1999_s1 + $0x298] sm:$0xff]  ;;  %v764_v63 = vpack.c.bf16 %v110_v56, %v102_v55  ;;  %v101_v0 = vld [vmem:[%s1999_s1 + $0x280] sm:$0xff]  ;;  %v826_v2 = vpack.c.bf16 %v95_v59, %v87_v58  ;;  %v118_v3 = vld [vmem:[%s1999_s1 + $0x308] sm:$0xff] }
  0x10   :  { %821 = vmatprep.subr.bf16.mxu1 %v820_v45  ;;  %v112_v62 = vld [vmem:[%s1999_s1 + $0x2d8] sm:$0xff]  ;;  %v109_v1 = vld [vmem:[%s1999_s1 + $0x2c0] sm:$0xff]  ;;  %v126_v4 = vld [vmem:[%s1999_s1 + $0x348] sm:$0xff] }
  0x11   :  { %v828_v5 = vpack.c.bf16 %v112_v62, %v104_v61  ;;  %v103_v6 = vld [vmem:[%s1999_s1 + $0x290] sm:$0xff]  ;;  %v766_v8 = vpack.c.bf16 %v109_v1, %v101_v0  ;;  %v120_v9 = vld [vmem:[%s1999_s1 + $0x318] sm:$0xff]  ;;  %v768_v11 = vpack.c.bf16 %v126_v4, %v118_v3  ;;  %v117_v12 = vld [vmem:[%s1999_s1 + $0x300] sm:$0xff] }
  0x12   :  { %759 = vmatpush1.bf16.msra.mxu0 %v758_v48  ;;  %v111_v7 = vld [vmem:[%s1999_s1 + $0x2d0] sm:$0xff]  ;;  %v128_v10 = vld [vmem:[%s1999_s1 + $0x358] sm:$0xff]  ;;  %v125_v13 = vld [vmem:[%s1999_s1 + $0x340] sm:$0xff] }
  0x13   :  { %761 = vmatprep.subr.bf16.mxu0 %v760_v51  ;;  %823 = vmatpush1.bf16.msra.mxu1 %v822_v54  ;;  %v830_v14 = vpack.c.bf16 %v111_v7, %v103_v6  ;;  %v134_v15 = vld [vmem:[%s1999_s1 + $0x388] sm:$0xff]  ;;  %v832_v17 = vpack.c.bf16 %v128_v10, %v120_v9  ;;  %v119_v18 = vld [vmem:[%s1999_s1 + $0x310] sm:$0xff]  ;;  %v770_v20 = vpack.c.bf16 %v125_v13, %v117_v12  ;;  %v136_v21 = vld [vmem:[%s1999_s1 + $0x398] sm:$0xff] }
  0x14   :  { %825 = vmatprep.subr.bf16.mxu1 %v824_v57  ;;  %v142_v16 = vld [vmem:[%s1999_s1 + $0x3c8] sm:$0xff]  ;;  %v127_v19 = vld [vmem:[%s1999_s1 + $0x350] sm:$0xff]  ;;  %v144_v22 = vld [vmem:[%s1999_s1 + $0x3d8] sm:$0xff] }
  0x15   :  { %v772_v23 = vpack.c.bf16 %v142_v16, %v134_v15  ;;  %v133_v24 = vld [vmem:[%s1999_s1 + $0x380] sm:$0xff]  ;;  %v834_v26 = vpack.c.bf16 %v127_v19, %v119_v18  ;;  %v150_v27 = vld [vmem:[%s1999_s1 + $0x408] sm:$0xff]  ;;  %v836_v29 = vpack.c.bf16 %v144_v22, %v136_v21  ;;  %v135_v30 = vld [vmem:[%s1999_s1 + $0x390] sm:$0xff] }
  0x16   :  { %763 = vmatpush1.bf16.msra.mxu0 %v762_v60  ;;  %v141_v25 = vld [vmem:[%s1999_s1 + $0x3c0] sm:$0xff]  ;;  %v158_v28 = vld [vmem:[%s1999_s1 + $0x448] sm:$0xff]  ;;  %v143_v31 = vld [vmem:[%s1999_s1 + $0x3d0] sm:$0xff] }
  0x17   :  { %765 = vmatprep.subr.bf16.mxu0 %v764_v63  ;;  %827 = vmatpush1.bf16.msra.mxu1 %v826_v2  ;;  %v774_v32 = vpack.c.bf16 %v141_v25, %v133_v24  ;;  %v152_v33 = vld [vmem:[%s1999_s1 + $0x418] sm:$0xff]  ;;  %v776_v35 = vpack.c.bf16 %v158_v28, %v150_v27  ;;  %v149_v36 = vld [vmem:[%s1999_s1 + $0x400] sm:$0xff]  ;;  %v838_v38 = vpack.c.bf16 %v143_v31, %v135_v30  ;;  %v166_v39 = vld [vmem:[%s1999_s1 + $0x488] sm:$0xff] }
  0x18   :  { %829 = vmatprep.subr.bf16.mxu1 %v828_v5  ;;  %v160_v34 = vld [vmem:[%s1999_s1 + $0x458] sm:$0xff]  ;;  %v157_v37 = vld [vmem:[%s1999_s1 + $0x440] sm:$0xff]  ;;  %v174_v40 = vld [vmem:[%s1999_s1 + $0x4c8] sm:$0xff] }
  0x19   :  { %v840_v41 = vpack.c.bf16 %v160_v34, %v152_v33  ;;  %v151_v42 = vld [vmem:[%s1999_s1 + $0x410] sm:$0xff]  ;;  %v778_v44 = vpack.c.bf16 %v157_v37, %v149_v36  ;;  %v168_v45 = vld [vmem:[%s1999_s1 + $0x498] sm:$0xff]  ;;  %v780_v47 = vpack.c.bf16 %v174_v40, %v166_v39  ;;  %v165_v48 = vld [vmem:[%s1999_s1 + $0x480] sm:$0xff] }
  0x1a   :  { %767 = vmatpush1.bf16.msra.mxu0 %v766_v8  ;;  %v159_v43 = vld [vmem:[%s1999_s1 + $0x450] sm:$0xff]  ;;  %v176_v46 = vld [vmem:[%s1999_s1 + $0x4d8] sm:$0xff]  ;;  %v173_v49 = vld [vmem:[%s1999_s1 + $0x4c0] sm:$0xff] }
  0x1b   :  { %769 = vmatprep.subr.bf16.mxu0 %v768_v11  ;;  %831 = vmatpush1.bf16.msra.mxu1 %v830_v14  ;;  %v842_v50 = vpack.c.bf16 %v159_v43, %v151_v42  ;;  %v182_v51 = vld [vmem:[%s1999_s1 + $0x508] sm:$0xff]  ;;  %v844_v53 = vpack.c.bf16 %v176_v46, %v168_v45  ;;  %v167_v54 = vld [vmem:[%s1999_s1 + $0x490] sm:$0xff]  ;;  %v782_v56 = vpack.c.bf16 %v173_v49, %v165_v48  ;;  %v184_v57 = vld [vmem:[%s1999_s1 + $0x518] sm:$0xff] }
  0x1c   :  { %833 = vmatprep.subr.bf16.mxu1 %v832_v17  ;;  %v190_v52 = vld [vmem:[%s1999_s1 + $0x548] sm:$0xff]  ;;  %v175_v55 = vld [vmem:[%s1999_s1 + $0x4d0] sm:$0xff]  ;;  %v192_v58 = vld [vmem:[%s1999_s1 + $0x558] sm:$0xff] }
  0x1d   :  { %v784_v59 = vpack.c.bf16 %v190_v52, %v182_v51  ;;  %v181_v60 = vld [vmem:[%s1999_s1 + $0x500] sm:$0xff]  ;;  %v846_v62 = vpack.c.bf16 %v175_v55, %v167_v54  ;;  %v198_v63 = vld [vmem:[%s1999_s1 + $0x588] sm:$0xff]  ;;  %v848_v1 = vpack.c.bf16 %v192_v58, %v184_v57  ;;  %v183_v2 = vld [vmem:[%s1999_s1 + $0x510] sm:$0xff] }
  0x1e   :  { %771 = vmatpush1.bf16.msra.mxu0 %v770_v20  ;;  %v189_v61 = vld [vmem:[%s1999_s1 + $0x540] sm:$0xff]  ;;  %v206_v0 = vld [vmem:[%s1999_s1 + $0x5c8] sm:$0xff]  ;;  %v191_v3 = vld [vmem:[%s1999_s1 + $0x550] sm:$0xff] }
  0x1f   :  { %773 = vmatprep.subr.bf16.mxu0 %v772_v23  ;;  %835 = vmatpush1.bf16.msra.mxu1 %v834_v26  ;;  %v786_v4 = vpack.c.bf16 %v189_v61, %v181_v60  ;;  %v200_v5 = vld [vmem:[%s1999_s1 + $0x598] sm:$0xff]  ;;  %v788_v7 = vpack.c.bf16 %v206_v0, %v198_v63  ;;  %v197_v8 = vld [vmem:[%s1999_s1 + $0x580] sm:$0xff]  ;;  %v1318_v10 = vld [vmem:[%s2000_s0 + $0x8] sm:$0xff]  ;;  %v850_v11 = vpack.c.bf16 %v191_v3, %v183_v2 }
  0x20   :  { %837 = vmatprep.subr.bf16.mxu1 %v836_v29  ;;  %v208_v6 = vld [vmem:[%s1999_s1 + $0x5d8] sm:$0xff]  ;;  %v205_v9 = vld [vmem:[%s1999_s1 + $0x5c0] sm:$0xff]  ;;  %v214_v12 = vld [vmem:[%s1999_s1 + $0x608] sm:$0xff]  ;;  %341 = vmatprep.mubr.f32.mxu0 %v1318_v10 }
  0x21   :  { %v222_v13 = vld [vmem:[%s1999_s1 + $0x648] sm:$0xff]  ;;  %v852_v14 = vpack.c.bf16 %v208_v6, %v200_v5  ;;  %v199_v15 = vld [vmem:[%s1999_s1 + $0x590] sm:$0xff]  ;;  %418 = vmatprep.mubr.f32.mxu1 %v1318_v10  ;;  %v790_v17 = vpack.c.bf16 %v205_v9, %v197_v8  ;;  %v216_v18 = vld [vmem:[%s1999_s1 + $0x618] sm:$0xff] }
  0x22   :  { %775 = vmatpush1.bf16.msra.mxu0 %v774_v32  ;;  %v207_v16 = vld [vmem:[%s1999_s1 + $0x5d0] sm:$0xff]  ;;  %v224_v19 = vld [vmem:[%s1999_s1 + $0x658] sm:$0xff]  ;;  %v792_v20 = vpack.c.bf16 %v222_v13, %v214_v12  ;;  %v213_v21 = vld [vmem:[%s1999_s1 + $0x600] sm:$0xff] }
  0x23   :  { %777 = vmatprep.subr.bf16.mxu0 %v776_v35  ;;  %839 = vmatpush1.bf16.msra.mxu1 %v838_v38  ;;  %v221_v22 = vld [vmem:[%s1999_s1 + $0x640] sm:$0xff]  ;;  %v854_v23 = vpack.c.bf16 %v207_v16, %v199_v15  ;;  %v230_v24 = vld [vmem:[%s1999_s1 + $0x688] sm:$0xff]  ;;  %v856_v26 = vpack.c.bf16 %v224_v19, %v216_v18  ;;  %v215_v27 = vld [vmem:[%s1999_s1 + $0x610] sm:$0xff] }
  0x24   :  { %841 = vmatprep.subr.bf16.mxu1 %v840_v41  ;;  %v238_v25 = vld [vmem:[%s1999_s1 + $0x6c8] sm:$0xff]  ;;  %v223_v28 = vld [vmem:[%s1999_s1 + $0x650] sm:$0xff]  ;;  %v794_v29 = vpack.c.bf16 %v221_v22, %v213_v21  ;;  %v232_v30 = vld [vmem:[%s1999_s1 + $0x698] sm:$0xff] }
  0x25   :  { %v240_v31 = vld [vmem:[%s1999_s1 + $0x6d8] sm:$0xff]  ;;  %v796_v32 = vpack.c.bf16 %v238_v25, %v230_v24  ;;  %v229_v33 = vld [vmem:[%s1999_s1 + $0x680] sm:$0xff]  ;;  %v858_v35 = vpack.c.bf16 %v223_v28, %v215_v27  ;;  %v246_v36 = vld [vmem:[%s1999_s1 + $0x708] sm:$0xff] }
  0x26   :  { %779 = vmatpush1.bf16.msra.mxu0 %v778_v44  ;;  %v237_v34 = vld [vmem:[%s1999_s1 + $0x6c0] sm:$0xff]  ;;  %v254_v37 = vld [vmem:[%s1999_s1 + $0x748] sm:$0xff]  ;;  %v860_v38 = vpack.c.bf16 %v240_v31, %v232_v30  ;;  %v231_v39 = vld [vmem:[%s1999_s1 + $0x690] sm:$0xff] }
  0x27   :  { %781 = vmatprep.subr.bf16.mxu0 %v780_v47  ;;  %843 = vmatpush1.bf16.msra.mxu1 %v842_v50  ;;  %v239_v40 = vld [vmem:[%s1999_s1 + $0x6d0] sm:$0xff]  ;;  %v798_v41 = vpack.c.bf16 %v237_v34, %v229_v33  ;;  %v248_v42 = vld [vmem:[%s1999_s1 + $0x718] sm:$0xff]  ;;  %v800_v44 = vpack.c.bf16 %v254_v37, %v246_v36  ;;  %v245_v45 = vld [vmem:[%s1999_s1 + $0x700] sm:$0xff] }
  0x28   :  { %845 = vmatprep.subr.bf16.mxu1 %v844_v53  ;;  %v256_v43 = vld [vmem:[%s1999_s1 + $0x758] sm:$0xff]  ;;  %v253_v46 = vld [vmem:[%s1999_s1 + $0x740] sm:$0xff]  ;;  %v862_v47 = vpack.c.bf16 %v239_v40, %v231_v39  ;;  %v262_v48 = vld [vmem:[%s1999_s1 + $0x788] sm:$0xff] }
  0x29   :  { %v270_v49 = vld [vmem:[%s1999_s1 + $0x7c8] sm:$0xff]  ;;  %v864_v50 = vpack.c.bf16 %v256_v43, %v248_v42  ;;  %v247_v51 = vld [vmem:[%s1999_s1 + $0x710] sm:$0xff]  ;;  %v802_v53 = vpack.c.bf16 %v253_v46, %v245_v45  ;;  %v264_v54 = vld [vmem:[%s1999_s1 + $0x798] sm:$0xff] }
  0x2a   :  { %783 = vmatpush1.bf16.msra.mxu0 %v782_v56  ;;  %v255_v52 = vld [vmem:[%s1999_s1 + $0x750] sm:$0xff]  ;;  %v272_v55 = vld [vmem:[%s1999_s1 + $0x7d8] sm:$0xff]  ;;  %v804_v56 = vpack.c.bf16 %v270_v49, %v262_v48  ;;  %v261_v57 = vld [vmem:[%s1999_s1 + $0x780] sm:$0xff] }
  0x2b   :  { %785 = vmatprep.subr.bf16.mxu0 %v784_v59  ;;  %847 = vmatpush1.bf16.msra.mxu1 %v846_v62  ;;  %v269_v58 = vld [vmem:[%s1999_s1 + $0x7c0] sm:$0xff]  ;;  %v866_v59 = vpack.c.bf16 %v255_v52, %v247_v51  ;;  %v26_v60 = vld [vmem:[%s1999_s1 + $0x28] sm:$0xff]  ;;  %v868_v62 = vpack.c.bf16 %v272_v55, %v264_v54  ;;  %v263_v63 = vld [vmem:[%s1999_s1 + $0x790] sm:$0xff] }
  0x2c   :  { %849 = vmatprep.subr.bf16.mxu1 %v848_v1  ;;  %v34_v61 = vld [vmem:[%s1999_s1 + $0x68] sm:$0xff]  ;;  %v271_v0 = vld [vmem:[%s1999_s1 + $0x7d0] sm:$0xff]  ;;  %v806_v1 = vpack.c.bf16 %v269_v58, %v261_v57  ;;  %v28_v2 = vld [vmem:[%s1999_s1 + $0x38] sm:$0xff] }
  0x2d   :  { %v36_v3 = vld [vmem:[%s1999_s1 + $0x78] sm:$0xff]  ;;  %v25_v5 = vld [vmem:[%s1999_s1 + $0x20] sm:$0xff]  ;;  %v42_v8 = vld [vmem:[%s1999_s1 + $0xa8] sm:$0xff] }
  0x2e   :  { %787 = vmatpush1.bf16.msra.mxu0 %v786_v4  ;;  %v872_v4 = vpack.c.bf16 %v34_v61, %v26_v60  ;;  %v33_v6 = vld [vmem:[%s1999_s1 + $0x60] sm:$0xff]  ;;  %v50_v9 = vld [vmem:[%s1999_s1 + $0xe8] sm:$0xff]  ;;  %v27_v12 = vld [vmem:[%s1999_s1 + $0x30] sm:$0xff] }
  0x2f   :  { %789 = vmatprep.subr.bf16.mxu0 %v788_v7  ;;  %851 = vmatpush1.bf16.msra.mxu1 %v850_v11  ;;  %v870_v7 = vpack.c.bf16 %v271_v0, %v263_v63  ;;  %v936_v11 = vpack.c.bf16 %v36_v3, %v28_v2  ;;  %v35_v13 = vld [vmem:[%s1999_s1 + $0x70] sm:$0xff]  ;;  %v874_v15 = vpack.c.bf16 %v33_v6, %v25_v5  ;;  %v44_v16 = vld [vmem:[%s1999_s1 + $0xb8] sm:$0xff]  ;;  %v41_v19 = vld [vmem:[%s1999_s1 + $0xa0] sm:$0xff] }
  0x30   :  { %853 = vmatprep.subr.bf16.mxu1 %v852_v14  ;;  %v1457_v14 = vld [vmem:[%s2000_s0] sm:$0xff]  ;;  %v876_v18 = vpack.c.bf16 %v50_v9, %v42_v8  ;;  %v938_v21 = vpack.c.bf16 %v35_v13, %v27_v12  ;;  %v58_v22 = vld [vmem:[%s1999_s1 + $0x128] sm:$0xff]  ;;  %v43_v25 = vld [vmem:[%s1999_s1 + $0xb0] sm:$0xff] }
  0x31   :  { %v60_v28 = vld [vmem:[%s1999_s1 + $0x138] sm:$0xff]  ;;  %v57_v31 = vld [vmem:[%s1999_s1 + $0x120] sm:$0xff]  ;;  %v74_v34 = vld [vmem:[%s1999_s1 + $0x1a8] sm:$0xff] }
  0x32   :  { %791 = vmatpush1.bf16.msra.mxu0 %v790_v17  ;;  %v52_v17 = vld [vmem:[%s1999_s1 + $0xf8] sm:$0xff]  ;;  %v59_v37 = vld [vmem:[%s1999_s1 + $0x130] sm:$0xff]  ;;  %v73_v43 = vld [vmem:[%s1999_s1 + $0x1a0] sm:$0xff] }
  0x33   :  { %793 = vmatprep.subr.bf16.mxu0 %v792_v20  ;;  %855 = vmatpush1.bf16.msra.mxu1 %v854_v23  ;;  %v49_v20 = vld [vmem:[%s1999_s1 + $0xe0] sm:$0xff]  ;;  %v66_v23 = vld [vmem:[%s1999_s1 + $0x168] sm:$0xff]  ;;  %v940_v24 = vpack.c.bf16 %v52_v17, %v44_v16  ;;  %v76_v40 = vld [vmem:[%s1999_s1 + $0x1b8] sm:$0xff] }
  0x34   :  { %857 = vmatprep.subr.bf16.mxu1 %v856_v26  ;;  %v51_v26 = vld [vmem:[%s1999_s1 + $0xf0] sm:$0xff]  ;;  %v878_v27 = vpack.c.bf16 %v49_v20, %v41_v19  ;;  %v880_v30 = vpack.c.bf16 %v66_v23, %v58_v22  ;;  %v90_v46 = vld [vmem:[%s1999_s1 + $0x228] sm:$0xff]  ;;  %v92_v52 = vld [vmem:[%s1999_s1 + $0x238] sm:$0xff] }
  0x35   :  { %v942_v33 = vpack.c.bf16 %v51_v26, %v43_v25  ;;  %v75_v49 = vld [vmem:[%s1999_s1 + $0x1b0] sm:$0xff]  ;;  %v89_v55 = vld [vmem:[%s1999_s1 + $0x220] sm:$0xff]  ;;  %v106_v58 = vld [vmem:[%s1999_s1 + $0x2a8] sm:$0xff] }
  0x36   :  { %795 = vmatpush1.bf16.msra.mxu0 %v794_v29  ;;  %v68_v29 = vld [vmem:[%s1999_s1 + $0x178] sm:$0xff]  ;;  %v91_v61 = vld [vmem:[%s1999_s1 + $0x230] sm:$0xff]  ;;  %v105_v3 = vld [vmem:[%s1999_s1 + $0x2a0] sm:$0xff] }
  0x37   :  { %797 = vmatprep.subr.bf16.mxu0 %v796_v32  ;;  %859 = vmatpush1.bf16.msra.mxu1 %v858_v35  ;;  %v65_v32 = vld [vmem:[%s1999_s1 + $0x160] sm:$0xff]  ;;  %v82_v35 = vld [vmem:[%s1999_s1 + $0x1e8] sm:$0xff]  ;;  %v944_v36 = vpack.c.bf16 %v68_v29, %v60_v28  ;;  %v108_v0 = vld [vmem:[%s1999_s1 + $0x2b8] sm:$0xff] }
  0x38   :  { %861 = vmatprep.subr.bf16.mxu1 %v860_v38  ;;  %v67_v38 = vld [vmem:[%s1999_s1 + $0x170] sm:$0xff]  ;;  %v882_v39 = vpack.c.bf16 %v65_v32, %v57_v31  ;;  %v884_v42 = vpack.c.bf16 %v82_v35, %v74_v34  ;;  %v122_v5 = vld [vmem:[%s1999_s1 + $0x328] sm:$0xff]  ;;  %v1578_v8 = vld [vmem:[%s2000_s0 + $0x18] sm:$0xff] }
  0x39   :  { %v946_v45 = vpack.c.bf16 %v67_v38, %v59_v37  ;;  %v1583_v9 = vld [vmem:[%s2000_s0 + $0x10] sm:$0xff]  ;;  %v124_v16 = vld [vmem:[%s1999_s1 + $0x338] sm:$0xff]  ;;  %v121_v19 = vld [vmem:[%s1999_s1 + $0x320] sm:$0xff] }
  0x3a   :  { %799 = vmatpush1.bf16.msra.mxu0 %v798_v41  ;;  %v84_v41 = vld [vmem:[%s1999_s1 + $0x1f8] sm:$0xff]  ;;  %v107_v12 = vld [vmem:[%s1999_s1 + $0x2b0] sm:$0xff]  ;;  %v129_v20 = vld [vmem:[%s1999_s1 + $0x360] sm:$0xff] }
  0x3b   :  { %801 = vmatprep.subr.bf16.mxu0 %v800_v44  ;;  %863 = vmatpush1.bf16.msra.mxu1 %v862_v47  ;;  %v81_v44 = vld [vmem:[%s1999_s1 + $0x1e0] sm:$0xff]  ;;  %v98_v47 = vld [vmem:[%s1999_s1 + $0x268] sm:$0xff]  ;;  %v948_v48 = vpack.c.bf16 %v84_v41, %v76_v40  ;;  %v115_v13 = vld [vmem:[%s1999_s1 + $0x2f0] sm:$0xff] }
  0x3c   :  { %865 = vmatprep.subr.bf16.mxu1 %v864_v50  ;;  %v83_v50 = vld [vmem:[%s1999_s1 + $0x1f0] sm:$0xff]  ;;  %v886_v51 = vpack.c.bf16 %v81_v44, %v73_v43  ;;  %v888_v54 = vpack.c.bf16 %v98_v47, %v90_v46  ;;  %v132_v17 = vld [vmem:[%s1999_s1 + $0x378] sm:$0xff]  ;;  %v138_v22 = vld [vmem:[%s1999_s1 + $0x3a8] sm:$0xff] }
  0x3d   :  { %v950_v57 = vpack.c.bf16 %v83_v50, %v75_v49  ;;  %v146_v23 = vld [vmem:[%s1999_s1 + $0x3e8] sm:$0xff]  ;;  %v123_v25 = vld [vmem:[%s1999_s1 + $0x330] sm:$0xff]  ;;  %v140_v28 = vld [vmem:[%s1999_s1 + $0x3b8] sm:$0xff] }
  0x3e   :  { %803 = vmatpush1.bf16.msra.mxu0 %v802_v53  ;;  %v100_v53 = vld [vmem:[%s1999_s1 + $0x278] sm:$0xff]  ;;  %v131_v26 = vld [vmem:[%s1999_s1 + $0x370] sm:$0xff]  ;;  %v137_v31 = vld [vmem:[%s1999_s1 + $0x3a0] sm:$0xff] }
  0x3f   :  { %805 = vmatprep.subr.bf16.mxu0 %v804_v56  ;;  %867 = vmatpush1.bf16.msra.mxu1 %v866_v59  ;;  %v97_v56 = vld [vmem:[%s1999_s1 + $0x260] sm:$0xff]  ;;  %v114_v59 = vld [vmem:[%s1999_s1 + $0x2e8] sm:$0xff]  ;;  %v952_v60 = vpack.c.bf16 %v100_v53, %v92_v52  ;;  %v148_v29 = vld [vmem:[%s1999_s1 + $0x3f8] sm:$0xff] }
  0x40   :  { %869 = vmatprep.subr.bf16.mxu1 %v868_v62  ;;  %v99_v62 = vld [vmem:[%s1999_s1 + $0x270] sm:$0xff]  ;;  %v890_v63 = vpack.c.bf16 %v97_v56, %v89_v55  ;;  %v892_v2 = vpack.c.bf16 %v114_v59, %v106_v58  ;;  %v145_v32 = vld [vmem:[%s1999_s1 + $0x3e0] sm:$0xff]  ;;  %v154_v34 = vld [vmem:[%s1999_s1 + $0x428] sm:$0xff]  ;;  %v964_v35 = vpack.c.bf16 %v148_v29, %v140_v28 }
  0x41   :  { %v954_v6 = vpack.c.bf16 %v99_v62, %v91_v61  ;;  %v147_v37 = vld [vmem:[%s1999_s1 + $0x3f0] sm:$0xff]  ;;  %v902_v38 = vpack.c.bf16 %v145_v32, %v137_v31  ;;  %v164_v40 = vld [vmem:[%s1999_s1 + $0x478] sm:$0xff]  ;;  %v161_v43 = vld [vmem:[%s1999_s1 + $0x460] sm:$0xff] }
  0x42   :  { %807 = vmatpush1.bf16.msra.mxu0 %v806_v1  ;;  %v116_v1 = vld [vmem:[%s1999_s1 + $0x2f8] sm:$0xff]  ;;  %v178_v46 = vld [vmem:[%s1999_s1 + $0x4e8] sm:$0xff]  ;;  %v163_v49 = vld [vmem:[%s1999_s1 + $0x470] sm:$0xff] }
  0x43   :  { %873 = vmatprep.subr.bf16.mxu0 %v872_v4  ;;  %871 = vmatpush1.bf16.msra.mxu1 %v870_v7  ;;  %v113_v4 = vld [vmem:[%s1999_s1 + $0x2e0] sm:$0xff]  ;;  %v130_v7 = vld [vmem:[%s1999_s1 + $0x368] sm:$0xff]  ;;  %v180_v52 = vld [vmem:[%s1999_s1 + $0x4f8] sm:$0xff] }
  0x44   :  { %937 = vmatprep.subr.bf16.mxu1 %v936_v11  ;;  %v956_v11 = vpack.c.bf16 %v116_v1, %v108_v0  ;;  %v177_v55 = vld [vmem:[%s1999_s1 + $0x4e0] sm:$0xff]  ;;  %v194_v58 = vld [vmem:[%s1999_s1 + $0x568] sm:$0xff]  ;;  %v179_v61 = vld [vmem:[%s1999_s1 + $0x4f0] sm:$0xff] }
  0x45   :  { %342 = vmatmul.mubr.f32.vlgmr.msra.gmra.mrb[0].mxu0 %v1457_v14  ;;  %v196_v0 = vld [vmem:[%s1999_s1 + $0x578] sm:$0xff]  ;;  %v225_v31 = vld [vmem:[%s1999_s1 + $0x660] sm:$0xff] }
  0x46   :  { %875 = vmatpush1.bf16.msra.mxu0 %v874_v15  ;;  %419 = vmatmul.mubr.f32.vlgmr.msra.gmra.mrb[0].mxu1 %v1457_v14  ;;  %v894_v15 = vpack.c.bf16 %v113_v4, %v105_v3  ;;  %v193_v3 = vld [vmem:[%s1999_s1 + $0x560] sm:$0xff]  ;;  %v228_v28 = vld [vmem:[%s1999_s1 + $0x678] sm:$0xff] }
  0x47   :  { %877 = vmatprep.subr.bf16.mxu0 %v876_v18  ;;  %939 = vmatpush1.bf16.msra.mxu1 %v938_v21  ;;  %v896_v18 = vpack.c.bf16 %v130_v7, %v122_v5  ;;  %v958_v21 = vpack.c.bf16 %v115_v13, %v107_v12  ;;  %v202_v5 = vld [vmem:[%s1999_s1 + $0x5a8] sm:$0xff]  ;;  %v195_v12 = vld [vmem:[%s1999_s1 + $0x570] sm:$0xff] }
  0x48   :  { %941 = vmatprep.subr.bf16.mxu1 %v940_v24  ;;  %347 = vmatprep.mubr.f32.mxu0 %v1578_v8  ;;  %v960_v24 = vpack.c.bf16 %v132_v17, %v124_v16  ;;  %v212_v16 = vld [vmem:[%s1999_s1 + $0x5f8] sm:$0xff] }
  0x49   :  { %424 = vmatprep.mubr.f32.mxu1 %v1578_v8  ;;  %348 = vmatmul.mubr.f32.gmra.mrb[2].mxu0 %v1583_v9 }
  0x4a   :  { %879 = vmatpush1.bf16.msra.mxu0 %v878_v27  ;;  %495 = vmatprep.mubr.f32.mxu0 %v1318_v10  ;;  %v898_v27 = vpack.c.bf16 %v129_v20, %v121_v19  ;;  %v209_v19 = vld [vmem:[%s1999_s1 + $0x5e0] sm:$0xff] }
  0x4b   :  { %881 = vmatprep.subr.bf16.mxu0 %v880_v30  ;;  %943 = vmatpush1.bf16.msra.mxu1 %v942_v33  ;;  %v900_v30 = vpack.c.bf16 %v146_v23, %v138_v22  ;;  %v962_v33 = vpack.c.bf16 %v131_v26, %v123_v25  ;;  %v226_v22 = vld [vmem:[%s1999_s1 + $0x668] sm:$0xff]  ;;  %v211_v25 = vld [vmem:[%s1999_s1 + $0x5f0] sm:$0xff] }
  0x4c   :  { %945 = vmatprep.subr.bf16.mxu1 %v944_v36  ;;  %425 = vmatmul.mubr.f32.gmra.mrb[2].mxu1 %v1583_v9  ;;  %v139_v36 = vld [vmem:[%s1999_s1 + $0x3b0] sm:$0xff] }
  0x4d   :  { %572 = vmatprep.mubr.f32.mxu1 %v1318_v10  ;;  %v162_v10 = vld [vmem:[%s1999_s1 + $0x468] sm:$0xff]  ;;  %v966_v44 = vpack.c.bf16 %v147_v37, %v139_v36  ;;  %v227_v36 = vld [vmem:[%s1999_s1 + $0x670] sm:$0xff] }
  0x4e   :  { %883 = vmatpush1.bf16.msra.mxu0 %v882_v39  ;;  %v156_v39 = vld [vmem:[%s1999_s1 + $0x438] sm:$0xff]  ;;  %v904_v41 = vpack.c.bf16 %v162_v10, %v154_v34  ;;  %v242_v34 = vld [vmem:[%s1999_s1 + $0x6e8] sm:$0xff] }
  0x4f   :  { %885 = vmatprep.subr.bf16.mxu0 %v884_v42  ;;  %947 = vmatpush1.bf16.msra.mxu1 %v946_v45  ;;  %v153_v42 = vld [vmem:[%s1999_s1 + $0x420] sm:$0xff]  ;;  %v170_v45 = vld [vmem:[%s1999_s1 + $0x4a8] sm:$0xff]  ;;  %v968_v47 = vpack.c.bf16 %v164_v40, %v156_v39  ;;  %v244_v39 = vld [vmem:[%s1999_s1 + $0x6f8] sm:$0xff] }
  0x50   :  { %949 = vmatprep.subr.bf16.mxu1 %v948_v48  ;;  %v155_v48 = vld [vmem:[%s1999_s1 + $0x430] sm:$0xff]  ;;  %v906_v50 = vpack.c.bf16 %v161_v43, %v153_v42  ;;  %v908_v53 = vpack.c.bf16 %v178_v46, %v170_v45  ;;  %v241_v42 = vld [vmem:[%s1999_s1 + $0x6e0] sm:$0xff]  ;;  %v258_v45 = vld [vmem:[%s1999_s1 + $0x768] sm:$0xff] }
  0x51   :  { %v970_v56 = vpack.c.bf16 %v163_v49, %v155_v48  ;;  %v243_v48 = vld [vmem:[%s1999_s1 + $0x6f0] sm:$0xff] }
  0x52   :  { %887 = vmatpush1.bf16.msra.mxu0 %v886_v51  ;;  %v172_v51 = vld [vmem:[%s1999_s1 + $0x4b8] sm:$0xff] }
  0x53   :  { %889 = vmatprep.subr.bf16.mxu0 %v888_v54  ;;  %951 = vmatpush1.bf16.msra.mxu1 %v950_v57  ;;  %v169_v54 = vld [vmem:[%s1999_s1 + $0x4a0] sm:$0xff]  ;;  %v186_v57 = vld [vmem:[%s1999_s1 + $0x528] sm:$0xff]  ;;  %v972_v59 = vpack.c.bf16 %v180_v52, %v172_v51  ;;  %v260_v51 = vld [vmem:[%s1999_s1 + $0x778] sm:$0xff] }
  0x54   :  { %953 = vmatprep.subr.bf16.mxu1 %v952_v60  ;;  %v171_v60 = vld [vmem:[%s1999_s1 + $0x4b0] sm:$0xff]  ;;  %v910_v62 = vpack.c.bf16 %v177_v55, %v169_v54  ;;  %v912_v1 = vpack.c.bf16 %v194_v58, %v186_v57  ;;  %v257_v54 = vld [vmem:[%s1999_s1 + $0x760] sm:$0xff]  ;;  %v274_v57 = vld [vmem:[%s1999_s1 + $0x7e8] sm:$0xff] }
  0x55   :  { %v974_v4 = vpack.c.bf16 %v179_v61, %v171_v60  ;;  %v259_v60 = vld [vmem:[%s1999_s1 + $0x770] sm:$0xff] }
  0x56   :  { %891 = vmatpush1.bf16.msra.mxu0 %v890_v63  ;;  %v188_v63 = vld [vmem:[%s1999_s1 + $0x538] sm:$0xff] }
  0x57   :  { %893 = vmatprep.subr.bf16.mxu0 %v892_v2  ;;  %955 = vmatpush1.bf16.msra.mxu1 %v954_v6  ;;  %v185_v2 = vld [vmem:[%s1999_s1 + $0x520] sm:$0xff]  ;;  %v210_v6 = vld [vmem:[%s1999_s1 + $0x5e8] sm:$0xff]  ;;  %v976_v7 = vpack.c.bf16 %v196_v0, %v188_v63  ;;  %v276_v63 = vld [vmem:[%s1999_s1 + $0x7f8] sm:$0xff] }
  0x58   :  { %957 = vmatprep.subr.bf16.mxu1 %v956_v11  ;;  %v187_v11 = vld [vmem:[%s1999_s1 + $0x530] sm:$0xff]  ;;  %v914_v13 = vpack.c.bf16 %v193_v3, %v185_v2  ;;  %v916_v17 = vpack.c.bf16 %v210_v6, %v202_v5  ;;  %v273_v2 = vld [vmem:[%s1999_s1 + $0x7e0] sm:$0xff] }
  0x59   :  { %v978_v20 = vpack.c.bf16 %v195_v12, %v187_v11  ;;  %v267_v5 = vld [vmem:[%s1999_s1 + $0x7b0] sm:$0xff] }
  0x5a   :  { %895 = vmatpush1.bf16.msra.mxu0 %v894_v15  ;;  %v204_v15 = vld [vmem:[%s1999_s1 + $0x5b8] sm:$0xff]  ;;  %v275_v6 = vld [vmem:[%s1999_s1 + $0x7f0] sm:$0xff] }
  0x5b   :  { %897 = vmatprep.subr.bf16.mxu0 %v896_v18  ;;  %959 = vmatpush1.bf16.msra.mxu1 %v958_v21  ;;  %v201_v18 = vld [vmem:[%s1999_s1 + $0x5a0] sm:$0xff]  ;;  %v218_v21 = vld [vmem:[%s1999_s1 + $0x628] sm:$0xff]  ;;  %v980_v23 = vpack.c.bf16 %v212_v16, %v204_v15  ;;  %v998_v11 = vpack.c.bf16 %v275_v6, %v267_v5 }
  0x5c   :  { %961 = vmatprep.subr.bf16.mxu1 %v960_v24  ;;  %v203_v24 = vld [vmem:[%s1999_s1 + $0x5b0] sm:$0xff]  ;;  %v918_v26 = vpack.c.bf16 %v209_v19, %v201_v18  ;;  %v920_v29 = vpack.c.bf16 %v226_v22, %v218_v21 }
  0x5d   :  { %v982_v32 = vpack.c.bf16 %v211_v25, %v203_v24 }
  0x5e   :  { %899 = vmatpush1.bf16.msra.mxu0 %v898_v27  ;;  %v220_v27 = vld [vmem:[%s1999_s1 + $0x638] sm:$0xff] }
  0x5f   :  { %901 = vmatprep.subr.bf16.mxu0 %v900_v30  ;;  %963 = vmatpush1.bf16.msra.mxu1 %v962_v33  ;;  %v217_v30 = vld [vmem:[%s1999_s1 + $0x620] sm:$0xff]  ;;  %v234_v33 = vld [vmem:[%s1999_s1 + $0x6a8] sm:$0xff]  ;;  %v984_v10 = vpack.c.bf16 %v228_v28, %v220_v27 }
  0x60   :  { %965 = vmatprep.subr.bf16.mxu1 %v964_v35  ;;  %v219_v35 = vld [vmem:[%s1999_s1 + $0x630] sm:$0xff]  ;;  %v922_v37 = vpack.c.bf16 %v225_v31, %v217_v30  ;;  %v924_v40 = vpack.c.bf16 %v242_v34, %v234_v33 }
  0x61   :  { %v986_v43 = vpack.c.bf16 %v227_v36, %v219_v35 }
  0x62   :  { %903 = vmatpush1.bf16.msra.mxu0 %v902_v38  ;;  %v236_v38 = vld [vmem:[%s1999_s1 + $0x6b8] sm:$0xff] }
  0x63   :  { %905 = vmatprep.subr.bf16.mxu0 %v904_v41  ;;  %967 = vmatpush1.bf16.msra.mxu1 %v966_v44  ;;  %v233_v41 = vld [vmem:[%s1999_s1 + $0x6a0] sm:$0xff]  ;;  %v250_v44 = vld [vmem:[%s1999_s1 + $0x728] sm:$0xff]  ;;  %v988_v46 = vpack.c.bf16 %v244_v39, %v236_v38 }
  0x64   :  { %969 = vmatprep.subr.bf16.mxu1 %v968_v47  ;;  %v235_v47 = vld [vmem:[%s1999_s1 + $0x6b0] sm:$0xff]  ;;  %v926_v49 = vpack.c.bf16 %v241_v42, %v233_v41  ;;  %v928_v52 = vpack.c.bf16 %v258_v45, %v250_v44 }
  0x65   :  { %v990_v55 = vpack.c.bf16 %v243_v48, %v235_v47 }
  0x66   :  { %907 = vmatpush1.bf16.msra.mxu0 %v906_v50  ;;  %v252_v50 = vld [vmem:[%s1999_s1 + $0x738] sm:$0xff] }
  0x67   :  { %909 = vmatprep.subr.bf16.mxu0 %v908_v53  ;;  %971 = vmatpush1.bf16.msra.mxu1 %v970_v56  ;;  %v249_v53 = vld [vmem:[%s1999_s1 + $0x720] sm:$0xff]  ;;  %v266_v56 = vld [vmem:[%s1999_s1 + $0x7a8] sm:$0xff]  ;;  %v992_v58 = vpack.c.bf16 %v260_v51, %v252_v50 }
  0x68   :  { %973 = vmatprep.subr.bf16.mxu1 %v972_v59  ;;  %v251_v59 = vld [vmem:[%s1999_s1 + $0x730] sm:$0xff]  ;;  %v930_v61 = vpack.c.bf16 %v257_v54, %v249_v53  ;;  %v932_v0 = vpack.c.bf16 %v274_v57, %v266_v56 }
  0x69   :  { %v994_v3 = vpack.c.bf16 %v259_v60, %v251_v59 }
  0x6a   :  { %911 = vmatpush1.bf16.msra.mxu0 %v910_v62  ;;  %v268_v62 = vld [vmem:[%s1999_s1 + $0x7b8] sm:$0xff] }
  0x6b   :  { %913 = vmatprep.subr.bf16.mxu0 %v912_v1  ;;  %975 = vmatpush1.bf16.msra.mxu1 %v974_v4  ;;  %v265_v1 = vld [vmem:[%s1999_s1 + $0x7a0] sm:$0xff]  ;;  %v996_v4 = vpack.c.bf16 %v276_v63, %v268_v62 }
  0x6c   :  { %977 = vmatprep.subr.bf16.mxu1 %v976_v7  ;;  %v934_v7 = vpack.c.bf16 %v273_v2, %v265_v1 }
  0x6e   :  { %915 = vmatpush1.bf16.msra.mxu0 %v914_v13 }
  0x6f   :  { %917 = vmatprep.subr.bf16.mxu0 %v916_v17  ;;  %979 = vmatpush1.bf16.msra.mxu1 %v978_v20 }
  0x70   :  { %981 = vmatprep.subr.bf16.mxu1 %v980_v23 }
  0x72   :  { %919 = vmatpush1.bf16.msra.mxu0 %v918_v26 }
  0x73   :  { %921 = vmatprep.subr.bf16.mxu0 %v920_v29  ;;  %983 = vmatpush1.bf16.msra.mxu1 %v982_v32 }
  0x74   :  { %985 = vmatprep.subr.bf16.mxu1 %v984_v10 }
  0x76   :  { %923 = vmatpush1.bf16.msra.mxu0 %v922_v37 }
  0x77   :  { %925 = vmatprep.subr.bf16.mxu0 %v924_v40  ;;  %987 = vmatpush1.bf16.msra.mxu1 %v986_v43 }
  0x78   :  { %989 = vmatprep.subr.bf16.mxu1 %v988_v46 }
  0x7a   :  { %927 = vmatpush1.bf16.msra.mxu0 %v926_v49 }
  0x7b   :  { %929 = vmatprep.subr.bf16.mxu0 %v928_v52  ;;  %991 = vmatpush1.bf16.msra.mxu1 %v990_v55 }
  0x7c   :  { %993 = vmatprep.subr.bf16.mxu1 %v992_v58 }
  0x7e   :  { %931 = vmatpush1.bf16.msra.mxu0 %v930_v61 }
  0x7f   :  { %933 = vmatprep.subr.bf16.mxu0 %v932_v0  ;;  %995 = vmatpush1.bf16.msra.mxu1 %v994_v3 }
  0x80   :  { %997 = vmatprep.subr.bf16.mxu1 %v996_v4 }
  0x82   :  { %935 = vmatpush1.bf16.msra.mxu0 %v934_v7 }
  0x83   :  { %999 = vmatpush1.bf16.msra.mxu1 %v998_v11 }
  0x85   :  { %496 = vmatmul.mubr.f32.vlgmr.msra.gmra.mrb[4].mxu0 %v1457_v14 }
  0x86   :  { %501 = vmatprep.mubr.f32.mxu0 %v1578_v8  ;;  %573 = vmatmul.mubr.f32.vlgmr.msra.gmra.mrb[4].mxu1 %v1457_v14 }
  0x87   :  { %578 = vmatprep.mubr.f32.mxu1 %v1578_v8 }
  0x89   :  { %502 = vmatmul.mubr.f32.gmra.mrb[6].mxu0 %v1583_v9 }
  0x8a   :  { %579 = vmatmul.mubr.f32.gmra.mrb[6].mxu1 %v1583_v9 }
 0x118   :  { %v1837_v12 = vpop.f32.mrb[0].mxu0 }
 0x119   :  { %v1839_v13 = vpop.f32.mrb[1].mxu0  ;;  %v1843_v16 = vpop.f32.mrb[0].mxu1 }
 0x11a   :  { %v589_v15 = vadd.f32 %v1839_v13, %v1837_v12  ;;  %v1845_v17 = vpop.f32.mrb[1].mxu1 }
 0x11c   :  { %v590_v18 = vadd.f32 %v589_v15, %v1843_v16  ;;  %v1849_v8 = vpop.f32.mrb[2].mxu0 }
 0x11d   :  { %v1851_v19 = vpop.f32.mrb[3].mxu0 }
 0x11e   :  { %v591_v14 = vadd.f32 %v590_v18, %v1845_v17  ;;  %v598_v9 = vadd.f32 %v1851_v19, %v1849_v8 }
 0x11f   :  { %v1855_v20 = vpop.f32.mrb[2].mxu1 }
 0x120   :  { %v1857_v21 = vpop.f32.mrb[3].mxu1  ;;  %v599_v22 = vadd.f32 %v598_v9, %v1855_v20 }
 0x122   :  { %v600_v23 = vadd.f32 %v599_v22, %v1857_v21 }
 0x158   :  { %v1861_v24 = vpop.f32.mrb[4].mxu0 }
 0x159   :  { %v592_v25 = vadd.f32 %v591_v14, %v1861_v24  ;;  %v1864_v26 = vpop.f32.mrb[5].mxu0  ;;  %v1866_v27 = vpop.f32.mrb[4].mxu1 }
 0x15a   :  { %v1869_v29 = vpop.f32.mrb[5].mxu1 }
 0x15b   :  { %v593_v28 = vadd.f32 %v592_v25, %v1864_v26 }
 0x15c   :  { %v1871_v30 = vpop.f32.mrb[6].mxu0 }
 0x15d   :  { %v601_v31 = vadd.f32 %v600_v23, %v1871_v30  ;;  %v1874_v32 = vpop.f32.mrb[7].mxu0  ;;  %v594_v33 = vadd.f32 %v593_v28, %v1866_v27  ;;  %v1877_v34 = vpop.f32.mrb[6].mxu1 }
 0x15e   :  { %v1880_v35 = vpop.f32.mrb[7].mxu1 }
 0x15f   :  { %v602_v10 = vadd.f32 %v601_v31, %v1874_v32  ;;  %v595_v36 = vadd.f32 %v594_v33, %v1869_v29 }
 0x161   :  { %596 = vadd.xlane.f32.xlu0 %v595_v36  ;;  %v603_v37 = vadd.f32 %v602_v10, %v1877_v34 }
 0x163   :  { %v604_v38 = vadd.f32 %v603_v37, %v1880_v35 }
 0x165   :  { %605 = vadd.xlane.f32.xlu0 %v604_v38 }
 0x1ee   :  { %v597_v39 = vpop.xlane.xlu0 %596 }
 0x1ef   :  { %v1885_v40 = vmul.f32 0.0009765625, %v597_v39 }
 0x1f1   :  { %v610_v41 = vsub.f32 %v1837_v12, %v1885_v40  ;;  %v611_v42 = vsub.f32 %v1839_v13, %v1885_v40  ;;  %v612_v43 = vsub.f32 %v1843_v16, %v1885_v40  ;;  %v613_v46 = vsub.f32 %v1845_v17, %v1885_v40 }
 0x1f2   :  { %v606_v44 = vpop.xlane.xlu0 %605  ;;  %v614_v49 = vsub.f32 %v1861_v24, %v1885_v40  ;;  %v615_v55 = vsub.f32 %v1864_v26, %v1885_v40  ;;  %v616_v61 = vsub.f32 %v1866_v27, %v1885_v40  ;;  %v617_v3 = vsub.f32 %v1869_v29, %v1885_v40 }
 0x1f3   :  { %v1893_v45 = vmul.f32 0.0009765625, %v606_v44  ;;  %v626_v47 = vmul.f32 %v610_v41, %v610_v41  ;;  %v627_v48 = vmul.f32 %v611_v42, %v611_v42  ;;  %v628_v50 = vmul.f32 %v612_v43, %v612_v43 }
 0x1f4   :  { %v629_v56 = vmul.f32 %v613_v46, %v613_v46  ;;  %v630_v62 = vmul.f32 %v614_v49, %v614_v49  ;;  %v631_v4 = vmul.f32 %v615_v55, %v615_v55  ;;  %v632_v15 = vmul.f32 %v616_v61, %v616_v61 }
 0x1f5   :  { %v642_v51 = vadd.f32 %v627_v48, %v626_v47  ;;  %v618_v52 = vsub.f32 %v1849_v8, %v1893_v45  ;;  %v619_v53 = vsub.f32 %v1851_v19, %v1893_v45  ;;  %v620_v54 = vsub.f32 %v1855_v20, %v1893_v45 }
 0x1f6   :  { %v621_v59 = vsub.f32 %v1857_v21, %v1893_v45  ;;  %v622_v0 = vsub.f32 %v1871_v30, %v1893_v45  ;;  %v623_v6 = vsub.f32 %v1874_v32, %v1893_v45  ;;  %v624_v14 = vsub.f32 %v1877_v34, %v1893_v45 }
 0x1f7   :  { %v643_v57 = vadd.f32 %v642_v51, %v628_v50  ;;  %v634_v58 = vmul.f32 %v618_v52, %v618_v52  ;;  %v635_v60 = vmul.f32 %v619_v53, %v619_v53  ;;  %v636_v1 = vmul.f32 %v620_v54, %v620_v54  ;;  %v585_v50 = vld [vmem:[%s2001_s2] sm:$0xff]  ;;  %v586_v53 = vld [vmem:[%s2001_s2 + $0x8] sm:$0xff] }
 0x1f8   :  { %v637_v7 = vmul.f32 %v621_v59, %v621_v59  ;;  %v638_v9 = vmul.f32 %v622_v0, %v622_v0  ;;  %v633_v23 = vmul.f32 %v617_v3, %v617_v3  ;;  %v625_v28 = vsub.f32 %v1880_v35, %v1893_v45 }
 0x1f9   :  { %v644_v63 = vadd.f32 %v643_v57, %v629_v56  ;;  %v651_v2 = vadd.f32 %v635_v60, %v634_v58  ;;  %v639_v31 = vmul.f32 %v623_v6, %v623_v6  ;;  %v640_v36 = vmul.f32 %v624_v14, %v624_v14  ;;  %v587_v57 = vld [vmem:[%s2002_s3] sm:$0xff]  ;;  %v588_v60 = vld [vmem:[%s2002_s3 + $0x8] sm:$0xff] }
 0x1fa   :  { %v641_v38 = vmul.f32 %v625_v28, %v625_v28  ;;  %v1007_v42 = vmov 0  }
 0x1fb   :  { %v645_v5 = vadd.f32 %v644_v63, %v630_v62  ;;  %v652_v11 = vadd.f32 %v651_v2, %v636_v1  ;;  %1001 = vset.pattern.permute.xlu0 %v1007_v42  ;;  %1002 = vset.pattern.permute.xlu1 %v1007_v42 }
 0x1fd   :  { %v646_v18 = vadd.f32 %v645_v5, %v631_v4  ;;  %v653_v22 = vadd.f32 %v652_v11, %v637_v7 }
 0x1ff   :  { %v647_v25 = vadd.f32 %v646_v18, %v632_v15  ;;  %v654_v33 = vadd.f32 %v653_v22, %v638_v9 }
 0x201   :  { %v648_v10 = vadd.f32 %v647_v25, %v633_v23  ;;  %v655_v37 = vadd.f32 %v654_v33, %v639_v31 }
 0x203   :  { %649 = vadd.xlane.f32.xlu1 %v648_v10  ;;  %v656_v39 = vadd.f32 %v655_v37, %v640_v36 }
 0x205   :  { %v657_v41 = vadd.f32 %v656_v39, %v641_v38 }
 0x207   :  { %658 = vadd.xlane.f32.xlu1 %v657_v41 }
 0x290   :  { %v650_v43 = vpop.xlane.xlu1 %649 }
 0x291   :  { %v660_v44 = vmul.f32 0.0009765625, %v650_v43 }
 0x293   :  { %v662_v46 = vadd.f32 1e-05, %v660_v44 }
 0x294   :  { %v659_v47 = vpop.xlane.xlu1 %658 }
 0x295   :  { %1003 = vrsqrt.f32 %v662_v46  ;;  %v661_v48 = vmul.f32 0.0009765625, %v659_v47 }
 0x297   :  { %v663_v49 = vadd.f32 1e-05, %v661_v48 }
 0x299   :  { %1005 = vrsqrt.f32 %v663_v49 }
 0x29f   :  { %v1004_v51 = vpop.eup %1003 }
 0x2a0   :  { %v666_v52 = vmul.f32 %v1004_v51, %v585_v50 }
 0x2a2   :  { %670 = vperm.xlu0 %1001, %v666_v52   ;;  %v694_v56 = vmul.f32 %v666_v52, %v1885_v40 }
 0x2a3   :  { %v1006_v54 = vpop.eup %1005 }
 0x2a4   :  { %v667_v55 = vmul.f32 %v1006_v54, %v586_v53  ;;  %v696_v58 = vsub.f32 %v587_v57, %v694_v56 }
 0x2a6   :  { %675 = vperm.xlu1 %1002, %v667_v55   ;;  %v695_v59 = vmul.f32 %v667_v55, %v1893_v45 }
 0x2a8   :  { %v697_v61 = vsub.f32 %v588_v60, %v695_v59 }
 0x2aa   :  { %700 = vperm.xlu1 %1002, %v696_v58  }
 0x2ae   :  { %705 = vperm.xlu1 %1002, %v697_v61  }
 0x321   :  { %v671_v62 = vpop.permute.xlu0 %670 }
 0x322   :  { %v678_v0 = vmul.f32 %v671_v62, %v1837_v12  ;;  %v679_v40 = vmul.f32 %v671_v62, %v1839_v13  ;;  %v680_v1 = vmul.f32 %v671_v62, %v1843_v16  ;;  %v681_v2 = vmul.f32 %v671_v62, %v1845_v17 }
 0x323   :  { %v682_v3 = vmul.f32 %v671_v62, %v1861_v24  ;;  %v683_v45 = vmul.f32 %v671_v62, %v1864_v26  ;;  %v684_v4 = vmul.f32 %v671_v62, %v1866_v27  ;;  %v685_v5 = vmul.f32 %v671_v62, %v1869_v29 }
 0x325   :  { %v676_v63 = vpop.permute.xlu1 %675 }
 0x326   :  { %v686_v16 = vmul.f32 %v676_v63, %v1849_v8  ;;  %v687_v17 = vmul.f32 %v676_v63, %v1851_v19  ;;  %v688_v24 = vmul.f32 %v676_v63, %v1855_v20  ;;  %v689_v26 = vmul.f32 %v676_v63, %v1857_v21 }
 0x327   :  { %v690_v8 = vmul.f32 %v676_v63, %v1871_v30  ;;  %v691_v19 = vmul.f32 %v676_v63, %v1874_v32  ;;  %v692_v20 = vmul.f32 %v676_v63, %v1877_v34  ;;  %v693_v21 = vmul.f32 %v676_v63, %v1880_v35 }
 0x329   :  { %v701_v6 = vpop.permute.xlu1 %700 }
 0x32a   :  { %v708_v7 = vadd.f32 %v701_v6, %v678_v0  ;;  %v709_v11 = vadd.f32 %v701_v6, %v679_v40  ;;  %v710_v15 = vadd.f32 %v701_v6, %v680_v1  ;;  %v711_v18 = vadd.f32 %v701_v6, %v681_v2 }
 0x32b   :  { %v712_v12 = vadd.f32 %v701_v6, %v682_v3  ;;  %v713_v14 = vadd.f32 %v701_v6, %v683_v45  ;;  %v714_v13 = vadd.f32 %v701_v6, %v684_v4  ;;  %v715_v9 = vadd.f32 %v701_v6, %v685_v5 }
 0x32c   :  { %724 = vst [vmem:[%s2003_s4] sm:$0xff] %v708_v7  ;;  %725 = vst [vmem:[%s2003_s4 + $0x8] sm:$0xff] %v709_v11 }
 0x32d   :  { %726 = vst [vmem:[%s2003_s4 + $0x10] sm:$0xff] %v710_v15  ;;  %727 = vst [vmem:[%s2003_s4 + $0x18] sm:$0xff] %v711_v18  ;;  %v706_v27 = vpop.permute.xlu1 %705 }
 0x32e   :  { %728 = vst [vmem:[%s2003_s4 + $0x20] sm:$0xff] %v712_v12  ;;  %729 = vst [vmem:[%s2003_s4 + $0x28] sm:$0xff] %v713_v14  ;;  %v716_v29 = vadd.f32 %v706_v27, %v686_v16  ;;  %v717_v22 = vadd.f32 %v706_v27, %v687_v17  ;;  %v718_v23 = vadd.f32 %v706_v27, %v688_v24 }
 0x32f   :  { %730 = vst [vmem:[%s2003_s4 + $0x30] sm:$0xff] %v714_v13  ;;  %731 = vst [vmem:[%s2003_s4 + $0x38] sm:$0xff] %v715_v9  ;;  %v719_v25 = vadd.f32 %v706_v27, %v689_v26  ;;  %v720_v28 = vadd.f32 %v706_v27, %v690_v8  ;;  %v721_v31 = vadd.f32 %v706_v27, %v691_v19 }
 0x330   :  { %v722_v33 = vadd.f32 %v706_v27, %v692_v20  ;;  %v723_v10 = vadd.f32 %v706_v27, %v693_v21  ;;  %732 = vst [vmem:[%s2003_s4 + $0x40] sm:$0xff] %v716_v29  ;;  %733 = vst [vmem:[%s2003_s4 + $0x48] sm:$0xff] %v717_v22 }
 0x331   :  { %734 = vst [vmem:[%s2003_s4 + $0x50] sm:$0xff] %v718_v23  ;;  %735 = vst [vmem:[%s2003_s4 + $0x58] sm:$0xff] %v719_v25 }
 0x332   :  { %736 = vst [vmem:[%s2003_s4 + $0x60] sm:$0xff] %v720_v28  ;;  %737 = vst [vmem:[%s2003_s4 + $0x68] sm:$0xff] %v721_v31 }
 0x333   :  { %738 = vst [vmem:[%s2003_s4 + $0x70] sm:$0xff] %v722_v33  ;;  %739 = vst [vmem:[%s2003_s4 + $0x78] sm:$0xff] %v723_v10 }

// kernel: unet2_forward.37
= control target key start
LH: loop header
LB: loop body
LE: loop exit
PB: predicated region body
PF: predicated region fallthrough
CT: control target
= control target key end

     0   :  { %v1793_v3 = vmov 0   ;;  %vm629_vm0 = vcmask 424960   ;;  %vm633_vm1 = vcmask 1041408   ;;  %vm1046_vm13 = vcmask 130048   ;;  %s2522_s0 = inlined_call_operand.vmem [shape: bf16[180,1024], index: 0, kind: input, shape index: {}]   ;;  %s2523_s1 = inlined_call_operand.vmem [shape: bf16[16,180], index: 1, kind: input, shape index: {}]   ;;  %s2524_s2 = inlined_call_operand.vmem [shape: f32[16,1], index: 2, kind: input, shape index: {}]   ;;  %s2525_s7 = inlined_call_operand.vmem [shape: f32[16,1], index: 7, kind: input, shape index: {}]   ;;  %s2526_s3 = inlined_call_operand.vmem [shape: f32[16,1], index: 3, kind: input, shape index: {}]   ;;  %s2527_s4 = inlined_call_operand.vmem [shape: f32[16,1], index: 4, kind: input, shape index: {}]   ;;  %s2528_s6 = inlined_call_operand.vmem [shape: bf16[16,16], index: 6, kind: input, shape index: {}]   ;;  %s2529_s5 = inlined_call_operand.<no memory space> [shape: f32[1], index: 5, kind: input, shape index: {}]   ;;  %s2530_s12 = inlined_call_operand.<no memory space> [shape: f32[1,1], index: 12, kind: input, shape index: {}]   ;;  %s2531_s8 = inlined_call_operand.vmem [shape: f32[16,1], index: 8, kind: input, shape index: {}]   ;;  %s2532_s9 = inlined_call_operand.vmem [shape: f32[16,1], index: 9, kind: input, shape index: {}]   ;;  %s2533_s10 = inlined_call_operand.<no memory space> [shape: f32[1], index: 10, kind: input, shape index: {}]   ;;  %s2534_s11 = inlined_call_operand.vmem [shape: bf16[1,16], index: 11, kind: input, shape index: {}]   ;;  %s2535_s13 = inlined_call_operand.vmem [shape: f32[1,1024], index: 13, kind: output, shape index: {}]  }
   0x1   :  { %v49_v0 = vld [vmem:[%s2522_s0] sm:$0xff]  ;;  %v50_v2 = vld [vmem:[%s2522_s0 + $0x8] sm:$0xff]  ;;  %1771 = vset.pattern.permute.xlu0 %v1793_v3  ;;  %1772 = vset.pattern.permute.xlu1 %v1793_v3 }
   0x2   :  { %v53_v1 = vld [vmem:[%s2522_s0 + $0x20] sm:$0xff]  ;;  %v54_v5 = vld [vmem:[%s2522_s0 + $0x28] sm:$0xff] }
   0x3   :  { %v1657_v4 = vcombine.high %v49_v0, %v53_v1  ;;  %v1656_v6 = vcombine.low %v49_v0, %v53_v1  ;;  %v57_v7 = vld [vmem:[%s2522_s0 + $0x40] sm:$0xff]  ;;  %v1659_v9 = vcombine.high %v50_v2, %v54_v5  ;;  %v1658_v10 = vcombine.low %v50_v2, %v54_v5  ;;  %v58_v12 = vld [vmem:[%s2522_s0 + $0x48] sm:$0xff] }
   0x4   :  { %v61_v8 = vld [vmem:[%s2522_s0 + $0x60] sm:$0xff]  ;;  %v62_v13 = vld [vmem:[%s2522_s0 + $0x68] sm:$0xff] }
   0x5   :  { %v1665_v11 = vcombine.high %v57_v7, %v61_v8  ;;  %v65_v14 = vld [vmem:[%s2522_s0 + $0x80] sm:$0xff]  ;;  %658 = vmatprep.subr.bf16.mxu0 %v1657_v4  ;;  %v1667_v15 = vcombine.high %v58_v12, %v62_v13  ;;  %v66_v17 = vld [vmem:[%s2522_s0 + $0x88] sm:$0xff]  ;;  %701 = vmatprep.subr.bf16.mxu1 %v1659_v9  ;;  %v1664_v19 = vcombine.low %v57_v7, %v61_v8 }
   0x6   :  { %v69_v16 = vld [vmem:[%s2522_s0 + $0xa0] sm:$0xff]  ;;  %v70_v18 = vld [vmem:[%s2522_s0 + $0xa8] sm:$0xff]  ;;  %659 = vmatpush1.bf16.msra.mxu0 %v1656_v6  ;;  %702 = vmatpush1.bf16.msra.mxu1 %v1658_v10  ;;  %v1666_v20 = vcombine.low %v58_v12, %v62_v13 }
   0x7   :  { %660 = vmatprep.subr.bf16.mxu0 %v1665_v11  ;;  %v1673_v21 = vcombine.high %v65_v14, %v69_v16  ;;  %703 = vmatprep.subr.bf16.mxu1 %v1667_v15  ;;  %v1675_v22 = vcombine.high %v66_v17, %v70_v18  ;;  %v73_v23 = vld [vmem:[%s2522_s0 + $0xc0] sm:$0xff]  ;;  %v74_v25 = vld [vmem:[%s2522_s0 + $0xc8] sm:$0xff]  ;;  %v1672_v27 = vcombine.low %v65_v14, %v69_v16 }
   0x8   :  { %v77_v24 = vld [vmem:[%s2522_s0 + $0xe0] sm:$0xff]  ;;  %v78_v26 = vld [vmem:[%s2522_s0 + $0xe8] sm:$0xff]  ;;  %v1674_v28 = vcombine.low %v66_v17, %v70_v18 }
   0x9   :  { %v1681_v29 = vcombine.high %v73_v23, %v77_v24  ;;  %v1683_v30 = vcombine.high %v74_v25, %v78_v26  ;;  %v81_v31 = vld [vmem:[%s2522_s0 + $0x100] sm:$0xff]  ;;  %v82_v33 = vld [vmem:[%s2522_s0 + $0x108] sm:$0xff]  ;;  %v1680_v35 = vcombine.low %v73_v23, %v77_v24  ;;  %v1682_v36 = vcombine.low %v74_v25, %v78_v26 }
   0xa   :  { %661 = vmatpush1.bf16.msra.mxu0 %v1664_v19  ;;  %704 = vmatpush1.bf16.msra.mxu1 %v1666_v20  ;;  %v85_v32 = vld [vmem:[%s2522_s0 + $0x120] sm:$0xff]  ;;  %v86_v34 = vld [vmem:[%s2522_s0 + $0x128] sm:$0xff] }
   0xb   :  { %662 = vmatprep.subr.bf16.mxu0 %v1673_v21  ;;  %705 = vmatprep.subr.bf16.mxu1 %v1675_v22  ;;  %v1689_v37 = vcombine.high %v81_v31, %v85_v32  ;;  %v1691_v38 = vcombine.high %v82_v33, %v86_v34  ;;  %v89_v39 = vld [vmem:[%s2522_s0 + $0x140] sm:$0xff]  ;;  %v90_v41 = vld [vmem:[%s2522_s0 + $0x148] sm:$0xff]  ;;  %v1688_v43 = vcombine.low %v81_v31, %v85_v32 }
   0xc   :  { %v93_v40 = vld [vmem:[%s2522_s0 + $0x160] sm:$0xff]  ;;  %v94_v42 = vld [vmem:[%s2522_s0 + $0x168] sm:$0xff]  ;;  %v1690_v45 = vcombine.low %v82_v33, %v86_v34 }
   0xd   :  { %v1942_v44 = vld [vmem:[%s2523_s1 + $0x4] ss:$8 sps:$4 sm:$0xff]   ;;  %v1697_v46 = vcombine.high %v89_v39, %v93_v40  ;;  %v1699_v47 = vcombine.high %v90_v41, %v94_v42  ;;  %v1696_v52 = vcombine.low %v89_v39, %v93_v40  ;;  %v1698_v53 = vcombine.low %v90_v41, %v94_v42 }
   0xe   :  { %663 = vmatpush1.bf16.msra.mxu0 %v1672_v27  ;;  %706 = vmatpush1.bf16.msra.mxu1 %v1674_v28  ;;  %v97_v48 = vld [vmem:[%s2522_s0 + $0x180] sm:$0xff]  ;;  %v98_v50 = vld [vmem:[%s2522_s0 + $0x188] sm:$0xff] }
   0xf   :  { %664 = vmatprep.subr.bf16.mxu0 %v1681_v29  ;;  %707 = vmatprep.subr.bf16.mxu1 %v1683_v30  ;;  %v101_v49 = vld [vmem:[%s2522_s0 + $0x1a0] sm:$0xff]  ;;  %v102_v51 = vld [vmem:[%s2522_s0 + $0x1a8] sm:$0xff] }
  0x10   :  { %1753 = vmatprep.mubr.msk.bf16.mxu0 %vm629_vm0, %v1942_v44  ;;  %1755 = vmatprep.mubr.msk.bf16.mxu1 %vm629_vm0, %v1942_v44  ;;  %v1705_v54 = vcombine.high %v97_v48, %v101_v49  ;;  %v1707_v55 = vcombine.high %v98_v50, %v102_v51  ;;  %v105_v56 = vld [vmem:[%s2522_s0 + $0x1c0] sm:$0xff]  ;;  %v106_v58 = vld [vmem:[%s2522_s0 + $0x1c8] sm:$0xff]  ;;  %v1704_v60 = vcombine.low %v97_v48, %v101_v49  ;;  %v64_v48 = vld [vmem:[%s2522_s0 + $0x78] sm:$0xff] }
  0x11   :  { %v109_v57 = vld [vmem:[%s2522_s0 + $0x1e0] sm:$0xff]  ;;  %v110_v59 = vld [vmem:[%s2522_s0 + $0x1e8] sm:$0xff]  ;;  %v1706_v61 = vcombine.low %v98_v50, %v102_v51 }
  0x12   :  { %665 = vmatpush1.bf16.msra.mxu0 %v1680_v35  ;;  %708 = vmatpush1.bf16.msra.mxu1 %v1682_v36  ;;  %v1713_v62 = vcombine.high %v105_v56, %v109_v57  ;;  %v1715_v63 = vcombine.high %v106_v58, %v110_v59  ;;  %v113_v0 = vld [vmem:[%s2522_s0 + $0x200] sm:$0xff]  ;;  %v114_v2 = vld [vmem:[%s2522_s0 + $0x208] sm:$0xff]  ;;  %v1712_v5 = vcombine.low %v105_v56, %v109_v57  ;;  %v51_v35 = vld [vmem:[%s2522_s0 + $0x10] sm:$0xff] }
  0x13   :  { %666 = vmatprep.subr.bf16.mxu0 %v1689_v37  ;;  %709 = vmatprep.subr.bf16.mxu1 %v1691_v38  ;;  %v117_v1 = vld [vmem:[%s2522_s0 + $0x220] sm:$0xff]  ;;  %v118_v4 = vld [vmem:[%s2522_s0 + $0x228] sm:$0xff]  ;;  %v1714_v6 = vcombine.low %v106_v58, %v110_v59  ;;  %v55_v36 = vld [vmem:[%s2522_s0 + $0x30] sm:$0xff] }
  0x14   :  { %v1721_v7 = vcombine.high %v113_v0, %v117_v1  ;;  %v1723_v8 = vcombine.high %v114_v2, %v118_v4  ;;  %v121_v9 = vld [vmem:[%s2522_s0 + $0x240] sm:$0xff]  ;;  %v122_v11 = vld [vmem:[%s2522_s0 + $0x248] sm:$0xff]  ;;  %v1720_v13 = vcombine.low %v113_v0, %v117_v1  ;;  %v1722_v15 = vcombine.low %v114_v2, %v118_v4  ;;  %v52_v37 = vld [vmem:[%s2522_s0 + $0x18] sm:$0xff] }
  0x15   :  { %v125_v10 = vld [vmem:[%s2522_s0 + $0x260] sm:$0xff]  ;;  %v126_v12 = vld [vmem:[%s2522_s0 + $0x268] sm:$0xff]  ;;  %v56_v38 = vld [vmem:[%s2522_s0 + $0x38] sm:$0xff]  ;;  %v1661_v40 = vcombine.high %v51_v35, %v55_v36  ;;  %v1660_v49 = vcombine.low %v51_v35, %v55_v36 }
  0x16   :  { %667 = vmatpush1.bf16.msra.mxu0 %v1688_v43  ;;  %710 = vmatpush1.bf16.msra.mxu1 %v1690_v45  ;;  %v143_v14 = vld [vmem:[%s2524_s2] sm:$0xff]  ;;  %v1729_v16 = vcombine.high %v121_v9, %v125_v10  ;;  %v1731_v17 = vcombine.high %v122_v11, %v126_v12  ;;  %v130_v20 = vld [vmem:[%s2522_s0 + $0x288] sm:$0xff]  ;;  %v1728_v23 = vcombine.low %v121_v9, %v125_v10  ;;  %v59_v43 = vld [vmem:[%s2522_s0 + $0x50] sm:$0xff] }
  0x17   :  { %668 = vmatprep.subr.bf16.mxu0 %v1697_v46  ;;  %711 = vmatprep.subr.bf16.mxu1 %v1699_v47  ;;  %v129_v18 = vld [vmem:[%s2522_s0 + $0x280] sm:$0xff]  ;;  %v134_v21 = vld [vmem:[%s2522_s0 + $0x2a8] sm:$0xff]  ;;  %v1730_v24 = vcombine.low %v122_v11, %v126_v12  ;;  %v1663_v42 = vcombine.high %v52_v37, %v56_v38  ;;  %v63_v45 = vld [vmem:[%s2522_s0 + $0x70] sm:$0xff]  ;;  %v1662_v50 = vcombine.low %v52_v37, %v56_v38 }
  0x18   :  { %v133_v19 = vld [vmem:[%s2522_s0 + $0x2a0] sm:$0xff]  ;;  %152 = vperm.xlu0 %1771, %v143_v14   ;;  %v144_v22 = vld [vmem:[%s2524_s2 + $0x8] sm:$0xff]  ;;  %v1739_v26 = vcombine.high %v130_v20, %v134_v21  ;;  %v1738_v30 = vcombine.low %v130_v20, %v134_v21  ;;  %v60_v47 = vld [vmem:[%s2522_s0 + $0x58] sm:$0xff]  ;;  %v1669_v51 = vcombine.high %v59_v43, %v63_v45  ;;  %v1668_v57 = vcombine.low %v59_v43, %v63_v45 }
  0x19   :  { %v1737_v25 = vcombine.high %v129_v18, %v133_v19  ;;  %v137_v27 = vld [vmem:[%s2522_s0 + $0x2c0] sm:$0x33]  ;;  %v138_v28 = vld [vmem:[%s2522_s0 + $0x2c8] sm:$0x33]  ;;  %v1736_v29 = vcombine.low %v129_v18, %v133_v19  ;;  %v72_v56 = vld [vmem:[%s2522_s0 + $0xb8] sm:$0xff]  ;;  %v1670_v58 = vcombine.low %v60_v47, %v64_v48 }
  0x1a   :  { %669 = vmatpush1.bf16.msra.mxu0 %v1696_v52  ;;  %712 = vmatpush1.bf16.msra.mxu1 %v1698_v53  ;;  %v1745_v31 = vcombine.high %v137_v27, %v137_v27  ;;  %v1744_v32 = vcombine.low %v137_v27, %v137_v27  ;;  %v1747_v33 = vcombine.high %v138_v28, %v138_v28  ;;  %v2045_v46 = vld [vmem:[%s2523_s1] ss:$8 sps:$4 sm:$0xff]   ;;  %v67_v53 = vld [vmem:[%s2522_s0 + $0x90] sm:$0xff]  ;;  %v80_v0 = vld [vmem:[%s2522_s0 + $0xf8] sm:$0xff] }
  0x1b   :  { %670 = vmatprep.subr.bf16.mxu0 %v1705_v54  ;;  %713 = vmatprep.subr.bf16.mxu1 %v1707_v55  ;;  %v1746_v34 = vcombine.low %v138_v28, %v138_v28  ;;  %v1671_v52 = vcombine.high %v60_v47, %v64_v48  ;;  %v71_v54 = vld [vmem:[%s2522_s0 + $0xb0] sm:$0xff]  ;;  %v68_v55 = vld [vmem:[%s2522_s0 + $0x98] sm:$0xff] }
  0x1c   :  { %157 = vperm.xlu0 %1771, %v144_v22   ;;  %v635_v39 = vsel %vm633_vm1, %v1744_v32, 0  ;;  %v1677_v59 = vcombine.high %v67_v53, %v71_v54  ;;  %v1676_v1 = vcombine.low %v67_v53, %v71_v54  ;;  %v1678_v2 = vcombine.low %v68_v55, %v72_v56  ;;  %v95_v14 = vld [vmem:[%s2522_s0 + $0x170] sm:$0xff]  ;;  %v112_v32 = vld [vmem:[%s2522_s0 + $0x1f8] sm:$0xff] }
  0x1d   :  { %v641_v41 = vsel %vm633_vm1, %v1746_v34, 0  ;;  %v99_v21 = vld [vmem:[%s2522_s0 + $0x190] sm:$0xff] }
  0x1e   :  { %671 = vmatpush1.bf16.msra.mxu0 %v1704_v60  ;;  %714 = vmatpush1.bf16.msra.mxu1 %v1706_v61  ;;  %v1679_v60 = vcombine.high %v68_v55, %v72_v56  ;;  %v75_v61 = vld [vmem:[%s2522_s0 + $0xd0] sm:$0xff] }
  0x1f   :  { %672 = vmatprep.subr.bf16.mxu0 %v1713_v62  ;;  %715 = vmatprep.subr.bf16.mxu1 %v1715_v63  ;;  %v79_v62 = vld [vmem:[%s2522_s0 + $0xf0] sm:$0xff]  ;;  %v76_v63 = vld [vmem:[%s2522_s0 + $0xd8] sm:$0xff] }
  0x20   :  { %v1685_v4 = vcombine.high %v75_v61, %v79_v62  ;;  %v1684_v9 = vcombine.low %v75_v61, %v79_v62  ;;  %v1686_v10 = vcombine.low %v76_v63, %v80_v0  ;;  %v103_v22 = vld [vmem:[%s2522_s0 + $0x1b0] sm:$0xff] }
  0x21   :  { %v1709_v27 = vcombine.high %v99_v21, %v103_v22  ;;  %v115_v37 = vld [vmem:[%s2522_s0 + $0x210] sm:$0xff] }
  0x22   :  { %673 = vmatpush1.bf16.msra.mxu0 %v1712_v5  ;;  %716 = vmatpush1.bf16.msra.mxu1 %v1714_v6  ;;  %v1687_v5 = vcombine.high %v76_v63, %v80_v0  ;;  %v83_v6 = vld [vmem:[%s2522_s0 + $0x110] sm:$0xff]  ;;  %v140_v0 = vld [vmem:[%s2522_s0 + $0x2d8] sm:$0x33] }
  0x23   :  { %674 = vmatprep.subr.bf16.mxu0 %v1721_v7  ;;  %717 = vmatprep.subr.bf16.mxu1 %v1723_v8  ;;  %v87_v7 = vld [vmem:[%s2522_s0 + $0x130] sm:$0xff]  ;;  %v88_v8 = vld [vmem:[%s2522_s0 + $0x138] sm:$0xff] }
  0x24   :  { %v1693_v11 = vcombine.high %v83_v6, %v87_v7  ;;  %v119_v38 = vld [vmem:[%s2522_s0 + $0x230] sm:$0xff] }
  0x25   :  { %v1725_v43 = vcombine.high %v115_v37, %v119_v38  ;;  %v123_v47 = vld [vmem:[%s2522_s0 + $0x250] sm:$0xff] }
  0x26   :  { %675 = vmatpush1.bf16.msra.mxu0 %v1720_v13  ;;  %718 = vmatpush1.bf16.msra.mxu1 %v1722_v15  ;;  %v91_v13 = vld [vmem:[%s2522_s0 + $0x150] sm:$0xff]  ;;  %v92_v15 = vld [vmem:[%s2522_s0 + $0x158] sm:$0xff] }
  0x27   :  { %676 = vmatprep.subr.bf16.mxu0 %v1729_v16  ;;  %719 = vmatprep.subr.bf16.mxu1 %v1731_v17  ;;  %v96_v16 = vld [vmem:[%s2522_s0 + $0x178] sm:$0xff]  ;;  %v1692_v17 = vcombine.low %v83_v6, %v87_v7  ;;  %v1701_v19 = vcombine.high %v91_v13, %v95_v14  ;;  %v127_v48 = vld [vmem:[%s2522_s0 + $0x270] sm:$0xff]  ;;  %v1751_v6 = vcombine.high %v140_v0, %v140_v0 }
  0x28   :  { %v1703_v20 = vcombine.high %v92_v15, %v96_v16  ;;  %v1733_v53 = vcombine.high %v123_v47, %v127_v48  ;;  %v131_v55 = vld [vmem:[%s2522_s0 + $0x290] sm:$0xff]  ;;  %v1750_v7 = vcombine.low %v140_v0, %v140_v0 }
  0x29   :  { %v135_v56 = vld [vmem:[%s2522_s0 + $0x2b0] sm:$0xff] }
  0x2a   :  { %677 = vmatpush1.bf16.msra.mxu0 %v1728_v23  ;;  %720 = vmatpush1.bf16.msra.mxu1 %v1730_v24  ;;  %v100_v23 = vld [vmem:[%s2522_s0 + $0x198] sm:$0xff]  ;;  %v1741_v61 = vcombine.high %v131_v55, %v135_v56  ;;  %v139_v63 = vld [vmem:[%s2522_s0 + $0x2d0] sm:$0x33] }
  0x2b   :  { %678 = vmatprep.subr.bf16.mxu0 %v1737_v25  ;;  %721 = vmatprep.subr.bf16.mxu1 %v1739_v26  ;;  %v104_v24 = vld [vmem:[%s2522_s0 + $0x1b8] sm:$0xff]  ;;  %v1700_v25 = vcombine.low %v91_v13, %v95_v14  ;;  %v1702_v26 = vcombine.low %v92_v15, %v96_v16 }
  0x2c   :  { %v1711_v28 = vcombine.high %v100_v23, %v104_v24  ;;  %v1710_v34 = vcombine.low %v100_v23, %v104_v24 }
  0x2e   :  { %679 = vmatpush1.bf16.msra.mxu0 %v1736_v29  ;;  %722 = vmatpush1.bf16.msra.mxu1 %v1738_v30  ;;  %v107_v29 = vld [vmem:[%s2522_s0 + $0x1d0] sm:$0xff] }
  0x2f   :  { %1752 = vmatprep.subr.msk.bf16.mxu0 %vm633_vm1, %v1745_v31  ;;  %1754 = vmatprep.subr.msk.bf16.mxu1 %vm633_vm1, %v1747_v33  ;;  %v111_v30 = vld [vmem:[%s2522_s0 + $0x1f0] sm:$0xff]  ;;  %v108_v31 = vld [vmem:[%s2522_s0 + $0x1d8] sm:$0xff]  ;;  %v1708_v33 = vcombine.low %v99_v21, %v103_v22 }
  0x30   :  { %v1717_v35 = vcombine.high %v107_v29, %v111_v30  ;;  %v1719_v36 = vcombine.high %v108_v31, %v112_v32 }
  0x32   :  { %681 = vmatpush1.bf16.msra.mxu0 %v635_v39  ;;  %724 = vmatpush1.bf16.msra.mxu1 %v641_v41  ;;  %v116_v39 = vld [vmem:[%s2522_s0 + $0x218] sm:$0xff]  ;;  %v1716_v41 = vcombine.low %v107_v29, %v111_v30 }
  0x33   :  { %744 = vmatprep.subr.bf16.mxu0 %v1661_v40  ;;  %787 = vmatprep.subr.bf16.mxu1 %v1663_v42  ;;  %v120_v40 = vld [vmem:[%s2522_s0 + $0x238] sm:$0xff]  ;;  %v1718_v42 = vcombine.low %v108_v31, %v112_v32 }
  0x34   :  { %v1727_v45 = vcombine.high %v116_v39, %v120_v40 }
  0x35   :  { %691 = vmatmul.mubr.bf16.vlgmr.msra.gmra.mrb[0].mxu0 %v2045_v46  ;;  %734 = vmatmul.mubr.bf16.vlgmr.msra.gmra.mrb[0].mxu1 %v2045_v46 }
  0x36   :  { %745 = vmatpush1.bf16.msra.mxu0 %v1660_v49  ;;  %788 = vmatpush1.bf16.msra.mxu1 %v1662_v50  ;;  %v124_v49 = vld [vmem:[%s2522_s0 + $0x258] sm:$0xff] }
  0x37   :  { %746 = vmatprep.subr.bf16.mxu0 %v1669_v51  ;;  %789 = vmatprep.subr.bf16.mxu1 %v1671_v52  ;;  %v128_v50 = vld [vmem:[%s2522_s0 + $0x278] sm:$0xff]  ;;  %v1724_v51 = vcombine.low %v115_v37, %v119_v38  ;;  %v1726_v52 = vcombine.low %v116_v39, %v120_v40 }
  0x38   :  { %1757 = vmatprep.mubr.msk.bf16.mxu0 %vm629_vm0, %v1942_v44  ;;  %1759 = vmatprep.mubr.msk.bf16.mxu1 %vm629_vm0, %v1942_v44  ;;  %v84_v44 = vld [vmem:[%s2522_s0 + $0x118] sm:$0xff]  ;;  %v1735_v54 = vcombine.high %v124_v49, %v128_v50 }
  0x39   :  { %v1695_v12 = vcombine.high %v84_v44, %v88_v8  ;;  %v1694_v18 = vcombine.low %v84_v44, %v88_v8  ;;  %v653_v8 = vsel %vm633_vm1, %v1750_v7, 0 }
  0x3a   :  { %747 = vmatpush1.bf16.msra.mxu0 %v1668_v57  ;;  %790 = vmatpush1.bf16.msra.mxu1 %v1670_v58  ;;  %v132_v57 = vld [vmem:[%s2522_s0 + $0x298] sm:$0xff] }
  0x3b   :  { %748 = vmatprep.subr.bf16.mxu0 %v1677_v59  ;;  %791 = vmatprep.subr.bf16.mxu1 %v1679_v60  ;;  %v136_v58 = vld [vmem:[%s2522_s0 + $0x2b8] sm:$0xff]  ;;  %v1732_v59 = vcombine.low %v123_v47, %v127_v48  ;;  %v1734_v60 = vcombine.low %v124_v49, %v128_v50 }
  0x3c   :  { %v1743_v62 = vcombine.high %v132_v57, %v136_v58 }
  0x3e   :  { %749 = vmatpush1.bf16.msra.mxu0 %v1676_v1  ;;  %792 = vmatpush1.bf16.msra.mxu1 %v1678_v2  ;;  %v1740_v1 = vcombine.low %v131_v55, %v135_v56  ;;  %v1742_v2 = vcombine.low %v132_v57, %v136_v58 }
  0x3f   :  { %750 = vmatprep.subr.bf16.mxu0 %v1685_v4  ;;  %793 = vmatprep.subr.bf16.mxu1 %v1687_v5  ;;  %v1749_v4 = vcombine.high %v139_v63, %v139_v63  ;;  %v1748_v5 = vcombine.low %v139_v63, %v139_v63 }
  0x41   :  { %v647_v44 = vsel %vm633_vm1, %v1748_v5, 0 }
  0x42   :  { %751 = vmatpush1.bf16.msra.mxu0 %v1684_v9  ;;  %794 = vmatpush1.bf16.msra.mxu1 %v1686_v10 }
  0x43   :  { %752 = vmatprep.subr.bf16.mxu0 %v1693_v11  ;;  %795 = vmatprep.subr.bf16.mxu1 %v1695_v12 }
  0x46   :  { %753 = vmatpush1.bf16.msra.mxu0 %v1692_v17  ;;  %796 = vmatpush1.bf16.msra.mxu1 %v1694_v18 }
  0x47   :  { %754 = vmatprep.subr.bf16.mxu0 %v1701_v19  ;;  %797 = vmatprep.subr.bf16.mxu1 %v1703_v20 }
  0x4a   :  { %755 = vmatpush1.bf16.msra.mxu0 %v1700_v25  ;;  %798 = vmatpush1.bf16.msra.mxu1 %v1702_v26 }
  0x4b   :  { %756 = vmatprep.subr.bf16.mxu0 %v1709_v27  ;;  %799 = vmatprep.subr.bf16.mxu1 %v1711_v28 }
  0x4e   :  { %757 = vmatpush1.bf16.msra.mxu0 %v1708_v33  ;;  %800 = vmatpush1.bf16.msra.mxu1 %v1710_v34 }
  0x4f   :  { %758 = vmatprep.subr.bf16.mxu0 %v1717_v35  ;;  %801 = vmatprep.subr.bf16.mxu1 %v1719_v36 }
  0x52   :  { %759 = vmatpush1.bf16.msra.mxu0 %v1716_v41  ;;  %802 = vmatpush1.bf16.msra.mxu1 %v1718_v42 }
  0x53   :  { %760 = vmatprep.subr.bf16.mxu0 %v1725_v43  ;;  %803 = vmatprep.subr.bf16.mxu1 %v1727_v45 }
  0x56   :  { %761 = vmatpush1.bf16.msra.mxu0 %v1724_v51  ;;  %804 = vmatpush1.bf16.msra.mxu1 %v1726_v52 }
  0x57   :  { %762 = vmatprep.subr.bf16.mxu0 %v1733_v53  ;;  %805 = vmatprep.subr.bf16.mxu1 %v1735_v54 }
  0x5a   :  { %763 = vmatpush1.bf16.msra.mxu0 %v1732_v59  ;;  %806 = vmatpush1.bf16.msra.mxu1 %v1734_v60 }
  0x5b   :  { %764 = vmatprep.subr.bf16.mxu0 %v1741_v61  ;;  %807 = vmatprep.subr.bf16.mxu1 %v1743_v62 }
  0x5e   :  { %765 = vmatpush1.bf16.msra.mxu0 %v1740_v1  ;;  %808 = vmatpush1.bf16.msra.mxu1 %v1742_v2 }
  0x5f   :  { %1756 = vmatprep.subr.msk.bf16.mxu0 %vm633_vm1, %v1749_v4  ;;  %1758 = vmatprep.subr.msk.bf16.mxu1 %vm633_vm1, %v1751_v6 }
  0x62   :  { %767 = vmatpush1.bf16.msra.mxu0 %v647_v44  ;;  %810 = vmatpush1.bf16.msra.mxu1 %v653_v8 }
  0x65   :  { %777 = vmatmul.mubr.bf16.vlgmr.msra.gmra.mrb[4].mxu0 %v2045_v46  ;;  %820 = vmatmul.mubr.bf16.vlgmr.msra.gmra.mrb[4].mxu1 %v2045_v46 }
  0x66   :  { %1082 = vmatprep.mubr.bf16.mxu0 %v1793_v3  ;;  %1125 = vmatprep.mubr.bf16.mxu1 %v1793_v3 }
  0x97   :  { %v153_v17 = vpop.permute.xlu0 %152 }
  0x9b   :  { %v158_v18 = vpop.permute.xlu0 %157 }
 0x108   :  { %v692_v9 = vpop.f32.mrb[0].mxu0  ;;  %v735_v11 = vpop.f32.mrb[0].mxu1 }
 0x109   :  { %v694_v10 = vpop.f32.mrb[1].mxu0  ;;  %v737_v13 = vpop.f32.mrb[1].mxu1  ;;  %v2181_v19 = vadd.f32 %v692_v9, %v153_v17  ;;  %v2191_v23 = vadd.f32 %v735_v11, %v153_v17 }
 0x10a   :  { %v696_v12 = vpop.f32.mrb[2].mxu0  ;;  %v739_v15 = vpop.f32.mrb[2].mxu1  ;;  %v2183_v20 = vadd.f32 %v694_v10, %v153_v17  ;;  %v2198_v27 = vadd.f32 %v737_v13, %v153_v17 }
 0x10b   :  { %v698_v14 = vpop.f32.mrb[3].mxu0  ;;  %v741_v16 = vpop.f32.mrb[3].mxu1  ;;  %v2185_v21 = vadd.f32 %v696_v12, %v158_v18  ;;  %v2195_v25 = vadd.f32 %v739_v15, %v158_v18 }
 0x10c   :  { %v2187_v46 = vadd.f32 %v698_v14, %v158_v18  ;;  %v830_v22 = vadd.f32 %v2183_v20, %v2181_v19  ;;  %v2202_v31 = vadd.f32 %v741_v16, %v158_v18 }
 0x10e   :  { %v839_v24 = vadd.f32 %v2187_v46, %v2185_v21  ;;  %v831_v26 = vadd.f32 %v830_v22, %v2191_v23 }
 0x110   :  { %v840_v28 = vadd.f32 %v839_v24, %v2195_v25  ;;  %v832_v30 = vadd.f32 %v831_v26, %v2198_v27 }
 0x112   :  { %v841_v38 = vadd.f32 %v840_v28, %v2202_v31 }
 0x138   :  { %v778_v29 = vpop.f32.mrb[4].mxu0  ;;  %v821_v33 = vpop.f32.mrb[4].mxu1 }
 0x139   :  { %v2204_v32 = vadd.f32 %v778_v29, %v153_v17  ;;  %v780_v34 = vpop.f32.mrb[5].mxu0  ;;  %v823_v36 = vpop.f32.mrb[5].mxu1  ;;  %v2214_v47 = vadd.f32 %v821_v33, %v153_v17 }
 0x13a   :  { %v2206_v35 = vadd.f32 %v780_v34, %v153_v17  ;;  %v782_v37 = vpop.f32.mrb[6].mxu0  ;;  %v825_v41 = vpop.f32.mrb[6].mxu1  ;;  %v2218_v50 = vadd.f32 %v823_v36, %v153_v17 }
 0x13b   :  { %v833_v39 = vadd.f32 %v832_v30, %v2204_v32  ;;  %v2210_v40 = vadd.f32 %v782_v37, %v158_v18  ;;  %v784_v42 = vpop.f32.mrb[7].mxu0  ;;  %v827_v45 = vpop.f32.mrb[7].mxu1  ;;  %v2220_v51 = vadd.f32 %v825_v41, %v158_v18 }
 0x13c   :  { %v2212_v43 = vadd.f32 %v784_v42, %v158_v18  ;;  %v2226_v56 = vadd.f32 %v827_v45, %v158_v18 }
 0x13d   :  { %v842_v48 = vadd.f32 %v841_v38, %v2210_v40  ;;  %v834_v49 = vadd.f32 %v833_v39, %v2206_v35 }
 0x13f   :  { %v843_v52 = vadd.f32 %v842_v48, %v2212_v43  ;;  %v835_v53 = vadd.f32 %v834_v49, %v2214_v47 }
 0x141   :  { %v836_v54 = vadd.f32 %v835_v53, %v2218_v50  ;;  %v844_v55 = vadd.f32 %v843_v52, %v2220_v51 }
 0x143   :  { %837 = vadd.xlane.f32.xlu1 %v836_v54  ;;  %v845_v57 = vadd.f32 %v844_v55, %v2226_v56 }
 0x147   :  { %846 = vadd.xlane.f32.xlu1 %v845_v57 }
 0x1d0   :  { %v838_v58 = vpop.xlane.xlu1 %837 }
 0x1d1   :  { %v2229_v59 = vmul.f32 0.0009765625, %v838_v58 }
 0x1d3   :  { %v851_v60 = vsub.f32 %v2181_v19, %v2229_v59  ;;  %v852_v61 = vsub.f32 %v2183_v20, %v2229_v59  ;;  %v853_v62 = vsub.f32 %v2191_v23, %v2229_v59  ;;  %v854_v1 = vsub.f32 %v2198_v27, %v2229_v59 }
 0x1d4   :  { %v847_v63 = vpop.xlane.xlu1 %846  ;;  %v855_v5 = vsub.f32 %v2204_v32, %v2229_v59  ;;  %v856_v10 = vsub.f32 %v2206_v35, %v2229_v59  ;;  %v857_v16 = vsub.f32 %v2214_v47, %v2229_v59  ;;  %v858_v28 = vsub.f32 %v2218_v50, %v2229_v59 }
 0x1d5   :  { %v2237_v0 = vmul.f32 0.0009765625, %v847_v63  ;;  %v867_v2 = vmul.f32 %v851_v60, %v851_v60  ;;  %v868_v4 = vmul.f32 %v852_v61, %v852_v61  ;;  %v869_v6 = vmul.f32 %v853_v62, %v853_v62  ;;  %v1024_v62 = vld [vmem:[%s2525_s7] sm:$0xff] }
 0x1d6   :  { %v870_v11 = vmul.f32 %v854_v1, %v854_v1  ;;  %v871_v17 = vmul.f32 %v855_v5, %v855_v5  ;;  %v872_v29 = vmul.f32 %v856_v10, %v856_v10  ;;  %v873_v37 = vmul.f32 %v857_v16, %v857_v16  ;;  %v148_v16 = vld [vmem:[%s2527_s4 + $0x8] sm:$0xff] }
 0x1d7   :  { %v883_v7 = vadd.f32 %v868_v4, %v867_v2  ;;  %v859_v44 = vsub.f32 %v2185_v21, %v2237_v0  ;;  %v860_v8 = vsub.f32 %v2187_v46, %v2237_v0  ;;  %v861_v9 = vsub.f32 %v2195_v25, %v2237_v0 }
 0x1d8   :  { %v862_v14 = vsub.f32 %v2202_v31, %v2237_v0  ;;  %v863_v22 = vsub.f32 %v2210_v40, %v2237_v0  ;;  %v864_v33 = vsub.f32 %v2212_v43, %v2237_v0  ;;  %v865_v39 = vsub.f32 %v2220_v51, %v2237_v0 }
 0x1d9   :  { %v884_v12 = vadd.f32 %v883_v7, %v869_v6  ;;  %v875_v13 = vmul.f32 %v859_v44, %v859_v44  ;;  %v876_v15 = vmul.f32 %v860_v8, %v860_v8  ;;  %v877_v24 = vmul.f32 %v861_v9, %v861_v9  ;;  %v145_v7 = vld [vmem:[%s2526_s3] sm:$0xff]  ;;  %v146_v9 = vld [vmem:[%s2526_s3 + $0x8] sm:$0xff] }
 0x1da   :  { %v878_v34 = vmul.f32 %v862_v14, %v862_v14  ;;  %v879_v41 = vmul.f32 %v863_v22, %v863_v22  ;;  %v874_v45 = vmul.f32 %v858_v28, %v858_v28  ;;  %v866_v49 = vsub.f32 %v2226_v56, %v2237_v0 }
 0x1db   :  { %v885_v18 = vadd.f32 %v884_v12, %v870_v11  ;;  %v892_v26 = vadd.f32 %v876_v15, %v875_v13  ;;  %v880_v52 = vmul.f32 %v864_v33, %v864_v33  ;;  %v881_v55 = vmul.f32 %v865_v39, %v865_v39  ;;  %v147_v13 = vld [vmem:[%s2527_s4] sm:$0xff] }
 0x1dc   :  { %v882_v58 = vmul.f32 %v866_v49, %v866_v49 }
 0x1dd   :  { %v886_v30 = vadd.f32 %v885_v18, %v871_v17  ;;  %v893_v36 = vadd.f32 %v892_v26, %v877_v24  ;;  %v1025_v18 = vld [vmem:[%s2525_s7 + $0x8] sm:$0xff]  ;;  %v2288_v24 = vstv %s2529_s5 }
 0x1df   :  { %v887_v38 = vadd.f32 %v886_v30, %v872_v29  ;;  %v894_v42 = vadd.f32 %v893_v36, %v878_v34 }
 0x1e1   :  { %v888_v48 = vadd.f32 %v887_v38, %v873_v37  ;;  %v895_v53 = vadd.f32 %v894_v42, %v879_v41 }
 0x1e3   :  { %v889_v54 = vadd.f32 %v888_v48, %v874_v45  ;;  %v896_v57 = vadd.f32 %v895_v53, %v880_v52 }
 0x1e5   :  { %890 = vadd.xlane.f32.xlu0 %v889_v54  ;;  %v897_v60 = vadd.f32 %v896_v57, %v881_v55 }
 0x1e7   :  { %v898_v61 = vadd.f32 %v897_v60, %v882_v58 }
 0x1e9   :  { %899 = vadd.xlane.f32.xlu1 %v898_v61 }
 0x1fb   :  { %1033 = vperm.xlu0 %1771, %v1024_v62  }
 0x272   :  { %v891_v63 = vpop.xlane.xlu0 %890 }
 0x273   :  { %v901_v1 = vmul.f32 0.0009765625, %v891_v63 }
 0x275   :  { %v903_v2 = vadd.f32 1e-05, %v901_v1 }
 0x276   :  { %v900_v4 = vpop.xlane.xlu1 %899 }
 0x277   :  { %1785 = vrsqrt.f32 %v903_v2  ;;  %v902_v5 = vmul.f32 0.0009765625, %v900_v4 }
 0x279   :  { %v904_v6 = vadd.f32 1e-05, %v902_v5 }
 0x27b   :  { %1787 = vrsqrt.f32 %v904_v6 }
 0x281   :  { %v1786_v44 = vpop.eup %1785 }
 0x282   :  { %v907_v8 = vmul.f32 %v1786_v44, %v145_v7 }
 0x284   :  { %911 = vperm.xlu1 %1772, %v907_v8   ;;  %v935_v12 = vmul.f32 %v907_v8, %v2229_v59 }
 0x285   :  { %v1788_v10 = vpop.eup %1787 }
 0x286   :  { %v908_v11 = vmul.f32 %v1788_v10, %v146_v9  ;;  %v937_v14 = vsub.f32 %v147_v13, %v935_v12 }
 0x288   :  { %916 = vperm.xlu1 %1772, %v908_v11   ;;  %v936_v15 = vmul.f32 %v908_v11, %v2237_v0 }
 0x28a   :  { %v938_v17 = vsub.f32 %v148_v16, %v936_v15 }
 0x28c   :  { %941 = vperm.xlu1 %1772, %v937_v14   ;;  %v1784_v14 = vld [vmem:[%s2528_s6] sm:$0xff]  }
 0x290   :  { %946 = vperm.xlu1 %1772, %v938_v17  }
 0x294   :  { %1038 = vperm.xlu1 %1772, %v1025_v18  }
 0x303   :  { %v912_v59 = vpop.permute.xlu1 %911 }
 0x304   :  { %v920_v0 = vmul.f32 %v912_v59, %v2183_v20  ;;  %v922_v26 = vmul.f32 %v912_v59, %v2198_v27  ;;  %v919_v28 = vmul.f32 %v912_v59, %v2181_v19  ;;  %v921_v29 = vmul.f32 %v912_v59, %v2191_v23 }
 0x305   :  { %v924_v30 = vmul.f32 %v912_v59, %v2206_v35  ;;  %v926_v33 = vmul.f32 %v912_v59, %v2218_v50  ;;  %v923_v34 = vmul.f32 %v912_v59, %v2204_v32  ;;  %v925_v36 = vmul.f32 %v912_v59, %v2214_v47 }
 0x307   :  { %v917_v22 = vpop.permute.xlu1 %916 }
 0x308   :  { %v928_v37 = vmul.f32 %v917_v22, %v2187_v46  ;;  %v930_v38 = vmul.f32 %v917_v22, %v2202_v31  ;;  %v927_v20 = vmul.f32 %v917_v22, %v2185_v21  ;;  %v929_v27 = vmul.f32 %v917_v22, %v2195_v25 }
 0x309   :  { %v932_v19 = vmul.f32 %v917_v22, %v2212_v43  ;;  %v934_v23 = vmul.f32 %v917_v22, %v2226_v56  ;;  %v931_v35 = vmul.f32 %v917_v22, %v2210_v40  ;;  %v2306_v50 = vmul.f32 %v917_v22, %v2220_v51 }
 0x30b   :  { %v942_v39 = vpop.permute.xlu1 %941 }
 0x30c   :  { %v950_v32 = vadd.f32 %v942_v39, %v920_v0  ;;  %v952_v47 = vadd.f32 %v942_v39, %v922_v26  ;;  %v949_v41 = vadd.f32 %v942_v39, %v919_v28  ;;  %v951_v46 = vadd.f32 %v942_v39, %v921_v29 }
 0x30d   :  { %v954_v42 = vadd.f32 %v942_v39, %v924_v30  ;;  %v956_v31 = vadd.f32 %v942_v39, %v926_v33  ;;  %v2308_v45 = vadd.f32 %v942_v39, %v923_v34  ;;  %v2310_v21 = vadd.f32 %v942_v39, %v925_v36 }
 0x30e   :  { %vm966_vm2 = vcmp.gt.f32.partialorder %v950_v32, 0.0  ;;  %v983_v25 = vmul.f32 %v2288_v24, %v950_v32  ;;  %vm968_vm3 = vcmp.gt.f32.partialorder %v952_v47, 0.0  ;;  %v985_v43 = vmul.f32 %v2288_v24, %v952_v47 }
 0x30f   :  { %v947_v40 = vpop.permute.xlu1 %946  ;;  %vm965_vm4 = vcmp.gt.f32.partialorder %v949_v41, 0.0  ;;  %v982_v51 = vmul.f32 %v2288_v24, %v949_v41  ;;  %vm967_vm5 = vcmp.gt.f32.partialorder %v951_v46, 0.0  ;;  %v984_v56 = vmul.f32 %v2288_v24, %v951_v46 }
 0x310   :  { %v958_v48 = vadd.f32 %v947_v40, %v928_v37  ;;  %v999_v49 = vsel %vm966_vm2, %v950_v32, %v983_v25  ;;  %v960_v52 = vadd.f32 %v947_v40, %v930_v38  ;;  %v1001_v53 = vsel %vm968_vm3, %v952_v47, %v985_v43 }
 0x311   :  { %v957_v54 = vadd.f32 %v947_v40, %v927_v20  ;;  %v998_v55 = vsel %vm965_vm4, %v949_v41, %v982_v51  ;;  %v959_v57 = vadd.f32 %v947_v40, %v929_v27  ;;  %v1000_v58 = vsel %vm967_vm5, %v951_v46, %v984_v56 }
 0x312   :  { %vm974_vm6 = vcmp.gt.f32.partialorder %v958_v48, 0.0  ;;  %v991_v60 = vmul.f32 %v2288_v24, %v958_v48  ;;  %vm976_vm7 = vcmp.gt.f32.partialorder %v960_v52, 0.0  ;;  %v993_v61 = vmul.f32 %v2288_v24, %v960_v52 }
 0x313   :  { %vm973_vm8 = vcmp.gt.f32.partialorder %v957_v54, 0.0  ;;  %v990_v62 = vmul.f32 %v2288_v24, %v957_v54  ;;  %vm975_vm9 = vcmp.gt.f32.partialorder %v959_v57, 0.0  ;;  %v992_v63 = vmul.f32 %v2288_v24, %v959_v57 }
 0x314   :  { %v1007_v1 = vsel %vm974_vm6, %v958_v48, %v991_v60  ;;  %v1009_v2 = vsel %vm976_vm7, %v960_v52, %v993_v61  ;;  %v962_v4 = vadd.f32 %v947_v40, %v932_v19  ;;  %vm970_vm10 = vcmp.gt.f32.partialorder %v954_v42, 0.0  ;;  %v1034_v19 = vpop.permute.xlu0 %1033 }
 0x315   :  { %v1015_v5 = vpack.c.bf16 %v1007_v1, %v999_v49  ;;  %v1017_v6 = vpack.c.bf16 %v1009_v2, %v1001_v53  ;;  %v1006_v7 = vsel %vm973_vm8, %v957_v54, %v990_v62  ;;  %v1008_v44 = vsel %vm975_vm9, %v959_v57, %v992_v63 }
 0x316   :  { %v1014_v8 = vpack.c.bf16 %v1006_v7, %v998_v55  ;;  %v1016_v9 = vpack.c.bf16 %v1008_v44, %v1000_v58  ;;  %vm978_vm11 = vcmp.gt.f32.partialorder %v962_v4, 0.0  ;;  %v987_v10 = vmul.f32 %v2288_v24, %v954_v42 }
 0x317   :  { %1050 = vmatprep.subr.bf16.mxu0 %v1015_v5  ;;  %1093 = vmatprep.subr.bf16.mxu1 %v1017_v6  ;;  %v995_v11 = vmul.f32 %v2288_v24, %v962_v4  ;;  %v964_v12 = vadd.f32 %v947_v40, %v934_v23  ;;  %vm972_vm12 = vcmp.gt.f32.partialorder %v956_v31, 0.0  ;;  %v989_v13 = vmul.f32 %v2288_v24, %v956_v31  ;;  %v1039_v23 = vpop.permute.xlu1 %1038 }
 0x318   :  { %1051 = vmatpush1.bf16.msra.mxu0 %v1014_v8  ;;  %1094 = vmatpush1.bf16.msra.mxu1 %v1016_v9  ;;  %v1003_v15 = vsel %vm970_vm10, %v954_v42, %v987_v10  ;;  %v961_v16 = vadd.f32 %v947_v40, %v931_v35  ;;  %v986_v17 = vmul.f32 %v2288_v24, %v2308_v45  ;;  %vm969_vm15 = vcmp.gt.f32.partialorder %v2308_v45, 0.0 }
 0x319   :  { %v1011_v18 = vsel %vm978_vm11, %v962_v4, %v995_v11  ;;  %vm980_vm14 = vcmp.gt.f32.partialorder %v964_v12, 0.0  ;;  %v997_v59 = vmul.f32 %v2288_v24, %v964_v12  ;;  %v1005_v0 = vsel %vm972_vm12, %v956_v31, %v989_v13 }
 0x31a   :  { %v1019_v22 = vpack.c.bf16 %v1011_v18, %v1003_v15  ;;  %vm977_vm0 = vcmp.gt.f32.partialorder %v961_v16, 0.0  ;;  %v994_v26 = vmul.f32 %v2288_v24, %v961_v16  ;;  %v963_v29 = vadd.f32 %v947_v40, %v2306_v50 }
 0x31b   :  { %v1013_v28 = vsel %vm980_vm14, %v964_v12, %v997_v59  ;;  %1761 = vmatmul.mubr.msk.bf16.vlgmr.msra.gmra.mrb[8].mxu0 %vm1046_vm13, %v1784_v14  ;;  %1762 = vmatmul.mubr.msk.bf16.vlgmr.msra.gmra.mrb[8].mxu1 %vm1046_vm13, %v1784_v14  ;;  %v988_v30 = vmul.f32 %v2288_v24, %v2310_v21  ;;  %v1002_v34 = vsel %vm969_vm15, %v2308_v45, %v986_v17  ;;  %vm971_vm1 = vcmp.gt.f32.partialorder %v2310_v21, 0.0 }
 0x31c   :  { %1136 = vmatprep.subr.bf16.mxu0 %v1019_v22  ;;  %v1021_v33 = vpack.c.bf16 %v1013_v28, %v1005_v0  ;;  %v1010_v36 = vsel %vm977_vm0, %v961_v16, %v994_v26  ;;  %1168 = vmatprep.mubr.bf16.mxu0 %v1793_v3  ;;  %vm979_vm2 = vcmp.gt.f32.partialorder %v963_v29, 0.0  ;;  %v996_v38 = vmul.f32 %v2288_v24, %v963_v29 }
 0x31d   :  { %v1018_v37 = vpack.c.bf16 %v1010_v36, %v1002_v34  ;;  %1211 = vmatprep.mubr.bf16.mxu1 %v1793_v3  ;;  %v1004_v20 = vsel %vm971_vm1, %v2310_v21, %v988_v30 }
 0x31e   :  { %1179 = vmatprep.subr.bf16.mxu1 %v1021_v33  ;;  %v1012_v27 = vsel %vm979_vm2, %v963_v29, %v996_v38 }
 0x31f   :  { %1137 = vmatpush1.bf16.msra.mxu0 %v1018_v37  ;;  %v1020_v39 = vpack.c.bf16 %v1012_v27, %v1004_v20 }
 0x321   :  { %1180 = vmatpush1.bf16.msra.mxu1 %v1020_v39 }
 0x323   :  { %1763 = vmatmul.mubr.msk.bf16.vlgmr.msra.gmra.mrb[12].mxu0 %vm1046_vm13, %v1784_v14 }
 0x324   :  { %1459 = vmatprep.mubr.bf16.mxu0 %v1793_v3  ;;  %1764 = vmatmul.mubr.msk.bf16.vlgmr.msra.gmra.mrb[12].mxu1 %vm1046_vm13, %v1784_v14 }
 0x325   :  { %1500 = vmatprep.mubr.bf16.mxu1 %v1793_v3 }
 0x3ee   :  { %v1084_v24 = vpop.f32.mrb[8].mxu0  ;;  %v1127_v35 = vpop.f32.mrb[8].mxu1 }
 0x3ef   :  { %v2347_v50 = vadd.f32 %v1084_v24, %v1034_v19  ;;  %v1086_v32 = vpop.f32.mrb[9].mxu0  ;;  %v1129_v47 = vpop.f32.mrb[9].mxu1  ;;  %v2353_v25 = vadd.f32 %v1127_v35, %v1034_v19 }
 0x3f0   :  { %v2349_v41 = vadd.f32 %v1086_v32, %v1034_v19  ;;  %v1088_v46 = vpop.f32.mrb[10].mxu0  ;;  %v1131_v42 = vpop.f32.mrb[10].mxu1  ;;  %v2359_v51 = vadd.f32 %v1129_v47, %v1034_v19 }
 0x3f1   :  { %v2351_v31 = vadd.f32 %v1088_v46, %v1039_v23  ;;  %v1090_v45 = vpop.f32.mrb[11].mxu0  ;;  %v1133_v21 = vpop.f32.mrb[11].mxu1  ;;  %v2362_v48 = vadd.f32 %v1131_v42, %v1039_v23 }
 0x3f2   :  { %v1222_v43 = vadd.f32 %v2349_v41, %v2347_v50  ;;  %v2357_v40 = vadd.f32 %v1090_v45, %v1039_v23  ;;  %v2367_v53 = vadd.f32 %v1133_v21, %v1039_v23 }
 0x3f4   :  { %v1223_v56 = vadd.f32 %v1222_v43, %v2353_v25  ;;  %v1231_v49 = vadd.f32 %v2357_v40, %v2351_v31 }
 0x3f6   :  { %v1224_v52 = vadd.f32 %v1223_v56, %v2359_v51  ;;  %v1232_v54 = vadd.f32 %v1231_v49, %v2362_v48  ;;  %v1170_v55 = vpop.f32.mrb[12].mxu0 }
 0x3f7   :  { %v2370_v57 = vadd.f32 %v1170_v55, %v1034_v19  ;;  %v1172_v58 = vpop.f32.mrb[13].mxu0  ;;  %v1213_v61 = vpop.f32.mrb[12].mxu1 }
 0x3f8   :  { %v1233_v60 = vadd.f32 %v1232_v54, %v2367_v53  ;;  %v2373_v62 = vadd.f32 %v1172_v58, %v1034_v19  ;;  %v1174_v63 = vpop.f32.mrb[14].mxu0  ;;  %v1215_v2 = vpop.f32.mrb[13].mxu1  ;;  %v2380_v44 = vadd.f32 %v1213_v61, %v1034_v19 }
 0x3f9   :  { %v1225_v1 = vadd.f32 %v1224_v52, %v2370_v57  ;;  %v2376_v4 = vadd.f32 %v1174_v63, %v1039_v23  ;;  %v1176_v5 = vpop.f32.mrb[15].mxu0  ;;  %v1217_v6 = vpop.f32.mrb[14].mxu1  ;;  %v2384_v11 = vadd.f32 %v1215_v2, %v1034_v19 }
 0x3fa   :  { %v2378_v7 = vadd.f32 %v1176_v5, %v1039_v23  ;;  %v1219_v10 = vpop.f32.mrb[15].mxu1  ;;  %v2386_v12 = vadd.f32 %v1217_v6, %v1039_v23 }
 0x3fb   :  { %v1226_v8 = vadd.f32 %v1225_v1, %v2373_v62  ;;  %v1234_v9 = vadd.f32 %v1233_v60, %v2376_v4  ;;  %v2390_v15 = vadd.f32 %v1219_v10, %v1039_v23 }
 0x3fd   :  { %v1235_v13 = vadd.f32 %v1234_v9, %v2378_v7  ;;  %v1227_v14 = vadd.f32 %v1226_v8, %v2380_v44 }
 0x3ff   :  { %v1228_v16 = vadd.f32 %v1227_v14, %v2384_v11  ;;  %v1236_v17 = vadd.f32 %v1235_v13, %v2386_v12 }
 0x401   :  { %1229 = vadd.xlane.f32.xlu1 %v1228_v16  ;;  %v1237_v18 = vadd.f32 %v1236_v17, %v2390_v15 }
 0x403   :  { %1238 = vadd.xlane.f32.xlu0 %v1237_v18 }
 0x48e   :  { %v1230_v59 = vpop.xlane.xlu1 %1229 }
 0x48f   :  { %v2395_v22 = vmul.f32 0.0009765625, %v1230_v59 }
 0x490   :  { %v1239_v0 = vpop.xlane.xlu0 %1238 }
 0x491   :  { %v2397_v26 = vmul.f32 0.0009765625, %v1239_v0  ;;  %v1242_v28 = vsub.f32 %v2347_v50, %v2395_v22  ;;  %v1243_v29 = vsub.f32 %v2349_v41, %v2395_v22  ;;  %v1244_v30 = vsub.f32 %v2353_v25, %v2395_v22 }
 0x492   :  { %v1245_v33 = vsub.f32 %v2359_v51, %v2395_v22  ;;  %v1246_v37 = vsub.f32 %v2370_v57, %v2395_v22  ;;  %v1247_v23 = vsub.f32 %v2373_v62, %v2395_v22  ;;  %v1248_v42 = vsub.f32 %v2380_v44, %v2395_v22 }
 0x493   :  { %v1258_v34 = vmul.f32 %v1242_v28, %v1242_v28  ;;  %v1259_v36 = vmul.f32 %v1243_v29, %v1243_v29  ;;  %v1260_v38 = vmul.f32 %v1244_v30, %v1244_v30  ;;  %v1250_v27 = vsub.f32 %v2351_v31, %v2397_v26 }
 0x494   :  { %v1251_v39 = vsub.f32 %v2357_v40, %v2397_v26  ;;  %v1252_v19 = vsub.f32 %v2362_v48, %v2397_v26  ;;  %v1261_v24 = vmul.f32 %v1245_v33, %v1245_v33  ;;  %v1253_v47 = vsub.f32 %v2367_v53, %v2397_v26 }
 0x495   :  { %v1274_v20 = vadd.f32 %v1259_v36, %v1258_v34  ;;  %v1266_v32 = vmul.f32 %v1250_v27, %v1250_v27  ;;  %v1262_v45 = vmul.f32 %v1246_v37, %v1246_v37  ;;  %v1254_v43 = vsub.f32 %v2376_v4, %v2397_v26 }
 0x496   :  { %v1267_v46 = vmul.f32 %v1251_v39, %v1251_v39  ;;  %v1268_v56 = vmul.f32 %v1252_v19, %v1252_v19  ;;  %v1249_v52 = vsub.f32 %v2384_v11, %v2395_v22  ;;  %v1263_v54 = vmul.f32 %v1247_v23, %v1247_v23  ;;  %v1028_v19 = vld [vmem:[%s2532_s9] sm:$0xff] }
 0x497   :  { %v1275_v35 = vadd.f32 %v1274_v20, %v1260_v38  ;;  %v1255_v58 = vsub.f32 %v2378_v7, %v2397_v26  ;;  %v1269_v60 = vmul.f32 %v1253_v47, %v1253_v47  ;;  %v1264_v63 = vmul.f32 %v1248_v42, %v1248_v42  ;;  %v1026_v20 = vld [vmem:[%s2531_s8] sm:$0xff] }
 0x498   :  { %v1283_v49 = vadd.f32 %v1267_v46, %v1266_v32  ;;  %v1256_v2 = vsub.f32 %v2386_v12, %v2397_v26  ;;  %v1270_v5 = vmul.f32 %v1254_v43, %v1254_v43  ;;  %v1265_v8 = vmul.f32 %v1249_v52, %v1249_v52  ;;  %v1029_v46 = vld [vmem:[%s2532_s9 + $0x8] sm:$0xff] }
 0x499   :  { %v1276_v21 = vadd.f32 %v1275_v35, %v1261_v24  ;;  %v1257_v10 = vsub.f32 %v2390_v15, %v2397_v26  ;;  %v1271_v13 = vmul.f32 %v1255_v58, %v1255_v58  ;;  %v20_v29 = vstv %s2530_s12  ;;  %v1027_v24 = vld [vmem:[%s2531_s8 + $0x8] sm:$0xff] }
 0x49a   :  { %v1284_v61 = vadd.f32 %v1283_v49, %v1268_v56  ;;  %v1272_v17 = vmul.f32 %v1256_v2, %v1256_v2  ;;  %21 = vst [vmem:[#allocation4] sm:$0x1] %v20_v29 }
 0x49b   :  { %v1277_v55 = vadd.f32 %v1276_v21, %v1262_v45  ;;  %v1273_v59 = vmul.f32 %v1257_v10, %v1257_v10 }
 0x49c   :  { %v1285_v6 = vadd.f32 %v1284_v61, %v1269_v60 }
 0x49d   :  { %v1278_v1 = vadd.f32 %v1277_v55, %v1263_v54  ;;  %v2457_v55 = vstv %s2533_s10 }
 0x49e   :  { %v1286_v14 = vadd.f32 %v1285_v6, %v1270_v5 }
 0x49f   :  { %v1279_v9 = vadd.f32 %v1278_v1, %v1264_v63 }
 0x4a0   :  { %v1287_v18 = vadd.f32 %v1286_v14, %v1271_v13 }
 0x4a1   :  { %v1280_v16 = vadd.f32 %v1279_v9, %v1265_v8  ;;  %v1414_v45 = vld [vmem:[#allocation4] sm:$0x1] }
 0x4a2   :  { %v1288_v0 = vadd.f32 %v1287_v18, %v1272_v17 }
 0x4a3   :  { %1281 = vadd.xlane.f32.xlu1 %v1280_v16 }
 0x4a4   :  { %v1289_v28 = vadd.f32 %v1288_v0, %v1273_v59 }
 0x4a7   :  { %1290 = vadd.xlane.f32.xlu1 %v1289_v28 }
 0x530   :  { %v1282_v30 = vpop.xlane.xlu1 %1281 }
 0x531   :  { %v1292_v33 = vmul.f32 0.0009765625, %v1282_v30 }
 0x533   :  { %v1294_v34 = vadd.f32 1e-05, %v1292_v33 }
 0x534   :  { %v1291_v36 = vpop.xlane.xlu1 %1290 }
 0x535   :  { %1789 = vrsqrt.f32 %v1294_v34  ;;  %v1293_v37 = vmul.f32 0.0009765625, %v1291_v36 }
 0x537   :  { %v1295_v38 = vadd.f32 1e-05, %v1293_v37 }
 0x539   :  { %1791 = vrsqrt.f32 %v1295_v38 }
 0x53f   :  { %v1790_v27 = vpop.eup %1789 }
 0x540   :  { %v1298_v39 = vmul.f32 %v1790_v27, %v1026_v20 }
 0x542   :  { %1302 = vperm.xlu1 %1772, %v1298_v39   ;;  %v1326_v23 = vmul.f32 %v1298_v39, %v2395_v22 }
 0x543   :  { %v1792_v35 = vpop.eup %1791 }
 0x544   :  { %v1328_v32 = vsub.f32 %v1028_v19, %v1326_v23  ;;  %v1299_v47 = vmul.f32 %v1792_v35, %v1027_v24 }
 0x546   :  { %1332 = vperm.xlu1 %1772, %v1328_v32   ;;  %1307 = vperm.xlu0 %1771, %v1299_v47   ;;  %v1327_v42 = vmul.f32 %v1299_v47, %v2397_v26  ;;  %v1405_v47 = vld [vmem:[%s2534_s11] sm:$0x1] }
 0x548   :  { %v1329_v21 = vsub.f32 %v1029_v46, %v1327_v42 }
 0x54a   :  { %1417 = vperm.xlu0 %1771, %v1414_v45   ;;  %1337 = vperm.xlu1 %1772, %v1329_v21  }
 0x5c1   :  { %v1303_v22 = vpop.permute.xlu1 %1302 }
 0x5c2   :  { %v1311_v43 = vmul.f32 %v1303_v22, %v2349_v41  ;;  %v1313_v56 = vmul.f32 %v1303_v22, %v2359_v51  ;;  %v1310_v49 = vmul.f32 %v1303_v22, %v2347_v50  ;;  %v1312_v52 = vmul.f32 %v1303_v22, %v2353_v25 }
 0x5c3   :  { %v1315_v26 = vmul.f32 %v1303_v22, %v2373_v62  ;;  %v1317_v58 = vmul.f32 %v1303_v22, %v2384_v11  ;;  %v1314_v60 = vmul.f32 %v1303_v22, %v2370_v57  ;;  %v2475_v57 = vmul.f32 %v1303_v22, %v2380_v44 }
 0x5c5   :  { %v2452_v54 = vpop.permute.xlu1 %1332  ;;  %v2462_v41 = vpop.permute.xlu0 %1307 }
 0x5c6   :  { %v1341_v51 = vadd.f32 %v2452_v54, %v1311_v43  ;;  %v1343_v50 = vadd.f32 %v2452_v54, %v1313_v56  ;;  %v1340_v25 = vadd.f32 %v2452_v54, %v1310_v49  ;;  %v1342_v61 = vadd.f32 %v2452_v54, %v1312_v52 }
 0x5c7   :  { %v1319_v63 = vmul.f32 %v2462_v41, %v2357_v40  ;;  %v1321_v62 = vmul.f32 %v2462_v41, %v2367_v53  ;;  %v1318_v11 = vmul.f32 %v2462_v41, %v2351_v31  ;;  %v1320_v31 = vmul.f32 %v2462_v41, %v2362_v48 }
 0x5c8   :  { %vm1357_vm3 = vcmp.gt.f32.partialorder %v1341_v51, 0.0  ;;  %v1374_v1 = vmul.f32 %v2457_v55, %v1341_v51  ;;  %vm1359_vm4 = vcmp.gt.f32.partialorder %v1343_v50, 0.0  ;;  %v1376_v2 = vmul.f32 %v2457_v55, %v1343_v50 }
 0x5c9   :  { %vm1356_vm5 = vcmp.gt.f32.partialorder %v1340_v25, 0.0  ;;  %v1373_v5 = vmul.f32 %v2457_v55, %v1340_v25  ;;  %vm1358_vm6 = vcmp.gt.f32.partialorder %v1342_v61, 0.0  ;;  %v1375_v40 = vmul.f32 %v2457_v55, %v1342_v61  ;;  %v1338_v6 = vpop.permute.xlu1 %1337 }
 0x5ca   :  { %v1390_v53 = vsel %vm1357_vm3, %v1341_v51, %v1374_v1  ;;  %v1392_v8 = vsel %vm1359_vm4, %v1343_v50, %v1376_v2  ;;  %v1323_v44 = vmul.f32 %v2462_v41, %v2378_v7  ;;  %v1349_v9 = vadd.f32 %v1338_v6, %v1319_v63  ;;  %v1418_v2 = vpop.permute.xlu0 %1417 }
 0x5cb   :  { %v1351_v10 = vadd.f32 %v1338_v6, %v1321_v62  ;;  %v1348_v13 = vadd.f32 %v1338_v6, %v1318_v11  ;;  %v1345_v14 = vadd.f32 %v2452_v54, %v1315_v26  ;;  %v1389_v16 = vsel %vm1356_vm5, %v1340_v25, %v1373_v5 }
 0x5cc   :  { %v1350_v17 = vadd.f32 %v1338_v6, %v1320_v31  ;;  %v1391_v18 = vsel %vm1358_vm6, %v1342_v61, %v1375_v40  ;;  %v1353_v59 = vadd.f32 %v1338_v6, %v1323_v44  ;;  %vm1365_vm7 = vcmp.gt.f32.partialorder %v1349_v9, 0.0 }
 0x5cd   :  { %v1382_v0 = vmul.f32 %v2457_v55, %v1349_v9  ;;  %vm1367_vm8 = vcmp.gt.f32.partialorder %v1351_v10, 0.0  ;;  %v1384_v28 = vmul.f32 %v2457_v55, %v1351_v10  ;;  %vm1364_vm9 = vcmp.gt.f32.partialorder %v1348_v13, 0.0 }
 0x5ce   :  { %v1381_v48 = vmul.f32 %v2457_v55, %v1348_v13  ;;  %vm1366_vm10 = vcmp.gt.f32.partialorder %v1350_v17, 0.0  ;;  %v1383_v7 = vmul.f32 %v2457_v55, %v1350_v17  ;;  %vm1361_vm11 = vcmp.gt.f32.partialorder %v1345_v14, 0.0 }
 0x5cf   :  { %v1398_v29 = vsel %vm1365_vm7, %v1349_v9, %v1382_v0  ;;  %v1400_v30 = vsel %vm1367_vm8, %v1351_v10, %v1384_v28  ;;  %vm1369_vm12 = vcmp.gt.f32.partialorder %v1353_v59, 0.0  ;;  %v1378_v27 = vmul.f32 %v2457_v55, %v1345_v14 }
 0x5d0   :  { %v1407_v33 = vpack.c.bf16 %v1398_v29, %v1390_v53  ;;  %v1409_v34 = vpack.c.bf16 %v1400_v30, %v1392_v8  ;;  %v1397_v36 = vsel %vm1364_vm9, %v1348_v13, %v1381_v48  ;;  %v1399_v37 = vsel %vm1366_vm10, %v1350_v17, %v1383_v7 }
 0x5d1   :  { %v1406_v38 = vpack.c.bf16 %v1397_v36, %v1389_v16  ;;  %v1408_v20 = vpack.c.bf16 %v1399_v37, %v1391_v18  ;;  %v1386_v39 = vmul.f32 %v2457_v55, %v1353_v59  ;;  %v1325_v19 = vmul.f32 %v2462_v41, %v2390_v15 }
 0x5d2   :  { %1427 = vmatprep.subr.bf16.mxu0 %v1407_v33  ;;  %1468 = vmatprep.subr.bf16.mxu1 %v1409_v34  ;;  %v1347_v23 = vadd.f32 %v2452_v54, %v1317_v58  ;;  %v1322_v24 = vmul.f32 %v2462_v41, %v2376_v4  ;;  %v1394_v35 = vsel %vm1361_vm11, %v1345_v14, %v1378_v27  ;;  %v1420_v62 = vlaneseq }
 0x5d3   :  { %1428 = vmatpush1.bf16.msra.mxu0 %v1406_v38  ;;  %1469 = vmatpush1.bf16.msra.mxu1 %v1408_v20  ;;  %v1402_v32 = vsel %vm1369_vm12, %v1353_v59, %v1386_v39  ;;  %v1344_v46 = vadd.f32 %v2452_v54, %v1314_v60  ;;  %v1355_v45 = vadd.f32 %v1338_v6, %v1325_v19 }
 0x5d4   :  { %v1411_v42 = vpack.c.bf16 %v1402_v32, %v1394_v35  ;;  %vm1363_vm14 = vcmp.gt.f32.partialorder %v1347_v23, 0.0  ;;  %v1380_v15 = vmul.f32 %v2457_v55, %v1347_v23  ;;  %v1352_v21 = vadd.f32 %v1338_v6, %v1322_v24 }
 0x5d5   :  { %vm1360_vm15 = vcmp.gt.f32.partialorder %v1344_v46, 0.0  ;;  %v1377_v4 = vmul.f32 %v2457_v55, %v1344_v46  ;;  %v1324_v22 = vmul.f32 %v2462_v41, %v2386_v12  ;;  %vm1371_vm0 = vcmp.gt.f32.partialorder %v1355_v45, 0.0 }
 0x5d6   :  { %1509 = vmatprep.subr.bf16.mxu0 %v1411_v42  ;;  %v1388_v43 = vmul.f32 %v2457_v55, %v1355_v45  ;;  %1765 = vmatmul.mubr.msk.bf16.vlgmr.msra.gmra.mrb[16].mxu0 %vm1046_vm13, %v1405_v47  ;;  %v1346_v56 = vadd.f32 %v2452_v54, %v2475_v57  ;;  %v1396_v49 = vsel %vm1363_vm14, %v1347_v23, %v1380_v15  ;;  %vm1368_vm1 = vcmp.gt.f32.partialorder %v1352_v21, 0.0 }
 0x5d7   :  { %1766 = vmatmul.mubr.msk.bf16.vlgmr.msra.gmra.mrb[16].mxu1 %vm1046_vm13, %v1405_v47  ;;  %v1385_v52 = vmul.f32 %v2457_v55, %v1352_v21  ;;  %v1354_v26 = vadd.f32 %v1338_v6, %v1324_v22  ;;  %1541 = vmatprep.mubr.bf16.mxu0 %v1793_v3  ;;  %v1393_v12 = vsel %vm1360_vm15, %v1344_v46, %v1377_v4  ;;  %v1421_v11 = vshrl.u32 %v1420_v62, 7 }
 0x5d8   :  { %v1404_v58 = vsel %vm1371_vm0, %v1355_v45, %v1388_v43  ;;  %vm1362_vm2 = vcmp.gt.f32.partialorder %v1346_v56, 0.0  ;;  %v1379_v60 = vmul.f32 %v2457_v55, %v1346_v56  ;;  %1582 = vmatprep.mubr.bf16.mxu1 %v1793_v3  ;;  %v1794_v57 = vmov 1966171168  }
 0x5d9   :  { %v1413_v41 = vpack.c.bf16 %v1404_v58, %v1396_v49  ;;  %v1401_v51 = vsel %vm1368_vm1, %v1352_v21, %v1385_v52  ;;  %vm1370_vm3 = vcmp.gt.f32.partialorder %v1354_v26, 0.0  ;;  %v1387_v54 = vmul.f32 %v2457_v55, %v1354_v26 }
 0x5da   :  { %v1410_v50 = vpack.c.bf16 %v1401_v51, %v1393_v12  ;;  %v1395_v25 = vsel %vm1362_vm2, %v1346_v56, %v1379_v60  ;;  %v1604_v3 = vunpack.c.l.s4 %v1794_v57  ;;  %v1422_v1 = vsub.s32 0, %v1421_v11 }
 0x5db   :  { %1550 = vmatprep.subr.bf16.mxu1 %v1413_v41  ;;  %v1403_v61 = vsel %vm1370_vm3, %v1354_v26, %v1387_v54 }
 0x5dc   :  { %1510 = vmatpush1.bf16.msra.mxu0 %v1410_v50  ;;  %v1412_v63 = vpack.c.bf16 %v1403_v61, %v1395_v25  ;;  %v1605_v5 = vunpack.c.0.s8 %v1604_v3  ;;  %v1423_v40 = vrot.slane %v1418_v2, %v1422_v1 }
 0x5de   :  { %1551 = vmatpush1.bf16.msra.mxu1 %v1412_v63  ;;  %v1608_v31 = vsub.s32 %v1605_v5, %v1421_v11 }
 0x5df   :  { %1767 = vmatmul.mubr.msk.bf16.vlgmr.msra.gmra.mrb[20].mxu0 %vm1046_vm13, %v1405_v47 }
 0x5e1   :  { %1768 = vmatmul.mubr.msk.bf16.vlgmr.msra.gmra.mrb[20].mxu1 %vm1046_vm13, %v1405_v47 }
 0x6a9   :  { %v1461_v55 = vpop.f32.mrb[16].mxu0 }
 0x6aa   :  { %v1462_v6 = vadd.f32 %v1461_v55, %v1423_v40  ;;  %v1502_v53 = vpop.f32.mrb[16].mxu1  ;;  %v1463_v8 = vpop.f32.mrb[17].mxu0 }
 0x6ab   :  { %v1503_v44 = vadd.f32 %v1502_v53, %v1423_v40  ;;  %v1464_v9 = vadd.f32 %v1463_v8, %v1423_v40  ;;  %v1504_v10 = vpop.f32.mrb[17].mxu1  ;;  %v1465_v13 = vpop.f32.mrb[18].mxu0 }
 0x6ac   :  { %v1505_v14 = vadd.f32 %v1504_v10, %v1423_v40  ;;  %v1506_v16 = vpop.f32.mrb[18].mxu1  ;;  %v1466_v17 = vpop.f32.mrb[19].mxu0 }
 0x6ad   :  { %v1599_v18 = vcombine.low %v1462_v6, %v1464_v9  ;;  %v1507_v59 = vpop.f32.mrb[19].mxu1 }
 0x6ae   :  { %v1600_v0 = vcombine.low %v1503_v44, %v1505_v14 }
 0x6af   :  { %v1609_v28 = vrot.slane %v1599_v18, %v1608_v31 }
 0x6b0   :  { %v1616_v48 = vrot.slane %v1600_v0, %v1608_v31 }
 0x6b2   :  { %v1631_v7 = vcombine.low %v1609_v28, %v1616_v48  ;;  %v1543_v29 = vpop.f32.mrb[20].mxu0 }
 0x6b3   :  { %v1544_v30 = vadd.f32 %v1543_v29, %v1423_v40  ;;  %v1545_v33 = vpop.f32.mrb[21].mxu0 }
 0x6b4   :  { %v1584_v34 = vpop.f32.mrb[20].mxu1  ;;  %v1546_v36 = vadd.f32 %v1545_v33, %v1423_v40  ;;  %v1547_v37 = vpop.f32.mrb[22].mxu0  ;;  %v1639_v42 = vrot.slane %v1631_v7, %v1608_v31 }
 0x6b5   :  { %v1585_v38 = vadd.f32 %v1584_v34, %v1423_v40  ;;  %v1586_v20 = vpop.f32.mrb[21].mxu1  ;;  %v1548_v27 = vpop.f32.mrb[23].mxu0 }
 0x6b6   :  { %v1601_v39 = vcombine.low %v1544_v30, %v1546_v36  ;;  %v1587_v19 = vadd.f32 %v1586_v20, %v1423_v40  ;;  %v1588_v23 = vpop.f32.mrb[22].mxu1 }
 0x6b7   :  { %v1589_v24 = vpop.f32.mrb[23].mxu1 }
 0x6b8   :  { %v1623_v35 = vrot.slane %v1601_v39, %v1608_v31  ;;  %v1602_v32 = vcombine.low %v1585_v38, %v1587_v19 }
 0x6ba   :  { %v1630_v47 = vrot.slane %v1602_v32, %v1608_v31 }
 0x6bc   :  { %v1632_v46 = vcombine.low %v1623_v35, %v1630_v47 }
 0x6be   :  { %v1646_v45 = vrot.slane %v1632_v46, %v1608_v31 }
 0x6c0   :  { %v1647_v15 = vcombine.low %v1639_v42, %v1646_v45 }
 0x6c2   :  { %1649 = vst [vmem:[%s2535_s13] sm:$0xff] %v1647_v15 }

</bundles_post_ra>
